<compile_context>
chip_gen: v5e
topology: v5e:2x2
jax: 0.10.0
libtpu: 0.0.40
codegen_flags: <defaults>
</compile_context>

<pallas_src>
import jax
import jax.numpy as jnp
from jax.experimental import pallas as pl
from jax.experimental.pallas import tpu as pltpu

IN_FEATURES = 9216
OUT_FEATURES = 4096


def linear_kernel(x_ref, w_ref, b_ref, o_ref):
    """One (tm, tn) output tile, accumulated in-place over the K grid axis."""
    k = pl.program_id(2)

    @pl.when(k == 0)
    def _():
        # Initialize the resident f32 output tile with the bias (broadcast
        # over the tm rows); no separate accumulator scratch needed.
        o_ref[...] = jnp.broadcast_to(b_ref[...], o_ref.shape)

    o_ref[...] += jnp.dot(
        x_ref[...], w_ref[...], preferred_element_type=jnp.float32
    )


def stage2_forward(x, w_t, b, *, tm=8, tn=2048, tk=1536):
    """x: (B, K) f32; w_t: (K, N) f32; b: (N,) f32  ->  (B, N) f32."""
    M, K = x.shape
    Kw, N = w_t.shape
    assert K == Kw and b.shape == (N,)
    assert M % tm == 0 and N % tn == 0 and K % tk == 0

    b2d = b.reshape(1, N)  # glue: present bias as (1, N) for lane-dense tiling

    # NOTE: storing w_t in bfloat16 would ~halve wall-clock (kernel is purely
    # weight-bandwidth bound) but changes numerics vs the f32 PyTorch module,
    # so f32 is kept here.
    return pl.pallas_call(
        linear_kernel,
        out_shape=jax.ShapeDtypeStruct((M, N), jnp.float32),
        grid_spec=pltpu.PrefetchScalarGridSpec(
            num_scalar_prefetch=0,
            grid=(M // tm, N // tn, K // tk),
            in_specs=[
                pl.BlockSpec((tm, tk), lambda i, j, k: (i, k)),   # x tile
                pl.BlockSpec((tk, tn), lambda i, j, k: (k, j)),   # W_t tile
                pl.BlockSpec((1, tn), lambda i, j, k: (0, j)),    # bias tile
            ],
            out_specs=pl.BlockSpec((tm, tn), lambda i, j, k: (i, j)),
        ),
        compiler_params=pltpu.CompilerParams(
            # M and N tiles are independent (N split feeds v7x megacore);
            # K is the reduction axis and must stay last / "arbitrary".
            dimension_semantics=("parallel", "parallel", "arbitrary"),
            # 2 x 1536 x 2048 x 4 B = 24 MiB of double-buffered weights plus
            # small x / bias / output tiles; 48 MiB fits every generation
            # (v7x: 64 MiB physical VMEM per TC; v5e/v6e: 128 MiB).
            vmem_limit_bytes=48 * 1024 * 1024,
        ),
    )(x, w_t, b2d)


def init_params(key):
    """Deterministic init matching torch.nn.Linear's default (uniform +-1/sqrt(fan_in))."""
    kw, kb = jax.random.split(key)
    bound = 1.0 / jnp.sqrt(jnp.float32(IN_FEATURES))
    # PyTorch weight is (out, in); store transposed (in, out) for the kernel.
    w_t = jax.random.uniform(
        kw, (IN_FEATURES, OUT_FEATURES), jnp.float32, minval=-bound, maxval=bound
    )
    b = jax.random.uniform(
        kb, (OUT_FEATURES,), jnp.float32, minval=-bound, maxval=bound
    )
    return w_t, b


if __name__ == "__main__":
    key = jax.random.PRNGKey(0)
    k_in, k_params = jax.random.split(key)

    batch = 8  # small batch; feature dims are fixed by the module (9216 -> 4096)
    x = jax.random.normal(k_in, (batch, IN_FEATURES), jnp.float32)
    w_t, b = init_params(k_params)

    # forward: out0 = input0.clone(); out1 = Linear(out0)  (clone is a no-op here)
    out = stage2_forward(x, w_t, b)
    out = jax.block_until_ready(out)

    # sanity check against plain-JAX reference
    ref = x @ w_t + b
    assert out.shape == (batch, OUT_FEATURES)
    assert jnp.allclose(out, ref, atol=1e-3, rtol=1e-3)

    print("KERNEL_OK")
</pallas_src>

<mosaic_0001>
module attributes {stable_mosaic.version = 11 : i64} {
  func.func @linear_kernel(%arg0: i32, %arg1: i32, %arg2: i32, %arg3: memref<8x1536xf32, #tpu.memory_space<vmem>>, %arg4: memref<1536x2048xf32, #tpu.memory_space<vmem>>, %arg5: memref<1x2048xf32, #tpu.memory_space<vmem>>, %arg6: memref<8x2048xf32, #tpu.memory_space<vmem>>) attributes {dimension_semantics = [#tpu.dimension_semantics<parallel>, #tpu.dimension_semantics<parallel>, #tpu.dimension_semantics<arbitrary>], iteration_bounds = array<i64: 1, 2, 6>, scalar_prefetch = 0 : i64, scratch_operands = 0 : i64, tpu.core_type = #tpu.core_type<tc>, window_params = [{transform_indices = @transform_0, window_bounds = array<i64: 8, 1536>}, {transform_indices = @transform_1, window_bounds = array<i64: 1536, 2048>}, {transform_indices = @transform_2, window_bounds = array<i64: 1, 2048>}, {transform_indices = @transform_3, window_bounds = array<i64: 8, 2048>}]} {
    %c0_i32 = arith.constant 0 : i32
    %0 = arith.cmpi eq, %arg2, %c0_i32 : i32
    %1 = arith.extui %0 : i1 to i32
    %c0_i32_0 = arith.constant 0 : i32
    %2 = arith.cmpi ne, %1, %c0_i32_0 : i32
    scf.if %2 {
      %c0_8 = arith.constant 0 : index
      %c0_9 = arith.constant 0 : index
      %9 = vector.load %arg5[%c0_8, %c0_9] : memref<1x2048xf32, #tpu.memory_space<vmem>>, vector<1x2048xf32>
      %10 = vector.shape_cast %9 : vector<1x2048xf32> to vector<1x2048xf32>
      %11 = vector.broadcast %10 : vector<1x2048xf32> to vector<8x2048xf32>
      %c0_10 = arith.constant 0 : index
      %c0_11 = arith.constant 0 : index
      %12 = vector.load %arg6[%c0_10, %c0_11] : memref<8x2048xf32, #tpu.memory_space<vmem>>, vector<8x2048xf32>
      tpu.vector_store %arg6[%c0_10, %c0_11], %11 {strides = array<i32>} : memref<8x2048xf32, #tpu.memory_space<vmem>>, vector<8x2048xf32>,
    } else {
    }
    %c0 = arith.constant 0 : index
    %c0_1 = arith.constant 0 : index
    %3 = vector.load %arg6[%c0, %c0_1] : memref<8x2048xf32, #tpu.memory_space<vmem>>, vector<8x2048xf32>
    %c0_2 = arith.constant 0 : index
    %c0_3 = arith.constant 0 : index
    %4 = vector.load %arg3[%c0_2, %c0_3] : memref<8x1536xf32, #tpu.memory_space<vmem>>, vector<8x1536xf32>
    %c0_4 = arith.constant 0 : index
    %c0_5 = arith.constant 0 : index
    %5 = vector.load %arg4[%c0_4, %c0_5] : memref<1536x2048xf32, #tpu.memory_space<vmem>>, vector<1536x2048xf32>
    %cst = arith.constant dense<0.000000e+00> : vector<8x2048xf32>
    %6 = tpu.matmul %4, %5, %cst {dimension_numbers = #tpu.dot_dimension_numbers<[1], [0], [0], [1], [0, 0, 1, 1], [], []>} : vector<8x1536xf32>, vector<1536x2048xf32>, vector<8x2048xf32> -> vector<8x2048xf32>
    %7 = arith.addf %3, %6 : vector<8x2048xf32>
    %c0_6 = arith.constant 0 : index
    %c0_7 = arith.constant 0 : index
    %8 = vector.load %arg6[%c0_6, %c0_7] : memref<8x2048xf32, #tpu.memory_space<vmem>>, vector<8x2048xf32>
    tpu.vector_store %arg6[%c0_6, %c0_7], %7 {strides = array<i32>} : memref<8x2048xf32, #tpu.memory_space<vmem>>, vector<8x2048xf32>,
    return
  }
  func.func @transform_0(%arg0: i32, %arg1: i32, %arg2: i32) -> (i32, i32) {
    %c0_i32 = arith.constant 0 : i32
    return %arg0, %arg2 : i32, i32
  }
  func.func @transform_1(%arg0: i32, %arg1: i32, %arg2: i32) -> (i32, i32) {
    %c0_i32 = arith.constant 0 : i32
    return %arg2, %arg1 : i32, i32
  }
  func.func @transform_2(%arg0: i32, %arg1: i32, %arg2: i32) -> (i32, i32) {
    %c0_i32 = arith.constant 0 : i32
    %c0_i32_0 = arith.constant 0 : i32
    return %c0_i32, %arg1 : i32, i32
  }
  func.func @transform_3(%arg0: i32, %arg1: i32, %arg2: i32) -> (i32, i32) {
    %c0_i32 = arith.constant 0 : i32
    return %arg0, %arg1 : i32, i32
  }
}

</mosaic_0001>

<bundles_post_ra>
// kernel: tpu_custom_call.1
= control target key start
LH: loop header
LB: loop body
LE: loop exit
PB: predicated region body
PF: predicated region fallthrough
CT: control target
= control target key end

     0   :  { %s11906_s0 = inlined_call_operand.hbm [shape: f32[8,9216], index: 0, kind: input, shape index: {}]   ;;  %s11907_s1 = inlined_call_operand.hbm [shape: f32[9216,4096], index: 1, kind: input, shape index: {}]   ;;  %s11908_s2 = inlined_call_operand.hbm [shape: f32[1,4096], index: 2, kind: input, shape index: {}]   ;;  %s11909_s3 = inlined_call_operand.hbm [shape: f32[8,4096], index: 3, kind: output, shape index: {}]  }
   0x1   :  { %11918 = sst [smem:[#allocation21_spill]] %s11906_s0 }
   0x2   :  { %11919 = sst [smem:[#allocation22_spill]] %s11907_s1 }
   0x3   :  { %11920 = sst [smem:[#allocation23_spill]] %s11909_s3 }
   0x4   :  { %8 = vsyncpa [#allocation3], 0 }
   0x5   :  { %10 = vsyncpa [#allocation3 + $0x1], 0 }
   0x6   :  { %11 = vsyncpa [#allocation6], 0 }
   0x7   :  { %13 = vsyncpa [#allocation6 + $0x1], 0 }
   0x8   :  { %14 = vsyncpa [#allocation4], 0 }
   0x9   :  { %16 = vsyncpa [#allocation4 + $0x1], 0  ;;  %s8003_s12 = smov 0   ;;  %s8005_s13 = smov 0  }
   0xa   :  { %s8007_s14 = smov 0   ;;  %s8009_s15 = smov 0  }
   0xb   :  { %s8011_s16 = smov 0   ;;  %s8013_s17 = smov 0  }
   0xc   :  { %s8015_s18 = smov 0   ;;  %s8017_s19 = smov 0  }
   0xd   :  { %s8019_s20 = smov 0   ;;  %s8021_s21 = smov 0  }
   0xe   :  { %s8023_s22 = smov 0   ;;  %s8025_s23 = smov 0  }
   0xf   :  { %s8027_s24 = smov 0   ;;  %s8029_s25 = smov 0  }
  0x10 LB: > { %11921 = sst [smem:[#allocation13_spill]] %s7946_s17  ;;  %p58_p0 = scmp.eq.s32.totalorder %s7978_s25, 0  ;;  %s7978_s25 = sphi %s8029_s25, %s22_s25   ;;  %s7974_s24 = sphi %s8027_s24, %s11962_s24   ;;  %s7970_s23 = sphi %s8025_s23, %s11961_s23   ;;  %s7966_s22 = sphi %s8023_s22, %s11950_s22   ;;  %s7962_s21 = sphi %s8021_s21, %s11949_s21   ;;  %s7958_s20 = sphi %s8019_s20, %s11948_s20   ;;  %s7954_s19 = sphi %s8017_s19, %s11960_s19   ;;  %s7950_s18 = sphi %s8015_s18, %s11959_s18   ;;  %s7946_s17 = sphi %s8013_s17, %s11946_s17   ;;  %s7942_s16 = sphi %s8011_s16, %s11958_s16   ;;  %s7938_s15 = sphi %s8009_s15, %s11957_s15   ;;  %s7934_s14 = sphi %s8007_s14, %s11956_s14   ;;  %s7930_s13 = sphi %s8005_s13, %s11955_s13   ;;  %s7926_s12 = sphi %s8003_s12, %s11954_s12  }
  0x11   : > { %11922 = sst [smem:[#allocation14_spill]] %s7958_s20  ;;  %p85_p1 = scmp.ne.s32.totalorder %s7946_s17, %s7942_s16 }
  0x12   : > { %11923 = sst [smem:[#allocation15_spill]] %s7970_s23  ;;  %p91_p2 = scmp.ne.s32.totalorder %s7942_s16, %s7938_s15 }
  0x13   : > { %11924 = sst [smem:[#allocation16_spill]] %s7974_s24  ;;  %p87_p3 = por %p85_p1, %p58_p0 }
  0x14   : > { %p7533_p4 = scmp.lt.s32.totalorder %s7978_s25, 12  ;;  %s191_s28 = sand.u32 1, %s7978_s25  }
  0x15   : > { %s193_s29 = sand.u32 1, %s7946_s17   ;;  %s11910_s4 = sshll.u32 %s7974_s24, 4 }
  0x16   : > { %s7508_s30 = smul.u32 24576, %s193_s29  ;;  %p8089_p5 = pnand %p7533_p4, %p87_p3 }
  0x17   : > { %s7505_s5 = smul.u32 6144, %s7970_s23  ;;  %s11926_s1 = sld [smem:[#allocation22_spill]] }
  0x18   : > { %s195_s8 = scalar_lea.vmem [#allocation5], %s7508_s30  ;;  %p7495_p6 = scmp.ge.s32.totalorder %s7978_s25, 1 }
  0x19   : > { %s201_s7 = sadd.s32 %s7505_s5, %s11910_s4  ;;  %s206_s9 = sshll.u32 %s195_s8, 4  ;;  %s207_s9 = int_to_ptr.vmem [resolvable:$true] %s206_s9 }
  0x1a   : > { %s7492_s10 = sshll.u32 %s201_s7, 3  ;;  %s8099_s30 = scalar_lea.sflag [#allocation6], %s191_s28 }
  0x1b   : > { %s7980_s5 = smov 4096   ;;  %s7981_s7 = smov 2048  }
  0x1c   : > { %s7982_s8 = smov 128   ;;  %p233_p7 = scmp.lt.s32.totalorder %s7978_s25, 13 }
  0x1d   : > { %s203_s27 = scalar_lea.hbm %s11926_s1, %s7492_s10  ;;  %s34_s28 = sadd.s32 1, %s7970_s23 }
  0x1e   : > { %s204_s26 = sshll.u32 %s203_s27, 4  ;;  %p8105_p8 = pnand %p7495_p6, %p233_p7  ;;  %s205_s26 = int_to_ptr.hbm [resolvable:$true] %s204_s26 }
  0x1f   : > { %7525 = dma.hbm_to_vmem [thread:$0]  (!%p8089_p5), %s205_s26, 393216, %s207_s9, %s8099_s30, %s7980_s5, %s7981_s7, %s7982_s8  }
  0x20   : > { %s8110_s27 = sadd.s32 4294967295, %s7978_s25   ;;  %p35_p9 = scmp.ge.s32.totalorder %s34_s28, 6 }
  0x21   : > { %s50_s11 = sadd.s32 1, %s7958_s20  ;;  %p57_p10 = scmp.ne.s32.totalorder %s7958_s20, %s7954_s19 }
  0x22   : > { %p63_p11 = scmp.ne.s32.totalorder %s7954_s19, %s7950_s18  ;;  %s11964_s28 = smov (%p35_p9, %s34_s28), 0 }
  0x23   : > { %11928 = sst [smem:[#allocation17_spill]] %s11964_s28  ;;  %s11929_s26 = sadd.s32 1, %s7974_s24 }
  0x24   : > { %s11966_s26 = smov (!%p35_p9, %s11929_s26), %s7974_s24  ;;  %s46_s6 = ssub.s32 %s7970_s23, %s11964_s28 }
  0x25   : > { %p8127_p12 = por %p58_p0, %p57_p10  ;;  %p39_p13 = scmp.ge.s32.totalorder %s11966_s26, 2 }
  0x26   : > { %p48_p1 = scmp.eq.s32.totalorder %s46_s6, 0  ;;  %p64_p3 = scmp.eq.s32.totalorder %s8110_s27, 0 }
  0x27   : > { %s169_s18 = sand.u32 1, %s7958_s20   ;;  %s11968_s26 = smov (%p39_p13, %s11966_s26), 0 }
  0x28   : > { %11931 = sst [smem:[#allocation18_spill]] %s11968_s26  ;;  %p8140_p5 = por %p64_p3, %p63_p11 }
  0x29   : > { %s8136_s29 = scalar_select %p48_p1, %s7958_s20, %s50_s11  }
  0x2a   : > { %s74_s7 = ssub.s32 %s7974_s24, %s11968_s26  ;;  %p8151_p6 = por %p91_p2, %p64_p3 }
  0x2b   : > { %11932 = sst [smem:[#allocation19_spill]] %s8136_s29  ;;  %s75_s8 = sor.u32 %s74_s7, %s46_s6 }
  0x2c   : > { %p76_p7 = scmp.eq.s32.totalorder %s75_s8, 0  ;;  %s7507_s11 = smul.u32 96, %s169_s18 }
  0x2d   : > { %p7520_p9 = pnand %p7533_p4, %p8127_p12  ;;  %s11935_s1 = sadd.s32 1, %s7946_s17 }
  0x2e   : > { %s8162_s26 = scalar_select %p76_p7, %s7946_s17, %s11935_s1  }
  0x2f   : > { %s7504_s15 = smul.u32 96, %s7970_s23  ;;  %s173_s6 = scalar_lea.vmem [#allocation2], %s7507_s11 }
  0x30   : > { %11936 = sst [smem:[#allocation20_spill]] %s8162_s26  ;;  %s184_s28 = sshll.u32 %s173_s6, 4  ;;  %s185_s28 = int_to_ptr.vmem [resolvable:$true] %s184_s28 }
  0x31   : > { %s11937_s0 = sld [smem:[#allocation21_spill]]  ;;  %s170_s3 = scalar_lea.sflag [#allocation3], %s169_s18 }
  0x32   : > { %s7486_s1 = sadd.s32 4294967294, %s7978_s25   ;;  %p102_p2 = scmp.eq.s32.totalorder %s74_s7, 0 }
  0x33   : > { %s104_s26 = sadd.s32 1, %s7934_s14  ;;  %p111_p10 = scmp.ne.s32.totalorder %s7934_s14, %s7930_s13 }
  0x34   : > { %s8173_s23 = scalar_select %p102_p2, %s7934_s14, %s104_s26  }
  0x35   : > { %p8177_p11 = por %p111_p10, %p58_p0  ;;  %p117_p12 = scmp.ne.s32.totalorder %s7930_s13, %s7926_s12 }
  0x36   : > { %p143_p13 = scmp.eq.s32.totalorder %s8110_s27, 11  ;;  %p149_p1 = scmp.eq.s32.totalorder %s7486_s1, 11 }
  0x37   : > { %s180_s8 = scalar_lea.hbm %s11937_s0, %s7504_s15  ;;  %p8186_p7 = por %p117_p12, %p64_p3 }
  0x38   : > { %s182_s9 = sshll.u32 %s180_s8, 4  ;;  %s218_s20 = sand.u32 1, %s7934_s14   ;;  %s183_s9 = int_to_ptr.hbm [resolvable:$true] %s182_s9 }
  0x39   : > { %7522 = dma.hbm_to_vmem [thread:$0]  (!%p7520_p9), %s183_s9, 1536, %s185_s28, %s170_s3  }
  0x3a   : > { %p8191_p9 = por %p143_p13, %p111_p10  ;;  %p8195_p2 = por %p149_p1, %p117_p12 }
  0x3b   : > { %s7493_s18 = sshll.u32 %s218_s20, 4  ;;  %s11942_s29 = sshll.u32 %s7974_s24, 4 }
  0x3c   : > { %s224_s6 = scalar_lea.hbm %s11908_s2, %s11942_s29  ;;  %s220_s9 = scalar_lea.vmem [#allocation7], %s7493_s18 }
  0x3d   : > { %s226_s8 = sshll.u32 %s224_s6, 4  ;;  %s228_s1 = sshll.u32 %s220_s9, 4  ;;  %s227_s8 = int_to_ptr.hbm [resolvable:$true] %s226_s8  ;;  %s229_s1 = int_to_ptr.vmem [resolvable:$true] %s228_s1 }
  0x3e   : > { %p7526_p0 = pnand %p7533_p4, %p8177_p11  ;;  %237 = sbr.rel (%p8105_p8) target bundleno = 2574 (0xa0e), region = 32 }
  0x3f   : > { %s239_s20 = sand.u32 (!%p8105_p8), 1, %s7954_s19  }
  0x40   : > { %7528 = dma.hbm_to_vmem [thread:$0]  (!%p7526_p0), %s227_s8, 256, %s229_s1, %s8099_s30  }
  0x41   : > { %s7509_s0 = smul.u32 (!%p8105_p8), 96, %s239_s20  ;;  %s240_s24 = scalar_lea.sflag (!%p8105_p8), [#allocation3], %s239_s20 }
  0x43   : > { %s8212_s17 = scalar_lea.vmem [#allocation2], %s7509_s0 }
  0x44   : > { %7909 = dma.done.wait (%p8140_p5), %s240_s24, 1536  }
  0x45   : > { %7911 = vsyncadd (%p8140_p5), %s240_s24, 4294965760  ;;  %s249_s11 = sand.u32 1, %s8110_s27   ;;  %s251_s30 = sand.u32 1, %s7942_s16  }
  0x46   : > { %s7510_s18 = smul.u32 24576, %s251_s30  ;;  %s250_s10 = scalar_lea.sflag [#allocation6], %s249_s11 }
  0x48   : > { %s8220_s29 = scalar_lea.vmem [#allocation5], %s7510_s18 }
  0x49   : > { %7913 = dma.done.wait (%p8151_p6), %s250_s10, 393216  }
  0x4a   : > { %7915 = vsyncadd (%p8151_p6), %s250_s10, 4294574080  ;;  %s8227_s0 = sand.u32 1, %s7930_s13  }
  0x4b   : > { %s7496_s24 = sshll.u32 %s8227_s0, 4 }
  0x4c   : > { %s263_s5 = scalar_lea.vmem [#allocation7], %s7496_s24 }
  0x4d   : > { %7917 = dma.done.wait (%p8186_p7), %s250_s10, 256  }
  0x4e   : > { %7919 = vsyncadd (%p8186_p7), %s250_s10, 4294967040  ;;  %s7497_s27 = sshll.u32 %s8227_s0, 7  ;;  %p7498_p4 = scmp.ne.s32.totalorder %s7962_s21, 0 }
  0x4f   : > { %s8235_s7 = scalar_lea.vmem [#allocation8], %s7497_s27 }
  0x50   : > { %305 = sbr.rel (%p7498_p4) target bundleno = 104 (0x68), region = 48 }
  0x55   : > { %v306_v0 = vld [vmem:[%s263_s5] sm:$0xff]  ;;  %v307_v7 = vld [vmem:[%s263_s5 + $0x8] sm:$0xff] }
  0x56   : > { %v310_v1 = vperm.slane %v306_v0, 0  ;;  %v311_v2 = vperm.slane %v306_v0, 1  ;;  %v312_v3 = vperm.slane %v306_v0, 2  ;;  %v313_v4 = vperm.slane %v306_v0, 3 }
  0x57   : > { %v314_v5 = vperm.slane %v306_v0, 4  ;;  %v315_v6 = vperm.slane %v306_v0, 5  ;;  %v316_v8 = vperm.slane %v306_v0, 6  ;;  %v317_v9 = vperm.slane %v306_v0, 7 }
  0x58   : > { %342 = vst [vmem:[%s8235_s7] sm:$0xff] %v310_v1  ;;  %v318_v10 = vperm.slane %v307_v7, 0  ;;  %v319_v11 = vperm.slane %v307_v7, 1  ;;  %v320_v12 = vperm.slane %v307_v7, 2  ;;  %v321_v13 = vperm.slane %v307_v7, 3 }
  0x59   : > { %343 = vst [vmem:[%s8235_s7 + $0x8] sm:$0xff] %v311_v2  ;;  %v322_v14 = vperm.slane %v307_v7, 4  ;;  %v323_v15 = vperm.slane %v307_v7, 5  ;;  %v324_v16 = vperm.slane %v307_v7, 6  ;;  %v325_v17 = vperm.slane %v307_v7, 7 }
  0x5a   : > { %344 = vst [vmem:[%s8235_s7 + $0x10] sm:$0xff] %v312_v3 }
  0x5b   : > { %345 = vst [vmem:[%s8235_s7 + $0x18] sm:$0xff] %v313_v4 }
  0x5c   : > { %346 = vst [vmem:[%s8235_s7 + $0x20] sm:$0xff] %v314_v5 }
  0x5d   : > { %347 = vst [vmem:[%s8235_s7 + $0x28] sm:$0xff] %v315_v6 }
  0x5e   : > { %348 = vst [vmem:[%s8235_s7 + $0x30] sm:$0xff] %v316_v8 }
  0x5f   : > { %349 = vst [vmem:[%s8235_s7 + $0x38] sm:$0xff] %v317_v9 }
  0x60   : > { %350 = vst [vmem:[%s8235_s7 + $0x40] sm:$0xff] %v318_v10 }
  0x61   : > { %351 = vst [vmem:[%s8235_s7 + $0x48] sm:$0xff] %v319_v11 }
  0x62   : > { %352 = vst [vmem:[%s8235_s7 + $0x50] sm:$0xff] %v320_v12 }
  0x63   : > { %353 = vst [vmem:[%s8235_s7 + $0x58] sm:$0xff] %v321_v13 }
  0x64   : > { %354 = vst [vmem:[%s8235_s7 + $0x60] sm:$0xff] %v322_v14 }
  0x65   : > { %355 = vst [vmem:[%s8235_s7 + $0x68] sm:$0xff] %v323_v15 }
  0x66   : > { %356 = vst [vmem:[%s8235_s7 + $0x70] sm:$0xff] %v324_v16 }
  0x67   : > { %357 = vst [vmem:[%s8235_s7 + $0x78] sm:$0xff] %v325_v17 }
  0x68 PF: > { %v626_v18 = vld [vmem:[%s8220_s29 + $0x780] sm:$0xff]  ;;  %s11943_s3 = sld [smem:[#allocation23_spill]]  ;;  %s7346_s6 = sshll.u32 %s8235_s7, 4  ;;  %s7347_s6 = int_to_ptr.vmem [resolvable:$true] %s7346_s6 }
  0x69   : > { %v1138_v19 = vld [vmem:[%s8220_s29 + $0x1780] sm:$0xff]  ;;  %3458 = vmatpush.msra.mxu0 %v626_v18  ;;  %s7331_s9 = scalar_lea.sflag [#allocation4], %s8227_s0 }
  0x6a   : > { %v610_v20 = vld [vmem:[%s8220_s29 + $0x700] sm:$0xff]  ;;  %3498 = vmatpush.msra.mxu2 %v1138_v19 }
  0x6b   : > { %v882_v21 = vld [vmem:[%s8220_s29 + $0xf80] sm:$0xff]  ;;  %3459 = vmatpush.msra.mxu0 %v610_v20 }
  0x6c   : > { %v1122_v22 = vld [vmem:[%s8220_s29 + $0x1700] sm:$0xff]  ;;  %3478 = vmatpush.msra.mxu1 %v882_v21 }
  0x6d   : > { %v1394_v23 = vld [vmem:[%s8220_s29 + $0x1f80] sm:$0xff]  ;;  %3499 = vmatpush.msra.mxu2 %v1122_v22 }
  0x6e   : > { %3518 = vmatpush.msra.mxu3 %v1394_v23  ;;  %v594_v24 = vld [vmem:[%s8220_s29 + $0x680] sm:$0xff]  ;;  %s7844_s30 = scalar_lea.hbm %s11943_s3, 256 }
  0x6f   : > { %v866_v25 = vld [vmem:[%s8220_s29 + $0xf00] sm:$0xff]  ;;  %3460 = vmatpush.msra.mxu0 %v594_v24 }
  0x70   : > { %v1106_v26 = vld [vmem:[%s8220_s29 + $0x1680] sm:$0xff]  ;;  %3479 = vmatpush.msra.mxu1 %v866_v25 }
  0x71   : > { %v1378_v27 = vld [vmem:[%s8220_s29 + $0x1f00] sm:$0xff]  ;;  %3500 = vmatpush.msra.mxu2 %v1106_v26 }
  0x72   : > { %v850_v28 = vld [vmem:[%s8220_s29 + $0xe80] sm:$0xff]  ;;  %3519 = vmatpush.msra.mxu3 %v1378_v27 }
  0x73   : > { %v578_v29 = vld [vmem:[%s8220_s29 + $0x600] sm:$0xff]  ;;  %3480 = vmatpush.msra.mxu1 %v850_v28 }
  0x74   : > { %v1090_v30 = vld [vmem:[%s8220_s29 + $0x1600] sm:$0xff]  ;;  %3461 = vmatpush.msra.mxu0 %v578_v29 }
  0x75   : > { %v1362_v31 = vld [vmem:[%s8220_s29 + $0x1e80] sm:$0xff]  ;;  %3501 = vmatpush.msra.mxu2 %v1090_v30 }
  0x76   : > { %v834_v32 = vld [vmem:[%s8220_s29 + $0xe00] sm:$0xff]  ;;  %3520 = vmatpush.msra.mxu3 %v1362_v31 }
  0x77   : > { %v1346_v33 = vld [vmem:[%s8220_s29 + $0x1e00] sm:$0xff]  ;;  %3481 = vmatpush.msra.mxu1 %v834_v32 }
  0x78   : > { %v562_v34 = vld [vmem:[%s8220_s29 + $0x580] sm:$0xff]  ;;  %3521 = vmatpush.msra.mxu3 %v1346_v33 }
  0x79   : > { %v1074_v35 = vld [vmem:[%s8220_s29 + $0x1580] sm:$0xff]  ;;  %3462 = vmatpush.msra.mxu0 %v562_v34 }
  0x7a   : > { %v818_v36 = vld [vmem:[%s8220_s29 + $0xd80] sm:$0xff]  ;;  %3502 = vmatpush.msra.mxu2 %v1074_v35 }
  0x7b   : > { %v1330_v37 = vld [vmem:[%s8220_s29 + $0x1d80] sm:$0xff]  ;;  %3482 = vmatpush.msra.mxu1 %v818_v36 }
  0x7c   : > { %v546_v38 = vld [vmem:[%s8220_s29 + $0x500] sm:$0xff]  ;;  %3522 = vmatpush.msra.mxu3 %v1330_v37 }
  0x7d   : > { %v1058_v39 = vld [vmem:[%s8220_s29 + $0x1500] sm:$0xff]  ;;  %3463 = vmatpush.msra.mxu0 %v546_v38 }
  0x7e   : > { %v802_v40 = vld [vmem:[%s8220_s29 + $0xd00] sm:$0xff]  ;;  %3503 = vmatpush.msra.mxu2 %v1058_v39 }
  0x7f   : > { %v1314_v41 = vld [vmem:[%s8220_s29 + $0x1d00] sm:$0xff]  ;;  %3483 = vmatpush.msra.mxu1 %v802_v40 }
  0x80   : > { %v530_v42 = vld [vmem:[%s8220_s29 + $0x480] sm:$0xff]  ;;  %3523 = vmatpush.msra.mxu3 %v1314_v41 }
  0x81   : > { %v1042_v43 = vld [vmem:[%s8220_s29 + $0x1480] sm:$0xff]  ;;  %3464 = vmatpush.msra.mxu0 %v530_v42 }
  0x82   : > { %v786_v44 = vld [vmem:[%s8220_s29 + $0xc80] sm:$0xff]  ;;  %3504 = vmatpush.msra.mxu2 %v1042_v43 }
  0x83   : > { %v1298_v45 = vld [vmem:[%s8220_s29 + $0x1c80] sm:$0xff]  ;;  %3484 = vmatpush.msra.mxu1 %v786_v44 }
  0x84   : > { %v514_v46 = vld [vmem:[%s8220_s29 + $0x400] sm:$0xff]  ;;  %3524 = vmatpush.msra.mxu3 %v1298_v45 }
  0x85   : > { %v1026_v47 = vld [vmem:[%s8220_s29 + $0x1400] sm:$0xff]  ;;  %3465 = vmatpush.msra.mxu0 %v514_v46 }
  0x86   : > { %v770_v48 = vld [vmem:[%s8220_s29 + $0xc00] sm:$0xff]  ;;  %3505 = vmatpush.msra.mxu2 %v1026_v47 }
  0x87   : > { %v1282_v49 = vld [vmem:[%s8220_s29 + $0x1c00] sm:$0xff]  ;;  %3485 = vmatpush.msra.mxu1 %v770_v48 }
  0x88   : > { %v498_v50 = vld [vmem:[%s8220_s29 + $0x380] sm:$0xff]  ;;  %3525 = vmatpush.msra.mxu3 %v1282_v49 }
  0x89   : > { %v1010_v51 = vld [vmem:[%s8220_s29 + $0x1380] sm:$0xff]  ;;  %3466 = vmatpush.msra.mxu0 %v498_v50 }
  0x8a   : > { %v754_v52 = vld [vmem:[%s8220_s29 + $0xb80] sm:$0xff]  ;;  %3506 = vmatpush.msra.mxu2 %v1010_v51 }
  0x8b   : > { %v1266_v53 = vld [vmem:[%s8220_s29 + $0x1b80] sm:$0xff]  ;;  %3486 = vmatpush.msra.mxu1 %v754_v52 }
  0x8c   : > { %v482_v54 = vld [vmem:[%s8220_s29 + $0x300] sm:$0xff]  ;;  %3526 = vmatpush.msra.mxu3 %v1266_v53 }
  0x8d   : > { %v994_v55 = vld [vmem:[%s8220_s29 + $0x1300] sm:$0xff]  ;;  %3467 = vmatpush.msra.mxu0 %v482_v54 }
  0x8e   : > { %v738_v56 = vld [vmem:[%s8220_s29 + $0xb00] sm:$0xff]  ;;  %3507 = vmatpush.msra.mxu2 %v994_v55 }
  0x8f   : > { %v1250_v57 = vld [vmem:[%s8220_s29 + $0x1b00] sm:$0xff]  ;;  %3487 = vmatpush.msra.mxu1 %v738_v56 }
  0x90   : > { %v466_v58 = vld [vmem:[%s8220_s29 + $0x280] sm:$0xff]  ;;  %3527 = vmatpush.msra.mxu3 %v1250_v57 }
  0x91   : > { %v978_v59 = vld [vmem:[%s8220_s29 + $0x1280] sm:$0xff]  ;;  %3468 = vmatpush.msra.mxu0 %v466_v58 }
  0x92   : > { %v722_v60 = vld [vmem:[%s8220_s29 + $0xa80] sm:$0xff]  ;;  %3508 = vmatpush.msra.mxu2 %v978_v59 }
  0x93   : > { %v1234_v61 = vld [vmem:[%s8220_s29 + $0x1a80] sm:$0xff]  ;;  %3488 = vmatpush.msra.mxu1 %v722_v60 }
  0x94   : > { %v450_v62 = vld [vmem:[%s8220_s29 + $0x200] sm:$0xff]  ;;  %3528 = vmatpush.msra.mxu3 %v1234_v61 }
  0x95   : > { %v962_v63 = vld [vmem:[%s8220_s29 + $0x1200] sm:$0xff]  ;;  %3469 = vmatpush.msra.mxu0 %v450_v62 }
  0x96   : > { %v706_v0 = vld [vmem:[%s8220_s29 + $0xa00] sm:$0xff]  ;;  %3509 = vmatpush.msra.mxu2 %v962_v63 }
  0x97   : > { %v1218_v1 = vld [vmem:[%s8220_s29 + $0x1a00] sm:$0xff]  ;;  %3489 = vmatpush.msra.mxu1 %v706_v0 }
  0x98   : > { %v434_v2 = vld [vmem:[%s8220_s29 + $0x180] sm:$0xff]  ;;  %3529 = vmatpush.msra.mxu3 %v1218_v1 }
  0x99   : > { %v946_v3 = vld [vmem:[%s8220_s29 + $0x1180] sm:$0xff]  ;;  %3470 = vmatpush.msra.mxu0 %v434_v2 }
  0x9a   : > { %v690_v4 = vld [vmem:[%s8220_s29 + $0x980] sm:$0xff]  ;;  %3510 = vmatpush.msra.mxu2 %v946_v3 }
  0x9b   : > { %v1202_v5 = vld [vmem:[%s8220_s29 + $0x1980] sm:$0xff]  ;;  %3490 = vmatpush.msra.mxu1 %v690_v4 }
  0x9c   : > { %v418_v6 = vld [vmem:[%s8220_s29 + $0x100] sm:$0xff]  ;;  %3530 = vmatpush.msra.mxu3 %v1202_v5 }
  0x9d   : > { %v930_v7 = vld [vmem:[%s8220_s29 + $0x1100] sm:$0xff]  ;;  %3471 = vmatpush.msra.mxu0 %v418_v6 }
  0x9e   : > { %v674_v8 = vld [vmem:[%s8220_s29 + $0x900] sm:$0xff]  ;;  %3511 = vmatpush.msra.mxu2 %v930_v7 }
  0x9f   : > { %v1186_v9 = vld [vmem:[%s8220_s29 + $0x1900] sm:$0xff]  ;;  %3491 = vmatpush.msra.mxu1 %v674_v8 }
  0xa0   : > { %v402_v10 = vld [vmem:[%s8220_s29 + $0x80] sm:$0xff]  ;;  %3531 = vmatpush.msra.mxu3 %v1186_v9 }
  0xa1   : > { %v914_v11 = vld [vmem:[%s8220_s29 + $0x1080] sm:$0xff]  ;;  %3472 = vmatpush.msra.mxu0 %v402_v10 }
  0xa2   : > { %v658_v12 = vld [vmem:[%s8220_s29 + $0x880] sm:$0xff]  ;;  %3512 = vmatpush.msra.mxu2 %v914_v11 }
  0xa3   : > { %v1170_v13 = vld [vmem:[%s8220_s29 + $0x1880] sm:$0xff]  ;;  %3492 = vmatpush.msra.mxu1 %v658_v12  ;;  %v8377_v12 = vld [vmem:[%s8212_s17 + $0x10] sm:$0xff] }
  0xa4   : > { %v386_v14 = vld [vmem:[%s8220_s29] sm:$0xff]  ;;  %3532 = vmatpush.msra.mxu3 %v1170_v13 }
  0xa5   : > { %v898_v15 = vld [vmem:[%s8220_s29 + $0x1000] sm:$0xff]  ;;  %3473 = vmatpush.msra.mxu0 %v386_v14 }
  0xa6   : > { %v1650_v16 = vld [vmem:[%s8220_s29 + $0x2780] sm:$0xff]  ;;  %3513 = vmatpush.msra.mxu2 %v898_v15 }
  0xa7   : > { %v2162_v17 = vld [vmem:[%s8220_s29 + $0x3780] sm:$0xff]  ;;  %3538 = vmatpush.msrb.mxu0 %v1650_v16  ;;  %3514 = vmatmul.f32.vlgmr.msra.gmra.mxu2 %v8377_v12 }
  0xa8   : > { %v642_v18 = vld [vmem:[%s8220_s29 + $0x800] sm:$0xff]  ;;  %3578 = vmatpush.msrb.mxu2 %v2162_v17 }
  0xa9   : > { %v1154_v19 = vld [vmem:[%s8220_s29 + $0x1800] sm:$0xff]  ;;  %3493 = vmatpush.msra.mxu1 %v642_v18  ;;  %v8388_v18 = vld [vmem:[%s8212_s17 + $0x18] sm:$0xff] }
  0xaa   : > { %v1634_v20 = vld [vmem:[%s8220_s29 + $0x2700] sm:$0xff]  ;;  %3533 = vmatpush.msra.mxu3 %v1154_v19 }
  0xab   : > { %v1906_v21 = vld [vmem:[%s8220_s29 + $0x2f80] sm:$0xff]  ;;  %3539 = vmatpush.msrb.mxu0 %v1634_v20  ;;  %3534 = vmatmul.f32.vlgmr.msra.gmra.mxu3 %v8388_v18 }
  0xac   : > { %v2146_v22 = vld [vmem:[%s8220_s29 + $0x3700] sm:$0xff]  ;;  %3558 = vmatpush.msrb.mxu1 %v1906_v21 }
  0xad   : > { %v2418_v23 = vld [vmem:[%s8220_s29 + $0x3f80] sm:$0xff]  ;;  %3579 = vmatpush.msrb.mxu2 %v2146_v22 }
  0xae   : > { %v1618_v24 = vld [vmem:[%s8220_s29 + $0x2680] sm:$0xff]  ;;  %3598 = vmatpush.msrb.mxu3 %v2418_v23  ;;  %v8396_v23 = vld [vmem:[%s8212_s17 + $0x8] sm:$0xff] }
  0xaf   : > { %v1890_v25 = vld [vmem:[%s8220_s29 + $0x2f00] sm:$0xff]  ;;  %3540 = vmatpush.msrb.mxu0 %v1618_v24  ;;  %3494 = vmatmul.f32.vlgmr.msra.gmra.mxu1 %v8396_v23 }
  0xb0   : > { %v2130_v26 = vld [vmem:[%s8220_s29 + $0x3680] sm:$0xff]  ;;  %3559 = vmatpush.msrb.mxu1 %v1890_v25 }
  0xb1   : > { %v2402_v27 = vld [vmem:[%s8220_s29 + $0x3f00] sm:$0xff]  ;;  %3580 = vmatpush.msrb.mxu2 %v2130_v26 }
  0xb2   : > { %v1602_v28 = vld [vmem:[%s8220_s29 + $0x2600] sm:$0xff]  ;;  %3599 = vmatpush.msrb.mxu3 %v2402_v27 }
  0xb3   : > { %v1874_v29 = vld [vmem:[%s8220_s29 + $0x2e80] sm:$0xff]  ;;  %3541 = vmatpush.msrb.mxu0 %v1602_v28 }
  0xb4   : > { %v2114_v30 = vld [vmem:[%s8220_s29 + $0x3600] sm:$0xff]  ;;  %3560 = vmatpush.msrb.mxu1 %v1874_v29 }
  0xb5   : > { %v2386_v31 = vld [vmem:[%s8220_s29 + $0x3e80] sm:$0xff]  ;;  %3581 = vmatpush.msrb.mxu2 %v2114_v30 }
  0xb6   : > { %v1586_v32 = vld [vmem:[%s8220_s29 + $0x2580] sm:$0xff]  ;;  %3600 = vmatpush.msrb.mxu3 %v2386_v31 }
  0xb7   : > { %v1858_v33 = vld [vmem:[%s8220_s29 + $0x2e00] sm:$0xff]  ;;  %3542 = vmatpush.msrb.mxu0 %v1586_v32  ;;  %v8409_v32 = vld [vmem:[%s8212_s17 + $0x30] sm:$0xff] }
  0xb8   : > { %v2098_v34 = vld [vmem:[%s8220_s29 + $0x3580] sm:$0xff]  ;;  %3561 = vmatpush.msrb.mxu1 %v1858_v33 }
  0xb9   : > { %v2370_v35 = vld [vmem:[%s8220_s29 + $0x3e00] sm:$0xff]  ;;  %3582 = vmatpush.msrb.mxu2 %v2098_v34 }
  0xba   : > { %v1570_v36 = vld [vmem:[%s8220_s29 + $0x2500] sm:$0xff]  ;;  %3601 = vmatpush.msrb.mxu3 %v2370_v35 }
  0xbb   : > { %v1842_v37 = vld [vmem:[%s8220_s29 + $0x2d80] sm:$0xff]  ;;  %3543 = vmatpush.msrb.mxu0 %v1570_v36 }
  0xbc   : > { %v2082_v38 = vld [vmem:[%s8220_s29 + $0x3500] sm:$0xff]  ;;  %3562 = vmatpush.msrb.mxu1 %v1842_v37 }
  0xbd   : > { %v2354_v39 = vld [vmem:[%s8220_s29 + $0x3d80] sm:$0xff]  ;;  %3583 = vmatpush.msrb.mxu2 %v2082_v38  ;;  %v8420_v38 = vld [vmem:[%s8212_s17 + $0x38] sm:$0xff] }
  0xbe   : > { %v1554_v40 = vld [vmem:[%s8220_s29 + $0x2480] sm:$0xff]  ;;  %3602 = vmatpush.msrb.mxu3 %v2354_v39 }
  0xbf   : > { %v1826_v41 = vld [vmem:[%s8220_s29 + $0x2d00] sm:$0xff]  ;;  %3544 = vmatpush.msrb.mxu0 %v1554_v40 }
  0xc0   : > { %v2066_v42 = vld [vmem:[%s8220_s29 + $0x3480] sm:$0xff]  ;;  %3563 = vmatpush.msrb.mxu1 %v1826_v41 }
  0xc1   : > { %v2338_v43 = vld [vmem:[%s8220_s29 + $0x3d00] sm:$0xff]  ;;  %3584 = vmatpush.msrb.mxu2 %v2066_v42 }
  0xc2   : > { %v1538_v44 = vld [vmem:[%s8220_s29 + $0x2400] sm:$0xff]  ;;  %3603 = vmatpush.msrb.mxu3 %v2338_v43  ;;  %v8428_v43 = vld [vmem:[%s8212_s17 + $0x28] sm:$0xff] }
  0xc3   : > { %v1810_v45 = vld [vmem:[%s8220_s29 + $0x2c80] sm:$0xff]  ;;  %3545 = vmatpush.msrb.mxu0 %v1538_v44 }
  0xc4   : > { %v2050_v46 = vld [vmem:[%s8220_s29 + $0x3400] sm:$0xff]  ;;  %3564 = vmatpush.msrb.mxu1 %v1810_v45 }
  0xc5   : > { %v2322_v47 = vld [vmem:[%s8220_s29 + $0x3c80] sm:$0xff]  ;;  %3585 = vmatpush.msrb.mxu2 %v2050_v46 }
  0xc6   : > { %v1522_v48 = vld [vmem:[%s8220_s29 + $0x2380] sm:$0xff]  ;;  %3604 = vmatpush.msrb.mxu3 %v2322_v47 }
  0xc7   : > { %v1794_v49 = vld [vmem:[%s8220_s29 + $0x2c00] sm:$0xff]  ;;  %3546 = vmatpush.msrb.mxu0 %v1522_v48 }
  0xc8   : > { %v2034_v50 = vld [vmem:[%s8220_s29 + $0x3380] sm:$0xff]  ;;  %3565 = vmatpush.msrb.mxu1 %v1794_v49 }
  0xc9   : > { %v2306_v51 = vld [vmem:[%s8220_s29 + $0x3c00] sm:$0xff]  ;;  %3586 = vmatpush.msrb.mxu2 %v2034_v50 }
  0xca   : > { %v1506_v52 = vld [vmem:[%s8220_s29 + $0x2300] sm:$0xff]  ;;  %3605 = vmatpush.msrb.mxu3 %v2306_v51 }
  0xcb   : > { %v1778_v53 = vld [vmem:[%s8220_s29 + $0x2b80] sm:$0xff]  ;;  %3547 = vmatpush.msrb.mxu0 %v1506_v52 }
  0xcc   : > { %v2018_v54 = vld [vmem:[%s8220_s29 + $0x3300] sm:$0xff]  ;;  %3566 = vmatpush.msrb.mxu1 %v1778_v53 }
  0xcd   : > { %v2290_v55 = vld [vmem:[%s8220_s29 + $0x3b80] sm:$0xff]  ;;  %3587 = vmatpush.msrb.mxu2 %v2018_v54 }
  0xce   : > { %v1490_v56 = vld [vmem:[%s8220_s29 + $0x2280] sm:$0xff]  ;;  %3606 = vmatpush.msrb.mxu3 %v2290_v55 }
  0xcf   : > { %v1762_v57 = vld [vmem:[%s8220_s29 + $0x2b00] sm:$0xff]  ;;  %3548 = vmatpush.msrb.mxu0 %v1490_v56 }
  0xd0   : > { %v2002_v58 = vld [vmem:[%s8220_s29 + $0x3280] sm:$0xff]  ;;  %3567 = vmatpush.msrb.mxu1 %v1762_v57 }
  0xd1   : > { %v2274_v59 = vld [vmem:[%s8220_s29 + $0x3b00] sm:$0xff]  ;;  %3588 = vmatpush.msrb.mxu2 %v2002_v58 }
  0xd2   : > { %v1474_v60 = vld [vmem:[%s8220_s29 + $0x2200] sm:$0xff]  ;;  %3607 = vmatpush.msrb.mxu3 %v2274_v59 }
  0xd3   : > { %v1746_v61 = vld [vmem:[%s8220_s29 + $0x2a80] sm:$0xff]  ;;  %3549 = vmatpush.msrb.mxu0 %v1474_v60 }
  0xd4   : > { %v1986_v62 = vld [vmem:[%s8220_s29 + $0x3200] sm:$0xff]  ;;  %3568 = vmatpush.msrb.mxu1 %v1746_v61 }
  0xd5   : > { %v2258_v63 = vld [vmem:[%s8220_s29 + $0x3a80] sm:$0xff]  ;;  %3589 = vmatpush.msrb.mxu2 %v1986_v62 }
  0xd6   : > { %v1458_v0 = vld [vmem:[%s8220_s29 + $0x2180] sm:$0xff]  ;;  %3608 = vmatpush.msrb.mxu3 %v2258_v63 }
  0xd7   : > { %v1730_v1 = vld [vmem:[%s8220_s29 + $0x2a00] sm:$0xff]  ;;  %3550 = vmatpush.msrb.mxu0 %v1458_v0 }
  0xd8   : > { %v1970_v2 = vld [vmem:[%s8220_s29 + $0x3180] sm:$0xff]  ;;  %3569 = vmatpush.msrb.mxu1 %v1730_v1 }
  0xd9   : > { %v2242_v3 = vld [vmem:[%s8220_s29 + $0x3a00] sm:$0xff]  ;;  %3590 = vmatpush.msrb.mxu2 %v1970_v2 }
  0xda   : > { %v1442_v4 = vld [vmem:[%s8220_s29 + $0x2100] sm:$0xff]  ;;  %3609 = vmatpush.msrb.mxu3 %v2242_v3 }
  0xdb   : > { %v1714_v5 = vld [vmem:[%s8220_s29 + $0x2980] sm:$0xff]  ;;  %3551 = vmatpush.msrb.mxu0 %v1442_v4 }
  0xdc   : > { %v1954_v6 = vld [vmem:[%s8220_s29 + $0x3100] sm:$0xff]  ;;  %3570 = vmatpush.msrb.mxu1 %v1714_v5 }
  0xdd   : > { %v2226_v7 = vld [vmem:[%s8220_s29 + $0x3980] sm:$0xff]  ;;  %3591 = vmatpush.msrb.mxu2 %v1954_v6 }
  0xde   : > { %v1426_v8 = vld [vmem:[%s8220_s29 + $0x2080] sm:$0xff]  ;;  %3610 = vmatpush.msrb.mxu3 %v2226_v7 }
  0xdf   : > { %v1698_v9 = vld [vmem:[%s8220_s29 + $0x2900] sm:$0xff]  ;;  %3552 = vmatpush.msrb.mxu0 %v1426_v8 }
  0xe0   : > { %v1938_v10 = vld [vmem:[%s8220_s29 + $0x3080] sm:$0xff]  ;;  %3571 = vmatpush.msrb.mxu1 %v1698_v9 }
  0xe1   : > { %v2210_v11 = vld [vmem:[%s8220_s29 + $0x3900] sm:$0xff]  ;;  %3592 = vmatpush.msrb.mxu2 %v1938_v10 }
  0xe2   : > { %v1410_v13 = vld [vmem:[%s8220_s29 + $0x2000] sm:$0xff]  ;;  %3611 = vmatpush.msrb.mxu3 %v2210_v11 }
  0xe3   : > { %v1682_v14 = vld [vmem:[%s8220_s29 + $0x2880] sm:$0xff]  ;;  %3553 = vmatpush.msrb.mxu0 %v1410_v13 }
  0xe4   : > { %v1922_v15 = vld [vmem:[%s8220_s29 + $0x3000] sm:$0xff]  ;;  %3572 = vmatpush.msrb.mxu1 %v1682_v14 }
  0xe5   : > { %v2194_v16 = vld [vmem:[%s8220_s29 + $0x3880] sm:$0xff]  ;;  %3593 = vmatpush.msrb.mxu2 %v1922_v15 }
  0xe6   : > { %v8384_v17 = vld [vmem:[%s8212_s17] sm:$0xff]  ;;  %3612 = vmatpush.msrb.mxu3 %v2194_v16  ;;  %3594 = vmatmul.f32.vlgmr.msrb.gmra.mxu2 %v8409_v32 }
  0xe7   : > { %v2674_v19 = vld [vmem:[%s8220_s29 + $0x4780] sm:$0xff]  ;;  %3474 = vmatmul.f32.vlgmr.msra.gmra.mxu0 %v8384_v17 }
  0xe8   : > { %v3186_v20 = vld [vmem:[%s8220_s29 + $0x5780] sm:$0xff]  ;;  %3618 = vmatpush.msra.mxu0 %v2674_v19 }
  0xe9   : > { %v1666_v21 = vld [vmem:[%s8220_s29 + $0x2800] sm:$0xff]  ;;  %3658 = vmatpush.msra.mxu2 %v3186_v20 }
  0xea   : > { %v2178_v22 = vld [vmem:[%s8220_s29 + $0x3800] sm:$0xff]  ;;  %3573 = vmatpush.msrb.mxu1 %v1666_v21 }
  0xeb   : > { %v2658_v24 = vld [vmem:[%s8220_s29 + $0x4700] sm:$0xff]  ;;  %3613 = vmatpush.msrb.mxu3 %v2178_v22  ;;  %3574 = vmatmul.f32.vlgmr.msrb.gmra.mxu1 %v8428_v43 }
  0xec   : > { %v2930_v25 = vld [vmem:[%s8220_s29 + $0x4f80] sm:$0xff]  ;;  %3619 = vmatpush.msra.mxu0 %v2658_v24  ;;  %3614 = vmatmul.f32.vlgmr.msrb.gmra.mxu3 %v8420_v38 }
  0xed   : > { %v3170_v26 = vld [vmem:[%s8220_s29 + $0x5700] sm:$0xff]  ;;  %3638 = vmatpush.msra.mxu1 %v2930_v25 }
  0xee   : > { %v3442_v27 = vld [vmem:[%s8220_s29 + $0x5f80] sm:$0xff]  ;;  %3659 = vmatpush.msra.mxu2 %v3170_v26 }
  0xef   : > { %v2642_v28 = vld [vmem:[%s8220_s29 + $0x4680] sm:$0xff]  ;;  %3678 = vmatpush.msra.mxu3 %v3442_v27 }
  0xf0   : > { %v2914_v29 = vld [vmem:[%s8220_s29 + $0x4f00] sm:$0xff]  ;;  %3620 = vmatpush.msra.mxu0 %v2642_v28 }
  0xf1   : > { %v3154_v30 = vld [vmem:[%s8220_s29 + $0x5680] sm:$0xff]  ;;  %3639 = vmatpush.msra.mxu1 %v2914_v29  ;;  %v8480_v29 = vld [vmem:[%s8212_s17 + $0x50] sm:$0xff] }
  0xf2   : > { %v3426_v31 = vld [vmem:[%s8220_s29 + $0x5f00] sm:$0xff]  ;;  %3660 = vmatpush.msra.mxu2 %v3154_v30  ;;  %v627_v30 = vld [vmem:[%s8220_s29 + $0x788] sm:$0xff] }
  0xf3   : > { %v2626_v33 = vld [vmem:[%s8220_s29 + $0x4600] sm:$0xff]  ;;  %3679 = vmatpush.msra.mxu3 %v3426_v31  ;;  %v1139_v31 = vld [vmem:[%s8220_s29 + $0x1788] sm:$0xff] }
  0xf4   : > { %v2898_v34 = vld [vmem:[%s8220_s29 + $0x4e80] sm:$0xff]  ;;  %3621 = vmatpush.msra.mxu0 %v2626_v33 }
  0xf5   : > { %v3138_v35 = vld [vmem:[%s8220_s29 + $0x5600] sm:$0xff]  ;;  %3640 = vmatpush.msra.mxu1 %v2898_v34 }
  0xf6   : > { %v3410_v36 = vld [vmem:[%s8220_s29 + $0x5e80] sm:$0xff]  ;;  %3661 = vmatpush.msra.mxu2 %v3138_v35  ;;  %v8489_v35 = vld [vmem:[%s8212_s17 + $0x48] sm:$0xff] }
  0xf7   : > { %v8416_v37 = vld [vmem:[%s8212_s17 + $0x20] sm:$0xff]  ;;  %3680 = vmatpush.msra.mxu3 %v3410_v36  ;;  %v8492_v36 = vld [vmem:[%s8212_s17 + $0x58] sm:$0xff] }
  0xf8   : > { %v2610_v39 = vld [vmem:[%s8220_s29 + $0x4580] sm:$0xff]  ;;  %3554 = vmatmul.f32.vlgmr.msrb.gmra.mxu0 %v8416_v37 }
  0xf9   : > { %v2882_v40 = vld [vmem:[%s8220_s29 + $0x4e00] sm:$0xff]  ;;  %3622 = vmatpush.msra.mxu0 %v2610_v39  ;;  %v611_v39 = vld [vmem:[%s8220_s29 + $0x708] sm:$0xff] }
  0xfa   : > { %v3122_v41 = vld [vmem:[%s8220_s29 + $0x5580] sm:$0xff]  ;;  %3641 = vmatpush.msra.mxu1 %v2882_v40  ;;  %v883_v40 = vld [vmem:[%s8220_s29 + $0xf88] sm:$0xff] }
  0xfb   : > { %v3394_v42 = vld [vmem:[%s8220_s29 + $0x5e00] sm:$0xff]  ;;  %3662 = vmatpush.msra.mxu2 %v3122_v41  ;;  %v1123_v41 = vld [vmem:[%s8220_s29 + $0x1708] sm:$0xff] }
  0xfc   : > { %v2594_v44 = vld [vmem:[%s8220_s29 + $0x4500] sm:$0xff]  ;;  %3681 = vmatpush.msra.mxu3 %v3394_v42  ;;  %v1395_v42 = vld [vmem:[%s8220_s29 + $0x1f88] sm:$0xff] }
  0xfd   : > { %v2866_v45 = vld [vmem:[%s8220_s29 + $0x4d80] sm:$0xff]  ;;  %3623 = vmatpush.msra.mxu0 %v2594_v44  ;;  %v595_v44 = vld [vmem:[%s8220_s29 + $0x688] sm:$0xff] }
  0xfe   : > { %v3106_v46 = vld [vmem:[%s8220_s29 + $0x5500] sm:$0xff]  ;;  %3642 = vmatpush.msra.mxu1 %v2866_v45  ;;  %v867_v45 = vld [vmem:[%s8220_s29 + $0xf08] sm:$0xff] }
  0xff   : > { %v3378_v47 = vld [vmem:[%s8220_s29 + $0x5d80] sm:$0xff]  ;;  %3663 = vmatpush.msra.mxu2 %v3106_v46  ;;  %v1107_v46 = vld [vmem:[%s8220_s29 + $0x1688] sm:$0xff] }
 0x100   : > { %v2578_v48 = vld [vmem:[%s8220_s29 + $0x4480] sm:$0xff]  ;;  %3682 = vmatpush.msra.mxu3 %v3378_v47  ;;  %v1379_v47 = vld [vmem:[%s8220_s29 + $0x1f08] sm:$0xff] }
 0x101   : > { %v2850_v49 = vld [vmem:[%s8220_s29 + $0x4d00] sm:$0xff]  ;;  %3624 = vmatpush.msra.mxu0 %v2578_v48  ;;  %v579_v48 = vld [vmem:[%s8220_s29 + $0x608] sm:$0xff] }
 0x102   : > { %v3090_v50 = vld [vmem:[%s8220_s29 + $0x5480] sm:$0xff]  ;;  %3643 = vmatpush.msra.mxu1 %v2850_v49  ;;  %v851_v49 = vld [vmem:[%s8220_s29 + $0xe88] sm:$0xff] }
 0x103   : > { %v3362_v51 = vld [vmem:[%s8220_s29 + $0x5d00] sm:$0xff]  ;;  %3664 = vmatpush.msra.mxu2 %v3090_v50  ;;  %v1091_v50 = vld [vmem:[%s8220_s29 + $0x1608] sm:$0xff] }
 0x104   : > { %v2562_v52 = vld [vmem:[%s8220_s29 + $0x4400] sm:$0xff]  ;;  %3683 = vmatpush.msra.mxu3 %v3362_v51  ;;  %v1363_v51 = vld [vmem:[%s8220_s29 + $0x1e88] sm:$0xff] }
 0x105   : > { %v2834_v53 = vld [vmem:[%s8220_s29 + $0x4c80] sm:$0xff]  ;;  %3625 = vmatpush.msra.mxu0 %v2562_v52  ;;  %v563_v52 = vld [vmem:[%s8220_s29 + $0x588] sm:$0xff] }
 0x106   : > { %v3074_v54 = vld [vmem:[%s8220_s29 + $0x5400] sm:$0xff]  ;;  %3644 = vmatpush.msra.mxu1 %v2834_v53  ;;  %v835_v53 = vld [vmem:[%s8220_s29 + $0xe08] sm:$0xff] }
 0x107   : > { %v3346_v55 = vld [vmem:[%s8220_s29 + $0x5c80] sm:$0xff]  ;;  %3665 = vmatpush.msra.mxu2 %v3074_v54  ;;  %v1075_v54 = vld [vmem:[%s8220_s29 + $0x1588] sm:$0xff] }
 0x108   : > { %v2546_v56 = vld [vmem:[%s8220_s29 + $0x4380] sm:$0xff]  ;;  %3684 = vmatpush.msra.mxu3 %v3346_v55  ;;  %v1347_v55 = vld [vmem:[%s8220_s29 + $0x1e08] sm:$0xff] }
 0x109   : > { %v2818_v57 = vld [vmem:[%s8220_s29 + $0x4c00] sm:$0xff]  ;;  %3626 = vmatpush.msra.mxu0 %v2546_v56  ;;  %v547_v56 = vld [vmem:[%s8220_s29 + $0x508] sm:$0xff] }
 0x10a   : > { %v3058_v58 = vld [vmem:[%s8220_s29 + $0x5380] sm:$0xff]  ;;  %3645 = vmatpush.msra.mxu1 %v2818_v57  ;;  %v819_v57 = vld [vmem:[%s8220_s29 + $0xd88] sm:$0xff] }
 0x10b   : > { %v3330_v59 = vld [vmem:[%s8220_s29 + $0x5c00] sm:$0xff]  ;;  %3666 = vmatpush.msra.mxu2 %v3058_v58  ;;  %v1059_v58 = vld [vmem:[%s8220_s29 + $0x1508] sm:$0xff] }
 0x10c   : > { %v2530_v60 = vld [vmem:[%s8220_s29 + $0x4300] sm:$0xff]  ;;  %3685 = vmatpush.msra.mxu3 %v3330_v59  ;;  %v1331_v59 = vld [vmem:[%s8220_s29 + $0x1d88] sm:$0xff] }
 0x10d   : > { %v2802_v61 = vld [vmem:[%s8220_s29 + $0x4b80] sm:$0xff]  ;;  %3627 = vmatpush.msra.mxu0 %v2530_v60  ;;  %v531_v60 = vld [vmem:[%s8220_s29 + $0x488] sm:$0xff] }
 0x10e   : > { %v3042_v62 = vld [vmem:[%s8220_s29 + $0x5300] sm:$0xff]  ;;  %3646 = vmatpush.msra.mxu1 %v2802_v61  ;;  %v803_v61 = vld [vmem:[%s8220_s29 + $0xd08] sm:$0xff] }
 0x10f   : > { %v3314_v63 = vld [vmem:[%s8220_s29 + $0x5b80] sm:$0xff]  ;;  %3667 = vmatpush.msra.mxu2 %v3042_v62  ;;  %v1043_v62 = vld [vmem:[%s8220_s29 + $0x1488] sm:$0xff] }
 0x110   : > { %v2514_v0 = vld [vmem:[%s8220_s29 + $0x4280] sm:$0xff]  ;;  %3686 = vmatpush.msra.mxu3 %v3314_v63  ;;  %v1315_v63 = vld [vmem:[%s8220_s29 + $0x1d08] sm:$0xff] }
 0x111   : > { %v2786_v1 = vld [vmem:[%s8220_s29 + $0x4b00] sm:$0xff]  ;;  %3628 = vmatpush.msra.mxu0 %v2514_v0  ;;  %v515_v0 = vld [vmem:[%s8220_s29 + $0x408] sm:$0xff] }
 0x112   : > { %v3026_v2 = vld [vmem:[%s8220_s29 + $0x5280] sm:$0xff]  ;;  %3647 = vmatpush.msra.mxu1 %v2786_v1  ;;  %v787_v1 = vld [vmem:[%s8220_s29 + $0xc88] sm:$0xff] }
 0x113   : > { %v3298_v3 = vld [vmem:[%s8220_s29 + $0x5b00] sm:$0xff]  ;;  %3668 = vmatpush.msra.mxu2 %v3026_v2  ;;  %v1027_v2 = vld [vmem:[%s8220_s29 + $0x1408] sm:$0xff] }
 0x114   : > { %v2498_v4 = vld [vmem:[%s8220_s29 + $0x4200] sm:$0xff]  ;;  %3687 = vmatpush.msra.mxu3 %v3298_v3  ;;  %v1299_v3 = vld [vmem:[%s8220_s29 + $0x1c88] sm:$0xff] }
 0x115   : > { %v2770_v5 = vld [vmem:[%s8220_s29 + $0x4a80] sm:$0xff]  ;;  %3629 = vmatpush.msra.mxu0 %v2498_v4  ;;  %v499_v4 = vld [vmem:[%s8220_s29 + $0x388] sm:$0xff] }
 0x116   : > { %v3010_v6 = vld [vmem:[%s8220_s29 + $0x5200] sm:$0xff]  ;;  %3648 = vmatpush.msra.mxu1 %v2770_v5  ;;  %v771_v5 = vld [vmem:[%s8220_s29 + $0xc08] sm:$0xff] }
 0x117   : > { %v3282_v7 = vld [vmem:[%s8220_s29 + $0x5a80] sm:$0xff]  ;;  %3669 = vmatpush.msra.mxu2 %v3010_v6  ;;  %v1011_v6 = vld [vmem:[%s8220_s29 + $0x1388] sm:$0xff] }
 0x118   : > { %v2482_v8 = vld [vmem:[%s8220_s29 + $0x4180] sm:$0xff]  ;;  %3688 = vmatpush.msra.mxu3 %v3282_v7  ;;  %v1283_v7 = vld [vmem:[%s8220_s29 + $0x1c08] sm:$0xff] }
 0x119   : > { %v2754_v9 = vld [vmem:[%s8220_s29 + $0x4a00] sm:$0xff]  ;;  %3630 = vmatpush.msra.mxu0 %v2482_v8  ;;  %v483_v8 = vld [vmem:[%s8220_s29 + $0x308] sm:$0xff] }
 0x11a   : > { %v2994_v10 = vld [vmem:[%s8220_s29 + $0x5180] sm:$0xff]  ;;  %3649 = vmatpush.msra.mxu1 %v2754_v9  ;;  %v755_v9 = vld [vmem:[%s8220_s29 + $0xb88] sm:$0xff] }
 0x11b   : > { %v3266_v11 = vld [vmem:[%s8220_s29 + $0x5a00] sm:$0xff]  ;;  %3670 = vmatpush.msra.mxu2 %v2994_v10  ;;  %v995_v10 = vld [vmem:[%s8220_s29 + $0x1308] sm:$0xff] }
 0x11c   : > { %v2466_v13 = vld [vmem:[%s8220_s29 + $0x4100] sm:$0xff]  ;;  %3689 = vmatpush.msra.mxu3 %v3266_v11  ;;  %v1267_v11 = vld [vmem:[%s8220_s29 + $0x1b88] sm:$0xff] }
 0x11d   : > { %v2738_v14 = vld [vmem:[%s8220_s29 + $0x4980] sm:$0xff]  ;;  %3631 = vmatpush.msra.mxu0 %v2466_v13  ;;  %v467_v13 = vld [vmem:[%s8220_s29 + $0x288] sm:$0xff] }
 0x11e   : > { %v2978_v15 = vld [vmem:[%s8220_s29 + $0x5100] sm:$0xff]  ;;  %3650 = vmatpush.msra.mxu1 %v2738_v14  ;;  %v739_v14 = vld [vmem:[%s8220_s29 + $0xb08] sm:$0xff] }
 0x11f   : > { %v3250_v16 = vld [vmem:[%s8220_s29 + $0x5980] sm:$0xff]  ;;  %3671 = vmatpush.msra.mxu2 %v2978_v15  ;;  %v979_v15 = vld [vmem:[%s8220_s29 + $0x1288] sm:$0xff] }
 0x120   : > { %v2450_v19 = vld [vmem:[%s8220_s29 + $0x4080] sm:$0xff]  ;;  %3690 = vmatpush.msra.mxu3 %v3250_v16  ;;  %v1251_v16 = vld [vmem:[%s8220_s29 + $0x1b08] sm:$0xff] }
 0x121   : > { %v2722_v20 = vld [vmem:[%s8220_s29 + $0x4900] sm:$0xff]  ;;  %3632 = vmatpush.msra.mxu0 %v2450_v19  ;;  %v451_v19 = vld [vmem:[%s8220_s29 + $0x208] sm:$0xff] }
 0x122   : > { %v2962_v21 = vld [vmem:[%s8220_s29 + $0x5080] sm:$0xff]  ;;  %3651 = vmatpush.msra.mxu1 %v2722_v20  ;;  %v723_v20 = vld [vmem:[%s8220_s29 + $0xa88] sm:$0xff] }
 0x123   : > { %v3234_v22 = vld [vmem:[%s8220_s29 + $0x5900] sm:$0xff]  ;;  %3672 = vmatpush.msra.mxu2 %v2962_v21  ;;  %v963_v21 = vld [vmem:[%s8220_s29 + $0x1208] sm:$0xff] }
 0x124   : > { %v2434_v24 = vld [vmem:[%s8220_s29 + $0x4000] sm:$0xff]  ;;  %3691 = vmatpush.msra.mxu3 %v3234_v22  ;;  %v1235_v22 = vld [vmem:[%s8220_s29 + $0x1a88] sm:$0xff] }
 0x125   : > { %v2706_v25 = vld [vmem:[%s8220_s29 + $0x4880] sm:$0xff]  ;;  %3633 = vmatpush.msra.mxu0 %v2434_v24  ;;  %v435_v24 = vld [vmem:[%s8220_s29 + $0x188] sm:$0xff] }
 0x126   : > { %v2946_v26 = vld [vmem:[%s8220_s29 + $0x5000] sm:$0xff]  ;;  %3652 = vmatpush.msra.mxu1 %v2706_v25  ;;  %v707_v25 = vld [vmem:[%s8220_s29 + $0xa08] sm:$0xff] }
 0x127   : > { %v3218_v27 = vld [vmem:[%s8220_s29 + $0x5880] sm:$0xff]  ;;  %3673 = vmatpush.msra.mxu2 %v2946_v26  ;;  %3698 = vmatpush.msrb.mxu0 %v627_v30  ;;  %v947_v26 = vld [vmem:[%s8220_s29 + $0x1188] sm:$0xff] }
 0x128   : > { %v8477_v28 = vld [vmem:[%s8212_s17 + $0x40] sm:$0xff]  ;;  %3692 = vmatpush.msra.mxu3 %v3218_v27  ;;  %3674 = vmatmul.f32.vlgmr.msra.gmra.mxu2 %v8480_v29  ;;  %v1219_v27 = vld [vmem:[%s8220_s29 + $0x1a08] sm:$0xff] }
 0x129   : > { %v2690_v33 = vld [vmem:[%s8220_s29 + $0x4800] sm:$0xff]  ;;  %3634 = vmatmul.f32.vlgmr.msra.gmra.mxu0 %v8477_v28  ;;  %3738 = vmatpush.msrb.mxu2 %v1139_v31  ;;  %v419_v30 = vld [vmem:[%s8220_s29 + $0x108] sm:$0xff] }
 0x12a   : > { %v3202_v34 = vld [vmem:[%s8220_s29 + $0x5800] sm:$0xff]  ;;  %3653 = vmatpush.msra.mxu1 %v2690_v33  ;;  %3699 = vmatpush.msrb.mxu0 %v611_v39  ;;  %v691_v31 = vld [vmem:[%s8220_s29 + $0x988] sm:$0xff] }
 0x12b   : > { %3693 = vmatpush.msra.mxu3 %v3202_v34  ;;  %3654 = vmatmul.f32.vlgmr.msra.gmra.mxu1 %v8489_v35  ;;  %v931_v33 = vld [vmem:[%s8220_s29 + $0x1108] sm:$0xff] }
 0x12c   : > { %3694 = vmatmul.f32.vlgmr.msra.gmra.mxu3 %v8492_v36  ;;  %3718 = vmatpush.msrb.mxu1 %v883_v40  ;;  %v1203_v34 = vld [vmem:[%s8220_s29 + $0x1988] sm:$0xff] }
 0x12d   : > { %3739 = vmatpush.msrb.mxu2 %v1123_v41  ;;  %3758 = vmatpush.msrb.mxu3 %v1395_v42  ;;  %v403_v39 = vld [vmem:[%s8220_s29 + $0x88] sm:$0xff] }
 0x12e   : > { %3700 = vmatpush.msrb.mxu0 %v595_v44  ;;  %3719 = vmatpush.msrb.mxu1 %v867_v45  ;;  %v675_v40 = vld [vmem:[%s8220_s29 + $0x908] sm:$0xff] }
 0x12f   : > { %3740 = vmatpush.msrb.mxu2 %v1107_v46  ;;  %3759 = vmatpush.msrb.mxu3 %v1379_v47  ;;  %v915_v41 = vld [vmem:[%s8220_s29 + $0x1088] sm:$0xff] }
 0x130   : > { %3701 = vmatpush.msrb.mxu0 %v579_v48  ;;  %3720 = vmatpush.msrb.mxu1 %v851_v49  ;;  %v1187_v42 = vld [vmem:[%s8220_s29 + $0x1908] sm:$0xff] }
 0x131   : > { %3741 = vmatpush.msrb.mxu2 %v1091_v50  ;;  %3760 = vmatpush.msrb.mxu3 %v1363_v51  ;;  %v387_v44 = vld [vmem:[%s8220_s29 + $0x8] sm:$0xff] }
 0x132   : > { %3702 = vmatpush.msrb.mxu0 %v563_v52  ;;  %3721 = vmatpush.msrb.mxu1 %v835_v53  ;;  %v659_v45 = vld [vmem:[%s8220_s29 + $0x888] sm:$0xff] }
 0x133   : > { %3742 = vmatpush.msrb.mxu2 %v1075_v54  ;;  %3761 = vmatpush.msrb.mxu3 %v1347_v55  ;;  %v899_v46 = vld [vmem:[%s8220_s29 + $0x1008] sm:$0xff] }
 0x134   : > { %3703 = vmatpush.msrb.mxu0 %v547_v56  ;;  %3722 = vmatpush.msrb.mxu1 %v819_v57  ;;  %v1171_v47 = vld [vmem:[%s8220_s29 + $0x1888] sm:$0xff] }
 0x135   : > { %3743 = vmatpush.msrb.mxu2 %v1059_v58  ;;  %3762 = vmatpush.msrb.mxu3 %v1331_v59  ;;  %v1651_v48 = vld [vmem:[%s8220_s29 + $0x2788] sm:$0xff] }
 0x136   : > { %3704 = vmatpush.msrb.mxu0 %v531_v60  ;;  %3723 = vmatpush.msrb.mxu1 %v803_v61  ;;  %v2163_v49 = vld [vmem:[%s8220_s29 + $0x3788] sm:$0xff] }
 0x137   : > { %3744 = vmatpush.msrb.mxu2 %v1043_v62  ;;  %3763 = vmatpush.msrb.mxu3 %v1315_v63  ;;  %v643_v50 = vld [vmem:[%s8220_s29 + $0x808] sm:$0xff] }
 0x138   : > { %3705 = vmatpush.msrb.mxu0 %v515_v0  ;;  %3724 = vmatpush.msrb.mxu1 %v787_v1  ;;  %v1155_v51 = vld [vmem:[%s8220_s29 + $0x1808] sm:$0xff] }
 0x139   : > { %3745 = vmatpush.msrb.mxu2 %v1027_v2  ;;  %3764 = vmatpush.msrb.mxu3 %v1299_v3  ;;  %v1635_v52 = vld [vmem:[%s8220_s29 + $0x2708] sm:$0xff] }
 0x13a   : > { %3706 = vmatpush.msrb.mxu0 %v499_v4  ;;  %3725 = vmatpush.msrb.mxu1 %v771_v5  ;;  %v1907_v53 = vld [vmem:[%s8220_s29 + $0x2f88] sm:$0xff] }
 0x13b   : > { %3746 = vmatpush.msrb.mxu2 %v1011_v6  ;;  %3765 = vmatpush.msrb.mxu3 %v1283_v7  ;;  %v2147_v54 = vld [vmem:[%s8220_s29 + $0x3708] sm:$0xff] }
 0x13c   : > { %3707 = vmatpush.msrb.mxu0 %v483_v8  ;;  %3726 = vmatpush.msrb.mxu1 %v755_v9  ;;  %v2419_v55 = vld [vmem:[%s8220_s29 + $0x3f88] sm:$0xff] }
 0x13d   : > { %3747 = vmatpush.msrb.mxu2 %v995_v10  ;;  %3766 = vmatpush.msrb.mxu3 %v1267_v11  ;;  %v1619_v56 = vld [vmem:[%s8220_s29 + $0x2688] sm:$0xff] }
 0x13e   : > { %3708 = vmatpush.msrb.mxu0 %v467_v13  ;;  %3727 = vmatpush.msrb.mxu1 %v739_v14  ;;  %v1891_v57 = vld [vmem:[%s8220_s29 + $0x2f08] sm:$0xff] }
 0x13f   : > { %3748 = vmatpush.msrb.mxu2 %v979_v15  ;;  %3767 = vmatpush.msrb.mxu3 %v1251_v16  ;;  %v2131_v58 = vld [vmem:[%s8220_s29 + $0x3688] sm:$0xff] }
 0x140   : > { %3709 = vmatpush.msrb.mxu0 %v451_v19  ;;  %3728 = vmatpush.msrb.mxu1 %v723_v20  ;;  %v2403_v59 = vld [vmem:[%s8220_s29 + $0x3f08] sm:$0xff] }
 0x141   : > { %3749 = vmatpush.msrb.mxu2 %v963_v21  ;;  %3768 = vmatpush.msrb.mxu3 %v1235_v22  ;;  %v1603_v60 = vld [vmem:[%s8220_s29 + $0x2608] sm:$0xff] }
 0x142   : > { %3710 = vmatpush.msrb.mxu0 %v435_v24  ;;  %3729 = vmatpush.msrb.mxu1 %v707_v25  ;;  %v1875_v61 = vld [vmem:[%s8220_s29 + $0x2e88] sm:$0xff] }
 0x143   : > { %3750 = vmatpush.msrb.mxu2 %v947_v26  ;;  %3769 = vmatpush.msrb.mxu3 %v1219_v27  ;;  %v2115_v62 = vld [vmem:[%s8220_s29 + $0x3608] sm:$0xff] }
 0x144   : > { %3711 = vmatpush.msrb.mxu0 %v419_v30  ;;  %3730 = vmatpush.msrb.mxu1 %v691_v31  ;;  %v2387_v63 = vld [vmem:[%s8220_s29 + $0x3e88] sm:$0xff] }
 0x145   : > { %3751 = vmatpush.msrb.mxu2 %v931_v33  ;;  %3770 = vmatpush.msrb.mxu3 %v1203_v34  ;;  %v1587_v0 = vld [vmem:[%s8220_s29 + $0x2588] sm:$0xff] }
 0x146   : > { %3712 = vmatpush.msrb.mxu0 %v403_v39  ;;  %3731 = vmatpush.msrb.mxu1 %v675_v40  ;;  %v1859_v1 = vld [vmem:[%s8220_s29 + $0x2e08] sm:$0xff] }
 0x147   : > { %3752 = vmatpush.msrb.mxu2 %v915_v41  ;;  %3771 = vmatpush.msrb.mxu3 %v1187_v42  ;;  %v2099_v2 = vld [vmem:[%s8220_s29 + $0x3588] sm:$0xff] }
 0x148   : > { %3713 = vmatpush.msrb.mxu0 %v387_v44  ;;  %3732 = vmatpush.msrb.mxu1 %v659_v45  ;;  %v2371_v3 = vld [vmem:[%s8220_s29 + $0x3e08] sm:$0xff] }
 0x149   : > { %3753 = vmatpush.msrb.mxu2 %v899_v46  ;;  %3772 = vmatpush.msrb.mxu3 %v1171_v47  ;;  %v1571_v4 = vld [vmem:[%s8220_s29 + $0x2508] sm:$0xff] }
 0x14a   : > { %3778 = vmatpush.msra.mxu0 %v1651_v48  ;;  %3733 = vmatpush.msrb.mxu1 %v643_v50  ;;  %v1843_v5 = vld [vmem:[%s8220_s29 + $0x2d88] sm:$0xff] }
 0x14b   : > { %3818 = vmatpush.msra.mxu2 %v2163_v49  ;;  %3773 = vmatpush.msrb.mxu3 %v1155_v51  ;;  %v2083_v6 = vld [vmem:[%s8220_s29 + $0x3508] sm:$0xff] }
 0x14c   : > { %3779 = vmatpush.msra.mxu0 %v1635_v52  ;;  %3798 = vmatpush.msra.mxu1 %v1907_v53  ;;  %v2355_v7 = vld [vmem:[%s8220_s29 + $0x3d88] sm:$0xff] }
 0x14d   : > { %3819 = vmatpush.msra.mxu2 %v2147_v54  ;;  %3838 = vmatpush.msra.mxu3 %v2419_v55  ;;  %v1555_v8 = vld [vmem:[%s8220_s29 + $0x2488] sm:$0xff] }
 0x14e   : > { %3780 = vmatpush.msra.mxu0 %v1619_v56  ;;  %3799 = vmatpush.msra.mxu1 %v1891_v57  ;;  %v1827_v9 = vld [vmem:[%s8220_s29 + $0x2d08] sm:$0xff] }
 0x14f   : > { %3820 = vmatpush.msra.mxu2 %v2131_v58  ;;  %3839 = vmatpush.msra.mxu3 %v2403_v59  ;;  %v2067_v10 = vld [vmem:[%s8220_s29 + $0x3488] sm:$0xff] }
 0x150   : > { %3781 = vmatpush.msra.mxu0 %v1603_v60  ;;  %3800 = vmatpush.msra.mxu1 %v1875_v61  ;;  %v2339_v11 = vld [vmem:[%s8220_s29 + $0x3d08] sm:$0xff] }
 0x151   : > { %3821 = vmatpush.msra.mxu2 %v2115_v62  ;;  %3840 = vmatpush.msra.mxu3 %v2387_v63  ;;  %v1539_v13 = vld [vmem:[%s8220_s29 + $0x2408] sm:$0xff] }
 0x152   : > { %3782 = vmatpush.msra.mxu0 %v1587_v0  ;;  %3801 = vmatpush.msra.mxu1 %v1859_v1  ;;  %v1811_v14 = vld [vmem:[%s8220_s29 + $0x2c88] sm:$0xff] }
 0x153   : > { %3822 = vmatpush.msra.mxu2 %v2099_v2  ;;  %3841 = vmatpush.msra.mxu3 %v2371_v3  ;;  %v2051_v15 = vld [vmem:[%s8220_s29 + $0x3408] sm:$0xff] }
 0x154   : > { %3783 = vmatpush.msra.mxu0 %v1571_v4  ;;  %3802 = vmatpush.msra.mxu1 %v1843_v5  ;;  %v2323_v16 = vld [vmem:[%s8220_s29 + $0x3c88] sm:$0xff] }
 0x155   : > { %3823 = vmatpush.msra.mxu2 %v2083_v6  ;;  %3842 = vmatpush.msra.mxu3 %v2355_v7  ;;  %v1523_v19 = vld [vmem:[%s8220_s29 + $0x2388] sm:$0xff] }
 0x156   : > { %3784 = vmatpush.msra.mxu0 %v1555_v8  ;;  %3803 = vmatpush.msra.mxu1 %v1827_v9  ;;  %v1795_v20 = vld [vmem:[%s8220_s29 + $0x2c08] sm:$0xff] }
 0x157   : > { %3824 = vmatpush.msra.mxu2 %v2067_v10  ;;  %3843 = vmatpush.msra.mxu3 %v2339_v11  ;;  %v2035_v21 = vld [vmem:[%s8220_s29 + $0x3388] sm:$0xff] }
 0x158   : > { %3785 = vmatpush.msra.mxu0 %v1539_v13  ;;  %3804 = vmatpush.msra.mxu1 %v1811_v14  ;;  %v2307_v22 = vld [vmem:[%s8220_s29 + $0x3c08] sm:$0xff] }
 0x159   : > { %3825 = vmatpush.msra.mxu2 %v2051_v15  ;;  %3844 = vmatpush.msra.mxu3 %v2323_v16  ;;  %v1507_v24 = vld [vmem:[%s8220_s29 + $0x2308] sm:$0xff] }
 0x15a   : > { %v1779_v25 = vld [vmem:[%s8220_s29 + $0x2b88] sm:$0xff]  ;;  %3786 = vmatpush.msra.mxu0 %v1523_v19  ;;  %3805 = vmatpush.msra.mxu1 %v1795_v20 }
 0x15b   : > { %v2019_v26 = vld [vmem:[%s8220_s29 + $0x3308] sm:$0xff]  ;;  %3826 = vmatpush.msra.mxu2 %v2035_v21  ;;  %3845 = vmatpush.msra.mxu3 %v2307_v22 }
 0x15c   : > { %v2291_v27 = vld [vmem:[%s8220_s29 + $0x3b88] sm:$0xff]  ;;  %3787 = vmatpush.msra.mxu0 %v1507_v24  ;;  %3806 = vmatpush.msra.mxu1 %v1779_v25 }
 0x15d   : > { %v1491_v30 = vld [vmem:[%s8220_s29 + $0x2288] sm:$0xff]  ;;  %3827 = vmatpush.msra.mxu2 %v2019_v26  ;;  %3846 = vmatpush.msra.mxu3 %v2291_v27 }
 0x15e   : > { %v1763_v31 = vld [vmem:[%s8220_s29 + $0x2b08] sm:$0xff]  ;;  %3788 = vmatpush.msra.mxu0 %v1491_v30  ;;  %3754 = vmatmul.f32.vlgmr.msrb.gmra.mxu2 %v8377_v12 }
 0x15f   : > { %v2003_v33 = vld [vmem:[%s8220_s29 + $0x3288] sm:$0xff]  ;;  %3807 = vmatpush.msra.mxu1 %v1763_v31  ;;  %3714 = vmatmul.f32.vlgmr.msrb.gmra.mxu0 %v8384_v17 }
 0x160   : > { %v2275_v34 = vld [vmem:[%s8220_s29 + $0x3b08] sm:$0xff]  ;;  %3828 = vmatpush.msra.mxu2 %v2003_v33  ;;  %3774 = vmatmul.f32.vlgmr.msrb.gmra.mxu3 %v8388_v18 }
 0x161   : > { %v1475_v39 = vld [vmem:[%s8220_s29 + $0x2208] sm:$0xff]  ;;  %3847 = vmatpush.msra.mxu3 %v2275_v34  ;;  %3734 = vmatmul.f32.vlgmr.msrb.gmra.mxu1 %v8396_v23 }
 0x162   : > { %v1747_v40 = vld [vmem:[%s8220_s29 + $0x2a88] sm:$0xff]  ;;  %3789 = vmatpush.msra.mxu0 %v1475_v39 }
 0x163   : > { %v1987_v41 = vld [vmem:[%s8220_s29 + $0x3208] sm:$0xff]  ;;  %3808 = vmatpush.msra.mxu1 %v1747_v40 }
 0x164   : > { %v2259_v42 = vld [vmem:[%s8220_s29 + $0x3a88] sm:$0xff]  ;;  %3829 = vmatpush.msra.mxu2 %v1987_v41 }
 0x165   : > { %v1459_v44 = vld [vmem:[%s8220_s29 + $0x2188] sm:$0xff]  ;;  %3848 = vmatpush.msra.mxu3 %v2259_v42 }
 0x166   : > { %v1731_v45 = vld [vmem:[%s8220_s29 + $0x2a08] sm:$0xff]  ;;  %3790 = vmatpush.msra.mxu0 %v1459_v44 }
 0x167   : > { %v1971_v46 = vld [vmem:[%s8220_s29 + $0x3188] sm:$0xff]  ;;  %3809 = vmatpush.msra.mxu1 %v1731_v45 }
 0x168   : > { %v2243_v47 = vld [vmem:[%s8220_s29 + $0x3a08] sm:$0xff]  ;;  %3830 = vmatpush.msra.mxu2 %v1971_v46 }
 0x169   : > { %v1443_v48 = vld [vmem:[%s8220_s29 + $0x2108] sm:$0xff]  ;;  %3849 = vmatpush.msra.mxu3 %v2243_v47 }
 0x16a   : > { %v1715_v49 = vld [vmem:[%s8220_s29 + $0x2988] sm:$0xff]  ;;  %3791 = vmatpush.msra.mxu0 %v1443_v48 }
 0x16b   : > { %v1955_v50 = vld [vmem:[%s8220_s29 + $0x3108] sm:$0xff]  ;;  %3810 = vmatpush.msra.mxu1 %v1715_v49 }
 0x16c   : > { %v2227_v51 = vld [vmem:[%s8220_s29 + $0x3988] sm:$0xff]  ;;  %3831 = vmatpush.msra.mxu2 %v1955_v50 }
 0x16d   : > { %v1427_v52 = vld [vmem:[%s8220_s29 + $0x2088] sm:$0xff]  ;;  %3850 = vmatpush.msra.mxu3 %v2227_v51 }
 0x16e   : > { %v1699_v53 = vld [vmem:[%s8220_s29 + $0x2908] sm:$0xff]  ;;  %3792 = vmatpush.msra.mxu0 %v1427_v52 }
 0x16f   : > { %v1939_v54 = vld [vmem:[%s8220_s29 + $0x3088] sm:$0xff]  ;;  %3811 = vmatpush.msra.mxu1 %v1699_v53 }
 0x170   : > { %v2211_v55 = vld [vmem:[%s8220_s29 + $0x3908] sm:$0xff]  ;;  %3832 = vmatpush.msra.mxu2 %v1939_v54 }
 0x171   : > { %v1411_v56 = vld [vmem:[%s8220_s29 + $0x2008] sm:$0xff]  ;;  %3851 = vmatpush.msra.mxu3 %v2211_v55 }
 0x172   : > { %v1683_v57 = vld [vmem:[%s8220_s29 + $0x2888] sm:$0xff]  ;;  %3793 = vmatpush.msra.mxu0 %v1411_v56 }
 0x173   : > { %v1923_v58 = vld [vmem:[%s8220_s29 + $0x3008] sm:$0xff]  ;;  %3812 = vmatpush.msra.mxu1 %v1683_v57  ;;  %3794 = vmatmul.f32.vlgmr.msra.gmra.mxu0 %v8416_v37 }
 0x174   : > { %v2195_v59 = vld [vmem:[%s8220_s29 + $0x3888] sm:$0xff]  ;;  %3833 = vmatpush.msra.mxu2 %v1923_v58 }
 0x175   : > { %v2675_v60 = vld [vmem:[%s8220_s29 + $0x4788] sm:$0xff]  ;;  %3852 = vmatpush.msra.mxu3 %v2195_v59  ;;  %3834 = vmatmul.f32.vlgmr.msra.gmra.mxu2 %v8409_v32 }
 0x176   : > { %v3187_v61 = vld [vmem:[%s8220_s29 + $0x5788] sm:$0xff]  ;;  %3858 = vmatpush.msrb.mxu0 %v2675_v60 }
 0x177   : > { %v1667_v62 = vld [vmem:[%s8220_s29 + $0x2808] sm:$0xff]  ;;  %3898 = vmatpush.msrb.mxu2 %v3187_v61 }
 0x178   : > { %v2179_v63 = vld [vmem:[%s8220_s29 + $0x3808] sm:$0xff]  ;;  %3813 = vmatpush.msra.mxu1 %v1667_v62  ;;  %v3495_v62 = vpop.f32.mrf.mxu1 }
 0x179   : > { %v2659_v12 = vld [vmem:[%s8220_s29 + $0x4708] sm:$0xff]  ;;  %3853 = vmatpush.msra.mxu3 %v2179_v63  ;;  %3814 = vmatmul.f32.vlgmr.msra.gmra.mxu1 %v8428_v43 }
 0x17a   : > { %v2931_v0 = vld [vmem:[%s8220_s29 + $0x4f88] sm:$0xff]  ;;  %3859 = vmatpush.msrb.mxu0 %v2659_v12  ;;  %3854 = vmatmul.f32.vlgmr.msra.gmra.mxu3 %v8420_v38 }
 0x17b   : > { %v3171_v1 = vld [vmem:[%s8220_s29 + $0x5708] sm:$0xff]  ;;  %3878 = vmatpush.msrb.mxu1 %v2931_v0  ;;  %v3475_v0 = vpop.f32.mrf.mxu0 }
 0x17c   : > { %v3443_v2 = vld [vmem:[%s8220_s29 + $0x5f88] sm:$0xff]  ;;  %3899 = vmatpush.msrb.mxu2 %v3171_v1  ;;  %v628_v1 = vld [vmem:[%s8220_s29 + $0x790] sm:$0xff] }
 0x17d   : > { %v2643_v17 = vld [vmem:[%s8220_s29 + $0x4688] sm:$0xff]  ;;  %3918 = vmatpush.msrb.mxu3 %v3443_v2  ;;  %v1140_v2 = vld [vmem:[%s8220_s29 + $0x1790] sm:$0xff] }
 0x17e   : > { %v2915_v3 = vld [vmem:[%s8220_s29 + $0x4f08] sm:$0xff]  ;;  %3860 = vmatpush.msrb.mxu0 %v2643_v17  ;;  %v3496_v17 = vadd.f32 %v3495_v62, %v3475_v0  ;;  %v1236_v62 = vld [vmem:[%s8220_s29 + $0x1a90] sm:$0xff] }
 0x17f   : > { %v3155_v18 = vld [vmem:[%s8220_s29 + $0x5688] sm:$0xff]  ;;  %3879 = vmatpush.msrb.mxu1 %v2915_v3 }
 0x180   : > { %v3427_v4 = vld [vmem:[%s8220_s29 + $0x5f08] sm:$0xff]  ;;  %3900 = vmatpush.msrb.mxu2 %v3155_v18 }
 0x181   : > { %v2627_v5 = vld [vmem:[%s8220_s29 + $0x4608] sm:$0xff]  ;;  %3919 = vmatpush.msrb.mxu3 %v3427_v4  ;;  %v3515_v4 = vpop.f32.mrf.mxu2 }
 0x182   : > { %v2899_v6 = vld [vmem:[%s8220_s29 + $0x4e88] sm:$0xff]  ;;  %3861 = vmatpush.msrb.mxu0 %v2627_v5  ;;  %v612_v5 = vld [vmem:[%s8220_s29 + $0x710] sm:$0xff] }
 0x183   : > { %v3139_v7 = vld [vmem:[%s8220_s29 + $0x5608] sm:$0xff]  ;;  %3880 = vmatpush.msrb.mxu1 %v2899_v6  ;;  %v884_v6 = vld [vmem:[%s8220_s29 + $0xf90] sm:$0xff] }
 0x184   : > { %v3411_v23 = vld [vmem:[%s8220_s29 + $0x5e88] sm:$0xff]  ;;  %3901 = vmatpush.msrb.mxu2 %v3139_v7  ;;  %v1124_v7 = vld [vmem:[%s8220_s29 + $0x1710] sm:$0xff] }
 0x185   : > { %v2611_v8 = vld [vmem:[%s8220_s29 + $0x4588] sm:$0xff]  ;;  %3920 = vmatpush.msrb.mxu3 %v3411_v23  ;;  %v1396_v23 = vld [vmem:[%s8220_s29 + $0x1f90] sm:$0xff] }
 0x186   : > { %v2883_v9 = vld [vmem:[%s8220_s29 + $0x4e08] sm:$0xff]  ;;  %3862 = vmatpush.msrb.mxu0 %v2611_v8  ;;  %v3516_v8 = vadd.f32 %v3515_v4, %v3496_v17  ;;  %v932_v4 = vld [vmem:[%s8220_s29 + $0x1110] sm:$0xff] }
 0x187   : > { %v3123_v10 = vld [vmem:[%s8220_s29 + $0x5588] sm:$0xff]  ;;  %3881 = vmatpush.msrb.mxu1 %v2883_v9  ;;  %v3535_v9 = vpop.f32.mrf.mxu3 }
 0x188   : > { %v3395_v11 = vld [vmem:[%s8220_s29 + $0x5e08] sm:$0xff]  ;;  %3902 = vmatpush.msrb.mxu2 %v3123_v10  ;;  %v1108_v10 = vld [vmem:[%s8220_s29 + $0x1690] sm:$0xff] }
 0x189   : > { %v2595_v32 = vld [vmem:[%s8220_s29 + $0x4508] sm:$0xff]  ;;  %3921 = vmatpush.msrb.mxu3 %v3395_v11  ;;  %v1380_v11 = vld [vmem:[%s8220_s29 + $0x1f10] sm:$0xff] }
 0x18a   : > { %v2867_v13 = vld [vmem:[%s8220_s29 + $0x4d88] sm:$0xff]  ;;  %3863 = vmatpush.msrb.mxu0 %v2595_v32  ;;  %v580_v32 = vld [vmem:[%s8220_s29 + $0x610] sm:$0xff] }
 0x18b   : > { %v3107_v14 = vld [vmem:[%s8220_s29 + $0x5508] sm:$0xff]  ;;  %3882 = vmatpush.msrb.mxu1 %v2867_v13  ;;  %v852_v13 = vld [vmem:[%s8220_s29 + $0xe90] sm:$0xff] }
 0x18c   : > { %v3379_v15 = vld [vmem:[%s8220_s29 + $0x5d88] sm:$0xff]  ;;  %3903 = vmatpush.msrb.mxu2 %v3107_v14  ;;  %v3536_v14 = vadd.f32 %v3535_v9, %v3516_v8  ;;  %v916_v8 = vld [vmem:[%s8220_s29 + $0x1090] sm:$0xff] }
 0x18d   : > { %v2579_v37 = vld [vmem:[%s8220_s29 + $0x4488] sm:$0xff]  ;;  %3922 = vmatpush.msrb.mxu3 %v3379_v15  ;;  %v564_v15 = vld [vmem:[%s8220_s29 + $0x590] sm:$0xff] }
 0x18e   : > { %v2851_v16 = vld [vmem:[%s8220_s29 + $0x4d08] sm:$0xff]  ;;  %3864 = vmatpush.msrb.mxu0 %v2579_v37  ;;  %v836_v37 = vld [vmem:[%s8220_s29 + $0xe10] sm:$0xff] }
 0x18f   : > { %v3091_v38 = vld [vmem:[%s8220_s29 + $0x5488] sm:$0xff]  ;;  %3883 = vmatpush.msrb.mxu1 %v2851_v16  ;;  %v3555_v16 = vpop.f32.mrf.mxu0  ;;  %v388_v9 = vld [vmem:[%s8220_s29 + $0x10] sm:$0xff] }
 0x190   : > { %v3363_v19 = vld [vmem:[%s8220_s29 + $0x5d08] sm:$0xff]  ;;  %3904 = vmatpush.msrb.mxu2 %v3091_v38  ;;  %v1076_v38 = vld [vmem:[%s8220_s29 + $0x1590] sm:$0xff] }
 0x191   : > { %v2563_v20 = vld [vmem:[%s8220_s29 + $0x4408] sm:$0xff]  ;;  %3923 = vmatpush.msrb.mxu3 %v3363_v19  ;;  %v1348_v19 = vld [vmem:[%s8220_s29 + $0x1e10] sm:$0xff] }
 0x192   : > { %v2835_v21 = vld [vmem:[%s8220_s29 + $0x4c88] sm:$0xff]  ;;  %3865 = vmatpush.msrb.mxu0 %v2563_v20  ;;  %v548_v20 = vld [vmem:[%s8220_s29 + $0x510] sm:$0xff] }
 0x193   : > { %v3075_v22 = vld [vmem:[%s8220_s29 + $0x5408] sm:$0xff]  ;;  %3884 = vmatpush.msrb.mxu1 %v2835_v21  ;;  %v820_v21 = vld [vmem:[%s8220_s29 + $0xd90] sm:$0xff] }
 0x194   : > { %v3347_v43 = vld [vmem:[%s8220_s29 + $0x5c88] sm:$0xff]  ;;  %3905 = vmatpush.msrb.mxu2 %v3075_v22  ;;  %v3556_v22 = vadd.f32 %v3555_v16, %v3536_v14  ;;  %v2164_v14 = vld [vmem:[%s8220_s29 + $0x3790] sm:$0xff]  ;;  %v358_v16 = vld [vmem:[%s8235_s7] sm:$0xff] }
 0x195   : > { %v2547_v24 = vld [vmem:[%s8220_s29 + $0x4388] sm:$0xff]  ;;  %3924 = vmatpush.msrb.mxu3 %v3347_v43  ;;  %v1060_v43 = vld [vmem:[%s8220_s29 + $0x1510] sm:$0xff] }
 0x196   : > { %v2819_v25 = vld [vmem:[%s8220_s29 + $0x4c08] sm:$0xff]  ;;  %3866 = vmatpush.msrb.mxu0 %v2547_v24  ;;  %v1332_v24 = vld [vmem:[%s8220_s29 + $0x1d90] sm:$0xff] }
 0x197   : > { %v3059_v26 = vld [vmem:[%s8220_s29 + $0x5388] sm:$0xff]  ;;  %3885 = vmatpush.msrb.mxu1 %v2819_v25  ;;  %v3575_v25 = vpop.f32.mrf.mxu1 }
 0x198   : > { %v3331_v27 = vld [vmem:[%s8220_s29 + $0x5c08] sm:$0xff]  ;;  %3906 = vmatpush.msrb.mxu2 %v3059_v26  ;;  %v532_v26 = vld [vmem:[%s8220_s29 + $0x490] sm:$0xff] }
 0x199   : > { %v2531_v30 = vld [vmem:[%s8220_s29 + $0x4308] sm:$0xff]  ;;  %3925 = vmatpush.msrb.mxu3 %v3331_v27  ;;  %v804_v27 = vld [vmem:[%s8220_s29 + $0xd10] sm:$0xff] }
 0x19a   : > { %v2803_v31 = vld [vmem:[%s8220_s29 + $0x4b88] sm:$0xff]  ;;  %3867 = vmatpush.msrb.mxu0 %v2531_v30  ;;  %v1044_v30 = vld [vmem:[%s8220_s29 + $0x1490] sm:$0xff] }
 0x19b   : > { %v3043_v33 = vld [vmem:[%s8220_s29 + $0x5308] sm:$0xff]  ;;  %3886 = vmatpush.msrb.mxu1 %v2803_v31  ;;  %v1316_v31 = vld [vmem:[%s8220_s29 + $0x1d10] sm:$0xff] }
 0x19c   : > { %v3315_v34 = vld [vmem:[%s8220_s29 + $0x5b88] sm:$0xff]  ;;  %3907 = vmatpush.msrb.mxu2 %v3043_v33  ;;  %v516_v33 = vld [vmem:[%s8220_s29 + $0x410] sm:$0xff] }
 0x19d   : > { %v2515_v39 = vld [vmem:[%s8220_s29 + $0x4288] sm:$0xff]  ;;  %3926 = vmatpush.msrb.mxu3 %v3315_v34  ;;  %v788_v34 = vld [vmem:[%s8220_s29 + $0xc90] sm:$0xff] }
 0x19e   : > { %v2787_v40 = vld [vmem:[%s8220_s29 + $0x4b08] sm:$0xff]  ;;  %3868 = vmatpush.msrb.mxu0 %v2515_v39  ;;  %v3576_v39 = vadd.f32 %v3575_v25, %v3556_v22  ;;  %v2148_v22 = vld [vmem:[%s8220_s29 + $0x3710] sm:$0xff] }
 0x19f   : > { %v3027_v41 = vld [vmem:[%s8220_s29 + $0x5288] sm:$0xff]  ;;  %3887 = vmatpush.msrb.mxu1 %v2787_v40  ;;  %v1028_v40 = vld [vmem:[%s8220_s29 + $0x1410] sm:$0xff] }
 0x1a0   : > { %v3299_v42 = vld [vmem:[%s8220_s29 + $0x5b08] sm:$0xff]  ;;  %3908 = vmatpush.msrb.mxu2 %v3027_v41  ;;  %v1300_v41 = vld [vmem:[%s8220_s29 + $0x1c90] sm:$0xff] }
 0x1a1   : > { %v2499_v44 = vld [vmem:[%s8220_s29 + $0x4208] sm:$0xff]  ;;  %3927 = vmatpush.msrb.mxu3 %v3299_v42  ;;  %v3595_v42 = vpop.f32.mrf.mxu2  ;;  %v1892_v25 = vld [vmem:[%s8220_s29 + $0x2f10] sm:$0xff] }
 0x1a2   : > { %v2771_v45 = vld [vmem:[%s8220_s29 + $0x4a88] sm:$0xff]  ;;  %3869 = vmatpush.msrb.mxu0 %v2499_v44  ;;  %v500_v44 = vld [vmem:[%s8220_s29 + $0x390] sm:$0xff] }
 0x1a3   : > { %v3011_v46 = vld [vmem:[%s8220_s29 + $0x5208] sm:$0xff]  ;;  %3888 = vmatpush.msrb.mxu1 %v2771_v45  ;;  %v772_v45 = vld [vmem:[%s8220_s29 + $0xc10] sm:$0xff] }
 0x1a4   : > { %v3283_v47 = vld [vmem:[%s8220_s29 + $0x5a88] sm:$0xff]  ;;  %3909 = vmatpush.msrb.mxu2 %v3011_v46  ;;  %v1012_v46 = vld [vmem:[%s8220_s29 + $0x1390] sm:$0xff] }
 0x1a5   : > { %v2483_v48 = vld [vmem:[%s8220_s29 + $0x4188] sm:$0xff]  ;;  %3928 = vmatpush.msrb.mxu3 %v3283_v47  ;;  %v1284_v47 = vld [vmem:[%s8220_s29 + $0x1c10] sm:$0xff] }
 0x1a6   : > { %v2755_v49 = vld [vmem:[%s8220_s29 + $0x4a08] sm:$0xff]  ;;  %3870 = vmatpush.msrb.mxu0 %v2483_v48  ;;  %v484_v48 = vld [vmem:[%s8220_s29 + $0x310] sm:$0xff]  ;;  %v3635_v0 = vpop.f32.mrf.mxu0 }
 0x1a7   : > { %v2995_v50 = vld [vmem:[%s8220_s29 + $0x5188] sm:$0xff]  ;;  %3889 = vmatpush.msrb.mxu1 %v2755_v49  ;;  %v756_v49 = vld [vmem:[%s8220_s29 + $0xb90] sm:$0xff] }
 0x1a8   : > { %v3267_v51 = vld [vmem:[%s8220_s29 + $0x5a08] sm:$0xff]  ;;  %3910 = vmatpush.msrb.mxu2 %v2995_v50  ;;  %v3596_v50 = vadd.f32 %v3595_v42, %v3576_v39  ;;  %v2388_v39 = vld [vmem:[%s8220_s29 + $0x3e90] sm:$0xff] }
 0x1a9   : > { %v2467_v52 = vld [vmem:[%s8220_s29 + $0x4108] sm:$0xff]  ;;  %3929 = vmatpush.msrb.mxu3 %v3267_v51  ;;  %v996_v51 = vld [vmem:[%s8220_s29 + $0x1310] sm:$0xff] }
 0x1aa   : > { %v2739_v53 = vld [vmem:[%s8220_s29 + $0x4988] sm:$0xff]  ;;  %3871 = vmatpush.msrb.mxu0 %v2467_v52  ;;  %v1268_v52 = vld [vmem:[%s8220_s29 + $0x1b90] sm:$0xff] }
 0x1ab   : > { %v2979_v54 = vld [vmem:[%s8220_s29 + $0x5108] sm:$0xff]  ;;  %3890 = vmatpush.msrb.mxu1 %v2739_v53  ;;  %v3615_v53 = vpop.f32.mrf.mxu3  ;;  %v2100_v42 = vld [vmem:[%s8220_s29 + $0x3590] sm:$0xff] }
 0x1ac   : > { %v3251_v55 = vld [vmem:[%s8220_s29 + $0x5988] sm:$0xff]  ;;  %3911 = vmatpush.msrb.mxu2 %v2979_v54  ;;  %v468_v54 = vld [vmem:[%s8220_s29 + $0x290] sm:$0xff] }
 0x1ad   : > { %v2451_v56 = vld [vmem:[%s8220_s29 + $0x4088] sm:$0xff]  ;;  %3930 = vmatpush.msrb.mxu3 %v3251_v55  ;;  %v740_v55 = vld [vmem:[%s8220_s29 + $0xb10] sm:$0xff] }
 0x1ae   : > { %v2723_v57 = vld [vmem:[%s8220_s29 + $0x4908] sm:$0xff]  ;;  %3872 = vmatpush.msrb.mxu0 %v2451_v56  ;;  %v980_v56 = vld [vmem:[%s8220_s29 + $0x1290] sm:$0xff] }
 0x1af   : > { %v2963_v58 = vld [vmem:[%s8220_s29 + $0x5088] sm:$0xff]  ;;  %3891 = vmatpush.msrb.mxu1 %v2723_v57  ;;  %v1252_v57 = vld [vmem:[%s8220_s29 + $0x1b10] sm:$0xff] }
 0x1b0   : > { %v3235_v59 = vld [vmem:[%s8220_s29 + $0x5908] sm:$0xff]  ;;  %3912 = vmatpush.msrb.mxu2 %v2963_v58  ;;  %v452_v58 = vld [vmem:[%s8220_s29 + $0x210] sm:$0xff] }
 0x1b1   : > { %v2435_v60 = vld [vmem:[%s8220_s29 + $0x4008] sm:$0xff]  ;;  %3931 = vmatpush.msrb.mxu3 %v3235_v59  ;;  %v724_v59 = vld [vmem:[%s8220_s29 + $0xa90] sm:$0xff] }
 0x1b2   : > { %v2707_v61 = vld [vmem:[%s8220_s29 + $0x4888] sm:$0xff]  ;;  %3873 = vmatpush.msrb.mxu0 %v2435_v60  ;;  %v3616_v60 = vadd.f32 %v3615_v53, %v3596_v50  ;;  %v1828_v50 = vld [vmem:[%s8220_s29 + $0x2d10] sm:$0xff] }
 0x1b3   : > { %v2947_v63 = vld [vmem:[%s8220_s29 + $0x5008] sm:$0xff]  ;;  %3892 = vmatpush.msrb.mxu1 %v2707_v61  ;;  %3874 = vmatmul.f32.vlgmr.msrb.gmra.mxu0 %v8477_v28  ;;  %v596_v28 = vld [vmem:[%s8220_s29 + $0x690] sm:$0xff] }
 0x1b4   : > { %v3219_v12 = vld [vmem:[%s8220_s29 + $0x5888] sm:$0xff]  ;;  %3913 = vmatpush.msrb.mxu2 %v2947_v63  ;;  %3938 = vmatpush.msra.mxu0 %v628_v1  ;;  %v964_v61 = vld [vmem:[%s8220_s29 + $0x1210] sm:$0xff]  ;;  %v3636_v17 = vadd.f32 %v3635_v0, %v3616_v60 }
 0x1b5   : > { %3932 = vmatpush.msrb.mxu3 %v3219_v12  ;;  %v2691_v3 = vld [vmem:[%s8220_s29 + $0x4808] sm:$0xff]  ;;  %3914 = vmatmul.f32.vlgmr.msrb.gmra.mxu2 %v8480_v29  ;;  %v868_v29 = vld [vmem:[%s8220_s29 + $0xf10] sm:$0xff] }
 0x1b6   : > { %v3203_v18 = vld [vmem:[%s8220_s29 + $0x5808] sm:$0xff]  ;;  %3978 = vmatpush.msra.mxu2 %v1140_v2  ;;  %3893 = vmatpush.msrb.mxu1 %v2691_v3  ;;  %v436_v63 = vld [vmem:[%s8220_s29 + $0x190] sm:$0xff] }
 0x1b7   : > { %3933 = vmatpush.msrb.mxu3 %v3203_v18  ;;  %3894 = vmatmul.f32.vlgmr.msrb.gmra.mxu1 %v8489_v35  ;;  %v1092_v35 = vld [vmem:[%s8220_s29 + $0x1610] sm:$0xff] }
 0x1b8   : > { %3934 = vmatmul.f32.vlgmr.msrb.gmra.mxu3 %v8492_v36  ;;  %3939 = vmatpush.msra.mxu0 %v612_v5  ;;  %v1364_v36 = vld [vmem:[%s8220_s29 + $0x1e90] sm:$0xff] }
 0x1b9   : > { %3958 = vmatpush.msra.mxu1 %v884_v6  ;;  %3979 = vmatpush.msra.mxu2 %v1124_v7  ;;  %v708_v12 = vld [vmem:[%s8220_s29 + $0xa10] sm:$0xff]  ;;  %v3655_v6 = vpop.f32.mrf.mxu1 }
 0x1ba   : > { %3998 = vmatpush.msra.mxu3 %v1396_v23  ;;  %3940 = vmatpush.msra.mxu0 %v596_v28  ;;  %v948_v1 = vld [vmem:[%s8220_s29 + $0x1190] sm:$0xff] }
 0x1bb   : > { %3959 = vmatpush.msra.mxu1 %v868_v29  ;;  %3980 = vmatpush.msra.mxu2 %v1108_v10  ;;  %v1220_v2 = vld [vmem:[%s8220_s29 + $0x1a10] sm:$0xff]  ;;  %v3656_v29 = vadd.f32 %v3655_v6, %v3636_v17 }
 0x1bc   : > { %3999 = vmatpush.msra.mxu3 %v1380_v11  ;;  %3941 = vmatpush.msra.mxu0 %v580_v32  ;;  %v420_v3 = vld [vmem:[%s8220_s29 + $0x110] sm:$0xff]  ;;  %v3675_v11 = vpop.f32.mrf.mxu2 }
 0x1bd   : > { %3960 = vmatpush.msra.mxu1 %v852_v13  ;;  %3981 = vmatpush.msra.mxu2 %v1092_v35  ;;  %v692_v18 = vld [vmem:[%s8220_s29 + $0x990] sm:$0xff]  ;;  %v3676_v35 = vadd.f32 %v3675_v11, %v3656_v29 }
 0x1be   : > { %4000 = vmatpush.msra.mxu3 %v1364_v36  ;;  %3942 = vmatpush.msra.mxu0 %v564_v15  ;;  %v1204_v5 = vld [vmem:[%s8220_s29 + $0x1990] sm:$0xff] }
 0x1bf   : > { %3961 = vmatpush.msra.mxu1 %v836_v37  ;;  %3982 = vmatpush.msra.mxu2 %v1076_v38  ;;  %v404_v7 = vld [vmem:[%s8220_s29 + $0x90] sm:$0xff]  ;;  %v3695_v38 = vpop.f32.mrf.mxu3 }
 0x1c0   : > { %4001 = vmatpush.msra.mxu3 %v1348_v19  ;;  %3943 = vmatpush.msra.mxu0 %v548_v20  ;;  %v676_v23 = vld [vmem:[%s8220_s29 + $0x910] sm:$0xff] }
 0x1c1   : > { %3962 = vmatpush.msra.mxu1 %v820_v21  ;;  %3983 = vmatpush.msra.mxu2 %v1060_v43  ;;  %v1188_v28 = vld [vmem:[%s8220_s29 + $0x1910] sm:$0xff]  ;;  %v3696_v21 = vadd.f32 %v3695_v38, %v3676_v35 }
 0x1c2   : > { %4002 = vmatpush.msra.mxu3 %v1332_v24  ;;  %3944 = vmatpush.msra.mxu0 %v532_v26  ;;  %v660_v10 = vld [vmem:[%s8220_s29 + $0x890] sm:$0xff] }
 0x1c3   : > { %3963 = vmatpush.msra.mxu1 %v804_v27  ;;  %3984 = vmatpush.msra.mxu2 %v1044_v30  ;;  %v900_v32 = vld [vmem:[%s8220_s29 + $0x1010] sm:$0xff]  ;;  %v7298_v26 = vadd.f32 %v3696_v21, %v358_v16  ;;  %v8834_v21 = vld [vmem:[%s8212_s17] sm:$0xff] }
 0x1c4   : > { %4003 = vmatpush.msra.mxu3 %v1316_v31  ;;  %3945 = vmatpush.msra.mxu0 %v516_v33  ;;  %v1172_v13 = vld [vmem:[%s8220_s29 + $0x1890] sm:$0xff] }
 0x1c5   : > { %3964 = vmatpush.msra.mxu1 %v788_v34  ;;  %3985 = vmatpush.msra.mxu2 %v1028_v40  ;;  %v1652_v36 = vld [vmem:[%s8220_s29 + $0x2790] sm:$0xff]  ;;  %7314 = vst [vmem:[%s8235_s7] sm:$0xff] %v7298_v26 }
 0x1c6   : > { %4004 = vmatpush.msra.mxu3 %v1300_v41  ;;  %3946 = vmatpush.msra.mxu0 %v500_v44  ;;  %v644_v15 = vld [vmem:[%s8220_s29 + $0x810] sm:$0xff] }
 0x1c7   : > { %3965 = vmatpush.msra.mxu1 %v772_v45  ;;  %3986 = vmatpush.msra.mxu2 %v1012_v46  ;;  %v1156_v37 = vld [vmem:[%s8220_s29 + $0x1810] sm:$0xff] }
 0x1c8   : > { %4005 = vmatpush.msra.mxu3 %v1284_v47  ;;  %3947 = vmatpush.msra.mxu0 %v484_v48  ;;  %v1636_v19 = vld [vmem:[%s8220_s29 + $0x2710] sm:$0xff] }
 0x1c9   : > { %3966 = vmatpush.msra.mxu1 %v756_v49  ;;  %3987 = vmatpush.msra.mxu2 %v996_v51  ;;  %v1908_v20 = vld [vmem:[%s8220_s29 + $0x2f90] sm:$0xff] }
 0x1ca   : > { %4006 = vmatpush.msra.mxu3 %v1268_v52  ;;  %3948 = vmatpush.msra.mxu0 %v468_v54  ;;  %v2420_v43 = vld [vmem:[%s8220_s29 + $0x3f90] sm:$0xff] }
 0x1cb   : > { %3967 = vmatpush.msra.mxu1 %v740_v55  ;;  %3988 = vmatpush.msra.mxu2 %v980_v56  ;;  %v1620_v24 = vld [vmem:[%s8220_s29 + $0x2690] sm:$0xff] }
 0x1cc   : > { %4007 = vmatpush.msra.mxu3 %v1252_v57  ;;  %3949 = vmatpush.msra.mxu0 %v452_v58  ;;  %v2132_v27 = vld [vmem:[%s8220_s29 + $0x3690] sm:$0xff] }
 0x1cd   : > { %3968 = vmatpush.msra.mxu1 %v724_v59  ;;  %3989 = vmatpush.msra.mxu2 %v964_v61  ;;  %v2404_v30 = vld [vmem:[%s8220_s29 + $0x3f10] sm:$0xff] }
 0x1ce   : > { %4008 = vmatpush.msra.mxu3 %v1236_v62  ;;  %3950 = vmatpush.msra.mxu0 %v436_v63  ;;  %v1604_v31 = vld [vmem:[%s8220_s29 + $0x2610] sm:$0xff] }
 0x1cf   : > { %3969 = vmatpush.msra.mxu1 %v708_v12  ;;  %3990 = vmatpush.msra.mxu2 %v948_v1  ;;  %v1876_v33 = vld [vmem:[%s8220_s29 + $0x2e90] sm:$0xff] }
 0x1d0   : > { %4009 = vmatpush.msra.mxu3 %v1220_v2  ;;  %3951 = vmatpush.msra.mxu0 %v420_v3  ;;  %v2116_v34 = vld [vmem:[%s8220_s29 + $0x3610] sm:$0xff] }
 0x1d1   : > { %3970 = vmatpush.msra.mxu1 %v692_v18  ;;  %3991 = vmatpush.msra.mxu2 %v932_v4  ;;  %v1588_v40 = vld [vmem:[%s8220_s29 + $0x2590] sm:$0xff] }
 0x1d2   : > { %4010 = vmatpush.msra.mxu3 %v1204_v5  ;;  %3952 = vmatpush.msra.mxu0 %v404_v7  ;;  %v1860_v41 = vld [vmem:[%s8220_s29 + $0x2e10] sm:$0xff] }
 0x1d3   : > { %3971 = vmatpush.msra.mxu1 %v676_v23  ;;  %3992 = vmatpush.msra.mxu2 %v916_v8  ;;  %v2372_v44 = vld [vmem:[%s8220_s29 + $0x3e10] sm:$0xff] }
 0x1d4   : > { %4011 = vmatpush.msra.mxu3 %v1188_v28  ;;  %3953 = vmatpush.msra.mxu0 %v388_v9  ;;  %v1572_v45 = vld [vmem:[%s8220_s29 + $0x2510] sm:$0xff] }
 0x1d5   : > { %3972 = vmatpush.msra.mxu1 %v660_v10  ;;  %3993 = vmatpush.msra.mxu2 %v900_v32  ;;  %v1844_v46 = vld [vmem:[%s8220_s29 + $0x2d90] sm:$0xff] }
 0x1d6   : > { %4012 = vmatpush.msra.mxu3 %v1172_v13  ;;  %4018 = vmatpush.msrb.mxu0 %v1652_v36  ;;  %v2084_v47 = vld [vmem:[%s8220_s29 + $0x3510] sm:$0xff] }
 0x1d7   : > { %4058 = vmatpush.msrb.mxu2 %v2164_v14  ;;  %3973 = vmatpush.msra.mxu1 %v644_v15  ;;  %v2356_v48 = vld [vmem:[%s8220_s29 + $0x3d90] sm:$0xff] }
 0x1d8   : > { %4013 = vmatpush.msra.mxu3 %v1156_v37  ;;  %4019 = vmatpush.msrb.mxu0 %v1636_v19  ;;  %v1556_v49 = vld [vmem:[%s8220_s29 + $0x2490] sm:$0xff] }
 0x1d9   : > { %4038 = vmatpush.msrb.mxu1 %v1908_v20  ;;  %4059 = vmatpush.msrb.mxu2 %v2148_v22  ;;  %v2068_v51 = vld [vmem:[%s8220_s29 + $0x3490] sm:$0xff] }
 0x1da   : > { %4078 = vmatpush.msrb.mxu3 %v2420_v43  ;;  %4020 = vmatpush.msrb.mxu0 %v1620_v24  ;;  %v2340_v52 = vld [vmem:[%s8220_s29 + $0x3d10] sm:$0xff]  ;;  %v8839_v43 = vld [vmem:[%s8212_s17 + $0x18] sm:$0xff] }
 0x1db   : > { %4039 = vmatpush.msrb.mxu1 %v1892_v25  ;;  %4060 = vmatpush.msrb.mxu2 %v2132_v27  ;;  %v1540_v53 = vld [vmem:[%s8220_s29 + $0x2410] sm:$0xff] }
 0x1dc   : > { %4079 = vmatpush.msrb.mxu3 %v2404_v30  ;;  %4021 = vmatpush.msrb.mxu0 %v1604_v31  ;;  %v1812_v54 = vld [vmem:[%s8220_s29 + $0x2c90] sm:$0xff]  ;;  %v8847_v30 = vld [vmem:[%s8212_s17 + $0x8] sm:$0xff] }
 0x1dd   : > { %4040 = vmatpush.msrb.mxu1 %v1876_v33  ;;  %4061 = vmatpush.msrb.mxu2 %v2116_v34  ;;  %v2052_v55 = vld [vmem:[%s8220_s29 + $0x3410] sm:$0xff] }
 0x1de   : > { %4080 = vmatpush.msrb.mxu3 %v2388_v39  ;;  %4022 = vmatpush.msrb.mxu0 %v1588_v40  ;;  %v2324_v56 = vld [vmem:[%s8220_s29 + $0x3c90] sm:$0xff] }
 0x1df   : > { %4041 = vmatpush.msrb.mxu1 %v1860_v41  ;;  %4062 = vmatpush.msrb.mxu2 %v2100_v42  ;;  %v1524_v57 = vld [vmem:[%s8220_s29 + $0x2390] sm:$0xff] }
 0x1e0   : > { %4081 = vmatpush.msrb.mxu3 %v2372_v44  ;;  %4023 = vmatpush.msrb.mxu0 %v1572_v45  ;;  %v1796_v58 = vld [vmem:[%s8220_s29 + $0x2c10] sm:$0xff] }
 0x1e1   : > { %4042 = vmatpush.msrb.mxu1 %v1844_v46  ;;  %4063 = vmatpush.msrb.mxu2 %v2084_v47  ;;  %v2036_v59 = vld [vmem:[%s8220_s29 + $0x3390] sm:$0xff] }
 0x1e2   : > { %4082 = vmatpush.msrb.mxu3 %v2356_v48  ;;  %4024 = vmatpush.msrb.mxu0 %v1556_v49  ;;  %v2308_v60 = vld [vmem:[%s8220_s29 + $0x3c10] sm:$0xff]  ;;  %v8866_v49 = vld [vmem:[%s8212_s17 + $0x20] sm:$0xff] }
 0x1e3   : > { %4043 = vmatpush.msrb.mxu1 %v1828_v50  ;;  %4064 = vmatpush.msrb.mxu2 %v2068_v51  ;;  %v1508_v61 = vld [vmem:[%s8220_s29 + $0x2310] sm:$0xff]  ;;  %v8871_v51 = vld [vmem:[%s8212_s17 + $0x38] sm:$0xff] }
 0x1e4   : > { %4083 = vmatpush.msrb.mxu3 %v2340_v52  ;;  %4025 = vmatpush.msrb.mxu0 %v1540_v53  ;;  %v1780_v62 = vld [vmem:[%s8220_s29 + $0x2b90] sm:$0xff] }
 0x1e5   : > { %4044 = vmatpush.msrb.mxu1 %v1812_v54  ;;  %4065 = vmatpush.msrb.mxu2 %v2052_v55  ;;  %v2020_v63 = vld [vmem:[%s8220_s29 + $0x3310] sm:$0xff] }
 0x1e6   : > { %4084 = vmatpush.msrb.mxu3 %v2324_v56  ;;  %4026 = vmatpush.msrb.mxu0 %v1524_v57  ;;  %v2292_v12 = vld [vmem:[%s8220_s29 + $0x3b90] sm:$0xff]  ;;  %v8879_v56 = vld [vmem:[%s8212_s17 + $0x28] sm:$0xff] }
 0x1e7   : > { %4045 = vmatpush.msrb.mxu1 %v1796_v58  ;;  %4066 = vmatpush.msrb.mxu2 %v2036_v59  ;;  %v1492_v0 = vld [vmem:[%s8220_s29 + $0x2290] sm:$0xff] }
 0x1e8   : > { %4085 = vmatpush.msrb.mxu3 %v2308_v60  ;;  %v1764_v1 = vld [vmem:[%s8220_s29 + $0x2b10] sm:$0xff]  ;;  %4027 = vmatpush.msrb.mxu0 %v1508_v61 }
 0x1e9   : > { %4046 = vmatpush.msrb.mxu1 %v1780_v62  ;;  %v2004_v2 = vld [vmem:[%s8220_s29 + $0x3290] sm:$0xff]  ;;  %4067 = vmatpush.msrb.mxu2 %v2020_v63 }
 0x1ea   : > { %v2276_v17 = vld [vmem:[%s8220_s29 + $0x3b10] sm:$0xff]  ;;  %4086 = vmatpush.msrb.mxu3 %v2292_v12  ;;  %4028 = vmatpush.msrb.mxu0 %v1492_v0 }
 0x1eb   : > { %v1476_v3 = vld [vmem:[%s8220_s29 + $0x2210] sm:$0xff]  ;;  %4047 = vmatpush.msrb.mxu1 %v1764_v1  ;;  %4068 = vmatpush.msrb.mxu2 %v2004_v2 }
 0x1ec   : > { %v1748_v18 = vld [vmem:[%s8220_s29 + $0x2a90] sm:$0xff]  ;;  %4087 = vmatpush.msrb.mxu3 %v2276_v17  ;;  %4029 = vmatpush.msrb.mxu0 %v1476_v3 }
 0x1ed   : > { %v1988_v4 = vld [vmem:[%s8220_s29 + $0x3210] sm:$0xff]  ;;  %4048 = vmatpush.msrb.mxu1 %v1748_v18  ;;  %3954 = vmatmul.f32.vlgmr.msra.gmra.mxu0 %v8834_v21 }
 0x1ee   : > { %v2260_v5 = vld [vmem:[%s8220_s29 + $0x3a90] sm:$0xff]  ;;  %4069 = vmatpush.msrb.mxu2 %v1988_v4  ;;  %4014 = vmatmul.f32.vlgmr.msra.gmra.mxu3 %v8839_v43 }
 0x1ef   : > { %v1460_v6 = vld [vmem:[%s8220_s29 + $0x2190] sm:$0xff]  ;;  %4088 = vmatpush.msrb.mxu3 %v2260_v5  ;;  %3974 = vmatmul.f32.vlgmr.msra.gmra.mxu1 %v8847_v30 }
 0x1f0   : > { %v1732_v7 = vld [vmem:[%s8220_s29 + $0x2a10] sm:$0xff]  ;;  %4030 = vmatpush.msrb.mxu0 %v1460_v6 }
 0x1f1   : > { %v1972_v23 = vld [vmem:[%s8220_s29 + $0x3190] sm:$0xff]  ;;  %4049 = vmatpush.msrb.mxu1 %v1732_v7 }
 0x1f2   : > { %v2244_v8 = vld [vmem:[%s8220_s29 + $0x3a10] sm:$0xff]  ;;  %4070 = vmatpush.msrb.mxu2 %v1972_v23 }
 0x1f3   : > { %v1444_v28 = vld [vmem:[%s8220_s29 + $0x2110] sm:$0xff]  ;;  %4089 = vmatpush.msrb.mxu3 %v2244_v8 }
 0x1f4   : > { %v1716_v29 = vld [vmem:[%s8220_s29 + $0x2990] sm:$0xff]  ;;  %4031 = vmatpush.msrb.mxu0 %v1444_v28 }
 0x1f5   : > { %v1956_v9 = vld [vmem:[%s8220_s29 + $0x3110] sm:$0xff]  ;;  %4050 = vmatpush.msrb.mxu1 %v1716_v29 }
 0x1f6   : > { %v2228_v10 = vld [vmem:[%s8220_s29 + $0x3990] sm:$0xff]  ;;  %4071 = vmatpush.msrb.mxu2 %v1956_v9 }
 0x1f7   : > { %v1428_v11 = vld [vmem:[%s8220_s29 + $0x2090] sm:$0xff]  ;;  %4090 = vmatpush.msrb.mxu3 %v2228_v10 }
 0x1f8   : > { %v1700_v32 = vld [vmem:[%s8220_s29 + $0x2910] sm:$0xff]  ;;  %4032 = vmatpush.msrb.mxu0 %v1428_v11 }
 0x1f9   : > { %v1940_v13 = vld [vmem:[%s8220_s29 + $0x3090] sm:$0xff]  ;;  %4051 = vmatpush.msrb.mxu1 %v1700_v32 }
 0x1fa   : > { %v2212_v35 = vld [vmem:[%s8220_s29 + $0x3910] sm:$0xff]  ;;  %4072 = vmatpush.msrb.mxu2 %v1940_v13 }
 0x1fb   : > { %v1412_v36 = vld [vmem:[%s8220_s29 + $0x2010] sm:$0xff]  ;;  %4091 = vmatpush.msrb.mxu3 %v2212_v35 }
 0x1fc   : > { %v1684_v14 = vld [vmem:[%s8220_s29 + $0x2890] sm:$0xff]  ;;  %4033 = vmatpush.msrb.mxu0 %v1412_v36 }
 0x1fd   : > { %v1924_v15 = vld [vmem:[%s8220_s29 + $0x3010] sm:$0xff]  ;;  %4052 = vmatpush.msrb.mxu1 %v1684_v14  ;;  %4034 = vmatmul.f32.vlgmr.msrb.gmra.mxu0 %v8866_v49 }
 0x1fe   : > { %v2196_v37 = vld [vmem:[%s8220_s29 + $0x3890] sm:$0xff]  ;;  %4073 = vmatpush.msrb.mxu2 %v1924_v15 }
 0x1ff   : > { %v8827_v16 = vld [vmem:[%s8212_s17 + $0x10] sm:$0xff]  ;;  %4092 = vmatpush.msrb.mxu3 %v2196_v37 }
 0x200   : > { %3994 = vmatmul.f32.vlgmr.msra.gmra.mxu2 %v8827_v16  ;;  %v2676_v38 = vld [vmem:[%s8220_s29 + $0x4790] sm:$0xff] }
 0x201   : > { %v3188_v19 = vld [vmem:[%s8220_s29 + $0x5790] sm:$0xff]  ;;  %4098 = vmatpush.msra.mxu0 %v2676_v38 }
 0x202   : > { %v1668_v20 = vld [vmem:[%s8220_s29 + $0x2810] sm:$0xff]  ;;  %4138 = vmatpush.msra.mxu2 %v3188_v19 }
 0x203   : > { %v2180_v22 = vld [vmem:[%s8220_s29 + $0x3810] sm:$0xff]  ;;  %4053 = vmatpush.msrb.mxu1 %v1668_v20 }
 0x204   : > { %v2660_v24 = vld [vmem:[%s8220_s29 + $0x4710] sm:$0xff]  ;;  %4093 = vmatpush.msrb.mxu3 %v2180_v22  ;;  %4054 = vmatmul.f32.vlgmr.msrb.gmra.mxu1 %v8879_v56 }
 0x205   : > { %v2932_v25 = vld [vmem:[%s8220_s29 + $0x4f90] sm:$0xff]  ;;  %4099 = vmatpush.msra.mxu0 %v2660_v24  ;;  %4094 = vmatmul.f32.vlgmr.msrb.gmra.mxu3 %v8871_v51 }
 0x206   : > { %v3172_v26 = vld [vmem:[%s8220_s29 + $0x5710] sm:$0xff]  ;;  %4118 = vmatpush.msra.mxu1 %v2932_v25 }
 0x207   : > { %v3444_v27 = vld [vmem:[%s8220_s29 + $0x5f90] sm:$0xff]  ;;  %4139 = vmatpush.msra.mxu2 %v3172_v26  ;;  %v3735_v26 = vpop.f32.mrf.mxu1 }
 0x208   : > { %v2644_v31 = vld [vmem:[%s8220_s29 + $0x4690] sm:$0xff]  ;;  %4158 = vmatpush.msra.mxu3 %v3444_v27 }
 0x209   : > { %v2916_v33 = vld [vmem:[%s8220_s29 + $0x4f10] sm:$0xff]  ;;  %4100 = vmatpush.msra.mxu0 %v2644_v31 }
 0x20a   : > { %v3156_v34 = vld [vmem:[%s8220_s29 + $0x5690] sm:$0xff]  ;;  %4119 = vmatpush.msra.mxu1 %v2916_v33  ;;  %v3715_v33 = vpop.f32.mrf.mxu0 }
 0x20b   : > { %v3428_v39 = vld [vmem:[%s8220_s29 + $0x5f10] sm:$0xff]  ;;  %4140 = vmatpush.msra.mxu2 %v3156_v34  ;;  %v629_v34 = vld [vmem:[%s8220_s29 + $0x798] sm:$0xff] }
 0x20c   : > { %v2628_v40 = vld [vmem:[%s8220_s29 + $0x4610] sm:$0xff]  ;;  %4159 = vmatpush.msra.mxu3 %v3428_v39  ;;  %v1141_v39 = vld [vmem:[%s8220_s29 + $0x1798] sm:$0xff] }
 0x20d   : > { %v2900_v41 = vld [vmem:[%s8220_s29 + $0x4e90] sm:$0xff]  ;;  %4101 = vmatpush.msra.mxu0 %v2628_v40  ;;  %v3736_v40 = vadd.f32 %v3735_v26, %v3715_v33 }
 0x20e   : > { %v3140_v42 = vld [vmem:[%s8220_s29 + $0x5610] sm:$0xff]  ;;  %4120 = vmatpush.msra.mxu1 %v2900_v41 }
 0x20f   : > { %v3412_v44 = vld [vmem:[%s8220_s29 + $0x5e90] sm:$0xff]  ;;  %4141 = vmatpush.msra.mxu2 %v3140_v42 }
 0x210   : > { %v8859_v45 = vld [vmem:[%s8212_s17 + $0x30] sm:$0xff]  ;;  %4160 = vmatpush.msra.mxu3 %v3412_v44  ;;  %v3755_v44 = vpop.f32.mrf.mxu2 }
 0x211   : > { %4074 = vmatmul.f32.vlgmr.msrb.gmra.mxu2 %v8859_v45  ;;  %v2612_v46 = vld [vmem:[%s8220_s29 + $0x4590] sm:$0xff] }
 0x212   : > { %v2884_v47 = vld [vmem:[%s8220_s29 + $0x4e10] sm:$0xff]  ;;  %4102 = vmatpush.msra.mxu0 %v2612_v46  ;;  %v8927_v46 = vld [vmem:[%s8212_s17 + $0x40] sm:$0xff] }
 0x213   : > { %v3124_v48 = vld [vmem:[%s8220_s29 + $0x5590] sm:$0xff]  ;;  %4121 = vmatpush.msra.mxu1 %v2884_v47 }
 0x214   : > { %v3396_v50 = vld [vmem:[%s8220_s29 + $0x5e10] sm:$0xff]  ;;  %4142 = vmatpush.msra.mxu2 %v3124_v48  ;;  %v613_v48 = vld [vmem:[%s8220_s29 + $0x718] sm:$0xff] }
 0x215   : > { %v2596_v52 = vld [vmem:[%s8220_s29 + $0x4510] sm:$0xff]  ;;  %4161 = vmatpush.msra.mxu3 %v3396_v50  ;;  %v885_v50 = vld [vmem:[%s8220_s29 + $0xf98] sm:$0xff] }
 0x216   : > { %v2868_v53 = vld [vmem:[%s8220_s29 + $0x4d90] sm:$0xff]  ;;  %4103 = vmatpush.msra.mxu0 %v2596_v52  ;;  %v1125_v52 = vld [vmem:[%s8220_s29 + $0x1718] sm:$0xff] }
 0x217   : > { %v3108_v54 = vld [vmem:[%s8220_s29 + $0x5510] sm:$0xff]  ;;  %4122 = vmatpush.msra.mxu1 %v2868_v53  ;;  %v1397_v53 = vld [vmem:[%s8220_s29 + $0x1f98] sm:$0xff] }
 0x218   : > { %v3380_v55 = vld [vmem:[%s8220_s29 + $0x5d90] sm:$0xff]  ;;  %4143 = vmatpush.msra.mxu2 %v3108_v54  ;;  %v3756_v54 = vadd.f32 %v3755_v44, %v3736_v40  ;;  %v981_v40 = vld [vmem:[%s8220_s29 + $0x1298] sm:$0xff] }
 0x219   : > { %v2580_v57 = vld [vmem:[%s8220_s29 + $0x4490] sm:$0xff]  ;;  %4162 = vmatpush.msra.mxu3 %v3380_v55  ;;  %v8939_v55 = vld [vmem:[%s8212_s17 + $0x48] sm:$0xff]  ;;  %v725_v44 = vld [vmem:[%s8220_s29 + $0xa98] sm:$0xff] }
 0x21a   : > { %v2852_v58 = vld [vmem:[%s8220_s29 + $0x4d10] sm:$0xff]  ;;  %4104 = vmatpush.msra.mxu0 %v2580_v57  ;;  %v8943_v57 = vld [vmem:[%s8212_s17 + $0x58] sm:$0xff] }
 0x21b   : > { %v3092_v59 = vld [vmem:[%s8220_s29 + $0x5490] sm:$0xff]  ;;  %4123 = vmatpush.msra.mxu1 %v2852_v58  ;;  %v597_v58 = vld [vmem:[%s8220_s29 + $0x698] sm:$0xff] }
 0x21c   : > { %v3364_v60 = vld [vmem:[%s8220_s29 + $0x5d10] sm:$0xff]  ;;  %4144 = vmatpush.msra.mxu2 %v3092_v59  ;;  %v869_v59 = vld [vmem:[%s8220_s29 + $0xf18] sm:$0xff] }
 0x21d   : > { %v2564_v61 = vld [vmem:[%s8220_s29 + $0x4410] sm:$0xff]  ;;  %4163 = vmatpush.msra.mxu3 %v3364_v60  ;;  %v3775_v60 = vpop.f32.mrf.mxu3 }
 0x21e   : > { %v2836_v62 = vld [vmem:[%s8220_s29 + $0x4c90] sm:$0xff]  ;;  %4105 = vmatpush.msra.mxu0 %v2564_v61  ;;  %v1109_v61 = vld [vmem:[%s8220_s29 + $0x1698] sm:$0xff] }
 0x21f   : > { %v3076_v63 = vld [vmem:[%s8220_s29 + $0x5410] sm:$0xff]  ;;  %4124 = vmatpush.msra.mxu1 %v2836_v62  ;;  %v1381_v62 = vld [vmem:[%s8220_s29 + $0x1f18] sm:$0xff] }
 0x220   : > { %v3348_v12 = vld [vmem:[%s8220_s29 + $0x5c90] sm:$0xff]  ;;  %4145 = vmatpush.msra.mxu2 %v3076_v63  ;;  %v581_v63 = vld [vmem:[%s8220_s29 + $0x618] sm:$0xff] }
 0x221   : > { %v2548_v0 = vld [vmem:[%s8220_s29 + $0x4390] sm:$0xff]  ;;  %4164 = vmatpush.msra.mxu3 %v3348_v12  ;;  %v853_v12 = vld [vmem:[%s8220_s29 + $0xe98] sm:$0xff] }
 0x222   : > { %v2820_v1 = vld [vmem:[%s8220_s29 + $0x4c10] sm:$0xff]  ;;  %4106 = vmatpush.msra.mxu0 %v2548_v0  ;;  %v1093_v0 = vld [vmem:[%s8220_s29 + $0x1618] sm:$0xff] }
 0x223   : > { %v3060_v2 = vld [vmem:[%s8220_s29 + $0x5390] sm:$0xff]  ;;  %4125 = vmatpush.msra.mxu1 %v2820_v1  ;;  %v1365_v1 = vld [vmem:[%s8220_s29 + $0x1e98] sm:$0xff] }
 0x224   : > { %v3332_v17 = vld [vmem:[%s8220_s29 + $0x5c10] sm:$0xff]  ;;  %4146 = vmatpush.msra.mxu2 %v3060_v2  ;;  %v3776_v2 = vadd.f32 %v3775_v60, %v3756_v54  ;;  %v709_v54 = vld [vmem:[%s8220_s29 + $0xa18] sm:$0xff] }
 0x225   : > { %v2532_v3 = vld [vmem:[%s8220_s29 + $0x4310] sm:$0xff]  ;;  %4165 = vmatpush.msra.mxu3 %v3332_v17  ;;  %v565_v17 = vld [vmem:[%s8220_s29 + $0x598] sm:$0xff]  ;;  %v3855_v33 = vpop.f32.mrf.mxu3 }
 0x226   : > { %v2804_v18 = vld [vmem:[%s8220_s29 + $0x4b90] sm:$0xff]  ;;  %4107 = vmatpush.msra.mxu0 %v2532_v3  ;;  %v837_v3 = vld [vmem:[%s8220_s29 + $0xe18] sm:$0xff] }
 0x227   : > { %v3044_v4 = vld [vmem:[%s8220_s29 + $0x5310] sm:$0xff]  ;;  %4126 = vmatpush.msra.mxu1 %v2804_v18  ;;  %v3795_v18 = vpop.f32.mrf.mxu0  ;;  %v1221_v60 = vld [vmem:[%s8220_s29 + $0x1a18] sm:$0xff] }
 0x228   : > { %v3316_v5 = vld [vmem:[%s8220_s29 + $0x5b90] sm:$0xff]  ;;  %4147 = vmatpush.msra.mxu2 %v3044_v4  ;;  %v1077_v4 = vld [vmem:[%s8220_s29 + $0x1598] sm:$0xff] }
 0x229   : > { %v2516_v6 = vld [vmem:[%s8220_s29 + $0x4290] sm:$0xff]  ;;  %4166 = vmatpush.msra.mxu3 %v3316_v5  ;;  %v1349_v5 = vld [vmem:[%s8220_s29 + $0x1e18] sm:$0xff] }
 0x22a   : > { %v2788_v7 = vld [vmem:[%s8220_s29 + $0x4b10] sm:$0xff]  ;;  %4108 = vmatpush.msra.mxu0 %v2516_v6  ;;  %v549_v6 = vld [vmem:[%s8220_s29 + $0x518] sm:$0xff] }
 0x22b   : > { %v3028_v23 = vld [vmem:[%s8220_s29 + $0x5290] sm:$0xff]  ;;  %4127 = vmatpush.msra.mxu1 %v2788_v7  ;;  %v821_v7 = vld [vmem:[%s8220_s29 + $0xd98] sm:$0xff] }
 0x22c   : > { %v3300_v8 = vld [vmem:[%s8220_s29 + $0x5b10] sm:$0xff]  ;;  %4148 = vmatpush.msra.mxu2 %v3028_v23  ;;  %v3796_v23 = vadd.f32 %v3795_v18, %v3776_v2  ;;  %v405_v2 = vld [vmem:[%s8220_s29 + $0x98] sm:$0xff] }
 0x22d   : > { %v2500_v28 = vld [vmem:[%s8220_s29 + $0x4210] sm:$0xff]  ;;  %4167 = vmatpush.msra.mxu3 %v3300_v8  ;;  %v1061_v8 = vld [vmem:[%s8220_s29 + $0x1518] sm:$0xff] }
 0x22e   : > { %v2772_v29 = vld [vmem:[%s8220_s29 + $0x4a90] sm:$0xff]  ;;  %4109 = vmatpush.msra.mxu0 %v2500_v28  ;;  %v1333_v28 = vld [vmem:[%s8220_s29 + $0x1d98] sm:$0xff] }
 0x22f   : > { %v3012_v9 = vld [vmem:[%s8220_s29 + $0x5210] sm:$0xff]  ;;  %4128 = vmatpush.msra.mxu1 %v2772_v29  ;;  %v3815_v29 = vpop.f32.mrf.mxu1  ;;  %v1189_v18 = vld [vmem:[%s8220_s29 + $0x1918] sm:$0xff] }
 0x230   : > { %v3284_v10 = vld [vmem:[%s8220_s29 + $0x5a90] sm:$0xff]  ;;  %4149 = vmatpush.msra.mxu2 %v3012_v9  ;;  %v533_v9 = vld [vmem:[%s8220_s29 + $0x498] sm:$0xff] }
 0x231   : > { %v2484_v11 = vld [vmem:[%s8220_s29 + $0x4190] sm:$0xff]  ;;  %4168 = vmatpush.msra.mxu3 %v3284_v10  ;;  %v805_v10 = vld [vmem:[%s8220_s29 + $0xd18] sm:$0xff] }
 0x232   : > { %v2756_v32 = vld [vmem:[%s8220_s29 + $0x4a10] sm:$0xff]  ;;  %4110 = vmatpush.msra.mxu0 %v2484_v11  ;;  %v1045_v11 = vld [vmem:[%s8220_s29 + $0x1498] sm:$0xff] }
 0x233   : > { %v2996_v13 = vld [vmem:[%s8220_s29 + $0x5190] sm:$0xff]  ;;  %4129 = vmatpush.msra.mxu1 %v2756_v32  ;;  %v1317_v32 = vld [vmem:[%s8220_s29 + $0x1d18] sm:$0xff] }
 0x234   : > { %v3268_v35 = vld [vmem:[%s8220_s29 + $0x5a10] sm:$0xff]  ;;  %4150 = vmatpush.msra.mxu2 %v2996_v13  ;;  %v517_v13 = vld [vmem:[%s8220_s29 + $0x418] sm:$0xff] }
 0x235   : > { %v2468_v36 = vld [vmem:[%s8220_s29 + $0x4110] sm:$0xff]  ;;  %4169 = vmatpush.msra.mxu3 %v3268_v35  ;;  %v789_v35 = vld [vmem:[%s8220_s29 + $0xc98] sm:$0xff] }
 0x236   : > { %v2740_v14 = vld [vmem:[%s8220_s29 + $0x4990] sm:$0xff]  ;;  %4111 = vmatpush.msra.mxu0 %v2468_v36  ;;  %v3816_v36 = vadd.f32 %v3815_v29, %v3796_v23  ;;  %v901_v23 = vld [vmem:[%s8220_s29 + $0x1018] sm:$0xff] }
 0x237   : > { %v2980_v15 = vld [vmem:[%s8220_s29 + $0x5110] sm:$0xff]  ;;  %4130 = vmatpush.msra.mxu1 %v2740_v14  ;;  %v1029_v14 = vld [vmem:[%s8220_s29 + $0x1418] sm:$0xff] }
 0x238   : > { %v3252_v37 = vld [vmem:[%s8220_s29 + $0x5990] sm:$0xff]  ;;  %4151 = vmatpush.msra.mxu2 %v2980_v15  ;;  %v1301_v15 = vld [vmem:[%s8220_s29 + $0x1c98] sm:$0xff] }
 0x239   : > { %v2452_v38 = vld [vmem:[%s8220_s29 + $0x4090] sm:$0xff]  ;;  %4170 = vmatpush.msra.mxu3 %v3252_v37  ;;  %v3835_v37 = vpop.f32.mrf.mxu2  ;;  %v1653_v29 = vld [vmem:[%s8220_s29 + $0x2798] sm:$0xff] }
 0x23a   : > { %v2724_v19 = vld [vmem:[%s8220_s29 + $0x4910] sm:$0xff]  ;;  %4112 = vmatpush.msra.mxu0 %v2452_v38  ;;  %v501_v38 = vld [vmem:[%s8220_s29 + $0x398] sm:$0xff]  ;;  %v3836_v26 = vadd.f32 %v3835_v37, %v3816_v36 }
 0x23b   : > { %v2964_v20 = vld [vmem:[%s8220_s29 + $0x5090] sm:$0xff]  ;;  %4131 = vmatpush.msra.mxu1 %v2724_v19  ;;  %v773_v19 = vld [vmem:[%s8220_s29 + $0xc18] sm:$0xff] }
 0x23c   : > { %v3236_v22 = vld [vmem:[%s8220_s29 + $0x5910] sm:$0xff]  ;;  %4152 = vmatpush.msra.mxu2 %v2964_v20  ;;  %v1013_v20 = vld [vmem:[%s8220_s29 + $0x1398] sm:$0xff] }
 0x23d   : > { %v2436_v24 = vld [vmem:[%s8220_s29 + $0x4010] sm:$0xff]  ;;  %4171 = vmatpush.msra.mxu3 %v3236_v22  ;;  %v1285_v22 = vld [vmem:[%s8220_s29 + $0x1c18] sm:$0xff] }
 0x23e   : > { %v2708_v25 = vld [vmem:[%s8220_s29 + $0x4890] sm:$0xff]  ;;  %4113 = vmatpush.msra.mxu0 %v2436_v24  ;;  %v485_v24 = vld [vmem:[%s8220_s29 + $0x318] sm:$0xff] }
 0x23f   : > { %v2948_v27 = vld [vmem:[%s8220_s29 + $0x5010] sm:$0xff]  ;;  %4132 = vmatpush.msra.mxu1 %v2708_v25  ;;  %4114 = vmatmul.f32.vlgmr.msra.gmra.mxu0 %v8927_v46  ;;  %v757_v25 = vld [vmem:[%s8220_s29 + $0xb98] sm:$0xff] }
 0x240   : > { %v3220_v31 = vld [vmem:[%s8220_s29 + $0x5890] sm:$0xff]  ;;  %4153 = vmatpush.msra.mxu2 %v2948_v27  ;;  %4178 = vmatpush.msrb.mxu0 %v629_v34  ;;  %v997_v27 = vld [vmem:[%s8220_s29 + $0x1318] sm:$0xff] }
 0x241   : > { %4172 = vmatpush.msra.mxu3 %v3220_v31  ;;  %v2692_v41 = vld [vmem:[%s8220_s29 + $0x4810] sm:$0xff]  ;;  %v1269_v31 = vld [vmem:[%s8220_s29 + $0x1b98] sm:$0xff] }
 0x242   : > { %v3204_v42 = vld [vmem:[%s8220_s29 + $0x5810] sm:$0xff]  ;;  %4218 = vmatpush.msrb.mxu2 %v1141_v39  ;;  %4133 = vmatpush.msra.mxu1 %v2692_v41  ;;  %v469_v34 = vld [vmem:[%s8220_s29 + $0x298] sm:$0xff] }
 0x243   : > { %v8931_v47 = vld [vmem:[%s8212_s17 + $0x50] sm:$0xff]  ;;  %4173 = vmatpush.msra.mxu3 %v3204_v42  ;;  %4134 = vmatmul.f32.vlgmr.msra.gmra.mxu1 %v8939_v55  ;;  %v741_v39 = vld [vmem:[%s8220_s29 + $0xb18] sm:$0xff] }
 0x244   : > { %4154 = vmatmul.f32.vlgmr.msra.gmra.mxu2 %v8931_v47  ;;  %4174 = vmatmul.f32.vlgmr.msra.gmra.mxu3 %v8943_v57  ;;  %v1253_v41 = vld [vmem:[%s8220_s29 + $0x1b18] sm:$0xff] }
 0x245   : > { %4179 = vmatpush.msrb.mxu0 %v613_v48  ;;  %4198 = vmatpush.msrb.mxu1 %v885_v50  ;;  %v453_v42 = vld [vmem:[%s8220_s29 + $0x218] sm:$0xff]  ;;  %v3856_v48 = vadd.f32 %v3855_v33, %v3836_v26 }
 0x246   : > { %4219 = vmatpush.msrb.mxu2 %v1125_v52  ;;  %4238 = vmatpush.msrb.mxu3 %v1397_v53  ;;  %v965_v50 = vld [vmem:[%s8220_s29 + $0x1218] sm:$0xff] }
 0x247   : > { %4180 = vmatpush.msrb.mxu0 %v597_v58  ;;  %4199 = vmatpush.msrb.mxu1 %v869_v59  ;;  %v1237_v52 = vld [vmem:[%s8220_s29 + $0x1a98] sm:$0xff]  ;;  %v3875_v58 = vpop.f32.mrf.mxu0 }
 0x248   : > { %4220 = vmatpush.msrb.mxu2 %v1109_v61  ;;  %4239 = vmatpush.msrb.mxu3 %v1381_v62  ;;  %v437_v53 = vld [vmem:[%s8220_s29 + $0x198] sm:$0xff]  ;;  %v3876_v61 = vadd.f32 %v3875_v58, %v3856_v48 }
 0x249   : > { %4181 = vmatpush.msrb.mxu0 %v581_v63  ;;  %4200 = vmatpush.msrb.mxu1 %v853_v12  ;;  %v949_v59 = vld [vmem:[%s8220_s29 + $0x1198] sm:$0xff] }
 0x24a   : > { %4221 = vmatpush.msrb.mxu2 %v1093_v0  ;;  %4240 = vmatpush.msrb.mxu3 %v1365_v1  ;;  %v421_v62 = vld [vmem:[%s8220_s29 + $0x118] sm:$0xff]  ;;  %v3895_v1 = vpop.f32.mrf.mxu1 }
 0x24b   : > { %4182 = vmatpush.msrb.mxu0 %v565_v17  ;;  %4201 = vmatpush.msrb.mxu1 %v837_v3  ;;  %v693_v63 = vld [vmem:[%s8220_s29 + $0x998] sm:$0xff] }
 0x24c   : > { %4222 = vmatpush.msrb.mxu2 %v1077_v4  ;;  %4241 = vmatpush.msrb.mxu3 %v1349_v5  ;;  %v933_v12 = vld [vmem:[%s8220_s29 + $0x1118] sm:$0xff]  ;;  %v3896_v4 = vadd.f32 %v3895_v1, %v3876_v61 }
 0x24d   : > { %4183 = vmatpush.msrb.mxu0 %v549_v6  ;;  %4202 = vmatpush.msrb.mxu1 %v821_v7  ;;  %v1205_v0 = vld [vmem:[%s8220_s29 + $0x1998] sm:$0xff]  ;;  %v3915_v7 = vpop.f32.mrf.mxu2 }
 0x24e   : > { %4223 = vmatpush.msrb.mxu2 %v1061_v8  ;;  %4242 = vmatpush.msrb.mxu3 %v1333_v28  ;;  %v677_v17 = vld [vmem:[%s8220_s29 + $0x918] sm:$0xff]  ;;  %v3916_v28 = vadd.f32 %v3915_v7, %v3896_v4 }
 0x24f   : > { %4184 = vmatpush.msrb.mxu0 %v533_v9  ;;  %4203 = vmatpush.msrb.mxu1 %v805_v10  ;;  %v917_v3 = vld [vmem:[%s8220_s29 + $0x1098] sm:$0xff] }
 0x250   : > { %4224 = vmatpush.msrb.mxu2 %v1045_v11  ;;  %4243 = vmatpush.msrb.mxu3 %v1317_v32  ;;  %v389_v5 = vld [vmem:[%s8220_s29 + $0x18] sm:$0xff]  ;;  %v359_v32 = vld [vmem:[%s8235_s7 + $0x8] sm:$0xff] }
 0x251   : > { %4185 = vmatpush.msrb.mxu0 %v517_v13  ;;  %4204 = vmatpush.msrb.mxu1 %v789_v35  ;;  %v661_v6 = vld [vmem:[%s8220_s29 + $0x898] sm:$0xff]  ;;  %v3935_v13 = vpop.f32.mrf.mxu3 }
 0x252   : > { %4225 = vmatpush.msrb.mxu2 %v1029_v14  ;;  %4244 = vmatpush.msrb.mxu3 %v1301_v15  ;;  %v1173_v8 = vld [vmem:[%s8220_s29 + $0x1898] sm:$0xff]  ;;  %v3936_v14 = vadd.f32 %v3935_v13, %v3916_v28 }
 0x253   : > { %4186 = vmatpush.msrb.mxu0 %v501_v38  ;;  %4205 = vmatpush.msrb.mxu1 %v773_v19  ;;  %v2165_v9 = vld [vmem:[%s8220_s29 + $0x3798] sm:$0xff] }
 0x254   : > { %4226 = vmatpush.msrb.mxu2 %v1013_v20  ;;  %4245 = vmatpush.msrb.mxu3 %v1285_v22  ;;  %v645_v10 = vld [vmem:[%s8220_s29 + $0x818] sm:$0xff]  ;;  %v7299_v20 = vadd.f32 %v3936_v14, %v359_v32 }
 0x255   : > { %4187 = vmatpush.msrb.mxu0 %v485_v24  ;;  %4206 = vmatpush.msrb.mxu1 %v757_v25  ;;  %v1157_v11 = vld [vmem:[%s8220_s29 + $0x1818] sm:$0xff] }
 0x256   : > { %4227 = vmatpush.msrb.mxu2 %v997_v27  ;;  %4246 = vmatpush.msrb.mxu3 %v1269_v31  ;;  %v1637_v35 = vld [vmem:[%s8220_s29 + $0x2718] sm:$0xff]  ;;  %7315 = vst [vmem:[%s8235_s7 + $0x8] sm:$0xff] %v7299_v20 }
 0x257   : > { %4188 = vmatpush.msrb.mxu0 %v469_v34  ;;  %4207 = vmatpush.msrb.mxu1 %v741_v39  ;;  %v1909_v36 = vld [vmem:[%s8220_s29 + $0x2f98] sm:$0xff] }
 0x258   : > { %4228 = vmatpush.msrb.mxu2 %v981_v40  ;;  %4247 = vmatpush.msrb.mxu3 %v1253_v41  ;;  %v2149_v15 = vld [vmem:[%s8220_s29 + $0x3718] sm:$0xff] }
 0x259   : > { %4189 = vmatpush.msrb.mxu0 %v453_v42  ;;  %4208 = vmatpush.msrb.mxu1 %v725_v44  ;;  %v2421_v37 = vld [vmem:[%s8220_s29 + $0x3f98] sm:$0xff] }
 0x25a   : > { %4229 = vmatpush.msrb.mxu2 %v965_v50  ;;  %4248 = vmatpush.msrb.mxu3 %v1237_v52  ;;  %v1621_v38 = vld [vmem:[%s8220_s29 + $0x2698] sm:$0xff] }
 0x25b   : > { %4190 = vmatpush.msrb.mxu0 %v437_v53  ;;  %4209 = vmatpush.msrb.mxu1 %v709_v54  ;;  %v1893_v19 = vld [vmem:[%s8220_s29 + $0x2f18] sm:$0xff] }
 0x25c   : > { %4230 = vmatpush.msrb.mxu2 %v949_v59  ;;  %4249 = vmatpush.msrb.mxu3 %v1221_v60  ;;  %v2133_v22 = vld [vmem:[%s8220_s29 + $0x3698] sm:$0xff] }
 0x25d   : > { %4191 = vmatpush.msrb.mxu0 %v421_v62  ;;  %4210 = vmatpush.msrb.mxu1 %v693_v63  ;;  %v2405_v24 = vld [vmem:[%s8220_s29 + $0x3f18] sm:$0xff] }
 0x25e   : > { %4231 = vmatpush.msrb.mxu2 %v933_v12  ;;  %4250 = vmatpush.msrb.mxu3 %v1205_v0  ;;  %v1605_v25 = vld [vmem:[%s8220_s29 + $0x2618] sm:$0xff] }
 0x25f   : > { %4192 = vmatpush.msrb.mxu0 %v405_v2  ;;  %4211 = vmatpush.msrb.mxu1 %v677_v17  ;;  %v1877_v26 = vld [vmem:[%s8220_s29 + $0x2e98] sm:$0xff] }
 0x260   : > { %4232 = vmatpush.msrb.mxu2 %v917_v3  ;;  %4251 = vmatpush.msrb.mxu3 %v1189_v18  ;;  %v2117_v27 = vld [vmem:[%s8220_s29 + $0x3618] sm:$0xff] }
 0x261   : > { %4193 = vmatpush.msrb.mxu0 %v389_v5  ;;  %4212 = vmatpush.msrb.mxu1 %v661_v6  ;;  %v2389_v31 = vld [vmem:[%s8220_s29 + $0x3e98] sm:$0xff] }
 0x262   : > { %4233 = vmatpush.msrb.mxu2 %v901_v23  ;;  %4252 = vmatpush.msrb.mxu3 %v1173_v8  ;;  %v1589_v33 = vld [vmem:[%s8220_s29 + $0x2598] sm:$0xff] }
 0x263   : > { %4258 = vmatpush.msra.mxu0 %v1653_v29  ;;  %4213 = vmatpush.msrb.mxu1 %v645_v10  ;;  %v1861_v34 = vld [vmem:[%s8220_s29 + $0x2e18] sm:$0xff] }
 0x264   : > { %4298 = vmatpush.msra.mxu2 %v2165_v9  ;;  %4253 = vmatpush.msrb.mxu3 %v1157_v11  ;;  %v2101_v39 = vld [vmem:[%s8220_s29 + $0x3598] sm:$0xff] }
 0x265   : > { %4259 = vmatpush.msra.mxu0 %v1637_v35  ;;  %4278 = vmatpush.msra.mxu1 %v1909_v36  ;;  %v2373_v40 = vld [vmem:[%s8220_s29 + $0x3e18] sm:$0xff] }
 0x266   : > { %4299 = vmatpush.msra.mxu2 %v2149_v15  ;;  %4318 = vmatpush.msra.mxu3 %v2421_v37  ;;  %v1573_v41 = vld [vmem:[%s8220_s29 + $0x2518] sm:$0xff] }
 0x267   : > { %4260 = vmatpush.msra.mxu0 %v1621_v38  ;;  %4279 = vmatpush.msra.mxu1 %v1893_v19  ;;  %v1845_v42 = vld [vmem:[%s8220_s29 + $0x2d98] sm:$0xff] }
 0x268   : > { %4300 = vmatpush.msra.mxu2 %v2133_v22  ;;  %4319 = vmatpush.msra.mxu3 %v2405_v24  ;;  %v2085_v44 = vld [vmem:[%s8220_s29 + $0x3518] sm:$0xff] }
 0x269   : > { %4261 = vmatpush.msra.mxu0 %v1605_v25  ;;  %4280 = vmatpush.msra.mxu1 %v1877_v26  ;;  %v2357_v48 = vld [vmem:[%s8220_s29 + $0x3d98] sm:$0xff] }
 0x26a   : > { %4301 = vmatpush.msra.mxu2 %v2117_v27  ;;  %4320 = vmatpush.msra.mxu3 %v2389_v31  ;;  %v1557_v50 = vld [vmem:[%s8220_s29 + $0x2498] sm:$0xff] }
 0x26b   : > { %4262 = vmatpush.msra.mxu0 %v1589_v33  ;;  %4281 = vmatpush.msra.mxu1 %v1861_v34  ;;  %v1829_v52 = vld [vmem:[%s8220_s29 + $0x2d18] sm:$0xff] }
 0x26c   : > { %4302 = vmatpush.msra.mxu2 %v2101_v39  ;;  %4321 = vmatpush.msra.mxu3 %v2373_v40  ;;  %v2069_v53 = vld [vmem:[%s8220_s29 + $0x3498] sm:$0xff] }
 0x26d   : > { %4263 = vmatpush.msra.mxu0 %v1573_v41  ;;  %4282 = vmatpush.msra.mxu1 %v1845_v42  ;;  %v2341_v54 = vld [vmem:[%s8220_s29 + $0x3d18] sm:$0xff] }
 0x26e   : > { %4303 = vmatpush.msra.mxu2 %v2085_v44  ;;  %4322 = vmatpush.msra.mxu3 %v2357_v48  ;;  %v1541_v58 = vld [vmem:[%s8220_s29 + $0x2418] sm:$0xff] }
 0x26f   : > { %v1813_v59 = vld [vmem:[%s8220_s29 + $0x2c98] sm:$0xff]  ;;  %4264 = vmatpush.msra.mxu0 %v1557_v50  ;;  %4283 = vmatpush.msra.mxu1 %v1829_v52 }
 0x270   : > { %v2053_v60 = vld [vmem:[%s8220_s29 + $0x3418] sm:$0xff]  ;;  %4304 = vmatpush.msra.mxu2 %v2069_v53  ;;  %4323 = vmatpush.msra.mxu3 %v2341_v54 }
 0x271   : > { %v2325_v61 = vld [vmem:[%s8220_s29 + $0x3c98] sm:$0xff]  ;;  %4265 = vmatpush.msra.mxu0 %v1541_v58  ;;  %4284 = vmatpush.msra.mxu1 %v1813_v59 }
 0x272   : > { %v1525_v62 = vld [vmem:[%s8220_s29 + $0x2398] sm:$0xff]  ;;  %4305 = vmatpush.msra.mxu2 %v2053_v60  ;;  %4324 = vmatpush.msra.mxu3 %v2325_v61 }
 0x273   : > { %v1797_v63 = vld [vmem:[%s8220_s29 + $0x2c18] sm:$0xff]  ;;  %4266 = vmatpush.msra.mxu0 %v1525_v62  ;;  %4234 = vmatmul.f32.vlgmr.msrb.gmra.mxu2 %v8827_v16 }
 0x274   : > { %v2037_v12 = vld [vmem:[%s8220_s29 + $0x3398] sm:$0xff]  ;;  %4285 = vmatpush.msra.mxu1 %v1797_v63  ;;  %4194 = vmatmul.f32.vlgmr.msrb.gmra.mxu0 %v8834_v21 }
 0x275   : > { %v2309_v0 = vld [vmem:[%s8220_s29 + $0x3c18] sm:$0xff]  ;;  %4306 = vmatpush.msra.mxu2 %v2037_v12  ;;  %4254 = vmatmul.f32.vlgmr.msrb.gmra.mxu3 %v8839_v43 }
 0x276   : > { %v1509_v1 = vld [vmem:[%s8220_s29 + $0x2318] sm:$0xff]  ;;  %4325 = vmatpush.msra.mxu3 %v2309_v0  ;;  %4214 = vmatmul.f32.vlgmr.msrb.gmra.mxu1 %v8847_v30 }
 0x277   : > { %v1781_v2 = vld [vmem:[%s8220_s29 + $0x2b98] sm:$0xff]  ;;  %4267 = vmatpush.msra.mxu0 %v1509_v1 }
 0x278   : > { %v2021_v17 = vld [vmem:[%s8220_s29 + $0x3318] sm:$0xff]  ;;  %4286 = vmatpush.msra.mxu1 %v1781_v2 }
 0x279   : > { %v2293_v3 = vld [vmem:[%s8220_s29 + $0x3b98] sm:$0xff]  ;;  %4307 = vmatpush.msra.mxu2 %v2021_v17 }
 0x27a   : > { %v1493_v18 = vld [vmem:[%s8220_s29 + $0x2298] sm:$0xff]  ;;  %4326 = vmatpush.msra.mxu3 %v2293_v3 }
 0x27b   : > { %v1765_v4 = vld [vmem:[%s8220_s29 + $0x2b18] sm:$0xff]  ;;  %4268 = vmatpush.msra.mxu0 %v1493_v18 }
 0x27c   : > { %v2005_v5 = vld [vmem:[%s8220_s29 + $0x3298] sm:$0xff]  ;;  %4287 = vmatpush.msra.mxu1 %v1765_v4 }
 0x27d   : > { %v2277_v6 = vld [vmem:[%s8220_s29 + $0x3b18] sm:$0xff]  ;;  %4308 = vmatpush.msra.mxu2 %v2005_v5 }
 0x27e   : > { %v1477_v7 = vld [vmem:[%s8220_s29 + $0x2218] sm:$0xff]  ;;  %4327 = vmatpush.msra.mxu3 %v2277_v6 }
 0x27f   : > { %v1749_v23 = vld [vmem:[%s8220_s29 + $0x2a98] sm:$0xff]  ;;  %4269 = vmatpush.msra.mxu0 %v1477_v7 }
 0x280   : > { %v1989_v8 = vld [vmem:[%s8220_s29 + $0x3218] sm:$0xff]  ;;  %4288 = vmatpush.msra.mxu1 %v1749_v23 }
 0x281   : > { %v2261_v28 = vld [vmem:[%s8220_s29 + $0x3a98] sm:$0xff]  ;;  %4309 = vmatpush.msra.mxu2 %v1989_v8 }
 0x282   : > { %v1461_v29 = vld [vmem:[%s8220_s29 + $0x2198] sm:$0xff]  ;;  %4328 = vmatpush.msra.mxu3 %v2261_v28 }
 0x283   : > { %v1733_v9 = vld [vmem:[%s8220_s29 + $0x2a18] sm:$0xff]  ;;  %4270 = vmatpush.msra.mxu0 %v1461_v29 }
 0x284   : > { %v1973_v10 = vld [vmem:[%s8220_s29 + $0x3198] sm:$0xff]  ;;  %4289 = vmatpush.msra.mxu1 %v1733_v9 }
 0x285   : > { %v2245_v11 = vld [vmem:[%s8220_s29 + $0x3a18] sm:$0xff]  ;;  %4310 = vmatpush.msra.mxu2 %v1973_v10 }
 0x286   : > { %v1445_v32 = vld [vmem:[%s8220_s29 + $0x2118] sm:$0xff]  ;;  %4329 = vmatpush.msra.mxu3 %v2245_v11 }
 0x287   : > { %v1717_v13 = vld [vmem:[%s8220_s29 + $0x2998] sm:$0xff]  ;;  %4271 = vmatpush.msra.mxu0 %v1445_v32 }
 0x288   : > { %v1957_v35 = vld [vmem:[%s8220_s29 + $0x3118] sm:$0xff]  ;;  %4290 = vmatpush.msra.mxu1 %v1717_v13 }
 0x289   : > { %v2229_v36 = vld [vmem:[%s8220_s29 + $0x3998] sm:$0xff]  ;;  %4311 = vmatpush.msra.mxu2 %v1957_v35 }
 0x28a   : > { %v1429_v14 = vld [vmem:[%s8220_s29 + $0x2098] sm:$0xff]  ;;  %4330 = vmatpush.msra.mxu3 %v2229_v36 }
 0x28b   : > { %v1701_v15 = vld [vmem:[%s8220_s29 + $0x2918] sm:$0xff]  ;;  %4272 = vmatpush.msra.mxu0 %v1429_v14 }
 0x28c   : > { %v1941_v37 = vld [vmem:[%s8220_s29 + $0x3098] sm:$0xff]  ;;  %4291 = vmatpush.msra.mxu1 %v1701_v15 }
 0x28d   : > { %v2213_v38 = vld [vmem:[%s8220_s29 + $0x3918] sm:$0xff]  ;;  %4312 = vmatpush.msra.mxu2 %v1941_v37 }
 0x28e   : > { %v1413_v19 = vld [vmem:[%s8220_s29 + $0x2018] sm:$0xff]  ;;  %4331 = vmatpush.msra.mxu3 %v2213_v38 }
 0x28f   : > { %v1685_v20 = vld [vmem:[%s8220_s29 + $0x2898] sm:$0xff]  ;;  %4273 = vmatpush.msra.mxu0 %v1413_v19 }
 0x290   : > { %v1925_v22 = vld [vmem:[%s8220_s29 + $0x3018] sm:$0xff]  ;;  %4292 = vmatpush.msra.mxu1 %v1685_v20  ;;  %4274 = vmatmul.f32.vlgmr.msra.gmra.mxu0 %v8866_v49 }
 0x291   : > { %v2197_v24 = vld [vmem:[%s8220_s29 + $0x3898] sm:$0xff]  ;;  %4313 = vmatpush.msra.mxu2 %v1925_v22 }
 0x292   : > { %v2677_v25 = vld [vmem:[%s8220_s29 + $0x4798] sm:$0xff]  ;;  %4332 = vmatpush.msra.mxu3 %v2197_v24  ;;  %4314 = vmatmul.f32.vlgmr.msra.gmra.mxu2 %v8859_v45 }
 0x293   : > { %v3189_v26 = vld [vmem:[%s8220_s29 + $0x5798] sm:$0xff]  ;;  %4338 = vmatpush.msrb.mxu0 %v2677_v25 }
 0x294   : > { %v1669_v27 = vld [vmem:[%s8220_s29 + $0x2818] sm:$0xff]  ;;  %4378 = vmatpush.msrb.mxu2 %v3189_v26 }
 0x295   : > { %v2181_v31 = vld [vmem:[%s8220_s29 + $0x3818] sm:$0xff]  ;;  %4293 = vmatpush.msra.mxu1 %v1669_v27  ;;  %v3975_v27 = vpop.f32.mrf.mxu1 }
 0x296   : > { %v2661_v16 = vld [vmem:[%s8220_s29 + $0x4718] sm:$0xff]  ;;  %4333 = vmatpush.msra.mxu3 %v2181_v31  ;;  %4294 = vmatmul.f32.vlgmr.msra.gmra.mxu1 %v8879_v56 }
 0x297   : > { %v2933_v33 = vld [vmem:[%s8220_s29 + $0x4f98] sm:$0xff]  ;;  %4339 = vmatpush.msrb.mxu0 %v2661_v16  ;;  %4334 = vmatmul.f32.vlgmr.msra.gmra.mxu3 %v8871_v51 }
 0x298   : > { %v3173_v34 = vld [vmem:[%s8220_s29 + $0x5718] sm:$0xff]  ;;  %4358 = vmatpush.msrb.mxu1 %v2933_v33  ;;  %v3955_v33 = vpop.f32.mrf.mxu0 }
 0x299   : > { %v3445_v39 = vld [vmem:[%s8220_s29 + $0x5f98] sm:$0xff]  ;;  %4379 = vmatpush.msrb.mxu2 %v3173_v34  ;;  %v630_v34 = vld [vmem:[%s8220_s29 + $0x7a0] sm:$0xff] }
 0x29a   : > { %v2645_v21 = vld [vmem:[%s8220_s29 + $0x4698] sm:$0xff]  ;;  %4398 = vmatpush.msrb.mxu3 %v3445_v39  ;;  %v1142_v39 = vld [vmem:[%s8220_s29 + $0x17a0] sm:$0xff] }
 0x29b   : > { %v2917_v40 = vld [vmem:[%s8220_s29 + $0x4f18] sm:$0xff]  ;;  %4340 = vmatpush.msrb.mxu0 %v2645_v21  ;;  %v3976_v21 = vadd.f32 %v3975_v27, %v3955_v33  ;;  %v1238_v27 = vld [vmem:[%s8220_s29 + $0x1aa0] sm:$0xff] }
 0x29c   : > { %v3157_v43 = vld [vmem:[%s8220_s29 + $0x5698] sm:$0xff]  ;;  %4359 = vmatpush.msrb.mxu1 %v2917_v40 }
 0x29d   : > { %v3429_v41 = vld [vmem:[%s8220_s29 + $0x5f18] sm:$0xff]  ;;  %4380 = vmatpush.msrb.mxu2 %v3157_v43 }
 0x29e   : > { %v2629_v42 = vld [vmem:[%s8220_s29 + $0x4618] sm:$0xff]  ;;  %4399 = vmatpush.msrb.mxu3 %v3429_v41  ;;  %v3995_v41 = vpop.f32.mrf.mxu2 }
 0x29f   : > { %v2901_v44 = vld [vmem:[%s8220_s29 + $0x4e98] sm:$0xff]  ;;  %4341 = vmatpush.msrb.mxu0 %v2629_v42  ;;  %v614_v42 = vld [vmem:[%s8220_s29 + $0x720] sm:$0xff] }
 0x2a0   : > { %v3141_v48 = vld [vmem:[%s8220_s29 + $0x5618] sm:$0xff]  ;;  %4360 = vmatpush.msrb.mxu1 %v2901_v44  ;;  %v886_v44 = vld [vmem:[%s8220_s29 + $0xfa0] sm:$0xff] }
 0x2a1   : > { %v3413_v30 = vld [vmem:[%s8220_s29 + $0x5e98] sm:$0xff]  ;;  %4381 = vmatpush.msrb.mxu2 %v3141_v48  ;;  %v1126_v48 = vld [vmem:[%s8220_s29 + $0x1720] sm:$0xff] }
 0x2a2   : > { %v2613_v50 = vld [vmem:[%s8220_s29 + $0x4598] sm:$0xff]  ;;  %4400 = vmatpush.msrb.mxu3 %v3413_v30  ;;  %v1398_v30 = vld [vmem:[%s8220_s29 + $0x1fa0] sm:$0xff] }
 0x2a3   : > { %v2885_v52 = vld [vmem:[%s8220_s29 + $0x4e18] sm:$0xff]  ;;  %4342 = vmatpush.msrb.mxu0 %v2613_v50  ;;  %v3996_v50 = vadd.f32 %v3995_v41, %v3976_v21  ;;  %v934_v41 = vld [vmem:[%s8220_s29 + $0x1120] sm:$0xff] }
 0x2a4   : > { %v3125_v53 = vld [vmem:[%s8220_s29 + $0x5598] sm:$0xff]  ;;  %4361 = vmatpush.msrb.mxu1 %v2885_v52  ;;  %v4015_v52 = vpop.f32.mrf.mxu3 }
 0x2a5   : > { %v3397_v54 = vld [vmem:[%s8220_s29 + $0x5e18] sm:$0xff]  ;;  %4382 = vmatpush.msrb.mxu2 %v3125_v53  ;;  %v1110_v53 = vld [vmem:[%s8220_s29 + $0x16a0] sm:$0xff] }
 0x2a6   : > { %v2597_v45 = vld [vmem:[%s8220_s29 + $0x4518] sm:$0xff]  ;;  %4401 = vmatpush.msrb.mxu3 %v3397_v54  ;;  %v1382_v54 = vld [vmem:[%s8220_s29 + $0x1f20] sm:$0xff] }
 0x2a7   : > { %v2869_v58 = vld [vmem:[%s8220_s29 + $0x4d98] sm:$0xff]  ;;  %4343 = vmatpush.msrb.mxu0 %v2597_v45  ;;  %v582_v45 = vld [vmem:[%s8220_s29 + $0x620] sm:$0xff] }
 0x2a8   : > { %v3109_v59 = vld [vmem:[%s8220_s29 + $0x5518] sm:$0xff]  ;;  %4362 = vmatpush.msrb.mxu1 %v2869_v58  ;;  %v854_v58 = vld [vmem:[%s8220_s29 + $0xea0] sm:$0xff] }
 0x2a9   : > { %v3381_v60 = vld [vmem:[%s8220_s29 + $0x5d98] sm:$0xff]  ;;  %4383 = vmatpush.msrb.mxu2 %v3109_v59  ;;  %v4016_v59 = vadd.f32 %v4015_v52, %v3996_v50  ;;  %v918_v50 = vld [vmem:[%s8220_s29 + $0x10a0] sm:$0xff] }
 0x2aa   : > { %v2581_v49 = vld [vmem:[%s8220_s29 + $0x4498] sm:$0xff]  ;;  %4402 = vmatpush.msrb.mxu3 %v3381_v60  ;;  %v566_v60 = vld [vmem:[%s8220_s29 + $0x5a0] sm:$0xff] }
 0x2ab   : > { %v2853_v61 = vld [vmem:[%s8220_s29 + $0x4d18] sm:$0xff]  ;;  %4344 = vmatpush.msrb.mxu0 %v2581_v49  ;;  %v838_v49 = vld [vmem:[%s8220_s29 + $0xe20] sm:$0xff] }
 0x2ac   : > { %v3093_v51 = vld [vmem:[%s8220_s29 + $0x5498] sm:$0xff]  ;;  %4363 = vmatpush.msrb.mxu1 %v2853_v61  ;;  %v4035_v61 = vpop.f32.mrf.mxu0  ;;  %v390_v52 = vld [vmem:[%s8220_s29 + $0x20] sm:$0xff] }
 0x2ad   : > { %v3365_v62 = vld [vmem:[%s8220_s29 + $0x5d18] sm:$0xff]  ;;  %4384 = vmatpush.msrb.mxu2 %v3093_v51  ;;  %v1078_v51 = vld [vmem:[%s8220_s29 + $0x15a0] sm:$0xff] }
 0x2ae   : > { %v2565_v63 = vld [vmem:[%s8220_s29 + $0x4418] sm:$0xff]  ;;  %4403 = vmatpush.msrb.mxu3 %v3365_v62  ;;  %v1350_v62 = vld [vmem:[%s8220_s29 + $0x1e20] sm:$0xff] }
 0x2af   : > { %v2837_v12 = vld [vmem:[%s8220_s29 + $0x4c98] sm:$0xff]  ;;  %4345 = vmatpush.msrb.mxu0 %v2565_v63  ;;  %v550_v63 = vld [vmem:[%s8220_s29 + $0x520] sm:$0xff] }
 0x2b0   : > { %v3077_v0 = vld [vmem:[%s8220_s29 + $0x5418] sm:$0xff]  ;;  %4364 = vmatpush.msrb.mxu1 %v2837_v12  ;;  %v822_v12 = vld [vmem:[%s8220_s29 + $0xda0] sm:$0xff] }
 0x2b1   : > { %v3349_v56 = vld [vmem:[%s8220_s29 + $0x5c98] sm:$0xff]  ;;  %4385 = vmatpush.msrb.mxu2 %v3077_v0  ;;  %v4036_v0 = vadd.f32 %v4035_v61, %v4016_v59  ;;  %v2166_v59 = vld [vmem:[%s8220_s29 + $0x37a0] sm:$0xff]  ;;  %v360_v61 = vld [vmem:[%s8235_s7 + $0x10] sm:$0xff] }
 0x2b2   : > { %v2549_v1 = vld [vmem:[%s8220_s29 + $0x4398] sm:$0xff]  ;;  %4404 = vmatpush.msrb.mxu3 %v3349_v56  ;;  %v1062_v56 = vld [vmem:[%s8220_s29 + $0x1520] sm:$0xff] }
 0x2b3   : > { %v2821_v2 = vld [vmem:[%s8220_s29 + $0x4c18] sm:$0xff]  ;;  %4346 = vmatpush.msrb.mxu0 %v2549_v1  ;;  %v1334_v1 = vld [vmem:[%s8220_s29 + $0x1da0] sm:$0xff] }
 0x2b4   : > { %v3061_v17 = vld [vmem:[%s8220_s29 + $0x5398] sm:$0xff]  ;;  %4365 = vmatpush.msrb.mxu1 %v2821_v2  ;;  %v4055_v2 = vpop.f32.mrf.mxu1 }
 0x2b5   : > { %v3333_v3 = vld [vmem:[%s8220_s29 + $0x5c18] sm:$0xff]  ;;  %4386 = vmatpush.msrb.mxu2 %v3061_v17  ;;  %v534_v17 = vld [vmem:[%s8220_s29 + $0x4a0] sm:$0xff] }
 0x2b6   : > { %v2533_v18 = vld [vmem:[%s8220_s29 + $0x4318] sm:$0xff]  ;;  %4405 = vmatpush.msrb.mxu3 %v3333_v3  ;;  %v806_v3 = vld [vmem:[%s8220_s29 + $0xd20] sm:$0xff] }
 0x2b7   : > { %v2805_v4 = vld [vmem:[%s8220_s29 + $0x4b98] sm:$0xff]  ;;  %4347 = vmatpush.msrb.mxu0 %v2533_v18  ;;  %v1046_v18 = vld [vmem:[%s8220_s29 + $0x14a0] sm:$0xff] }
 0x2b8   : > { %v3045_v5 = vld [vmem:[%s8220_s29 + $0x5318] sm:$0xff]  ;;  %4366 = vmatpush.msrb.mxu1 %v2805_v4  ;;  %v1318_v4 = vld [vmem:[%s8220_s29 + $0x1d20] sm:$0xff] }
 0x2b9   : > { %v3317_v6 = vld [vmem:[%s8220_s29 + $0x5b98] sm:$0xff]  ;;  %4387 = vmatpush.msrb.mxu2 %v3045_v5  ;;  %v518_v5 = vld [vmem:[%s8220_s29 + $0x420] sm:$0xff] }
 0x2ba   : > { %v2517_v7 = vld [vmem:[%s8220_s29 + $0x4298] sm:$0xff]  ;;  %4406 = vmatpush.msrb.mxu3 %v3317_v6  ;;  %v790_v6 = vld [vmem:[%s8220_s29 + $0xca0] sm:$0xff] }
 0x2bb   : > { %v2789_v23 = vld [vmem:[%s8220_s29 + $0x4b18] sm:$0xff]  ;;  %4348 = vmatpush.msrb.mxu0 %v2517_v7  ;;  %v4056_v7 = vadd.f32 %v4055_v2, %v4036_v0  ;;  %v2150_v0 = vld [vmem:[%s8220_s29 + $0x3720] sm:$0xff] }
 0x2bc   : > { %v3029_v8 = vld [vmem:[%s8220_s29 + $0x5298] sm:$0xff]  ;;  %4367 = vmatpush.msrb.mxu1 %v2789_v23  ;;  %v1030_v23 = vld [vmem:[%s8220_s29 + $0x1420] sm:$0xff]  ;;  %v4115_v33 = vpop.f32.mrf.mxu0 }
 0x2bd   : > { %v3301_v28 = vld [vmem:[%s8220_s29 + $0x5b18] sm:$0xff]  ;;  %4388 = vmatpush.msrb.mxu2 %v3029_v8  ;;  %v1302_v8 = vld [vmem:[%s8220_s29 + $0x1ca0] sm:$0xff] }
 0x2be   : > { %v2501_v29 = vld [vmem:[%s8220_s29 + $0x4218] sm:$0xff]  ;;  %4407 = vmatpush.msrb.mxu3 %v3301_v28  ;;  %v4075_v28 = vpop.f32.mrf.mxu2  ;;  %v1894_v2 = vld [vmem:[%s8220_s29 + $0x2f20] sm:$0xff] }
 0x2bf   : > { %v2773_v9 = vld [vmem:[%s8220_s29 + $0x4a98] sm:$0xff]  ;;  %4349 = vmatpush.msrb.mxu0 %v2501_v29  ;;  %v502_v29 = vld [vmem:[%s8220_s29 + $0x3a0] sm:$0xff] }
 0x2c0   : > { %v3013_v10 = vld [vmem:[%s8220_s29 + $0x5218] sm:$0xff]  ;;  %4368 = vmatpush.msrb.mxu1 %v2773_v9  ;;  %v774_v9 = vld [vmem:[%s8220_s29 + $0xc20] sm:$0xff] }
 0x2c1   : > { %v3285_v11 = vld [vmem:[%s8220_s29 + $0x5a98] sm:$0xff]  ;;  %4389 = vmatpush.msrb.mxu2 %v3013_v10  ;;  %v1014_v10 = vld [vmem:[%s8220_s29 + $0x13a0] sm:$0xff] }
 0x2c2   : > { %v2485_v32 = vld [vmem:[%s8220_s29 + $0x4198] sm:$0xff]  ;;  %4408 = vmatpush.msrb.mxu3 %v3285_v11  ;;  %v1286_v11 = vld [vmem:[%s8220_s29 + $0x1c20] sm:$0xff] }
 0x2c3   : > { %v2757_v13 = vld [vmem:[%s8220_s29 + $0x4a18] sm:$0xff]  ;;  %4350 = vmatpush.msrb.mxu0 %v2485_v32  ;;  %v486_v32 = vld [vmem:[%s8220_s29 + $0x320] sm:$0xff] }
 0x2c4   : > { %v2997_v35 = vld [vmem:[%s8220_s29 + $0x5198] sm:$0xff]  ;;  %4369 = vmatpush.msrb.mxu1 %v2757_v13  ;;  %v758_v13 = vld [vmem:[%s8220_s29 + $0xba0] sm:$0xff] }
 0x2c5   : > { %v3269_v36 = vld [vmem:[%s8220_s29 + $0x5a18] sm:$0xff]  ;;  %4390 = vmatpush.msrb.mxu2 %v2997_v35  ;;  %v4076_v35 = vadd.f32 %v4075_v28, %v4056_v7  ;;  %v2390_v7 = vld [vmem:[%s8220_s29 + $0x3ea0] sm:$0xff] }
 0x2c6   : > { %v2469_v14 = vld [vmem:[%s8220_s29 + $0x4118] sm:$0xff]  ;;  %4409 = vmatpush.msrb.mxu3 %v3269_v36  ;;  %v998_v36 = vld [vmem:[%s8220_s29 + $0x1320] sm:$0xff] }
 0x2c7   : > { %v2741_v15 = vld [vmem:[%s8220_s29 + $0x4998] sm:$0xff]  ;;  %4351 = vmatpush.msrb.mxu0 %v2469_v14  ;;  %v1270_v14 = vld [vmem:[%s8220_s29 + $0x1ba0] sm:$0xff] }
 0x2c8   : > { %v2981_v37 = vld [vmem:[%s8220_s29 + $0x5118] sm:$0xff]  ;;  %4370 = vmatpush.msrb.mxu1 %v2741_v15  ;;  %v4095_v15 = vpop.f32.mrf.mxu3  ;;  %v2102_v28 = vld [vmem:[%s8220_s29 + $0x35a0] sm:$0xff] }
 0x2c9   : > { %v3253_v38 = vld [vmem:[%s8220_s29 + $0x5998] sm:$0xff]  ;;  %4391 = vmatpush.msrb.mxu2 %v2981_v37  ;;  %v470_v37 = vld [vmem:[%s8220_s29 + $0x2a0] sm:$0xff] }
 0x2ca   : > { %v2453_v19 = vld [vmem:[%s8220_s29 + $0x4098] sm:$0xff]  ;;  %4410 = vmatpush.msrb.mxu3 %v3253_v38  ;;  %v742_v38 = vld [vmem:[%s8220_s29 + $0xb20] sm:$0xff] }
 0x2cb   : > { %v2725_v20 = vld [vmem:[%s8220_s29 + $0x4918] sm:$0xff]  ;;  %4352 = vmatpush.msrb.mxu0 %v2453_v19  ;;  %v982_v19 = vld [vmem:[%s8220_s29 + $0x12a0] sm:$0xff] }
 0x2cc   : > { %v2965_v22 = vld [vmem:[%s8220_s29 + $0x5098] sm:$0xff]  ;;  %4371 = vmatpush.msrb.mxu1 %v2725_v20  ;;  %v1254_v20 = vld [vmem:[%s8220_s29 + $0x1b20] sm:$0xff] }
 0x2cd   : > { %v3237_v24 = vld [vmem:[%s8220_s29 + $0x5918] sm:$0xff]  ;;  %4392 = vmatpush.msrb.mxu2 %v2965_v22  ;;  %v454_v22 = vld [vmem:[%s8220_s29 + $0x220] sm:$0xff] }
 0x2ce   : > { %v2437_v25 = vld [vmem:[%s8220_s29 + $0x4018] sm:$0xff]  ;;  %4411 = vmatpush.msrb.mxu3 %v3237_v24  ;;  %v726_v24 = vld [vmem:[%s8220_s29 + $0xaa0] sm:$0xff] }
 0x2cf   : > { %v2709_v26 = vld [vmem:[%s8220_s29 + $0x4898] sm:$0xff]  ;;  %4353 = vmatpush.msrb.mxu0 %v2437_v25  ;;  %v4096_v25 = vadd.f32 %v4095_v15, %v4076_v35  ;;  %v1830_v35 = vld [vmem:[%s8220_s29 + $0x2d20] sm:$0xff] }
 0x2d0   : > { %v2949_v31 = vld [vmem:[%s8220_s29 + $0x5018] sm:$0xff]  ;;  %4372 = vmatpush.msrb.mxu1 %v2709_v26  ;;  %4354 = vmatmul.f32.vlgmr.msrb.gmra.mxu0 %v8927_v46  ;;  %v598_v46 = vld [vmem:[%s8220_s29 + $0x6a0] sm:$0xff] }
 0x2d1   : > { %v3221_v16 = vld [vmem:[%s8220_s29 + $0x5898] sm:$0xff]  ;;  %4393 = vmatpush.msrb.mxu2 %v2949_v31  ;;  %4418 = vmatpush.msra.mxu0 %v630_v34  ;;  %v966_v26 = vld [vmem:[%s8220_s29 + $0x1220] sm:$0xff]  ;;  %v4116_v21 = vadd.f32 %v4115_v33, %v4096_v25 }
 0x2d2   : > { %4412 = vmatpush.msrb.mxu3 %v3221_v16  ;;  %v2693_v40 = vld [vmem:[%s8220_s29 + $0x4818] sm:$0xff]  ;;  %4394 = vmatmul.f32.vlgmr.msrb.gmra.mxu2 %v8931_v47  ;;  %v870_v47 = vld [vmem:[%s8220_s29 + $0xf20] sm:$0xff] }
 0x2d3   : > { %v3205_v43 = vld [vmem:[%s8220_s29 + $0x5818] sm:$0xff]  ;;  %4458 = vmatpush.msra.mxu2 %v1142_v39  ;;  %4373 = vmatpush.msrb.mxu1 %v2693_v40  ;;  %v438_v31 = vld [vmem:[%s8220_s29 + $0x1a0] sm:$0xff] }
 0x2d4   : > { %4413 = vmatpush.msrb.mxu3 %v3205_v43  ;;  %4374 = vmatmul.f32.vlgmr.msrb.gmra.mxu1 %v8939_v55  ;;  %v1094_v55 = vld [vmem:[%s8220_s29 + $0x1620] sm:$0xff] }
 0x2d5   : > { %4414 = vmatmul.f32.vlgmr.msrb.gmra.mxu3 %v8943_v57  ;;  %4419 = vmatpush.msra.mxu0 %v614_v42  ;;  %v1366_v57 = vld [vmem:[%s8220_s29 + $0x1ea0] sm:$0xff] }
 0x2d6   : > { %4438 = vmatpush.msra.mxu1 %v886_v44  ;;  %4459 = vmatpush.msra.mxu2 %v1126_v48  ;;  %v710_v16 = vld [vmem:[%s8220_s29 + $0xa20] sm:$0xff]  ;;  %v4135_v44 = vpop.f32.mrf.mxu1 }
 0x2d7   : > { %4478 = vmatpush.msra.mxu3 %v1398_v30  ;;  %4420 = vmatpush.msra.mxu0 %v598_v46  ;;  %v950_v34 = vld [vmem:[%s8220_s29 + $0x11a0] sm:$0xff] }
 0x2d8   : > { %4439 = vmatpush.msra.mxu1 %v870_v47  ;;  %4460 = vmatpush.msra.mxu2 %v1110_v53  ;;  %v1222_v39 = vld [vmem:[%s8220_s29 + $0x1a20] sm:$0xff]  ;;  %v4136_v47 = vadd.f32 %v4135_v44, %v4116_v21 }
 0x2d9   : > { %4479 = vmatpush.msra.mxu3 %v1382_v54  ;;  %4421 = vmatpush.msra.mxu0 %v582_v45  ;;  %v422_v40 = vld [vmem:[%s8220_s29 + $0x120] sm:$0xff]  ;;  %v4155_v54 = vpop.f32.mrf.mxu2 }
 0x2da   : > { %4440 = vmatpush.msra.mxu1 %v854_v58  ;;  %4461 = vmatpush.msra.mxu2 %v1094_v55  ;;  %v694_v43 = vld [vmem:[%s8220_s29 + $0x9a0] sm:$0xff]  ;;  %v4156_v55 = vadd.f32 %v4155_v54, %v4136_v47 }
 0x2db   : > { %4480 = vmatpush.msra.mxu3 %v1366_v57  ;;  %4422 = vmatpush.msra.mxu0 %v566_v60  ;;  %v1206_v42 = vld [vmem:[%s8220_s29 + $0x19a0] sm:$0xff] }
 0x2dc   : > { %4441 = vmatpush.msra.mxu1 %v838_v49  ;;  %4462 = vmatpush.msra.mxu2 %v1078_v51  ;;  %v406_v48 = vld [vmem:[%s8220_s29 + $0xa0] sm:$0xff]  ;;  %v4175_v51 = vpop.f32.mrf.mxu3 }
 0x2dd   : > { %4481 = vmatpush.msra.mxu3 %v1350_v62  ;;  %4423 = vmatpush.msra.mxu0 %v550_v63  ;;  %v678_v30 = vld [vmem:[%s8220_s29 + $0x920] sm:$0xff] }
 0x2de   : > { %4442 = vmatpush.msra.mxu1 %v822_v12  ;;  %4463 = vmatpush.msra.mxu2 %v1062_v56  ;;  %v1190_v46 = vld [vmem:[%s8220_s29 + $0x1920] sm:$0xff]  ;;  %v4176_v12 = vadd.f32 %v4175_v51, %v4156_v55 }
 0x2df   : > { %4482 = vmatpush.msra.mxu3 %v1334_v1  ;;  %4424 = vmatpush.msra.mxu0 %v534_v17  ;;  %v662_v53 = vld [vmem:[%s8220_s29 + $0x8a0] sm:$0xff] }
 0x2e0   : > { %4443 = vmatpush.msra.mxu1 %v806_v3  ;;  %4464 = vmatpush.msra.mxu2 %v1046_v18  ;;  %v902_v45 = vld [vmem:[%s8220_s29 + $0x1020] sm:$0xff]  ;;  %v7300_v17 = vadd.f32 %v4176_v12, %v360_v61  ;;  %v9275_v61 = vld [vmem:[%s8212_s17 + $0x10] sm:$0xff] }
 0x2e1   : > { %4483 = vmatpush.msra.mxu3 %v1318_v4  ;;  %4425 = vmatpush.msra.mxu0 %v518_v5  ;;  %v1174_v58 = vld [vmem:[%s8220_s29 + $0x18a0] sm:$0xff] }
 0x2e2   : > { %4444 = vmatpush.msra.mxu1 %v790_v6  ;;  %4465 = vmatpush.msra.mxu2 %v1030_v23  ;;  %v1654_v57 = vld [vmem:[%s8220_s29 + $0x27a0] sm:$0xff]  ;;  %7316 = vst [vmem:[%s8235_s7 + $0x10] sm:$0xff] %v7300_v17 }
 0x2e3   : > { %4484 = vmatpush.msra.mxu3 %v1302_v8  ;;  %4426 = vmatpush.msra.mxu0 %v502_v29  ;;  %v646_v60 = vld [vmem:[%s8220_s29 + $0x820] sm:$0xff] }
 0x2e4   : > { %4445 = vmatpush.msra.mxu1 %v774_v9  ;;  %4466 = vmatpush.msra.mxu2 %v1014_v10  ;;  %v1158_v49 = vld [vmem:[%s8220_s29 + $0x1820] sm:$0xff] }
 0x2e5   : > { %4485 = vmatpush.msra.mxu3 %v1286_v11  ;;  %4427 = vmatpush.msra.mxu0 %v486_v32  ;;  %v1638_v62 = vld [vmem:[%s8220_s29 + $0x2720] sm:$0xff] }
 0x2e6   : > { %4446 = vmatpush.msra.mxu1 %v758_v13  ;;  %4467 = vmatpush.msra.mxu2 %v998_v36  ;;  %v1910_v63 = vld [vmem:[%s8220_s29 + $0x2fa0] sm:$0xff] }
 0x2e7   : > { %4486 = vmatpush.msra.mxu3 %v1270_v14  ;;  %4428 = vmatpush.msra.mxu0 %v470_v37  ;;  %v2422_v56 = vld [vmem:[%s8220_s29 + $0x3fa0] sm:$0xff] }
 0x2e8   : > { %4447 = vmatpush.msra.mxu1 %v742_v38  ;;  %4468 = vmatpush.msra.mxu2 %v982_v19  ;;  %v1622_v1 = vld [vmem:[%s8220_s29 + $0x26a0] sm:$0xff] }
 0x2e9   : > { %4487 = vmatpush.msra.mxu3 %v1254_v20  ;;  %4429 = vmatpush.msra.mxu0 %v454_v22  ;;  %v2134_v3 = vld [vmem:[%s8220_s29 + $0x36a0] sm:$0xff] }
 0x2ea   : > { %4448 = vmatpush.msra.mxu1 %v726_v24  ;;  %4469 = vmatpush.msra.mxu2 %v966_v26  ;;  %v2406_v18 = vld [vmem:[%s8220_s29 + $0x3f20] sm:$0xff] }
 0x2eb   : > { %4488 = vmatpush.msra.mxu3 %v1238_v27  ;;  %4430 = vmatpush.msra.mxu0 %v438_v31  ;;  %v1606_v4 = vld [vmem:[%s8220_s29 + $0x2620] sm:$0xff] }
 0x2ec   : > { %4449 = vmatpush.msra.mxu1 %v710_v16  ;;  %4470 = vmatpush.msra.mxu2 %v950_v34  ;;  %v1878_v5 = vld [vmem:[%s8220_s29 + $0x2ea0] sm:$0xff] }
 0x2ed   : > { %4489 = vmatpush.msra.mxu3 %v1222_v39  ;;  %4431 = vmatpush.msra.mxu0 %v422_v40  ;;  %v2118_v6 = vld [vmem:[%s8220_s29 + $0x3620] sm:$0xff] }
 0x2ee   : > { %4450 = vmatpush.msra.mxu1 %v694_v43  ;;  %4471 = vmatpush.msra.mxu2 %v934_v41  ;;  %v1590_v23 = vld [vmem:[%s8220_s29 + $0x25a0] sm:$0xff] }
 0x2ef   : > { %4490 = vmatpush.msra.mxu3 %v1206_v42  ;;  %4432 = vmatpush.msra.mxu0 %v406_v48  ;;  %v1862_v8 = vld [vmem:[%s8220_s29 + $0x2e20] sm:$0xff] }
 0x2f0   : > { %4451 = vmatpush.msra.mxu1 %v678_v30  ;;  %4472 = vmatpush.msra.mxu2 %v918_v50  ;;  %v2374_v29 = vld [vmem:[%s8220_s29 + $0x3e20] sm:$0xff] }
 0x2f1   : > { %4491 = vmatpush.msra.mxu3 %v1190_v46  ;;  %4433 = vmatpush.msra.mxu0 %v390_v52  ;;  %v1574_v9 = vld [vmem:[%s8220_s29 + $0x2520] sm:$0xff] }
 0x2f2   : > { %4452 = vmatpush.msra.mxu1 %v662_v53  ;;  %4473 = vmatpush.msra.mxu2 %v902_v45  ;;  %v1846_v10 = vld [vmem:[%s8220_s29 + $0x2da0] sm:$0xff] }
 0x2f3   : > { %4492 = vmatpush.msra.mxu3 %v1174_v58  ;;  %4498 = vmatpush.msrb.mxu0 %v1654_v57  ;;  %v2086_v11 = vld [vmem:[%s8220_s29 + $0x3520] sm:$0xff] }
 0x2f4   : > { %4538 = vmatpush.msrb.mxu2 %v2166_v59  ;;  %4453 = vmatpush.msra.mxu1 %v646_v60  ;;  %v2358_v32 = vld [vmem:[%s8220_s29 + $0x3da0] sm:$0xff] }
 0x2f5   : > { %4493 = vmatpush.msra.mxu3 %v1158_v49  ;;  %4499 = vmatpush.msrb.mxu0 %v1638_v62  ;;  %v1558_v13 = vld [vmem:[%s8220_s29 + $0x24a0] sm:$0xff] }
 0x2f6   : > { %4518 = vmatpush.msrb.mxu1 %v1910_v63  ;;  %4539 = vmatpush.msrb.mxu2 %v2150_v0  ;;  %v2070_v36 = vld [vmem:[%s8220_s29 + $0x34a0] sm:$0xff] }
 0x2f7   : > { %4558 = vmatpush.msrb.mxu3 %v2422_v56  ;;  %4500 = vmatpush.msrb.mxu0 %v1622_v1  ;;  %v2342_v14 = vld [vmem:[%s8220_s29 + $0x3d20] sm:$0xff]  ;;  %v9287_v56 = vld [vmem:[%s8212_s17 + $0x18] sm:$0xff] }
 0x2f8   : > { %4519 = vmatpush.msrb.mxu1 %v1894_v2  ;;  %4540 = vmatpush.msrb.mxu2 %v2134_v3  ;;  %v1542_v15 = vld [vmem:[%s8220_s29 + $0x2420] sm:$0xff] }
 0x2f9   : > { %4559 = vmatpush.msrb.mxu3 %v2406_v18  ;;  %4501 = vmatpush.msrb.mxu0 %v1606_v4  ;;  %v1814_v37 = vld [vmem:[%s8220_s29 + $0x2ca0] sm:$0xff]  ;;  %v9295_v18 = vld [vmem:[%s8212_s17 + $0x8] sm:$0xff] }
 0x2fa   : > { %4520 = vmatpush.msrb.mxu1 %v1878_v5  ;;  %4541 = vmatpush.msrb.mxu2 %v2118_v6  ;;  %v2054_v38 = vld [vmem:[%s8220_s29 + $0x3420] sm:$0xff] }
 0x2fb   : > { %4560 = vmatpush.msrb.mxu3 %v2390_v7  ;;  %4502 = vmatpush.msrb.mxu0 %v1590_v23  ;;  %v2326_v19 = vld [vmem:[%s8220_s29 + $0x3ca0] sm:$0xff] }
 0x2fc   : > { %4521 = vmatpush.msrb.mxu1 %v1862_v8  ;;  %4542 = vmatpush.msrb.mxu2 %v2102_v28  ;;  %v1526_v20 = vld [vmem:[%s8220_s29 + $0x23a0] sm:$0xff] }
 0x2fd   : > { %4561 = vmatpush.msrb.mxu3 %v2374_v29  ;;  %4503 = vmatpush.msrb.mxu0 %v1574_v9  ;;  %v1798_v22 = vld [vmem:[%s8220_s29 + $0x2c20] sm:$0xff]  ;;  %v9307_v9 = vld [vmem:[%s8212_s17 + $0x30] sm:$0xff] }
 0x2fe   : > { %4522 = vmatpush.msrb.mxu1 %v1846_v10  ;;  %4543 = vmatpush.msrb.mxu2 %v2086_v11  ;;  %v2038_v24 = vld [vmem:[%s8220_s29 + $0x33a0] sm:$0xff] }
 0x2ff   : > { %4562 = vmatpush.msrb.mxu3 %v2358_v32  ;;  %4504 = vmatpush.msrb.mxu0 %v1558_v13  ;;  %v2310_v25 = vld [vmem:[%s8220_s29 + $0x3c20] sm:$0xff] }
 0x300   : > { %4523 = vmatpush.msrb.mxu1 %v1830_v35  ;;  %4544 = vmatpush.msrb.mxu2 %v2070_v36  ;;  %v1510_v26 = vld [vmem:[%s8220_s29 + $0x2320] sm:$0xff]  ;;  %v9319_v36 = vld [vmem:[%s8212_s17 + $0x38] sm:$0xff] }
 0x301   : > { %4563 = vmatpush.msrb.mxu3 %v2342_v14  ;;  %4505 = vmatpush.msrb.mxu0 %v1542_v15  ;;  %v1782_v27 = vld [vmem:[%s8220_s29 + $0x2ba0] sm:$0xff] }
 0x302   : > { %4524 = vmatpush.msrb.mxu1 %v1814_v37  ;;  %4545 = vmatpush.msrb.mxu2 %v2054_v38  ;;  %v2022_v31 = vld [vmem:[%s8220_s29 + $0x3320] sm:$0xff] }
 0x303   : > { %4564 = vmatpush.msrb.mxu3 %v2326_v19  ;;  %4506 = vmatpush.msrb.mxu0 %v1526_v20  ;;  %v2294_v16 = vld [vmem:[%s8220_s29 + $0x3ba0] sm:$0xff]  ;;  %v9327_v19 = vld [vmem:[%s8212_s17 + $0x28] sm:$0xff] }
 0x304   : > { %4525 = vmatpush.msrb.mxu1 %v1798_v22  ;;  %4546 = vmatpush.msrb.mxu2 %v2038_v24  ;;  %v1494_v33 = vld [vmem:[%s8220_s29 + $0x22a0] sm:$0xff] }
 0x305   : > { %4565 = vmatpush.msrb.mxu3 %v2310_v25  ;;  %v1766_v34 = vld [vmem:[%s8220_s29 + $0x2b20] sm:$0xff]  ;;  %4507 = vmatpush.msrb.mxu0 %v1510_v26 }
 0x306   : > { %4526 = vmatpush.msrb.mxu1 %v1782_v27  ;;  %v2006_v39 = vld [vmem:[%s8220_s29 + $0x32a0] sm:$0xff]  ;;  %4547 = vmatpush.msrb.mxu2 %v2022_v31 }
 0x307   : > { %v2278_v21 = vld [vmem:[%s8220_s29 + $0x3b20] sm:$0xff]  ;;  %4566 = vmatpush.msrb.mxu3 %v2294_v16  ;;  %4508 = vmatpush.msrb.mxu0 %v1494_v33 }
 0x308   : > { %v1478_v40 = vld [vmem:[%s8220_s29 + $0x2220] sm:$0xff]  ;;  %4527 = vmatpush.msrb.mxu1 %v1766_v34  ;;  %4548 = vmatpush.msrb.mxu2 %v2006_v39 }
 0x309   : > { %v1750_v43 = vld [vmem:[%s8220_s29 + $0x2aa0] sm:$0xff]  ;;  %4567 = vmatpush.msrb.mxu3 %v2278_v21  ;;  %4509 = vmatpush.msrb.mxu0 %v1478_v40 }
 0x30a   : > { %v1990_v41 = vld [vmem:[%s8220_s29 + $0x3220] sm:$0xff]  ;;  %4528 = vmatpush.msrb.mxu1 %v1750_v43  ;;  %4474 = vmatmul.f32.vlgmr.msra.gmra.mxu2 %v9275_v61 }
 0x30b   : > { %v2262_v42 = vld [vmem:[%s8220_s29 + $0x3aa0] sm:$0xff]  ;;  %4549 = vmatpush.msrb.mxu2 %v1990_v41  ;;  %4494 = vmatmul.f32.vlgmr.msra.gmra.mxu3 %v9287_v56 }
 0x30c   : > { %v1462_v44 = vld [vmem:[%s8220_s29 + $0x21a0] sm:$0xff]  ;;  %4568 = vmatpush.msrb.mxu3 %v2262_v42  ;;  %4454 = vmatmul.f32.vlgmr.msra.gmra.mxu1 %v9295_v18 }
 0x30d   : > { %v1734_v48 = vld [vmem:[%s8220_s29 + $0x2a20] sm:$0xff]  ;;  %4510 = vmatpush.msrb.mxu0 %v1462_v44 }
 0x30e   : > { %v1974_v30 = vld [vmem:[%s8220_s29 + $0x31a0] sm:$0xff]  ;;  %4529 = vmatpush.msrb.mxu1 %v1734_v48 }
 0x30f   : > { %v2246_v50 = vld [vmem:[%s8220_s29 + $0x3a20] sm:$0xff]  ;;  %4550 = vmatpush.msrb.mxu2 %v1974_v30 }
 0x310   : > { %v1446_v46 = vld [vmem:[%s8220_s29 + $0x2120] sm:$0xff]  ;;  %4569 = vmatpush.msrb.mxu3 %v2246_v50 }
 0x311   : > { %v1718_v47 = vld [vmem:[%s8220_s29 + $0x29a0] sm:$0xff]  ;;  %4511 = vmatpush.msrb.mxu0 %v1446_v46 }
 0x312   : > { %v1958_v52 = vld [vmem:[%s8220_s29 + $0x3120] sm:$0xff]  ;;  %4530 = vmatpush.msrb.mxu1 %v1718_v47 }
 0x313   : > { %v2230_v53 = vld [vmem:[%s8220_s29 + $0x39a0] sm:$0xff]  ;;  %4551 = vmatpush.msrb.mxu2 %v1958_v52 }
 0x314   : > { %v1430_v54 = vld [vmem:[%s8220_s29 + $0x20a0] sm:$0xff]  ;;  %4570 = vmatpush.msrb.mxu3 %v2230_v53 }
 0x315   : > { %v1702_v45 = vld [vmem:[%s8220_s29 + $0x2920] sm:$0xff]  ;;  %4512 = vmatpush.msrb.mxu0 %v1430_v54 }
 0x316   : > { %v1942_v58 = vld [vmem:[%s8220_s29 + $0x30a0] sm:$0xff]  ;;  %4531 = vmatpush.msrb.mxu1 %v1702_v45 }
 0x317   : > { %v2214_v55 = vld [vmem:[%s8220_s29 + $0x3920] sm:$0xff]  ;;  %4552 = vmatpush.msrb.mxu2 %v1942_v58 }
 0x318   : > { %v1414_v57 = vld [vmem:[%s8220_s29 + $0x2020] sm:$0xff]  ;;  %4571 = vmatpush.msrb.mxu3 %v2214_v55 }
 0x319   : > { %v1686_v59 = vld [vmem:[%s8220_s29 + $0x28a0] sm:$0xff]  ;;  %4513 = vmatpush.msrb.mxu0 %v1414_v57 }
 0x31a   : > { %v1926_v60 = vld [vmem:[%s8220_s29 + $0x3020] sm:$0xff]  ;;  %4532 = vmatpush.msrb.mxu1 %v1686_v59 }
 0x31b   : > { %v2198_v49 = vld [vmem:[%s8220_s29 + $0x38a0] sm:$0xff]  ;;  %4553 = vmatpush.msrb.mxu2 %v1926_v60 }
 0x31c   : > { %v2678_v51 = vld [vmem:[%s8220_s29 + $0x47a0] sm:$0xff]  ;;  %4572 = vmatpush.msrb.mxu3 %v2198_v49  ;;  %4554 = vmatmul.f32.vlgmr.msrb.gmra.mxu2 %v9307_v9 }
 0x31d   : > { %v3190_v62 = vld [vmem:[%s8220_s29 + $0x57a0] sm:$0xff] }
 0x31e   : > { %v1670_v63 = vld [vmem:[%s8220_s29 + $0x2820] sm:$0xff]  ;;  %4618 = vmatpush.msra.mxu2 %v3190_v62 }
 0x31f   : > { %v9282_v12 = vld [vmem:[%s8212_s17] sm:$0xff]  ;;  %4533 = vmatpush.msrb.mxu1 %v1670_v63 }
 0x320   : > { %4434 = vmatmul.f32.vlgmr.msra.gmra.mxu0 %v9282_v12  ;;  %v2182_v0 = vld [vmem:[%s8220_s29 + $0x3820] sm:$0xff]  ;;  %4534 = vmatmul.f32.vlgmr.msrb.gmra.mxu1 %v9327_v19 }
 0x321   : > { %4578 = vmatpush.msra.mxu0 %v2678_v51  ;;  %v2662_v1 = vld [vmem:[%s8220_s29 + $0x4720] sm:$0xff]  ;;  %4573 = vmatpush.msrb.mxu3 %v2182_v0 }
 0x322   : > { %v2934_v2 = vld [vmem:[%s8220_s29 + $0x4fa0] sm:$0xff]  ;;  %4574 = vmatmul.f32.vlgmr.msrb.gmra.mxu3 %v9319_v36 }
 0x323   : > { %v3174_v17 = vld [vmem:[%s8220_s29 + $0x5720] sm:$0xff]  ;;  %4579 = vmatpush.msra.mxu0 %v2662_v1  ;;  %4598 = vmatpush.msra.mxu1 %v2934_v2 }
 0x324   : > { %v3446_v3 = vld [vmem:[%s8220_s29 + $0x5fa0] sm:$0xff]  ;;  %4619 = vmatpush.msra.mxu2 %v3174_v17  ;;  %v4215_v17 = vpop.f32.mrf.mxu1 }
 0x325   : > { %v2646_v4 = vld [vmem:[%s8220_s29 + $0x46a0] sm:$0xff]  ;;  %4638 = vmatpush.msra.mxu3 %v3446_v3 }
 0x326   : > { %v2918_v5 = vld [vmem:[%s8220_s29 + $0x4f20] sm:$0xff]  ;;  %4580 = vmatpush.msra.mxu0 %v2646_v4 }
 0x327   : > { %v3158_v6 = vld [vmem:[%s8220_s29 + $0x56a0] sm:$0xff]  ;;  %4599 = vmatpush.msra.mxu1 %v2918_v5  ;;  %v4195_v5 = vpop.f32.mrf.mxu0 }
 0x328   : > { %v3430_v7 = vld [vmem:[%s8220_s29 + $0x5f20] sm:$0xff]  ;;  %4620 = vmatpush.msra.mxu2 %v3158_v6  ;;  %v631_v6 = vld [vmem:[%s8220_s29 + $0x7a8] sm:$0xff] }
 0x329   : > { %v2630_v23 = vld [vmem:[%s8220_s29 + $0x4620] sm:$0xff]  ;;  %4639 = vmatpush.msra.mxu3 %v3430_v7  ;;  %v1143_v7 = vld [vmem:[%s8220_s29 + $0x17a8] sm:$0xff] }
 0x32a   : > { %v2902_v8 = vld [vmem:[%s8220_s29 + $0x4ea0] sm:$0xff]  ;;  %4581 = vmatpush.msra.mxu0 %v2630_v23  ;;  %v4216_v23 = vadd.f32 %v4215_v17, %v4195_v5 }
 0x32b   : > { %v3142_v28 = vld [vmem:[%s8220_s29 + $0x5620] sm:$0xff]  ;;  %4600 = vmatpush.msra.mxu1 %v2902_v8 }
 0x32c   : > { %v3414_v29 = vld [vmem:[%s8220_s29 + $0x5ea0] sm:$0xff]  ;;  %4621 = vmatpush.msra.mxu2 %v3142_v28 }
 0x32d   : > { %v2614_v10 = vld [vmem:[%s8220_s29 + $0x45a0] sm:$0xff]  ;;  %4640 = vmatpush.msra.mxu3 %v3414_v29  ;;  %v4235_v29 = vpop.f32.mrf.mxu2 }
 0x32e   : > { %v2886_v11 = vld [vmem:[%s8220_s29 + $0x4e20] sm:$0xff]  ;;  %4582 = vmatpush.msra.mxu0 %v2614_v10 }
 0x32f   : > { %v3126_v32 = vld [vmem:[%s8220_s29 + $0x55a0] sm:$0xff]  ;;  %4601 = vmatpush.msra.mxu1 %v2886_v11  ;;  %v9379_v11 = vld [vmem:[%s8212_s17 + $0x50] sm:$0xff] }
 0x330   : > { %v9314_v13 = vld [vmem:[%s8212_s17 + $0x20] sm:$0xff]  ;;  %4622 = vmatpush.msra.mxu2 %v3126_v32  ;;  %v615_v32 = vld [vmem:[%s8220_s29 + $0x728] sm:$0xff] }
 0x331   : > { %4514 = vmatmul.f32.vlgmr.msrb.gmra.mxu0 %v9314_v13  ;;  %v3398_v35 = vld [vmem:[%s8220_s29 + $0x5e20] sm:$0xff] }
 0x332   : > { %v2598_v14 = vld [vmem:[%s8220_s29 + $0x4520] sm:$0xff]  ;;  %4641 = vmatpush.msra.mxu3 %v3398_v35  ;;  %v887_v35 = vld [vmem:[%s8220_s29 + $0xfa8] sm:$0xff] }
 0x333   : > { %v2870_v15 = vld [vmem:[%s8220_s29 + $0x4da0] sm:$0xff]  ;;  %4583 = vmatpush.msra.mxu0 %v2598_v14  ;;  %v1127_v14 = vld [vmem:[%s8220_s29 + $0x1728] sm:$0xff] }
 0x334   : > { %v3110_v37 = vld [vmem:[%s8220_s29 + $0x5520] sm:$0xff]  ;;  %4602 = vmatpush.msra.mxu1 %v2870_v15  ;;  %v1399_v15 = vld [vmem:[%s8220_s29 + $0x1fa8] sm:$0xff] }
 0x335   : > { %v3382_v38 = vld [vmem:[%s8220_s29 + $0x5da0] sm:$0xff]  ;;  %4623 = vmatpush.msra.mxu2 %v3110_v37  ;;  %v4236_v37 = vadd.f32 %v4235_v29, %v4216_v23  ;;  %v983_v23 = vld [vmem:[%s8220_s29 + $0x12a8] sm:$0xff] }
 0x336   : > { %v2582_v20 = vld [vmem:[%s8220_s29 + $0x44a0] sm:$0xff]  ;;  %4642 = vmatpush.msra.mxu3 %v3382_v38  ;;  %v9387_v38 = vld [vmem:[%s8212_s17 + $0x48] sm:$0xff] }
 0x337   : > { %v2854_v22 = vld [vmem:[%s8220_s29 + $0x4d20] sm:$0xff]  ;;  %4584 = vmatpush.msra.mxu0 %v2582_v20  ;;  %v9391_v20 = vld [vmem:[%s8212_s17 + $0x58] sm:$0xff]  ;;  %v727_v29 = vld [vmem:[%s8220_s29 + $0xaa8] sm:$0xff] }
 0x338   : > { %v3094_v24 = vld [vmem:[%s8220_s29 + $0x54a0] sm:$0xff]  ;;  %4603 = vmatpush.msra.mxu1 %v2854_v22  ;;  %v599_v22 = vld [vmem:[%s8220_s29 + $0x6a8] sm:$0xff] }
 0x339   : > { %v3366_v25 = vld [vmem:[%s8220_s29 + $0x5d20] sm:$0xff]  ;;  %4624 = vmatpush.msra.mxu2 %v3094_v24  ;;  %v871_v24 = vld [vmem:[%s8220_s29 + $0xf28] sm:$0xff] }
 0x33a   : > { %v2566_v26 = vld [vmem:[%s8220_s29 + $0x4420] sm:$0xff]  ;;  %4643 = vmatpush.msra.mxu3 %v3366_v25  ;;  %v4255_v25 = vpop.f32.mrf.mxu3 }
 0x33b   : > { %v2838_v27 = vld [vmem:[%s8220_s29 + $0x4ca0] sm:$0xff]  ;;  %4585 = vmatpush.msra.mxu0 %v2566_v26  ;;  %v1111_v26 = vld [vmem:[%s8220_s29 + $0x16a8] sm:$0xff] }
 0x33c   : > { %v3078_v31 = vld [vmem:[%s8220_s29 + $0x5420] sm:$0xff]  ;;  %4604 = vmatpush.msra.mxu1 %v2838_v27  ;;  %v1383_v27 = vld [vmem:[%s8220_s29 + $0x1f28] sm:$0xff] }
 0x33d   : > { %v3350_v16 = vld [vmem:[%s8220_s29 + $0x5ca0] sm:$0xff]  ;;  %4625 = vmatpush.msra.mxu2 %v3078_v31  ;;  %v583_v31 = vld [vmem:[%s8220_s29 + $0x628] sm:$0xff] }
 0x33e   : > { %v2550_v33 = vld [vmem:[%s8220_s29 + $0x43a0] sm:$0xff]  ;;  %4644 = vmatpush.msra.mxu3 %v3350_v16  ;;  %v855_v16 = vld [vmem:[%s8220_s29 + $0xea8] sm:$0xff] }
 0x33f   : > { %v2822_v34 = vld [vmem:[%s8220_s29 + $0x4c20] sm:$0xff]  ;;  %4586 = vmatpush.msra.mxu0 %v2550_v33  ;;  %v1095_v33 = vld [vmem:[%s8220_s29 + $0x1628] sm:$0xff] }
 0x340   : > { %v3062_v39 = vld [vmem:[%s8220_s29 + $0x53a0] sm:$0xff]  ;;  %4605 = vmatpush.msra.mxu1 %v2822_v34  ;;  %v1367_v34 = vld [vmem:[%s8220_s29 + $0x1ea8] sm:$0xff] }
 0x341   : > { %v3334_v21 = vld [vmem:[%s8220_s29 + $0x5c20] sm:$0xff]  ;;  %4626 = vmatpush.msra.mxu2 %v3062_v39  ;;  %v4256_v39 = vadd.f32 %v4255_v25, %v4236_v37  ;;  %v711_v37 = vld [vmem:[%s8220_s29 + $0xa28] sm:$0xff] }
 0x342   : > { %v2534_v40 = vld [vmem:[%s8220_s29 + $0x4320] sm:$0xff]  ;;  %4645 = vmatpush.msra.mxu3 %v3334_v21  ;;  %v567_v21 = vld [vmem:[%s8220_s29 + $0x5a8] sm:$0xff]  ;;  %v4335_v5 = vpop.f32.mrf.mxu3 }
 0x343   : > { %v2806_v43 = vld [vmem:[%s8220_s29 + $0x4ba0] sm:$0xff]  ;;  %4587 = vmatpush.msra.mxu0 %v2534_v40  ;;  %v839_v40 = vld [vmem:[%s8220_s29 + $0xe28] sm:$0xff] }
 0x344   : > { %v3046_v41 = vld [vmem:[%s8220_s29 + $0x5320] sm:$0xff]  ;;  %4606 = vmatpush.msra.mxu1 %v2806_v43  ;;  %v4275_v43 = vpop.f32.mrf.mxu0  ;;  %v1223_v25 = vld [vmem:[%s8220_s29 + $0x1a28] sm:$0xff] }
 0x345   : > { %v3318_v42 = vld [vmem:[%s8220_s29 + $0x5ba0] sm:$0xff]  ;;  %4627 = vmatpush.msra.mxu2 %v3046_v41  ;;  %v1079_v41 = vld [vmem:[%s8220_s29 + $0x15a8] sm:$0xff] }
 0x346   : > { %v2518_v44 = vld [vmem:[%s8220_s29 + $0x42a0] sm:$0xff]  ;;  %4646 = vmatpush.msra.mxu3 %v3318_v42  ;;  %v1351_v42 = vld [vmem:[%s8220_s29 + $0x1e28] sm:$0xff] }
 0x347   : > { %v2790_v48 = vld [vmem:[%s8220_s29 + $0x4b20] sm:$0xff]  ;;  %4588 = vmatpush.msra.mxu0 %v2518_v44  ;;  %v551_v44 = vld [vmem:[%s8220_s29 + $0x528] sm:$0xff] }
 0x348   : > { %v3030_v30 = vld [vmem:[%s8220_s29 + $0x52a0] sm:$0xff]  ;;  %4607 = vmatpush.msra.mxu1 %v2790_v48  ;;  %v823_v48 = vld [vmem:[%s8220_s29 + $0xda8] sm:$0xff] }
 0x349   : > { %v3302_v50 = vld [vmem:[%s8220_s29 + $0x5b20] sm:$0xff]  ;;  %4628 = vmatpush.msra.mxu2 %v3030_v30  ;;  %v4276_v30 = vadd.f32 %v4275_v43, %v4256_v39  ;;  %v407_v39 = vld [vmem:[%s8220_s29 + $0xa8] sm:$0xff] }
 0x34a   : > { %v2502_v46 = vld [vmem:[%s8220_s29 + $0x4220] sm:$0xff]  ;;  %4647 = vmatpush.msra.mxu3 %v3302_v50  ;;  %v1063_v50 = vld [vmem:[%s8220_s29 + $0x1528] sm:$0xff] }
 0x34b   : > { %v2774_v47 = vld [vmem:[%s8220_s29 + $0x4aa0] sm:$0xff]  ;;  %4589 = vmatpush.msra.mxu0 %v2502_v46  ;;  %v1335_v46 = vld [vmem:[%s8220_s29 + $0x1da8] sm:$0xff] }
 0x34c   : > { %v3014_v52 = vld [vmem:[%s8220_s29 + $0x5220] sm:$0xff]  ;;  %4608 = vmatpush.msra.mxu1 %v2774_v47  ;;  %v4295_v47 = vpop.f32.mrf.mxu1  ;;  %v1191_v43 = vld [vmem:[%s8220_s29 + $0x1928] sm:$0xff] }
 0x34d   : > { %v3286_v53 = vld [vmem:[%s8220_s29 + $0x5aa0] sm:$0xff]  ;;  %4629 = vmatpush.msra.mxu2 %v3014_v52  ;;  %v535_v52 = vld [vmem:[%s8220_s29 + $0x4a8] sm:$0xff] }
 0x34e   : > { %v2486_v54 = vld [vmem:[%s8220_s29 + $0x41a0] sm:$0xff]  ;;  %4648 = vmatpush.msra.mxu3 %v3286_v53  ;;  %v807_v53 = vld [vmem:[%s8220_s29 + $0xd28] sm:$0xff] }
 0x34f   : > { %v2758_v45 = vld [vmem:[%s8220_s29 + $0x4a20] sm:$0xff]  ;;  %4590 = vmatpush.msra.mxu0 %v2486_v54  ;;  %v1047_v54 = vld [vmem:[%s8220_s29 + $0x14a8] sm:$0xff] }
 0x350   : > { %v2998_v58 = vld [vmem:[%s8220_s29 + $0x51a0] sm:$0xff]  ;;  %4609 = vmatpush.msra.mxu1 %v2758_v45  ;;  %v1319_v45 = vld [vmem:[%s8220_s29 + $0x1d28] sm:$0xff] }
 0x351   : > { %v3270_v55 = vld [vmem:[%s8220_s29 + $0x5a20] sm:$0xff]  ;;  %4630 = vmatpush.msra.mxu2 %v2998_v58  ;;  %v519_v58 = vld [vmem:[%s8220_s29 + $0x428] sm:$0xff] }
 0x352   : > { %v2470_v57 = vld [vmem:[%s8220_s29 + $0x4120] sm:$0xff]  ;;  %4649 = vmatpush.msra.mxu3 %v3270_v55  ;;  %v791_v55 = vld [vmem:[%s8220_s29 + $0xca8] sm:$0xff] }
 0x353   : > { %v2742_v59 = vld [vmem:[%s8220_s29 + $0x49a0] sm:$0xff]  ;;  %4591 = vmatpush.msra.mxu0 %v2470_v57  ;;  %v4296_v57 = vadd.f32 %v4295_v47, %v4276_v30  ;;  %v903_v30 = vld [vmem:[%s8220_s29 + $0x1028] sm:$0xff] }
 0x354   : > { %v2982_v60 = vld [vmem:[%s8220_s29 + $0x5120] sm:$0xff]  ;;  %4610 = vmatpush.msra.mxu1 %v2742_v59  ;;  %v1031_v59 = vld [vmem:[%s8220_s29 + $0x1428] sm:$0xff] }
 0x355   : > { %v3254_v49 = vld [vmem:[%s8220_s29 + $0x59a0] sm:$0xff]  ;;  %4631 = vmatpush.msra.mxu2 %v2982_v60  ;;  %v1303_v60 = vld [vmem:[%s8220_s29 + $0x1ca8] sm:$0xff] }
 0x356   : > { %v2454_v51 = vld [vmem:[%s8220_s29 + $0x40a0] sm:$0xff]  ;;  %4650 = vmatpush.msra.mxu3 %v3254_v49  ;;  %v4315_v49 = vpop.f32.mrf.mxu2  ;;  %v1655_v47 = vld [vmem:[%s8220_s29 + $0x27a8] sm:$0xff] }
 0x357   : > { %v2726_v62 = vld [vmem:[%s8220_s29 + $0x4920] sm:$0xff]  ;;  %4592 = vmatpush.msra.mxu0 %v2454_v51  ;;  %v503_v51 = vld [vmem:[%s8220_s29 + $0x3a8] sm:$0xff]  ;;  %v4316_v17 = vadd.f32 %v4315_v49, %v4296_v57 }
 0x358   : > { %v2966_v63 = vld [vmem:[%s8220_s29 + $0x50a0] sm:$0xff]  ;;  %4611 = vmatpush.msra.mxu1 %v2726_v62  ;;  %v775_v62 = vld [vmem:[%s8220_s29 + $0xc28] sm:$0xff] }
 0x359   : > { %v3238_v0 = vld [vmem:[%s8220_s29 + $0x5920] sm:$0xff]  ;;  %4632 = vmatpush.msra.mxu2 %v2966_v63  ;;  %v1015_v63 = vld [vmem:[%s8220_s29 + $0x13a8] sm:$0xff] }
 0x35a   : > { %v2438_v1 = vld [vmem:[%s8220_s29 + $0x4020] sm:$0xff]  ;;  %4651 = vmatpush.msra.mxu3 %v3238_v0  ;;  %v1287_v0 = vld [vmem:[%s8220_s29 + $0x1c28] sm:$0xff] }
 0x35b   : > { %v2710_v2 = vld [vmem:[%s8220_s29 + $0x48a0] sm:$0xff]  ;;  %4593 = vmatpush.msra.mxu0 %v2438_v1  ;;  %v487_v1 = vld [vmem:[%s8220_s29 + $0x328] sm:$0xff] }
 0x35c   : > { %v2950_v3 = vld [vmem:[%s8220_s29 + $0x5020] sm:$0xff]  ;;  %4612 = vmatpush.msra.mxu1 %v2710_v2  ;;  %v759_v2 = vld [vmem:[%s8220_s29 + $0xba8] sm:$0xff] }
 0x35d   : > { %v3222_v4 = vld [vmem:[%s8220_s29 + $0x58a0] sm:$0xff]  ;;  %4633 = vmatpush.msra.mxu2 %v2950_v3  ;;  %4658 = vmatpush.msrb.mxu0 %v631_v6  ;;  %v999_v3 = vld [vmem:[%s8220_s29 + $0x1328] sm:$0xff] }
 0x35e   : > { %4652 = vmatpush.msra.mxu3 %v3222_v4  ;;  %v2694_v8 = vld [vmem:[%s8220_s29 + $0x4820] sm:$0xff]  ;;  %4634 = vmatmul.f32.vlgmr.msra.gmra.mxu2 %v9379_v11  ;;  %v1271_v4 = vld [vmem:[%s8220_s29 + $0x1ba8] sm:$0xff] }
 0x35f   : > { %v3206_v28 = vld [vmem:[%s8220_s29 + $0x5820] sm:$0xff]  ;;  %4698 = vmatpush.msrb.mxu2 %v1143_v7  ;;  %4613 = vmatpush.msra.mxu1 %v2694_v8  ;;  %v471_v6 = vld [vmem:[%s8220_s29 + $0x2a8] sm:$0xff] }
 0x360   : > { %v9375_v10 = vld [vmem:[%s8212_s17 + $0x40] sm:$0xff]  ;;  %4653 = vmatpush.msra.mxu3 %v3206_v28  ;;  %4614 = vmatmul.f32.vlgmr.msra.gmra.mxu1 %v9387_v38  ;;  %v743_v7 = vld [vmem:[%s8220_s29 + $0xb28] sm:$0xff] }
 0x361   : > { %4594 = vmatmul.f32.vlgmr.msra.gmra.mxu0 %v9375_v10  ;;  %4654 = vmatmul.f32.vlgmr.msra.gmra.mxu3 %v9391_v20  ;;  %v1255_v8 = vld [vmem:[%s8220_s29 + $0x1b28] sm:$0xff] }
 0x362   : > { %4659 = vmatpush.msrb.mxu0 %v615_v32  ;;  %4678 = vmatpush.msrb.mxu1 %v887_v35  ;;  %v455_v28 = vld [vmem:[%s8220_s29 + $0x228] sm:$0xff]  ;;  %v4336_v32 = vadd.f32 %v4335_v5, %v4316_v17 }
 0x363   : > { %4699 = vmatpush.msrb.mxu2 %v1127_v14  ;;  %4718 = vmatpush.msrb.mxu3 %v1399_v15  ;;  %v967_v35 = vld [vmem:[%s8220_s29 + $0x1228] sm:$0xff] }
 0x364   : > { %4660 = vmatpush.msrb.mxu0 %v599_v22  ;;  %4679 = vmatpush.msrb.mxu1 %v871_v24  ;;  %v1239_v14 = vld [vmem:[%s8220_s29 + $0x1aa8] sm:$0xff]  ;;  %v4355_v22 = vpop.f32.mrf.mxu0 }
 0x365   : > { %4700 = vmatpush.msrb.mxu2 %v1111_v26  ;;  %4719 = vmatpush.msrb.mxu3 %v1383_v27  ;;  %v439_v15 = vld [vmem:[%s8220_s29 + $0x1a8] sm:$0xff]  ;;  %v4356_v26 = vadd.f32 %v4355_v22, %v4336_v32 }
 0x366   : > { %4661 = vmatpush.msrb.mxu0 %v583_v31  ;;  %4680 = vmatpush.msrb.mxu1 %v855_v16  ;;  %v951_v24 = vld [vmem:[%s8220_s29 + $0x11a8] sm:$0xff] }
 0x367   : > { %4701 = vmatpush.msrb.mxu2 %v1095_v33  ;;  %4720 = vmatpush.msrb.mxu3 %v1367_v34  ;;  %v423_v27 = vld [vmem:[%s8220_s29 + $0x128] sm:$0xff]  ;;  %v4375_v34 = vpop.f32.mrf.mxu1 }
 0x368   : > { %4662 = vmatpush.msrb.mxu0 %v567_v21  ;;  %4681 = vmatpush.msrb.mxu1 %v839_v40  ;;  %v695_v31 = vld [vmem:[%s8220_s29 + $0x9a8] sm:$0xff] }
 0x369   : > { %4702 = vmatpush.msrb.mxu2 %v1079_v41  ;;  %4721 = vmatpush.msrb.mxu3 %v1351_v42  ;;  %v935_v16 = vld [vmem:[%s8220_s29 + $0x1128] sm:$0xff]  ;;  %v4376_v41 = vadd.f32 %v4375_v34, %v4356_v26 }
 0x36a   : > { %4663 = vmatpush.msrb.mxu0 %v551_v44  ;;  %4682 = vmatpush.msrb.mxu1 %v823_v48  ;;  %v1207_v33 = vld [vmem:[%s8220_s29 + $0x19a8] sm:$0xff]  ;;  %v4395_v48 = vpop.f32.mrf.mxu2 }
 0x36b   : > { %4703 = vmatpush.msrb.mxu2 %v1063_v50  ;;  %4722 = vmatpush.msrb.mxu3 %v1335_v46  ;;  %v679_v21 = vld [vmem:[%s8220_s29 + $0x928] sm:$0xff]  ;;  %v4396_v46 = vadd.f32 %v4395_v48, %v4376_v41 }
 0x36c   : > { %4664 = vmatpush.msrb.mxu0 %v535_v52  ;;  %4683 = vmatpush.msrb.mxu1 %v807_v53  ;;  %v919_v40 = vld [vmem:[%s8220_s29 + $0x10a8] sm:$0xff] }
 0x36d   : > { %4704 = vmatpush.msrb.mxu2 %v1047_v54  ;;  %4723 = vmatpush.msrb.mxu3 %v1319_v45  ;;  %v391_v42 = vld [vmem:[%s8220_s29 + $0x28] sm:$0xff]  ;;  %v361_v45 = vld [vmem:[%s8235_s7 + $0x18] sm:$0xff] }
 0x36e   : > { %4665 = vmatpush.msrb.mxu0 %v519_v58  ;;  %4684 = vmatpush.msrb.mxu1 %v791_v55  ;;  %v663_v44 = vld [vmem:[%s8220_s29 + $0x8a8] sm:$0xff]  ;;  %v4415_v58 = vpop.f32.mrf.mxu3 }
 0x36f   : > { %4705 = vmatpush.msrb.mxu2 %v1031_v59  ;;  %4724 = vmatpush.msrb.mxu3 %v1303_v60  ;;  %v1175_v50 = vld [vmem:[%s8220_s29 + $0x18a8] sm:$0xff]  ;;  %v4416_v59 = vadd.f32 %v4415_v58, %v4396_v46 }
 0x370   : > { %4666 = vmatpush.msrb.mxu0 %v503_v51  ;;  %4685 = vmatpush.msrb.mxu1 %v775_v62  ;;  %v2167_v52 = vld [vmem:[%s8220_s29 + $0x37a8] sm:$0xff] }
 0x371   : > { %4706 = vmatpush.msrb.mxu2 %v1015_v63  ;;  %4725 = vmatpush.msrb.mxu3 %v1287_v0  ;;  %v647_v53 = vld [vmem:[%s8220_s29 + $0x828] sm:$0xff]  ;;  %v7301_v63 = vadd.f32 %v4416_v59, %v361_v45 }
 0x372   : > { %4667 = vmatpush.msrb.mxu0 %v487_v1  ;;  %4686 = vmatpush.msrb.mxu1 %v759_v2  ;;  %v1159_v54 = vld [vmem:[%s8220_s29 + $0x1828] sm:$0xff] }
 0x373   : > { %4707 = vmatpush.msrb.mxu2 %v999_v3  ;;  %4726 = vmatpush.msrb.mxu3 %v1271_v4  ;;  %v1639_v55 = vld [vmem:[%s8220_s29 + $0x2728] sm:$0xff]  ;;  %7317 = vst [vmem:[%s8235_s7 + $0x18] sm:$0xff] %v7301_v63 }
 0x374   : > { %4668 = vmatpush.msrb.mxu0 %v471_v6  ;;  %4687 = vmatpush.msrb.mxu1 %v743_v7  ;;  %v1911_v57 = vld [vmem:[%s8220_s29 + $0x2fa8] sm:$0xff] }
 0x375   : > { %4708 = vmatpush.msrb.mxu2 %v983_v23  ;;  %4727 = vmatpush.msrb.mxu3 %v1255_v8  ;;  %v2151_v60 = vld [vmem:[%s8220_s29 + $0x3728] sm:$0xff] }
 0x376   : > { %4669 = vmatpush.msrb.mxu0 %v455_v28  ;;  %4688 = vmatpush.msrb.mxu1 %v727_v29  ;;  %v2423_v49 = vld [vmem:[%s8220_s29 + $0x3fa8] sm:$0xff] }
 0x377   : > { %4709 = vmatpush.msrb.mxu2 %v967_v35  ;;  %4728 = vmatpush.msrb.mxu3 %v1239_v14  ;;  %v1623_v51 = vld [vmem:[%s8220_s29 + $0x26a8] sm:$0xff] }
 0x378   : > { %4670 = vmatpush.msrb.mxu0 %v439_v15  ;;  %4689 = vmatpush.msrb.mxu1 %v711_v37  ;;  %v1895_v62 = vld [vmem:[%s8220_s29 + $0x2f28] sm:$0xff] }
 0x379   : > { %4710 = vmatpush.msrb.mxu2 %v951_v24  ;;  %4729 = vmatpush.msrb.mxu3 %v1223_v25  ;;  %v2135_v0 = vld [vmem:[%s8220_s29 + $0x36a8] sm:$0xff] }
 0x37a   : > { %4671 = vmatpush.msrb.mxu0 %v423_v27  ;;  %4690 = vmatpush.msrb.mxu1 %v695_v31  ;;  %v2407_v1 = vld [vmem:[%s8220_s29 + $0x3f28] sm:$0xff] }
 0x37b   : > { %4711 = vmatpush.msrb.mxu2 %v935_v16  ;;  %4730 = vmatpush.msrb.mxu3 %v1207_v33  ;;  %v1607_v2 = vld [vmem:[%s8220_s29 + $0x2628] sm:$0xff] }
 0x37c   : > { %4672 = vmatpush.msrb.mxu0 %v407_v39  ;;  %4691 = vmatpush.msrb.mxu1 %v679_v21  ;;  %v1879_v17 = vld [vmem:[%s8220_s29 + $0x2ea8] sm:$0xff] }
 0x37d   : > { %4712 = vmatpush.msrb.mxu2 %v919_v40  ;;  %4731 = vmatpush.msrb.mxu3 %v1191_v43  ;;  %v2119_v3 = vld [vmem:[%s8220_s29 + $0x3628] sm:$0xff] }
 0x37e   : > { %4673 = vmatpush.msrb.mxu0 %v391_v42  ;;  %4692 = vmatpush.msrb.mxu1 %v663_v44  ;;  %v2391_v4 = vld [vmem:[%s8220_s29 + $0x3ea8] sm:$0xff] }
 0x37f   : > { %4713 = vmatpush.msrb.mxu2 %v903_v30  ;;  %4732 = vmatpush.msrb.mxu3 %v1175_v50  ;;  %v1591_v5 = vld [vmem:[%s8220_s29 + $0x25a8] sm:$0xff] }
 0x380   : > { %4738 = vmatpush.msra.mxu0 %v1655_v47  ;;  %4693 = vmatpush.msrb.mxu1 %v647_v53  ;;  %v1863_v6 = vld [vmem:[%s8220_s29 + $0x2e28] sm:$0xff] }
 0x381   : > { %4778 = vmatpush.msra.mxu2 %v2167_v52  ;;  %4733 = vmatpush.msrb.mxu3 %v1159_v54  ;;  %v2103_v7 = vld [vmem:[%s8220_s29 + $0x35a8] sm:$0xff] }
 0x382   : > { %4739 = vmatpush.msra.mxu0 %v1639_v55  ;;  %4758 = vmatpush.msra.mxu1 %v1911_v57  ;;  %v2375_v23 = vld [vmem:[%s8220_s29 + $0x3e28] sm:$0xff] }
 0x383   : > { %4779 = vmatpush.msra.mxu2 %v2151_v60  ;;  %4798 = vmatpush.msra.mxu3 %v2423_v49  ;;  %v1575_v8 = vld [vmem:[%s8220_s29 + $0x2528] sm:$0xff] }
 0x384   : > { %4740 = vmatpush.msra.mxu0 %v1623_v51  ;;  %4759 = vmatpush.msra.mxu1 %v1895_v62  ;;  %v1847_v28 = vld [vmem:[%s8220_s29 + $0x2da8] sm:$0xff] }
 0x385   : > { %4780 = vmatpush.msra.mxu2 %v2135_v0  ;;  %4799 = vmatpush.msra.mxu3 %v2407_v1  ;;  %v2087_v29 = vld [vmem:[%s8220_s29 + $0x3528] sm:$0xff] }
 0x386   : > { %4741 = vmatpush.msra.mxu0 %v1607_v2  ;;  %4760 = vmatpush.msra.mxu1 %v1879_v17  ;;  %v2359_v32 = vld [vmem:[%s8220_s29 + $0x3da8] sm:$0xff] }
 0x387   : > { %4781 = vmatpush.msra.mxu2 %v2119_v3  ;;  %4800 = vmatpush.msra.mxu3 %v2391_v4  ;;  %v1559_v35 = vld [vmem:[%s8220_s29 + $0x24a8] sm:$0xff] }
 0x388   : > { %4742 = vmatpush.msra.mxu0 %v1591_v5  ;;  %4761 = vmatpush.msra.mxu1 %v1863_v6  ;;  %v1831_v14 = vld [vmem:[%s8220_s29 + $0x2d28] sm:$0xff] }
 0x389   : > { %4782 = vmatpush.msra.mxu2 %v2103_v7  ;;  %4801 = vmatpush.msra.mxu3 %v2375_v23  ;;  %v2071_v15 = vld [vmem:[%s8220_s29 + $0x34a8] sm:$0xff] }
 0x38a   : > { %4743 = vmatpush.msra.mxu0 %v1575_v8  ;;  %4762 = vmatpush.msra.mxu1 %v1847_v28  ;;  %v2343_v37 = vld [vmem:[%s8220_s29 + $0x3d28] sm:$0xff] }
 0x38b   : > { %4783 = vmatpush.msra.mxu2 %v2087_v29  ;;  %4802 = vmatpush.msra.mxu3 %v2359_v32  ;;  %v1543_v22 = vld [vmem:[%s8220_s29 + $0x2428] sm:$0xff] }
 0x38c   : > { %v1815_v24 = vld [vmem:[%s8220_s29 + $0x2ca8] sm:$0xff]  ;;  %4744 = vmatpush.msra.mxu0 %v1559_v35  ;;  %4763 = vmatpush.msra.mxu1 %v1831_v14 }
 0x38d   : > { %v2055_v25 = vld [vmem:[%s8220_s29 + $0x3428] sm:$0xff]  ;;  %4784 = vmatpush.msra.mxu2 %v2071_v15  ;;  %4803 = vmatpush.msra.mxu3 %v2343_v37 }
 0x38e   : > { %v2327_v26 = vld [vmem:[%s8220_s29 + $0x3ca8] sm:$0xff]  ;;  %4745 = vmatpush.msra.mxu0 %v1543_v22  ;;  %4764 = vmatpush.msra.mxu1 %v1815_v24 }
 0x38f   : > { %v1527_v27 = vld [vmem:[%s8220_s29 + $0x23a8] sm:$0xff]  ;;  %4785 = vmatpush.msra.mxu2 %v2055_v25  ;;  %4804 = vmatpush.msra.mxu3 %v2327_v26 }
 0x390   : > { %v1799_v31 = vld [vmem:[%s8220_s29 + $0x2c28] sm:$0xff]  ;;  %4746 = vmatpush.msra.mxu0 %v1527_v27  ;;  %4714 = vmatmul.f32.vlgmr.msrb.gmra.mxu2 %v9275_v61 }
 0x391   : > { %v2039_v16 = vld [vmem:[%s8220_s29 + $0x33a8] sm:$0xff]  ;;  %4765 = vmatpush.msra.mxu1 %v1799_v31  ;;  %4674 = vmatmul.f32.vlgmr.msrb.gmra.mxu0 %v9282_v12 }
 0x392   : > { %v2311_v33 = vld [vmem:[%s8220_s29 + $0x3c28] sm:$0xff]  ;;  %4786 = vmatpush.msra.mxu2 %v2039_v16  ;;  %4734 = vmatmul.f32.vlgmr.msrb.gmra.mxu3 %v9287_v56 }
 0x393   : > { %v1511_v34 = vld [vmem:[%s8220_s29 + $0x2328] sm:$0xff]  ;;  %4805 = vmatpush.msra.mxu3 %v2311_v33  ;;  %4694 = vmatmul.f32.vlgmr.msrb.gmra.mxu1 %v9295_v18 }
 0x394   : > { %v1783_v39 = vld [vmem:[%s8220_s29 + $0x2ba8] sm:$0xff]  ;;  %4747 = vmatpush.msra.mxu0 %v1511_v34 }
 0x395   : > { %v2023_v21 = vld [vmem:[%s8220_s29 + $0x3328] sm:$0xff]  ;;  %4766 = vmatpush.msra.mxu1 %v1783_v39 }
 0x396   : > { %v2295_v40 = vld [vmem:[%s8220_s29 + $0x3ba8] sm:$0xff]  ;;  %4787 = vmatpush.msra.mxu2 %v2023_v21 }
 0x397   : > { %v1495_v43 = vld [vmem:[%s8220_s29 + $0x22a8] sm:$0xff]  ;;  %4806 = vmatpush.msra.mxu3 %v2295_v40 }
 0x398   : > { %v1767_v41 = vld [vmem:[%s8220_s29 + $0x2b28] sm:$0xff]  ;;  %4748 = vmatpush.msra.mxu0 %v1495_v43 }
 0x399   : > { %v2007_v42 = vld [vmem:[%s8220_s29 + $0x32a8] sm:$0xff]  ;;  %4767 = vmatpush.msra.mxu1 %v1767_v41 }
 0x39a   : > { %v2279_v44 = vld [vmem:[%s8220_s29 + $0x3b28] sm:$0xff]  ;;  %4788 = vmatpush.msra.mxu2 %v2007_v42 }
 0x39b   : > { %v1479_v48 = vld [vmem:[%s8220_s29 + $0x2228] sm:$0xff]  ;;  %4807 = vmatpush.msra.mxu3 %v2279_v44 }
 0x39c   : > { %v1751_v30 = vld [vmem:[%s8220_s29 + $0x2aa8] sm:$0xff]  ;;  %4749 = vmatpush.msra.mxu0 %v1479_v48 }
 0x39d   : > { %v1991_v50 = vld [vmem:[%s8220_s29 + $0x3228] sm:$0xff]  ;;  %4768 = vmatpush.msra.mxu1 %v1751_v30 }
 0x39e   : > { %v2263_v46 = vld [vmem:[%s8220_s29 + $0x3aa8] sm:$0xff]  ;;  %4789 = vmatpush.msra.mxu2 %v1991_v50 }
 0x39f   : > { %v1463_v47 = vld [vmem:[%s8220_s29 + $0x21a8] sm:$0xff]  ;;  %4808 = vmatpush.msra.mxu3 %v2263_v46 }
 0x3a0   : > { %v1735_v52 = vld [vmem:[%s8220_s29 + $0x2a28] sm:$0xff]  ;;  %4750 = vmatpush.msra.mxu0 %v1463_v47 }
 0x3a1   : > { %v1975_v53 = vld [vmem:[%s8220_s29 + $0x31a8] sm:$0xff]  ;;  %4769 = vmatpush.msra.mxu1 %v1735_v52 }
 0x3a2   : > { %v2247_v54 = vld [vmem:[%s8220_s29 + $0x3a28] sm:$0xff]  ;;  %4790 = vmatpush.msra.mxu2 %v1975_v53 }
 0x3a3   : > { %v1447_v45 = vld [vmem:[%s8220_s29 + $0x2128] sm:$0xff]  ;;  %4809 = vmatpush.msra.mxu3 %v2247_v54 }
 0x3a4   : > { %v1719_v58 = vld [vmem:[%s8220_s29 + $0x29a8] sm:$0xff]  ;;  %4751 = vmatpush.msra.mxu0 %v1447_v45 }
 0x3a5   : > { %v1959_v55 = vld [vmem:[%s8220_s29 + $0x3128] sm:$0xff]  ;;  %4770 = vmatpush.msra.mxu1 %v1719_v58 }
 0x3a6   : > { %v2231_v57 = vld [vmem:[%s8220_s29 + $0x39a8] sm:$0xff]  ;;  %4791 = vmatpush.msra.mxu2 %v1959_v55 }
 0x3a7   : > { %v1431_v59 = vld [vmem:[%s8220_s29 + $0x20a8] sm:$0xff]  ;;  %4810 = vmatpush.msra.mxu3 %v2231_v57 }
 0x3a8   : > { %v1703_v60 = vld [vmem:[%s8220_s29 + $0x2928] sm:$0xff]  ;;  %4752 = vmatpush.msra.mxu0 %v1431_v59 }
 0x3a9   : > { %v1943_v49 = vld [vmem:[%s8220_s29 + $0x30a8] sm:$0xff]  ;;  %4771 = vmatpush.msra.mxu1 %v1703_v60 }
 0x3aa   : > { %v2215_v51 = vld [vmem:[%s8220_s29 + $0x3928] sm:$0xff]  ;;  %4792 = vmatpush.msra.mxu2 %v1943_v49 }
 0x3ab   : > { %v1415_v62 = vld [vmem:[%s8220_s29 + $0x2028] sm:$0xff]  ;;  %4811 = vmatpush.msra.mxu3 %v2215_v51 }
 0x3ac   : > { %v1687_v63 = vld [vmem:[%s8220_s29 + $0x28a8] sm:$0xff]  ;;  %4753 = vmatpush.msra.mxu0 %v1415_v62 }
 0x3ad   : > { %v1927_v0 = vld [vmem:[%s8220_s29 + $0x3028] sm:$0xff]  ;;  %4772 = vmatpush.msra.mxu1 %v1687_v63  ;;  %4754 = vmatmul.f32.vlgmr.msra.gmra.mxu0 %v9314_v13 }
 0x3ae   : > { %v2199_v1 = vld [vmem:[%s8220_s29 + $0x38a8] sm:$0xff]  ;;  %4793 = vmatpush.msra.mxu2 %v1927_v0 }
 0x3af   : > { %v2679_v2 = vld [vmem:[%s8220_s29 + $0x47a8] sm:$0xff]  ;;  %4812 = vmatpush.msra.mxu3 %v2199_v1  ;;  %4794 = vmatmul.f32.vlgmr.msra.gmra.mxu2 %v9307_v9 }
 0x3b0   : > { %v3191_v17 = vld [vmem:[%s8220_s29 + $0x57a8] sm:$0xff]  ;;  %4818 = vmatpush.msrb.mxu0 %v2679_v2 }
 0x3b1   : > { %v1671_v3 = vld [vmem:[%s8220_s29 + $0x2828] sm:$0xff]  ;;  %4858 = vmatpush.msrb.mxu2 %v3191_v17 }
 0x3b2   : > { %v2183_v4 = vld [vmem:[%s8220_s29 + $0x3828] sm:$0xff]  ;;  %4773 = vmatpush.msra.mxu1 %v1671_v3  ;;  %v4455_v3 = vpop.f32.mrf.mxu1 }
 0x3b3   : > { %v2663_v61 = vld [vmem:[%s8220_s29 + $0x4728] sm:$0xff]  ;;  %4813 = vmatpush.msra.mxu3 %v2183_v4  ;;  %4774 = vmatmul.f32.vlgmr.msra.gmra.mxu1 %v9327_v19 }
 0x3b4   : > { %v2935_v5 = vld [vmem:[%s8220_s29 + $0x4fa8] sm:$0xff]  ;;  %4819 = vmatpush.msrb.mxu0 %v2663_v61  ;;  %4814 = vmatmul.f32.vlgmr.msra.gmra.mxu3 %v9319_v36 }
 0x3b5   : > { %v3175_v6 = vld [vmem:[%s8220_s29 + $0x5728] sm:$0xff]  ;;  %4838 = vmatpush.msrb.mxu1 %v2935_v5  ;;  %v4435_v5 = vpop.f32.mrf.mxu0 }
 0x3b6   : > { %v3447_v7 = vld [vmem:[%s8220_s29 + $0x5fa8] sm:$0xff]  ;;  %4859 = vmatpush.msrb.mxu2 %v3175_v6  ;;  %v632_v6 = vld [vmem:[%s8220_s29 + $0x7b0] sm:$0xff] }
 0x3b7   : > { %v2647_v12 = vld [vmem:[%s8220_s29 + $0x46a8] sm:$0xff]  ;;  %4878 = vmatpush.msrb.mxu3 %v3447_v7  ;;  %v1144_v7 = vld [vmem:[%s8220_s29 + $0x17b0] sm:$0xff] }
 0x3b8   : > { %v2919_v23 = vld [vmem:[%s8220_s29 + $0x4f28] sm:$0xff]  ;;  %4820 = vmatpush.msrb.mxu0 %v2647_v12  ;;  %v4456_v12 = vadd.f32 %v4455_v3, %v4435_v5  ;;  %v1240_v3 = vld [vmem:[%s8220_s29 + $0x1ab0] sm:$0xff] }
 0x3b9   : > { %v3159_v56 = vld [vmem:[%s8220_s29 + $0x56a8] sm:$0xff]  ;;  %4839 = vmatpush.msrb.mxu1 %v2919_v23 }
 0x3ba   : > { %v3431_v8 = vld [vmem:[%s8220_s29 + $0x5f28] sm:$0xff]  ;;  %4860 = vmatpush.msrb.mxu2 %v3159_v56 }
 0x3bb   : > { %v2631_v28 = vld [vmem:[%s8220_s29 + $0x4628] sm:$0xff]  ;;  %4879 = vmatpush.msrb.mxu3 %v3431_v8  ;;  %v4475_v8 = vpop.f32.mrf.mxu2 }
 0x3bc   : > { %v2903_v29 = vld [vmem:[%s8220_s29 + $0x4ea8] sm:$0xff]  ;;  %4821 = vmatpush.msrb.mxu0 %v2631_v28  ;;  %v616_v28 = vld [vmem:[%s8220_s29 + $0x730] sm:$0xff] }
 0x3bd   : > { %v3143_v32 = vld [vmem:[%s8220_s29 + $0x5628] sm:$0xff]  ;;  %4840 = vmatpush.msrb.mxu1 %v2903_v29  ;;  %v888_v29 = vld [vmem:[%s8220_s29 + $0xfb0] sm:$0xff] }
 0x3be   : > { %v3415_v18 = vld [vmem:[%s8220_s29 + $0x5ea8] sm:$0xff]  ;;  %4861 = vmatpush.msrb.mxu2 %v3143_v32  ;;  %v1128_v32 = vld [vmem:[%s8220_s29 + $0x1730] sm:$0xff] }
 0x3bf   : > { %v2615_v35 = vld [vmem:[%s8220_s29 + $0x45a8] sm:$0xff]  ;;  %4880 = vmatpush.msrb.mxu3 %v3415_v18  ;;  %v1400_v18 = vld [vmem:[%s8220_s29 + $0x1fb0] sm:$0xff] }
 0x3c0   : > { %v2887_v14 = vld [vmem:[%s8220_s29 + $0x4e28] sm:$0xff]  ;;  %4822 = vmatpush.msrb.mxu0 %v2615_v35  ;;  %v4476_v35 = vadd.f32 %v4475_v8, %v4456_v12  ;;  %v936_v8 = vld [vmem:[%s8220_s29 + $0x1130] sm:$0xff] }
 0x3c1   : > { %v3127_v15 = vld [vmem:[%s8220_s29 + $0x55a8] sm:$0xff]  ;;  %4841 = vmatpush.msrb.mxu1 %v2887_v14  ;;  %v4495_v14 = vpop.f32.mrf.mxu3 }
 0x3c2   : > { %v3399_v37 = vld [vmem:[%s8220_s29 + $0x5e28] sm:$0xff]  ;;  %4862 = vmatpush.msrb.mxu2 %v3127_v15  ;;  %v1112_v15 = vld [vmem:[%s8220_s29 + $0x16b0] sm:$0xff] }
 0x3c3   : > { %v2599_v9 = vld [vmem:[%s8220_s29 + $0x4528] sm:$0xff]  ;;  %4881 = vmatpush.msrb.mxu3 %v3399_v37  ;;  %v1384_v37 = vld [vmem:[%s8220_s29 + $0x1f30] sm:$0xff] }
 0x3c4   : > { %v2871_v22 = vld [vmem:[%s8220_s29 + $0x4da8] sm:$0xff]  ;;  %4823 = vmatpush.msrb.mxu0 %v2599_v9  ;;  %v584_v9 = vld [vmem:[%s8220_s29 + $0x630] sm:$0xff] }
 0x3c5   : > { %v3111_v24 = vld [vmem:[%s8220_s29 + $0x5528] sm:$0xff]  ;;  %4842 = vmatpush.msrb.mxu1 %v2871_v22  ;;  %v856_v22 = vld [vmem:[%s8220_s29 + $0xeb0] sm:$0xff] }
 0x3c6   : > { %v3383_v25 = vld [vmem:[%s8220_s29 + $0x5da8] sm:$0xff]  ;;  %4863 = vmatpush.msrb.mxu2 %v3111_v24  ;;  %v4496_v24 = vadd.f32 %v4495_v14, %v4476_v35  ;;  %v920_v35 = vld [vmem:[%s8220_s29 + $0x10b0] sm:$0xff] }
 0x3c7   : > { %v2583_v13 = vld [vmem:[%s8220_s29 + $0x44a8] sm:$0xff]  ;;  %4882 = vmatpush.msrb.mxu3 %v3383_v25  ;;  %v568_v25 = vld [vmem:[%s8220_s29 + $0x5b0] sm:$0xff] }
 0x3c8   : > { %v2855_v26 = vld [vmem:[%s8220_s29 + $0x4d28] sm:$0xff]  ;;  %4824 = vmatpush.msrb.mxu0 %v2583_v13  ;;  %v840_v13 = vld [vmem:[%s8220_s29 + $0xe30] sm:$0xff] }
 0x3c9   : > { %v3095_v36 = vld [vmem:[%s8220_s29 + $0x54a8] sm:$0xff]  ;;  %4843 = vmatpush.msrb.mxu1 %v2855_v26  ;;  %v4515_v26 = vpop.f32.mrf.mxu0  ;;  %v392_v14 = vld [vmem:[%s8220_s29 + $0x30] sm:$0xff] }
 0x3ca   : > { %v3367_v27 = vld [vmem:[%s8220_s29 + $0x5d28] sm:$0xff]  ;;  %4864 = vmatpush.msrb.mxu2 %v3095_v36  ;;  %v1080_v36 = vld [vmem:[%s8220_s29 + $0x15b0] sm:$0xff] }
 0x3cb   : > { %v2567_v31 = vld [vmem:[%s8220_s29 + $0x4428] sm:$0xff]  ;;  %4883 = vmatpush.msrb.mxu3 %v3367_v27  ;;  %v1352_v27 = vld [vmem:[%s8220_s29 + $0x1e30] sm:$0xff] }
 0x3cc   : > { %v2839_v16 = vld [vmem:[%s8220_s29 + $0x4ca8] sm:$0xff]  ;;  %4825 = vmatpush.msrb.mxu0 %v2567_v31  ;;  %v552_v31 = vld [vmem:[%s8220_s29 + $0x530] sm:$0xff] }
 0x3cd   : > { %v3079_v33 = vld [vmem:[%s8220_s29 + $0x5428] sm:$0xff]  ;;  %4844 = vmatpush.msrb.mxu1 %v2839_v16  ;;  %v824_v16 = vld [vmem:[%s8220_s29 + $0xdb0] sm:$0xff] }
 0x3ce   : > { %v3351_v19 = vld [vmem:[%s8220_s29 + $0x5ca8] sm:$0xff]  ;;  %4865 = vmatpush.msrb.mxu2 %v3079_v33  ;;  %v4516_v33 = vadd.f32 %v4515_v26, %v4496_v24  ;;  %v2168_v24 = vld [vmem:[%s8220_s29 + $0x37b0] sm:$0xff]  ;;  %v362_v26 = vld [vmem:[%s8235_s7 + $0x20] sm:$0xff] }
 0x3cf   : > { %v2551_v34 = vld [vmem:[%s8220_s29 + $0x43a8] sm:$0xff]  ;;  %4884 = vmatpush.msrb.mxu3 %v3351_v19  ;;  %v1064_v19 = vld [vmem:[%s8220_s29 + $0x1530] sm:$0xff] }
 0x3d0   : > { %v2823_v39 = vld [vmem:[%s8220_s29 + $0x4c28] sm:$0xff]  ;;  %4826 = vmatpush.msrb.mxu0 %v2551_v34  ;;  %v1336_v34 = vld [vmem:[%s8220_s29 + $0x1db0] sm:$0xff] }
 0x3d1   : > { %v3063_v21 = vld [vmem:[%s8220_s29 + $0x53a8] sm:$0xff]  ;;  %4845 = vmatpush.msrb.mxu1 %v2823_v39  ;;  %v4535_v39 = vpop.f32.mrf.mxu1 }
 0x3d2   : > { %v3335_v40 = vld [vmem:[%s8220_s29 + $0x5c28] sm:$0xff]  ;;  %4866 = vmatpush.msrb.mxu2 %v3063_v21  ;;  %v536_v21 = vld [vmem:[%s8220_s29 + $0x4b0] sm:$0xff] }
 0x3d3   : > { %v2535_v43 = vld [vmem:[%s8220_s29 + $0x4328] sm:$0xff]  ;;  %4885 = vmatpush.msrb.mxu3 %v3335_v40  ;;  %v808_v40 = vld [vmem:[%s8220_s29 + $0xd30] sm:$0xff] }
 0x3d4   : > { %v2807_v41 = vld [vmem:[%s8220_s29 + $0x4ba8] sm:$0xff]  ;;  %4827 = vmatpush.msrb.mxu0 %v2535_v43  ;;  %v1048_v43 = vld [vmem:[%s8220_s29 + $0x14b0] sm:$0xff] }
 0x3d5   : > { %v3047_v42 = vld [vmem:[%s8220_s29 + $0x5328] sm:$0xff]  ;;  %4846 = vmatpush.msrb.mxu1 %v2807_v41  ;;  %v1320_v41 = vld [vmem:[%s8220_s29 + $0x1d30] sm:$0xff] }
 0x3d6   : > { %v3319_v44 = vld [vmem:[%s8220_s29 + $0x5ba8] sm:$0xff]  ;;  %4867 = vmatpush.msrb.mxu2 %v3047_v42  ;;  %v520_v42 = vld [vmem:[%s8220_s29 + $0x430] sm:$0xff] }
 0x3d7   : > { %v2519_v48 = vld [vmem:[%s8220_s29 + $0x42a8] sm:$0xff]  ;;  %4886 = vmatpush.msrb.mxu3 %v3319_v44  ;;  %v792_v44 = vld [vmem:[%s8220_s29 + $0xcb0] sm:$0xff] }
 0x3d8   : > { %v2791_v30 = vld [vmem:[%s8220_s29 + $0x4b28] sm:$0xff]  ;;  %4828 = vmatpush.msrb.mxu0 %v2519_v48  ;;  %v4536_v48 = vadd.f32 %v4535_v39, %v4516_v33  ;;  %v2152_v33 = vld [vmem:[%s8220_s29 + $0x3730] sm:$0xff] }
 0x3d9   : > { %v3031_v50 = vld [vmem:[%s8220_s29 + $0x52a8] sm:$0xff]  ;;  %4847 = vmatpush.msrb.mxu1 %v2791_v30  ;;  %v1032_v30 = vld [vmem:[%s8220_s29 + $0x1430] sm:$0xff] }
 0x3da   : > { %v3303_v46 = vld [vmem:[%s8220_s29 + $0x5b28] sm:$0xff]  ;;  %4868 = vmatpush.msrb.mxu2 %v3031_v50  ;;  %v1304_v50 = vld [vmem:[%s8220_s29 + $0x1cb0] sm:$0xff] }
 0x3db   : > { %v2503_v47 = vld [vmem:[%s8220_s29 + $0x4228] sm:$0xff]  ;;  %4887 = vmatpush.msrb.mxu3 %v3303_v46  ;;  %v4555_v46 = vpop.f32.mrf.mxu2  ;;  %v1896_v39 = vld [vmem:[%s8220_s29 + $0x2f30] sm:$0xff] }
 0x3dc   : > { %v2775_v52 = vld [vmem:[%s8220_s29 + $0x4aa8] sm:$0xff]  ;;  %4829 = vmatpush.msrb.mxu0 %v2503_v47  ;;  %v504_v47 = vld [vmem:[%s8220_s29 + $0x3b0] sm:$0xff] }
 0x3dd   : > { %v3015_v53 = vld [vmem:[%s8220_s29 + $0x5228] sm:$0xff]  ;;  %4848 = vmatpush.msrb.mxu1 %v2775_v52  ;;  %v776_v52 = vld [vmem:[%s8220_s29 + $0xc30] sm:$0xff] }
 0x3de   : > { %v3287_v54 = vld [vmem:[%s8220_s29 + $0x5aa8] sm:$0xff]  ;;  %4869 = vmatpush.msrb.mxu2 %v3015_v53  ;;  %v1016_v53 = vld [vmem:[%s8220_s29 + $0x13b0] sm:$0xff]  ;;  %v4595_v5 = vpop.f32.mrf.mxu0 }
 0x3df   : > { %v2487_v45 = vld [vmem:[%s8220_s29 + $0x41a8] sm:$0xff]  ;;  %4888 = vmatpush.msrb.mxu3 %v3287_v54  ;;  %v1288_v54 = vld [vmem:[%s8220_s29 + $0x1c30] sm:$0xff] }
 0x3e0   : > { %v2759_v58 = vld [vmem:[%s8220_s29 + $0x4a28] sm:$0xff]  ;;  %4830 = vmatpush.msrb.mxu0 %v2487_v45  ;;  %v488_v45 = vld [vmem:[%s8220_s29 + $0x330] sm:$0xff] }
 0x3e1   : > { %v2999_v55 = vld [vmem:[%s8220_s29 + $0x51a8] sm:$0xff]  ;;  %4849 = vmatpush.msrb.mxu1 %v2759_v58  ;;  %v760_v58 = vld [vmem:[%s8220_s29 + $0xbb0] sm:$0xff] }
 0x3e2   : > { %v3271_v57 = vld [vmem:[%s8220_s29 + $0x5a28] sm:$0xff]  ;;  %4870 = vmatpush.msrb.mxu2 %v2999_v55  ;;  %v4556_v55 = vadd.f32 %v4555_v46, %v4536_v48  ;;  %v2392_v48 = vld [vmem:[%s8220_s29 + $0x3eb0] sm:$0xff] }
 0x3e3   : > { %v2471_v59 = vld [vmem:[%s8220_s29 + $0x4128] sm:$0xff]  ;;  %4889 = vmatpush.msrb.mxu3 %v3271_v57  ;;  %v1000_v57 = vld [vmem:[%s8220_s29 + $0x1330] sm:$0xff] }
 0x3e4   : > { %v2743_v60 = vld [vmem:[%s8220_s29 + $0x49a8] sm:$0xff]  ;;  %4831 = vmatpush.msrb.mxu0 %v2471_v59  ;;  %v1272_v59 = vld [vmem:[%s8220_s29 + $0x1bb0] sm:$0xff] }
 0x3e5   : > { %v2983_v49 = vld [vmem:[%s8220_s29 + $0x5128] sm:$0xff]  ;;  %4850 = vmatpush.msrb.mxu1 %v2743_v60  ;;  %v4575_v60 = vpop.f32.mrf.mxu3  ;;  %v2104_v46 = vld [vmem:[%s8220_s29 + $0x35b0] sm:$0xff] }
 0x3e6   : > { %v3255_v51 = vld [vmem:[%s8220_s29 + $0x59a8] sm:$0xff]  ;;  %4871 = vmatpush.msrb.mxu2 %v2983_v49  ;;  %v472_v49 = vld [vmem:[%s8220_s29 + $0x2b0] sm:$0xff] }
 0x3e7   : > { %v2455_v62 = vld [vmem:[%s8220_s29 + $0x40a8] sm:$0xff]  ;;  %4890 = vmatpush.msrb.mxu3 %v3255_v51  ;;  %v744_v51 = vld [vmem:[%s8220_s29 + $0xb30] sm:$0xff] }
 0x3e8   : > { %v2727_v63 = vld [vmem:[%s8220_s29 + $0x4928] sm:$0xff]  ;;  %4832 = vmatpush.msrb.mxu0 %v2455_v62  ;;  %v984_v62 = vld [vmem:[%s8220_s29 + $0x12b0] sm:$0xff] }
 0x3e9   : > { %v2967_v0 = vld [vmem:[%s8220_s29 + $0x50a8] sm:$0xff]  ;;  %4851 = vmatpush.msrb.mxu1 %v2727_v63  ;;  %v1256_v63 = vld [vmem:[%s8220_s29 + $0x1b30] sm:$0xff] }
 0x3ea   : > { %v3239_v1 = vld [vmem:[%s8220_s29 + $0x5928] sm:$0xff]  ;;  %4872 = vmatpush.msrb.mxu2 %v2967_v0  ;;  %v456_v0 = vld [vmem:[%s8220_s29 + $0x230] sm:$0xff] }
 0x3eb   : > { %v2439_v2 = vld [vmem:[%s8220_s29 + $0x4028] sm:$0xff]  ;;  %4891 = vmatpush.msrb.mxu3 %v3239_v1  ;;  %v728_v1 = vld [vmem:[%s8220_s29 + $0xab0] sm:$0xff] }
 0x3ec   : > { %v2711_v17 = vld [vmem:[%s8220_s29 + $0x48a8] sm:$0xff]  ;;  %4833 = vmatpush.msrb.mxu0 %v2439_v2  ;;  %v4576_v2 = vadd.f32 %v4575_v60, %v4556_v55  ;;  %v1832_v55 = vld [vmem:[%s8220_s29 + $0x2d30] sm:$0xff] }
 0x3ed   : > { %v2951_v4 = vld [vmem:[%s8220_s29 + $0x5028] sm:$0xff]  ;;  %4852 = vmatpush.msrb.mxu1 %v2711_v17  ;;  %4834 = vmatmul.f32.vlgmr.msrb.gmra.mxu0 %v9375_v10  ;;  %v600_v10 = vld [vmem:[%s8220_s29 + $0x6b0] sm:$0xff] }
 0x3ee   : > { %v3223_v61 = vld [vmem:[%s8220_s29 + $0x58a8] sm:$0xff]  ;;  %4873 = vmatpush.msrb.mxu2 %v2951_v4  ;;  %4898 = vmatpush.msra.mxu0 %v632_v6  ;;  %v968_v17 = vld [vmem:[%s8220_s29 + $0x1230] sm:$0xff]  ;;  %v4596_v12 = vadd.f32 %v4595_v5, %v4576_v2 }
 0x3ef   : > { %4892 = vmatpush.msrb.mxu3 %v3223_v61  ;;  %v2695_v23 = vld [vmem:[%s8220_s29 + $0x4828] sm:$0xff]  ;;  %4874 = vmatmul.f32.vlgmr.msrb.gmra.mxu2 %v9379_v11  ;;  %v872_v11 = vld [vmem:[%s8220_s29 + $0xf30] sm:$0xff] }
 0x3f0   : > { %v3207_v56 = vld [vmem:[%s8220_s29 + $0x5828] sm:$0xff]  ;;  %4938 = vmatpush.msra.mxu2 %v1144_v7  ;;  %4853 = vmatpush.msrb.mxu1 %v2695_v23  ;;  %v440_v4 = vld [vmem:[%s8220_s29 + $0x1b0] sm:$0xff] }
 0x3f1   : > { %4893 = vmatpush.msrb.mxu3 %v3207_v56  ;;  %4854 = vmatmul.f32.vlgmr.msrb.gmra.mxu1 %v9387_v38  ;;  %v1096_v38 = vld [vmem:[%s8220_s29 + $0x1630] sm:$0xff] }
 0x3f2   : > { %4894 = vmatmul.f32.vlgmr.msrb.gmra.mxu3 %v9391_v20  ;;  %4899 = vmatpush.msra.mxu0 %v616_v28  ;;  %v1368_v20 = vld [vmem:[%s8220_s29 + $0x1eb0] sm:$0xff] }
 0x3f3   : > { %4918 = vmatpush.msra.mxu1 %v888_v29  ;;  %4939 = vmatpush.msra.mxu2 %v1128_v32  ;;  %v712_v61 = vld [vmem:[%s8220_s29 + $0xa30] sm:$0xff]  ;;  %v4615_v29 = vpop.f32.mrf.mxu1 }
 0x3f4   : > { %4958 = vmatpush.msra.mxu3 %v1400_v18  ;;  %4900 = vmatpush.msra.mxu0 %v600_v10  ;;  %v952_v6 = vld [vmem:[%s8220_s29 + $0x11b0] sm:$0xff] }
 0x3f5   : > { %4919 = vmatpush.msra.mxu1 %v872_v11  ;;  %4940 = vmatpush.msra.mxu2 %v1112_v15  ;;  %v1224_v7 = vld [vmem:[%s8220_s29 + $0x1a30] sm:$0xff]  ;;  %v4616_v11 = vadd.f32 %v4615_v29, %v4596_v12 }
 0x3f6   : > { %4959 = vmatpush.msra.mxu3 %v1384_v37  ;;  %4901 = vmatpush.msra.mxu0 %v584_v9  ;;  %v424_v23 = vld [vmem:[%s8220_s29 + $0x130] sm:$0xff]  ;;  %v4635_v37 = vpop.f32.mrf.mxu2 }
 0x3f7   : > { %4920 = vmatpush.msra.mxu1 %v856_v22  ;;  %4941 = vmatpush.msra.mxu2 %v1096_v38  ;;  %v696_v56 = vld [vmem:[%s8220_s29 + $0x9b0] sm:$0xff]  ;;  %v4636_v38 = vadd.f32 %v4635_v37, %v4616_v11 }
 0x3f8   : > { %4960 = vmatpush.msra.mxu3 %v1368_v20  ;;  %4902 = vmatpush.msra.mxu0 %v568_v25  ;;  %v1208_v28 = vld [vmem:[%s8220_s29 + $0x19b0] sm:$0xff] }
 0x3f9   : > { %4921 = vmatpush.msra.mxu1 %v840_v13  ;;  %4942 = vmatpush.msra.mxu2 %v1080_v36  ;;  %v408_v32 = vld [vmem:[%s8220_s29 + $0xb0] sm:$0xff]  ;;  %v4655_v36 = vpop.f32.mrf.mxu3 }
 0x3fa   : > { %4961 = vmatpush.msra.mxu3 %v1352_v27  ;;  %4903 = vmatpush.msra.mxu0 %v552_v31  ;;  %v680_v18 = vld [vmem:[%s8220_s29 + $0x930] sm:$0xff] }
 0x3fb   : > { %4922 = vmatpush.msra.mxu1 %v824_v16  ;;  %4943 = vmatpush.msra.mxu2 %v1064_v19  ;;  %v1192_v10 = vld [vmem:[%s8220_s29 + $0x1930] sm:$0xff]  ;;  %v4656_v16 = vadd.f32 %v4655_v36, %v4636_v38 }
 0x3fc   : > { %4962 = vmatpush.msra.mxu3 %v1336_v34  ;;  %4904 = vmatpush.msra.mxu0 %v536_v21  ;;  %v664_v15 = vld [vmem:[%s8220_s29 + $0x8b0] sm:$0xff] }
 0x3fd   : > { %4923 = vmatpush.msra.mxu1 %v808_v40  ;;  %4944 = vmatpush.msra.mxu2 %v1048_v43  ;;  %v904_v9 = vld [vmem:[%s8220_s29 + $0x1030] sm:$0xff]  ;;  %v7302_v21 = vadd.f32 %v4656_v16, %v362_v26  ;;  %v9730_v16 = vld [vmem:[%s8212_s17] sm:$0xff] }
 0x3fe   : > { %4963 = vmatpush.msra.mxu3 %v1320_v41  ;;  %4905 = vmatpush.msra.mxu0 %v520_v42  ;;  %v1176_v22 = vld [vmem:[%s8220_s29 + $0x18b0] sm:$0xff] }
 0x3ff   : > { %4924 = vmatpush.msra.mxu1 %v792_v44  ;;  %4945 = vmatpush.msra.mxu2 %v1032_v30  ;;  %v1656_v20 = vld [vmem:[%s8220_s29 + $0x27b0] sm:$0xff]  ;;  %7318 = vst [vmem:[%s8235_s7 + $0x20] sm:$0xff] %v7302_v21 }
 0x400   : > { %4964 = vmatpush.msra.mxu3 %v1304_v50  ;;  %4906 = vmatpush.msra.mxu0 %v504_v47  ;;  %v648_v25 = vld [vmem:[%s8220_s29 + $0x830] sm:$0xff] }
 0x401   : > { %4925 = vmatpush.msra.mxu1 %v776_v52  ;;  %4946 = vmatpush.msra.mxu2 %v1016_v53  ;;  %v1160_v13 = vld [vmem:[%s8220_s29 + $0x1830] sm:$0xff] }
 0x402   : > { %4965 = vmatpush.msra.mxu3 %v1288_v54  ;;  %4907 = vmatpush.msra.mxu0 %v488_v45  ;;  %v1640_v27 = vld [vmem:[%s8220_s29 + $0x2730] sm:$0xff] }
 0x403   : > { %4926 = vmatpush.msra.mxu1 %v760_v58  ;;  %4947 = vmatpush.msra.mxu2 %v1000_v57  ;;  %v1912_v31 = vld [vmem:[%s8220_s29 + $0x2fb0] sm:$0xff] }
 0x404   : > { %4966 = vmatpush.msra.mxu3 %v1272_v59  ;;  %4908 = vmatpush.msra.mxu0 %v472_v49  ;;  %v2424_v19 = vld [vmem:[%s8220_s29 + $0x3fb0] sm:$0xff] }
 0x405   : > { %4927 = vmatpush.msra.mxu1 %v744_v51  ;;  %4948 = vmatpush.msra.mxu2 %v984_v62  ;;  %v1624_v34 = vld [vmem:[%s8220_s29 + $0x26b0] sm:$0xff] }
 0x406   : > { %4967 = vmatpush.msra.mxu3 %v1256_v63  ;;  %4909 = vmatpush.msra.mxu0 %v456_v0  ;;  %v2136_v40 = vld [vmem:[%s8220_s29 + $0x36b0] sm:$0xff] }
 0x407   : > { %4928 = vmatpush.msra.mxu1 %v728_v1  ;;  %4949 = vmatpush.msra.mxu2 %v968_v17  ;;  %v2408_v43 = vld [vmem:[%s8220_s29 + $0x3f30] sm:$0xff] }
 0x408   : > { %4968 = vmatpush.msra.mxu3 %v1240_v3  ;;  %4910 = vmatpush.msra.mxu0 %v440_v4  ;;  %v1608_v41 = vld [vmem:[%s8220_s29 + $0x2630] sm:$0xff] }
 0x409   : > { %4929 = vmatpush.msra.mxu1 %v712_v61  ;;  %4950 = vmatpush.msra.mxu2 %v952_v6  ;;  %v1880_v42 = vld [vmem:[%s8220_s29 + $0x2eb0] sm:$0xff] }
 0x40a   : > { %4969 = vmatpush.msra.mxu3 %v1224_v7  ;;  %4911 = vmatpush.msra.mxu0 %v424_v23  ;;  %v2120_v44 = vld [vmem:[%s8220_s29 + $0x3630] sm:$0xff] }
 0x40b   : > { %4930 = vmatpush.msra.mxu1 %v696_v56  ;;  %4951 = vmatpush.msra.mxu2 %v936_v8  ;;  %v1592_v30 = vld [vmem:[%s8220_s29 + $0x25b0] sm:$0xff] }
 0x40c   : > { %4970 = vmatpush.msra.mxu3 %v1208_v28  ;;  %4912 = vmatpush.msra.mxu0 %v408_v32  ;;  %v1864_v50 = vld [vmem:[%s8220_s29 + $0x2e30] sm:$0xff] }
 0x40d   : > { %4931 = vmatpush.msra.mxu1 %v680_v18  ;;  %4952 = vmatpush.msra.mxu2 %v920_v35  ;;  %v2376_v47 = vld [vmem:[%s8220_s29 + $0x3e30] sm:$0xff] }
 0x40e   : > { %4971 = vmatpush.msra.mxu3 %v1192_v10  ;;  %4913 = vmatpush.msra.mxu0 %v392_v14  ;;  %v1576_v52 = vld [vmem:[%s8220_s29 + $0x2530] sm:$0xff] }
 0x40f   : > { %4932 = vmatpush.msra.mxu1 %v664_v15  ;;  %4953 = vmatpush.msra.mxu2 %v904_v9  ;;  %v1848_v53 = vld [vmem:[%s8220_s29 + $0x2db0] sm:$0xff] }
 0x410   : > { %4972 = vmatpush.msra.mxu3 %v1176_v22  ;;  %4978 = vmatpush.msrb.mxu0 %v1656_v20  ;;  %v2088_v54 = vld [vmem:[%s8220_s29 + $0x3530] sm:$0xff] }
 0x411   : > { %5018 = vmatpush.msrb.mxu2 %v2168_v24  ;;  %4933 = vmatpush.msra.mxu1 %v648_v25  ;;  %v2360_v45 = vld [vmem:[%s8220_s29 + $0x3db0] sm:$0xff] }
 0x412   : > { %4973 = vmatpush.msra.mxu3 %v1160_v13  ;;  %4979 = vmatpush.msrb.mxu0 %v1640_v27  ;;  %v1560_v58 = vld [vmem:[%s8220_s29 + $0x24b0] sm:$0xff] }
 0x413   : > { %4998 = vmatpush.msrb.mxu1 %v1912_v31  ;;  %5019 = vmatpush.msrb.mxu2 %v2152_v33  ;;  %v2072_v57 = vld [vmem:[%s8220_s29 + $0x34b0] sm:$0xff] }
 0x414   : > { %5038 = vmatpush.msrb.mxu3 %v2424_v19  ;;  %4980 = vmatpush.msrb.mxu0 %v1624_v34  ;;  %v2344_v59 = vld [vmem:[%s8220_s29 + $0x3d30] sm:$0xff]  ;;  %v9735_v19 = vld [vmem:[%s8212_s17 + $0x18] sm:$0xff] }
 0x415   : > { %4999 = vmatpush.msrb.mxu1 %v1896_v39  ;;  %5020 = vmatpush.msrb.mxu2 %v2136_v40  ;;  %v1544_v60 = vld [vmem:[%s8220_s29 + $0x2430] sm:$0xff] }
 0x416   : > { %5039 = vmatpush.msrb.mxu3 %v2408_v43  ;;  %4981 = vmatpush.msrb.mxu0 %v1608_v41  ;;  %v1816_v49 = vld [vmem:[%s8220_s29 + $0x2cb0] sm:$0xff]  ;;  %v9743_v43 = vld [vmem:[%s8212_s17 + $0x8] sm:$0xff] }
 0x417   : > { %5000 = vmatpush.msrb.mxu1 %v1880_v42  ;;  %5021 = vmatpush.msrb.mxu2 %v2120_v44  ;;  %v2056_v51 = vld [vmem:[%s8220_s29 + $0x3430] sm:$0xff] }
 0x418   : > { %5040 = vmatpush.msrb.mxu3 %v2392_v48  ;;  %4982 = vmatpush.msrb.mxu0 %v1592_v30  ;;  %v2328_v62 = vld [vmem:[%s8220_s29 + $0x3cb0] sm:$0xff] }
 0x419   : > { %5001 = vmatpush.msrb.mxu1 %v1864_v50  ;;  %5022 = vmatpush.msrb.mxu2 %v2104_v46  ;;  %v1528_v63 = vld [vmem:[%s8220_s29 + $0x23b0] sm:$0xff] }
 0x41a   : > { %5041 = vmatpush.msrb.mxu3 %v2376_v47  ;;  %4983 = vmatpush.msrb.mxu0 %v1576_v52  ;;  %v1800_v0 = vld [vmem:[%s8220_s29 + $0x2c30] sm:$0xff] }
 0x41b   : > { %5002 = vmatpush.msrb.mxu1 %v1848_v53  ;;  %5023 = vmatpush.msrb.mxu2 %v2088_v54  ;;  %v2040_v1 = vld [vmem:[%s8220_s29 + $0x33b0] sm:$0xff] }
 0x41c   : > { %5042 = vmatpush.msrb.mxu3 %v2360_v45  ;;  %4984 = vmatpush.msrb.mxu0 %v1560_v58  ;;  %v2312_v2 = vld [vmem:[%s8220_s29 + $0x3c30] sm:$0xff]  ;;  %v9762_v58 = vld [vmem:[%s8212_s17 + $0x20] sm:$0xff] }
 0x41d   : > { %5003 = vmatpush.msrb.mxu1 %v1832_v55  ;;  %5024 = vmatpush.msrb.mxu2 %v2072_v57  ;;  %v1512_v17 = vld [vmem:[%s8220_s29 + $0x2330] sm:$0xff]  ;;  %v9767_v57 = vld [vmem:[%s8212_s17 + $0x38] sm:$0xff] }
 0x41e   : > { %5043 = vmatpush.msrb.mxu3 %v2344_v59  ;;  %4985 = vmatpush.msrb.mxu0 %v1544_v60  ;;  %v1784_v3 = vld [vmem:[%s8220_s29 + $0x2bb0] sm:$0xff] }
 0x41f   : > { %5004 = vmatpush.msrb.mxu1 %v1816_v49  ;;  %5025 = vmatpush.msrb.mxu2 %v2056_v51  ;;  %v2024_v4 = vld [vmem:[%s8220_s29 + $0x3330] sm:$0xff] }
 0x420   : > { %5044 = vmatpush.msrb.mxu3 %v2328_v62  ;;  %4986 = vmatpush.msrb.mxu0 %v1528_v63  ;;  %v2296_v61 = vld [vmem:[%s8220_s29 + $0x3bb0] sm:$0xff]  ;;  %v9775_v62 = vld [vmem:[%s8212_s17 + $0x28] sm:$0xff] }
 0x421   : > { %5005 = vmatpush.msrb.mxu1 %v1800_v0  ;;  %5026 = vmatpush.msrb.mxu2 %v2040_v1  ;;  %v1496_v5 = vld [vmem:[%s8220_s29 + $0x22b0] sm:$0xff] }
 0x422   : > { %5045 = vmatpush.msrb.mxu3 %v2312_v2  ;;  %v1768_v6 = vld [vmem:[%s8220_s29 + $0x2b30] sm:$0xff]  ;;  %4987 = vmatpush.msrb.mxu0 %v1512_v17 }
 0x423   : > { %5006 = vmatpush.msrb.mxu1 %v1784_v3  ;;  %v2008_v7 = vld [vmem:[%s8220_s29 + $0x32b0] sm:$0xff]  ;;  %5027 = vmatpush.msrb.mxu2 %v2024_v4 }
 0x424   : > { %v2280_v12 = vld [vmem:[%s8220_s29 + $0x3b30] sm:$0xff]  ;;  %5046 = vmatpush.msrb.mxu3 %v2296_v61  ;;  %4988 = vmatpush.msrb.mxu0 %v1496_v5 }
 0x425   : > { %v1480_v23 = vld [vmem:[%s8220_s29 + $0x2230] sm:$0xff]  ;;  %5007 = vmatpush.msrb.mxu1 %v1768_v6  ;;  %5028 = vmatpush.msrb.mxu2 %v2008_v7 }
 0x426   : > { %v1752_v56 = vld [vmem:[%s8220_s29 + $0x2ab0] sm:$0xff]  ;;  %5047 = vmatpush.msrb.mxu3 %v2280_v12  ;;  %4989 = vmatpush.msrb.mxu0 %v1480_v23 }
 0x427   : > { %v1992_v8 = vld [vmem:[%s8220_s29 + $0x3230] sm:$0xff]  ;;  %5008 = vmatpush.msrb.mxu1 %v1752_v56  ;;  %4914 = vmatmul.f32.vlgmr.msra.gmra.mxu0 %v9730_v16 }
 0x428   : > { %v2264_v28 = vld [vmem:[%s8220_s29 + $0x3ab0] sm:$0xff]  ;;  %5029 = vmatpush.msrb.mxu2 %v1992_v8  ;;  %4974 = vmatmul.f32.vlgmr.msra.gmra.mxu3 %v9735_v19 }
 0x429   : > { %v1464_v29 = vld [vmem:[%s8220_s29 + $0x21b0] sm:$0xff]  ;;  %5048 = vmatpush.msrb.mxu3 %v2264_v28  ;;  %4934 = vmatmul.f32.vlgmr.msra.gmra.mxu1 %v9743_v43 }
 0x42a   : > { %v1736_v32 = vld [vmem:[%s8220_s29 + $0x2a30] sm:$0xff]  ;;  %4990 = vmatpush.msrb.mxu0 %v1464_v29 }
 0x42b   : > { %v1976_v18 = vld [vmem:[%s8220_s29 + $0x31b0] sm:$0xff]  ;;  %5009 = vmatpush.msrb.mxu1 %v1736_v32 }
 0x42c   : > { %v2248_v35 = vld [vmem:[%s8220_s29 + $0x3a30] sm:$0xff]  ;;  %5030 = vmatpush.msrb.mxu2 %v1976_v18 }
 0x42d   : > { %v1448_v10 = vld [vmem:[%s8220_s29 + $0x2130] sm:$0xff]  ;;  %5049 = vmatpush.msrb.mxu3 %v2248_v35 }
 0x42e   : > { %v1720_v11 = vld [vmem:[%s8220_s29 + $0x29b0] sm:$0xff]  ;;  %4991 = vmatpush.msrb.mxu0 %v1448_v10 }
 0x42f   : > { %v1960_v14 = vld [vmem:[%s8220_s29 + $0x3130] sm:$0xff]  ;;  %5010 = vmatpush.msrb.mxu1 %v1720_v11 }
 0x430   : > { %v2232_v15 = vld [vmem:[%s8220_s29 + $0x39b0] sm:$0xff]  ;;  %5031 = vmatpush.msrb.mxu2 %v1960_v14 }
 0x431   : > { %v1432_v37 = vld [vmem:[%s8220_s29 + $0x20b0] sm:$0xff]  ;;  %5050 = vmatpush.msrb.mxu3 %v2232_v15 }
 0x432   : > { %v1704_v9 = vld [vmem:[%s8220_s29 + $0x2930] sm:$0xff]  ;;  %4992 = vmatpush.msrb.mxu0 %v1432_v37 }
 0x433   : > { %v1944_v22 = vld [vmem:[%s8220_s29 + $0x30b0] sm:$0xff]  ;;  %5011 = vmatpush.msrb.mxu1 %v1704_v9 }
 0x434   : > { %v2216_v38 = vld [vmem:[%s8220_s29 + $0x3930] sm:$0xff]  ;;  %5032 = vmatpush.msrb.mxu2 %v1944_v22 }
 0x435   : > { %v1416_v20 = vld [vmem:[%s8220_s29 + $0x2030] sm:$0xff]  ;;  %5051 = vmatpush.msrb.mxu3 %v2216_v38 }
 0x436   : > { %v1688_v24 = vld [vmem:[%s8220_s29 + $0x28b0] sm:$0xff]  ;;  %4993 = vmatpush.msrb.mxu0 %v1416_v20 }
 0x437   : > { %v1928_v25 = vld [vmem:[%s8220_s29 + $0x3030] sm:$0xff]  ;;  %5012 = vmatpush.msrb.mxu1 %v1688_v24  ;;  %4994 = vmatmul.f32.vlgmr.msrb.gmra.mxu0 %v9762_v58 }
 0x438   : > { %v2200_v13 = vld [vmem:[%s8220_s29 + $0x38b0] sm:$0xff]  ;;  %5033 = vmatpush.msrb.mxu2 %v1928_v25 }
 0x439   : > { %v9723_v26 = vld [vmem:[%s8212_s17 + $0x10] sm:$0xff]  ;;  %5052 = vmatpush.msrb.mxu3 %v2200_v13 }
 0x43a   : > { %4954 = vmatmul.f32.vlgmr.msra.gmra.mxu2 %v9723_v26  ;;  %v2680_v36 = vld [vmem:[%s8220_s29 + $0x47b0] sm:$0xff] }
 0x43b   : > { %v3192_v27 = vld [vmem:[%s8220_s29 + $0x57b0] sm:$0xff]  ;;  %5058 = vmatpush.msra.mxu0 %v2680_v36 }
 0x43c   : > { %v1672_v31 = vld [vmem:[%s8220_s29 + $0x2830] sm:$0xff]  ;;  %5098 = vmatpush.msra.mxu2 %v3192_v27 }
 0x43d   : > { %v2184_v33 = vld [vmem:[%s8220_s29 + $0x3830] sm:$0xff]  ;;  %5013 = vmatpush.msrb.mxu1 %v1672_v31 }
 0x43e   : > { %v2664_v34 = vld [vmem:[%s8220_s29 + $0x4730] sm:$0xff]  ;;  %5053 = vmatpush.msrb.mxu3 %v2184_v33  ;;  %5014 = vmatmul.f32.vlgmr.msrb.gmra.mxu1 %v9775_v62 }
 0x43f   : > { %v2936_v39 = vld [vmem:[%s8220_s29 + $0x4fb0] sm:$0xff]  ;;  %5059 = vmatpush.msra.mxu0 %v2664_v34  ;;  %5054 = vmatmul.f32.vlgmr.msrb.gmra.mxu3 %v9767_v57 }
 0x440   : > { %v3176_v21 = vld [vmem:[%s8220_s29 + $0x5730] sm:$0xff]  ;;  %5078 = vmatpush.msra.mxu1 %v2936_v39 }
 0x441   : > { %v3448_v40 = vld [vmem:[%s8220_s29 + $0x5fb0] sm:$0xff]  ;;  %5099 = vmatpush.msra.mxu2 %v3176_v21  ;;  %v4695_v21 = vpop.f32.mrf.mxu1 }
 0x442   : > { %v2648_v41 = vld [vmem:[%s8220_s29 + $0x46b0] sm:$0xff]  ;;  %5118 = vmatpush.msra.mxu3 %v3448_v40 }
 0x443   : > { %v2920_v42 = vld [vmem:[%s8220_s29 + $0x4f30] sm:$0xff]  ;;  %5060 = vmatpush.msra.mxu0 %v2648_v41 }
 0x444   : > { %v3160_v44 = vld [vmem:[%s8220_s29 + $0x56b0] sm:$0xff]  ;;  %5079 = vmatpush.msra.mxu1 %v2920_v42  ;;  %v4675_v42 = vpop.f32.mrf.mxu0 }
 0x445   : > { %v3432_v48 = vld [vmem:[%s8220_s29 + $0x5f30] sm:$0xff]  ;;  %5100 = vmatpush.msra.mxu2 %v3160_v44  ;;  %v633_v44 = vld [vmem:[%s8220_s29 + $0x7b8] sm:$0xff] }
 0x446   : > { %v2632_v30 = vld [vmem:[%s8220_s29 + $0x4630] sm:$0xff]  ;;  %5119 = vmatpush.msra.mxu3 %v3432_v48  ;;  %v1145_v48 = vld [vmem:[%s8220_s29 + $0x17b8] sm:$0xff] }
 0x447   : > { %v2904_v50 = vld [vmem:[%s8220_s29 + $0x4eb0] sm:$0xff]  ;;  %5061 = vmatpush.msra.mxu0 %v2632_v30  ;;  %v4696_v30 = vadd.f32 %v4695_v21, %v4675_v42 }
 0x448   : > { %v3144_v46 = vld [vmem:[%s8220_s29 + $0x5630] sm:$0xff]  ;;  %5080 = vmatpush.msra.mxu1 %v2904_v50 }
 0x449   : > { %v3416_v47 = vld [vmem:[%s8220_s29 + $0x5eb0] sm:$0xff]  ;;  %5101 = vmatpush.msra.mxu2 %v3144_v46 }
 0x44a   : > { %v9755_v52 = vld [vmem:[%s8212_s17 + $0x30] sm:$0xff]  ;;  %5120 = vmatpush.msra.mxu3 %v3416_v47  ;;  %v4715_v47 = vpop.f32.mrf.mxu2 }
 0x44b   : > { %5034 = vmatmul.f32.vlgmr.msrb.gmra.mxu2 %v9755_v52  ;;  %v2616_v53 = vld [vmem:[%s8220_s29 + $0x45b0] sm:$0xff] }
 0x44c   : > { %v2888_v54 = vld [vmem:[%s8220_s29 + $0x4e30] sm:$0xff]  ;;  %5062 = vmatpush.msra.mxu0 %v2616_v53  ;;  %v9823_v53 = vld [vmem:[%s8212_s17 + $0x40] sm:$0xff] }
 0x44d   : > { %v3128_v45 = vld [vmem:[%s8220_s29 + $0x55b0] sm:$0xff]  ;;  %5081 = vmatpush.msra.mxu1 %v2888_v54 }
 0x44e   : > { %v3400_v55 = vld [vmem:[%s8220_s29 + $0x5e30] sm:$0xff]  ;;  %5102 = vmatpush.msra.mxu2 %v3128_v45  ;;  %v617_v45 = vld [vmem:[%s8220_s29 + $0x738] sm:$0xff] }
 0x44f   : > { %v2600_v59 = vld [vmem:[%s8220_s29 + $0x4530] sm:$0xff]  ;;  %5121 = vmatpush.msra.mxu3 %v3400_v55  ;;  %v889_v55 = vld [vmem:[%s8220_s29 + $0xfb8] sm:$0xff] }
 0x450   : > { %v2872_v60 = vld [vmem:[%s8220_s29 + $0x4db0] sm:$0xff]  ;;  %5063 = vmatpush.msra.mxu0 %v2600_v59  ;;  %v1129_v59 = vld [vmem:[%s8220_s29 + $0x1738] sm:$0xff] }
 0x451   : > { %v3112_v49 = vld [vmem:[%s8220_s29 + $0x5530] sm:$0xff]  ;;  %5082 = vmatpush.msra.mxu1 %v2872_v60  ;;  %v1401_v60 = vld [vmem:[%s8220_s29 + $0x1fb8] sm:$0xff] }
 0x452   : > { %v3384_v51 = vld [vmem:[%s8220_s29 + $0x5db0] sm:$0xff]  ;;  %5103 = vmatpush.msra.mxu2 %v3112_v49  ;;  %v4716_v49 = vadd.f32 %v4715_v47, %v4696_v30  ;;  %v985_v30 = vld [vmem:[%s8220_s29 + $0x12b8] sm:$0xff] }
 0x453   : > { %v2584_v63 = vld [vmem:[%s8220_s29 + $0x44b0] sm:$0xff]  ;;  %5122 = vmatpush.msra.mxu3 %v3384_v51  ;;  %v9835_v51 = vld [vmem:[%s8212_s17 + $0x48] sm:$0xff]  ;;  %v729_v47 = vld [vmem:[%s8220_s29 + $0xab8] sm:$0xff] }
 0x454   : > { %v2856_v0 = vld [vmem:[%s8220_s29 + $0x4d30] sm:$0xff]  ;;  %5064 = vmatpush.msra.mxu0 %v2584_v63  ;;  %v9839_v63 = vld [vmem:[%s8212_s17 + $0x58] sm:$0xff] }
 0x455   : > { %v3096_v1 = vld [vmem:[%s8220_s29 + $0x54b0] sm:$0xff]  ;;  %5083 = vmatpush.msra.mxu1 %v2856_v0  ;;  %v601_v0 = vld [vmem:[%s8220_s29 + $0x6b8] sm:$0xff] }
 0x456   : > { %v3368_v2 = vld [vmem:[%s8220_s29 + $0x5d30] sm:$0xff]  ;;  %5104 = vmatpush.msra.mxu2 %v3096_v1  ;;  %v873_v1 = vld [vmem:[%s8220_s29 + $0xf38] sm:$0xff] }
 0x457   : > { %v2568_v17 = vld [vmem:[%s8220_s29 + $0x4430] sm:$0xff]  ;;  %5123 = vmatpush.msra.mxu3 %v3368_v2  ;;  %v4735_v2 = vpop.f32.mrf.mxu3 }
 0x458   : > { %v2840_v3 = vld [vmem:[%s8220_s29 + $0x4cb0] sm:$0xff]  ;;  %5065 = vmatpush.msra.mxu0 %v2568_v17  ;;  %v1113_v17 = vld [vmem:[%s8220_s29 + $0x16b8] sm:$0xff] }
 0x459   : > { %v3080_v4 = vld [vmem:[%s8220_s29 + $0x5430] sm:$0xff]  ;;  %5084 = vmatpush.msra.mxu1 %v2840_v3  ;;  %v1385_v3 = vld [vmem:[%s8220_s29 + $0x1f38] sm:$0xff] }
 0x45a   : > { %v3352_v61 = vld [vmem:[%s8220_s29 + $0x5cb0] sm:$0xff]  ;;  %5105 = vmatpush.msra.mxu2 %v3080_v4  ;;  %v585_v4 = vld [vmem:[%s8220_s29 + $0x638] sm:$0xff] }
 0x45b   : > { %v2552_v5 = vld [vmem:[%s8220_s29 + $0x43b0] sm:$0xff]  ;;  %5124 = vmatpush.msra.mxu3 %v3352_v61  ;;  %v857_v61 = vld [vmem:[%s8220_s29 + $0xeb8] sm:$0xff] }
 0x45c   : > { %v2824_v6 = vld [vmem:[%s8220_s29 + $0x4c30] sm:$0xff]  ;;  %5066 = vmatpush.msra.mxu0 %v2552_v5  ;;  %v1097_v5 = vld [vmem:[%s8220_s29 + $0x1638] sm:$0xff] }
 0x45d   : > { %v3064_v7 = vld [vmem:[%s8220_s29 + $0x53b0] sm:$0xff]  ;;  %5085 = vmatpush.msra.mxu1 %v2824_v6  ;;  %v1369_v6 = vld [vmem:[%s8220_s29 + $0x1eb8] sm:$0xff] }
 0x45e   : > { %v3336_v12 = vld [vmem:[%s8220_s29 + $0x5c30] sm:$0xff]  ;;  %5106 = vmatpush.msra.mxu2 %v3064_v7  ;;  %v4736_v7 = vadd.f32 %v4735_v2, %v4716_v49  ;;  %v713_v49 = vld [vmem:[%s8220_s29 + $0xa38] sm:$0xff] }
 0x45f   : > { %v2536_v23 = vld [vmem:[%s8220_s29 + $0x4330] sm:$0xff]  ;;  %5125 = vmatpush.msra.mxu3 %v3336_v12  ;;  %v569_v12 = vld [vmem:[%s8220_s29 + $0x5b8] sm:$0xff]  ;;  %v4815_v42 = vpop.f32.mrf.mxu3 }
 0x460   : > { %v2808_v56 = vld [vmem:[%s8220_s29 + $0x4bb0] sm:$0xff]  ;;  %5067 = vmatpush.msra.mxu0 %v2536_v23  ;;  %v841_v23 = vld [vmem:[%s8220_s29 + $0xe38] sm:$0xff] }
 0x461   : > { %v3048_v8 = vld [vmem:[%s8220_s29 + $0x5330] sm:$0xff]  ;;  %5086 = vmatpush.msra.mxu1 %v2808_v56  ;;  %v4755_v56 = vpop.f32.mrf.mxu0  ;;  %v1225_v2 = vld [vmem:[%s8220_s29 + $0x1a38] sm:$0xff] }
 0x462   : > { %v3320_v28 = vld [vmem:[%s8220_s29 + $0x5bb0] sm:$0xff]  ;;  %5107 = vmatpush.msra.mxu2 %v3048_v8  ;;  %v1081_v8 = vld [vmem:[%s8220_s29 + $0x15b8] sm:$0xff] }
 0x463   : > { %v2520_v29 = vld [vmem:[%s8220_s29 + $0x42b0] sm:$0xff]  ;;  %5126 = vmatpush.msra.mxu3 %v3320_v28  ;;  %v1353_v28 = vld [vmem:[%s8220_s29 + $0x1e38] sm:$0xff] }
 0x464   : > { %v2792_v32 = vld [vmem:[%s8220_s29 + $0x4b30] sm:$0xff]  ;;  %5068 = vmatpush.msra.mxu0 %v2520_v29  ;;  %v553_v29 = vld [vmem:[%s8220_s29 + $0x538] sm:$0xff] }
 0x465   : > { %v3032_v18 = vld [vmem:[%s8220_s29 + $0x52b0] sm:$0xff]  ;;  %5087 = vmatpush.msra.mxu1 %v2792_v32  ;;  %v825_v32 = vld [vmem:[%s8220_s29 + $0xdb8] sm:$0xff] }
 0x466   : > { %v3304_v35 = vld [vmem:[%s8220_s29 + $0x5b30] sm:$0xff]  ;;  %5108 = vmatpush.msra.mxu2 %v3032_v18  ;;  %v4756_v18 = vadd.f32 %v4755_v56, %v4736_v7  ;;  %v409_v7 = vld [vmem:[%s8220_s29 + $0xb8] sm:$0xff] }
 0x467   : > { %v2504_v10 = vld [vmem:[%s8220_s29 + $0x4230] sm:$0xff]  ;;  %5127 = vmatpush.msra.mxu3 %v3304_v35  ;;  %v1065_v35 = vld [vmem:[%s8220_s29 + $0x1538] sm:$0xff] }
 0x468   : > { %v2776_v11 = vld [vmem:[%s8220_s29 + $0x4ab0] sm:$0xff]  ;;  %5069 = vmatpush.msra.mxu0 %v2504_v10  ;;  %v1337_v10 = vld [vmem:[%s8220_s29 + $0x1db8] sm:$0xff] }
 0x469   : > { %v3016_v14 = vld [vmem:[%s8220_s29 + $0x5230] sm:$0xff]  ;;  %5088 = vmatpush.msra.mxu1 %v2776_v11  ;;  %v4775_v11 = vpop.f32.mrf.mxu1  ;;  %v1193_v56 = vld [vmem:[%s8220_s29 + $0x1938] sm:$0xff] }
 0x46a   : > { %v3288_v15 = vld [vmem:[%s8220_s29 + $0x5ab0] sm:$0xff]  ;;  %5109 = vmatpush.msra.mxu2 %v3016_v14  ;;  %v537_v14 = vld [vmem:[%s8220_s29 + $0x4b8] sm:$0xff] }
 0x46b   : > { %v2488_v37 = vld [vmem:[%s8220_s29 + $0x41b0] sm:$0xff]  ;;  %5128 = vmatpush.msra.mxu3 %v3288_v15  ;;  %v809_v15 = vld [vmem:[%s8220_s29 + $0xd38] sm:$0xff] }
 0x46c   : > { %v2760_v9 = vld [vmem:[%s8220_s29 + $0x4a30] sm:$0xff]  ;;  %5070 = vmatpush.msra.mxu0 %v2488_v37  ;;  %v1049_v37 = vld [vmem:[%s8220_s29 + $0x14b8] sm:$0xff] }
 0x46d   : > { %v3000_v22 = vld [vmem:[%s8220_s29 + $0x51b0] sm:$0xff]  ;;  %5089 = vmatpush.msra.mxu1 %v2760_v9  ;;  %v1321_v9 = vld [vmem:[%s8220_s29 + $0x1d38] sm:$0xff] }
 0x46e   : > { %v3272_v38 = vld [vmem:[%s8220_s29 + $0x5a30] sm:$0xff]  ;;  %5110 = vmatpush.msra.mxu2 %v3000_v22  ;;  %v521_v22 = vld [vmem:[%s8220_s29 + $0x438] sm:$0xff] }
 0x46f   : > { %v2472_v20 = vld [vmem:[%s8220_s29 + $0x4130] sm:$0xff]  ;;  %5129 = vmatpush.msra.mxu3 %v3272_v38  ;;  %v793_v38 = vld [vmem:[%s8220_s29 + $0xcb8] sm:$0xff] }
 0x470   : > { %v2744_v24 = vld [vmem:[%s8220_s29 + $0x49b0] sm:$0xff]  ;;  %5071 = vmatpush.msra.mxu0 %v2472_v20  ;;  %v4776_v20 = vadd.f32 %v4775_v11, %v4756_v18  ;;  %v905_v18 = vld [vmem:[%s8220_s29 + $0x1038] sm:$0xff] }
 0x471   : > { %v2984_v25 = vld [vmem:[%s8220_s29 + $0x5130] sm:$0xff]  ;;  %5090 = vmatpush.msra.mxu1 %v2744_v24  ;;  %v1033_v24 = vld [vmem:[%s8220_s29 + $0x1438] sm:$0xff] }
 0x472   : > { %v3256_v13 = vld [vmem:[%s8220_s29 + $0x59b0] sm:$0xff]  ;;  %5111 = vmatpush.msra.mxu2 %v2984_v25  ;;  %v1305_v25 = vld [vmem:[%s8220_s29 + $0x1cb8] sm:$0xff] }
 0x473   : > { %v2456_v36 = vld [vmem:[%s8220_s29 + $0x40b0] sm:$0xff]  ;;  %5130 = vmatpush.msra.mxu3 %v3256_v13  ;;  %v4795_v13 = vpop.f32.mrf.mxu2  ;;  %v1657_v11 = vld [vmem:[%s8220_s29 + $0x27b8] sm:$0xff] }
 0x474   : > { %v2728_v27 = vld [vmem:[%s8220_s29 + $0x4930] sm:$0xff]  ;;  %5072 = vmatpush.msra.mxu0 %v2456_v36  ;;  %v505_v36 = vld [vmem:[%s8220_s29 + $0x3b8] sm:$0xff]  ;;  %v4796_v21 = vadd.f32 %v4795_v13, %v4776_v20 }
 0x475   : > { %v2968_v31 = vld [vmem:[%s8220_s29 + $0x50b0] sm:$0xff]  ;;  %5091 = vmatpush.msra.mxu1 %v2728_v27  ;;  %v777_v27 = vld [vmem:[%s8220_s29 + $0xc38] sm:$0xff] }
 0x476   : > { %v3240_v33 = vld [vmem:[%s8220_s29 + $0x5930] sm:$0xff]  ;;  %5112 = vmatpush.msra.mxu2 %v2968_v31  ;;  %v1017_v31 = vld [vmem:[%s8220_s29 + $0x13b8] sm:$0xff] }
 0x477   : > { %v2440_v34 = vld [vmem:[%s8220_s29 + $0x4030] sm:$0xff]  ;;  %5131 = vmatpush.msra.mxu3 %v3240_v33  ;;  %v1289_v33 = vld [vmem:[%s8220_s29 + $0x1c38] sm:$0xff] }
 0x478   : > { %v2712_v39 = vld [vmem:[%s8220_s29 + $0x48b0] sm:$0xff]  ;;  %5073 = vmatpush.msra.mxu0 %v2440_v34  ;;  %v489_v34 = vld [vmem:[%s8220_s29 + $0x338] sm:$0xff] }
 0x479   : > { %v2952_v40 = vld [vmem:[%s8220_s29 + $0x5030] sm:$0xff]  ;;  %5092 = vmatpush.msra.mxu1 %v2712_v39  ;;  %5074 = vmatmul.f32.vlgmr.msra.gmra.mxu0 %v9823_v53  ;;  %v761_v39 = vld [vmem:[%s8220_s29 + $0xbb8] sm:$0xff] }
 0x47a   : > { %v3224_v41 = vld [vmem:[%s8220_s29 + $0x58b0] sm:$0xff]  ;;  %5113 = vmatpush.msra.mxu2 %v2952_v40  ;;  %5138 = vmatpush.msrb.mxu0 %v633_v44  ;;  %v1001_v40 = vld [vmem:[%s8220_s29 + $0x1338] sm:$0xff] }
 0x47b   : > { %5132 = vmatpush.msra.mxu3 %v3224_v41  ;;  %v2696_v50 = vld [vmem:[%s8220_s29 + $0x4830] sm:$0xff]  ;;  %v1273_v41 = vld [vmem:[%s8220_s29 + $0x1bb8] sm:$0xff] }
 0x47c   : > { %v3208_v46 = vld [vmem:[%s8220_s29 + $0x5830] sm:$0xff]  ;;  %5178 = vmatpush.msrb.mxu2 %v1145_v48  ;;  %5093 = vmatpush.msra.mxu1 %v2696_v50  ;;  %v473_v44 = vld [vmem:[%s8220_s29 + $0x2b8] sm:$0xff] }
 0x47d   : > { %v9827_v54 = vld [vmem:[%s8212_s17 + $0x50] sm:$0xff]  ;;  %5133 = vmatpush.msra.mxu3 %v3208_v46  ;;  %5094 = vmatmul.f32.vlgmr.msra.gmra.mxu1 %v9835_v51  ;;  %v745_v48 = vld [vmem:[%s8220_s29 + $0xb38] sm:$0xff] }
 0x47e   : > { %5114 = vmatmul.f32.vlgmr.msra.gmra.mxu2 %v9827_v54  ;;  %5134 = vmatmul.f32.vlgmr.msra.gmra.mxu3 %v9839_v63  ;;  %v1257_v50 = vld [vmem:[%s8220_s29 + $0x1b38] sm:$0xff] }
 0x47f   : > { %5139 = vmatpush.msrb.mxu0 %v617_v45  ;;  %5158 = vmatpush.msrb.mxu1 %v889_v55  ;;  %v457_v46 = vld [vmem:[%s8220_s29 + $0x238] sm:$0xff]  ;;  %v4816_v45 = vadd.f32 %v4815_v42, %v4796_v21 }
 0x480   : > { %5179 = vmatpush.msrb.mxu2 %v1129_v59  ;;  %5198 = vmatpush.msrb.mxu3 %v1401_v60  ;;  %v969_v55 = vld [vmem:[%s8220_s29 + $0x1238] sm:$0xff] }
 0x481   : > { %5140 = vmatpush.msrb.mxu0 %v601_v0  ;;  %5159 = vmatpush.msrb.mxu1 %v873_v1  ;;  %v1241_v59 = vld [vmem:[%s8220_s29 + $0x1ab8] sm:$0xff]  ;;  %v4835_v0 = vpop.f32.mrf.mxu0 }
 0x482   : > { %5180 = vmatpush.msrb.mxu2 %v1113_v17  ;;  %5199 = vmatpush.msrb.mxu3 %v1385_v3  ;;  %v441_v60 = vld [vmem:[%s8220_s29 + $0x1b8] sm:$0xff]  ;;  %v4836_v17 = vadd.f32 %v4835_v0, %v4816_v45 }
 0x483   : > { %5141 = vmatpush.msrb.mxu0 %v585_v4  ;;  %5160 = vmatpush.msrb.mxu1 %v857_v61  ;;  %v953_v1 = vld [vmem:[%s8220_s29 + $0x11b8] sm:$0xff] }
 0x484   : > { %5181 = vmatpush.msrb.mxu2 %v1097_v5  ;;  %5200 = vmatpush.msrb.mxu3 %v1369_v6  ;;  %v425_v3 = vld [vmem:[%s8220_s29 + $0x138] sm:$0xff]  ;;  %v4855_v6 = vpop.f32.mrf.mxu1 }
 0x485   : > { %5142 = vmatpush.msrb.mxu0 %v569_v12  ;;  %5161 = vmatpush.msrb.mxu1 %v841_v23  ;;  %v697_v4 = vld [vmem:[%s8220_s29 + $0x9b8] sm:$0xff] }
 0x486   : > { %5182 = vmatpush.msrb.mxu2 %v1081_v8  ;;  %5201 = vmatpush.msrb.mxu3 %v1353_v28  ;;  %v937_v61 = vld [vmem:[%s8220_s29 + $0x1138] sm:$0xff]  ;;  %v4856_v8 = vadd.f32 %v4855_v6, %v4836_v17 }
 0x487   : > { %5143 = vmatpush.msrb.mxu0 %v553_v29  ;;  %5162 = vmatpush.msrb.mxu1 %v825_v32  ;;  %v1209_v5 = vld [vmem:[%s8220_s29 + $0x19b8] sm:$0xff]  ;;  %v4875_v32 = vpop.f32.mrf.mxu2 }
 0x488   : > { %5183 = vmatpush.msrb.mxu2 %v1065_v35  ;;  %5202 = vmatpush.msrb.mxu3 %v1337_v10  ;;  %v681_v12 = vld [vmem:[%s8220_s29 + $0x938] sm:$0xff]  ;;  %v4876_v10 = vadd.f32 %v4875_v32, %v4856_v8 }
 0x489   : > { %5144 = vmatpush.msrb.mxu0 %v537_v14  ;;  %5163 = vmatpush.msrb.mxu1 %v809_v15  ;;  %v921_v23 = vld [vmem:[%s8220_s29 + $0x10b8] sm:$0xff] }
 0x48a   : > { %5184 = vmatpush.msrb.mxu2 %v1049_v37  ;;  %5203 = vmatpush.msrb.mxu3 %v1321_v9  ;;  %v393_v28 = vld [vmem:[%s8220_s29 + $0x38] sm:$0xff]  ;;  %v363_v9 = vld [vmem:[%s8235_s7 + $0x28] sm:$0xff] }
 0x48b   : > { %5145 = vmatpush.msrb.mxu0 %v521_v22  ;;  %5164 = vmatpush.msrb.mxu1 %v793_v38  ;;  %v665_v29 = vld [vmem:[%s8220_s29 + $0x8b8] sm:$0xff]  ;;  %v4895_v22 = vpop.f32.mrf.mxu3 }
 0x48c   : > { %5185 = vmatpush.msrb.mxu2 %v1033_v24  ;;  %5204 = vmatpush.msrb.mxu3 %v1305_v25  ;;  %v1177_v35 = vld [vmem:[%s8220_s29 + $0x18b8] sm:$0xff]  ;;  %v4896_v24 = vadd.f32 %v4895_v22, %v4876_v10 }
 0x48d   : > { %5146 = vmatpush.msrb.mxu0 %v505_v36  ;;  %5165 = vmatpush.msrb.mxu1 %v777_v27  ;;  %v2169_v14 = vld [vmem:[%s8220_s29 + $0x37b8] sm:$0xff] }
 0x48e   : > { %5186 = vmatpush.msrb.mxu2 %v1017_v31  ;;  %5205 = vmatpush.msrb.mxu3 %v1289_v33  ;;  %v649_v15 = vld [vmem:[%s8220_s29 + $0x838] sm:$0xff]  ;;  %v7303_v31 = vadd.f32 %v4896_v24, %v363_v9 }
 0x48f   : > { %5147 = vmatpush.msrb.mxu0 %v489_v34  ;;  %5166 = vmatpush.msrb.mxu1 %v761_v39  ;;  %v1161_v37 = vld [vmem:[%s8220_s29 + $0x1838] sm:$0xff] }
 0x490   : > { %5187 = vmatpush.msrb.mxu2 %v1001_v40  ;;  %5206 = vmatpush.msrb.mxu3 %v1273_v41  ;;  %v1641_v38 = vld [vmem:[%s8220_s29 + $0x2738] sm:$0xff]  ;;  %7319 = vst [vmem:[%s8235_s7 + $0x28] sm:$0xff] %v7303_v31 }
 0x491   : > { %5148 = vmatpush.msrb.mxu0 %v473_v44  ;;  %5167 = vmatpush.msrb.mxu1 %v745_v48  ;;  %v1913_v20 = vld [vmem:[%s8220_s29 + $0x2fb8] sm:$0xff] }
 0x492   : > { %5188 = vmatpush.msrb.mxu2 %v985_v30  ;;  %5207 = vmatpush.msrb.mxu3 %v1257_v50  ;;  %v2153_v25 = vld [vmem:[%s8220_s29 + $0x3738] sm:$0xff] }
 0x493   : > { %5149 = vmatpush.msrb.mxu0 %v457_v46  ;;  %5168 = vmatpush.msrb.mxu1 %v729_v47  ;;  %v2425_v13 = vld [vmem:[%s8220_s29 + $0x3fb8] sm:$0xff] }
 0x494   : > { %5189 = vmatpush.msrb.mxu2 %v969_v55  ;;  %5208 = vmatpush.msrb.mxu3 %v1241_v59  ;;  %v1625_v36 = vld [vmem:[%s8220_s29 + $0x26b8] sm:$0xff] }
 0x495   : > { %5150 = vmatpush.msrb.mxu0 %v441_v60  ;;  %5169 = vmatpush.msrb.mxu1 %v713_v49  ;;  %v1897_v27 = vld [vmem:[%s8220_s29 + $0x2f38] sm:$0xff] }
 0x496   : > { %5190 = vmatpush.msrb.mxu2 %v953_v1  ;;  %5209 = vmatpush.msrb.mxu3 %v1225_v2  ;;  %v2137_v33 = vld [vmem:[%s8220_s29 + $0x36b8] sm:$0xff] }
 0x497   : > { %5151 = vmatpush.msrb.mxu0 %v425_v3  ;;  %5170 = vmatpush.msrb.mxu1 %v697_v4  ;;  %v2409_v34 = vld [vmem:[%s8220_s29 + $0x3f38] sm:$0xff] }
 0x498   : > { %5191 = vmatpush.msrb.mxu2 %v937_v61  ;;  %5210 = vmatpush.msrb.mxu3 %v1209_v5  ;;  %v1609_v39 = vld [vmem:[%s8220_s29 + $0x2638] sm:$0xff] }
 0x499   : > { %5152 = vmatpush.msrb.mxu0 %v409_v7  ;;  %5171 = vmatpush.msrb.mxu1 %v681_v12  ;;  %v1881_v21 = vld [vmem:[%s8220_s29 + $0x2eb8] sm:$0xff] }
 0x49a   : > { %5192 = vmatpush.msrb.mxu2 %v921_v23  ;;  %5211 = vmatpush.msrb.mxu3 %v1193_v56  ;;  %v2121_v40 = vld [vmem:[%s8220_s29 + $0x3638] sm:$0xff] }
 0x49b   : > { %5153 = vmatpush.msrb.mxu0 %v393_v28  ;;  %5172 = vmatpush.msrb.mxu1 %v665_v29  ;;  %v2393_v41 = vld [vmem:[%s8220_s29 + $0x3eb8] sm:$0xff] }
 0x49c   : > { %5193 = vmatpush.msrb.mxu2 %v905_v18  ;;  %5212 = vmatpush.msrb.mxu3 %v1177_v35  ;;  %v1593_v42 = vld [vmem:[%s8220_s29 + $0x25b8] sm:$0xff] }
 0x49d   : > { %5218 = vmatpush.msra.mxu0 %v1657_v11  ;;  %5173 = vmatpush.msrb.mxu1 %v649_v15  ;;  %v1865_v44 = vld [vmem:[%s8220_s29 + $0x2e38] sm:$0xff] }
 0x49e   : > { %5258 = vmatpush.msra.mxu2 %v2169_v14  ;;  %5213 = vmatpush.msrb.mxu3 %v1161_v37  ;;  %v2105_v48 = vld [vmem:[%s8220_s29 + $0x35b8] sm:$0xff] }
 0x49f   : > { %5219 = vmatpush.msra.mxu0 %v1641_v38  ;;  %5238 = vmatpush.msra.mxu1 %v1913_v20  ;;  %v2377_v30 = vld [vmem:[%s8220_s29 + $0x3e38] sm:$0xff] }
 0x4a0   : > { %5259 = vmatpush.msra.mxu2 %v2153_v25  ;;  %5278 = vmatpush.msra.mxu3 %v2425_v13  ;;  %v1577_v50 = vld [vmem:[%s8220_s29 + $0x2538] sm:$0xff] }
 0x4a1   : > { %5220 = vmatpush.msra.mxu0 %v1625_v36  ;;  %5239 = vmatpush.msra.mxu1 %v1897_v27  ;;  %v1849_v46 = vld [vmem:[%s8220_s29 + $0x2db8] sm:$0xff] }
 0x4a2   : > { %5260 = vmatpush.msra.mxu2 %v2137_v33  ;;  %5279 = vmatpush.msra.mxu3 %v2409_v34  ;;  %v2089_v47 = vld [vmem:[%s8220_s29 + $0x3538] sm:$0xff] }
 0x4a3   : > { %5221 = vmatpush.msra.mxu0 %v1609_v39  ;;  %5240 = vmatpush.msra.mxu1 %v1881_v21  ;;  %v2361_v45 = vld [vmem:[%s8220_s29 + $0x3db8] sm:$0xff] }
 0x4a4   : > { %5261 = vmatpush.msra.mxu2 %v2121_v40  ;;  %5280 = vmatpush.msra.mxu3 %v2393_v41  ;;  %v1561_v55 = vld [vmem:[%s8220_s29 + $0x24b8] sm:$0xff] }
 0x4a5   : > { %5222 = vmatpush.msra.mxu0 %v1593_v42  ;;  %5241 = vmatpush.msra.mxu1 %v1865_v44  ;;  %v1833_v59 = vld [vmem:[%s8220_s29 + $0x2d38] sm:$0xff] }
 0x4a6   : > { %5262 = vmatpush.msra.mxu2 %v2105_v48  ;;  %5281 = vmatpush.msra.mxu3 %v2377_v30  ;;  %v2073_v60 = vld [vmem:[%s8220_s29 + $0x34b8] sm:$0xff] }
 0x4a7   : > { %5223 = vmatpush.msra.mxu0 %v1577_v50  ;;  %5242 = vmatpush.msra.mxu1 %v1849_v46  ;;  %v2345_v49 = vld [vmem:[%s8220_s29 + $0x3d38] sm:$0xff] }
 0x4a8   : > { %5263 = vmatpush.msra.mxu2 %v2089_v47  ;;  %5282 = vmatpush.msra.mxu3 %v2361_v45  ;;  %v1545_v0 = vld [vmem:[%s8220_s29 + $0x2438] sm:$0xff] }
 0x4a9   : > { %v1817_v1 = vld [vmem:[%s8220_s29 + $0x2cb8] sm:$0xff]  ;;  %5224 = vmatpush.msra.mxu0 %v1561_v55  ;;  %5243 = vmatpush.msra.mxu1 %v1833_v59 }
 0x4aa   : > { %v2057_v2 = vld [vmem:[%s8220_s29 + $0x3438] sm:$0xff]  ;;  %5264 = vmatpush.msra.mxu2 %v2073_v60  ;;  %5283 = vmatpush.msra.mxu3 %v2345_v49 }
 0x4ab   : > { %v2329_v17 = vld [vmem:[%s8220_s29 + $0x3cb8] sm:$0xff]  ;;  %5225 = vmatpush.msra.mxu0 %v1545_v0  ;;  %5244 = vmatpush.msra.mxu1 %v1817_v1 }
 0x4ac   : > { %v1529_v3 = vld [vmem:[%s8220_s29 + $0x23b8] sm:$0xff]  ;;  %5265 = vmatpush.msra.mxu2 %v2057_v2  ;;  %5284 = vmatpush.msra.mxu3 %v2329_v17 }
 0x4ad   : > { %v1801_v4 = vld [vmem:[%s8220_s29 + $0x2c38] sm:$0xff]  ;;  %5226 = vmatpush.msra.mxu0 %v1529_v3  ;;  %5194 = vmatmul.f32.vlgmr.msrb.gmra.mxu2 %v9723_v26 }
 0x4ae   : > { %v2041_v61 = vld [vmem:[%s8220_s29 + $0x33b8] sm:$0xff]  ;;  %5245 = vmatpush.msra.mxu1 %v1801_v4  ;;  %5154 = vmatmul.f32.vlgmr.msrb.gmra.mxu0 %v9730_v16 }
 0x4af   : > { %v2313_v5 = vld [vmem:[%s8220_s29 + $0x3c38] sm:$0xff]  ;;  %5266 = vmatpush.msra.mxu2 %v2041_v61  ;;  %5214 = vmatmul.f32.vlgmr.msrb.gmra.mxu3 %v9735_v19 }
 0x4b0   : > { %v1513_v6 = vld [vmem:[%s8220_s29 + $0x2338] sm:$0xff]  ;;  %5285 = vmatpush.msra.mxu3 %v2313_v5  ;;  %5174 = vmatmul.f32.vlgmr.msrb.gmra.mxu1 %v9743_v43 }
 0x4b1   : > { %v1785_v7 = vld [vmem:[%s8220_s29 + $0x2bb8] sm:$0xff]  ;;  %5227 = vmatpush.msra.mxu0 %v1513_v6 }
 0x4b2   : > { %v2025_v12 = vld [vmem:[%s8220_s29 + $0x3338] sm:$0xff]  ;;  %5246 = vmatpush.msra.mxu1 %v1785_v7 }
 0x4b3   : > { %v2297_v23 = vld [vmem:[%s8220_s29 + $0x3bb8] sm:$0xff]  ;;  %5267 = vmatpush.msra.mxu2 %v2025_v12 }
 0x4b4   : > { %v1497_v56 = vld [vmem:[%s8220_s29 + $0x22b8] sm:$0xff]  ;;  %5286 = vmatpush.msra.mxu3 %v2297_v23 }
 0x4b5   : > { %v1769_v8 = vld [vmem:[%s8220_s29 + $0x2b38] sm:$0xff]  ;;  %5228 = vmatpush.msra.mxu0 %v1497_v56 }
 0x4b6   : > { %v2009_v28 = vld [vmem:[%s8220_s29 + $0x32b8] sm:$0xff]  ;;  %5247 = vmatpush.msra.mxu1 %v1769_v8 }
 0x4b7   : > { %v2281_v29 = vld [vmem:[%s8220_s29 + $0x3b38] sm:$0xff]  ;;  %5268 = vmatpush.msra.mxu2 %v2009_v28 }
 0x4b8   : > { %v1481_v32 = vld [vmem:[%s8220_s29 + $0x2238] sm:$0xff]  ;;  %5287 = vmatpush.msra.mxu3 %v2281_v29 }
 0x4b9   : > { %v1753_v18 = vld [vmem:[%s8220_s29 + $0x2ab8] sm:$0xff]  ;;  %5229 = vmatpush.msra.mxu0 %v1481_v32 }
 0x4ba   : > { %v1993_v35 = vld [vmem:[%s8220_s29 + $0x3238] sm:$0xff]  ;;  %5248 = vmatpush.msra.mxu1 %v1753_v18 }
 0x4bb   : > { %v2265_v10 = vld [vmem:[%s8220_s29 + $0x3ab8] sm:$0xff]  ;;  %5269 = vmatpush.msra.mxu2 %v1993_v35 }
 0x4bc   : > { %v1465_v11 = vld [vmem:[%s8220_s29 + $0x21b8] sm:$0xff]  ;;  %5288 = vmatpush.msra.mxu3 %v2265_v10 }
 0x4bd   : > { %v1737_v14 = vld [vmem:[%s8220_s29 + $0x2a38] sm:$0xff]  ;;  %5230 = vmatpush.msra.mxu0 %v1465_v11 }
 0x4be   : > { %v1977_v15 = vld [vmem:[%s8220_s29 + $0x31b8] sm:$0xff]  ;;  %5249 = vmatpush.msra.mxu1 %v1737_v14 }
 0x4bf   : > { %v2249_v37 = vld [vmem:[%s8220_s29 + $0x3a38] sm:$0xff]  ;;  %5270 = vmatpush.msra.mxu2 %v1977_v15 }
 0x4c0   : > { %v1449_v9 = vld [vmem:[%s8220_s29 + $0x2138] sm:$0xff]  ;;  %5289 = vmatpush.msra.mxu3 %v2249_v37 }
 0x4c1   : > { %v1721_v22 = vld [vmem:[%s8220_s29 + $0x29b8] sm:$0xff]  ;;  %5231 = vmatpush.msra.mxu0 %v1449_v9 }
 0x4c2   : > { %v1961_v38 = vld [vmem:[%s8220_s29 + $0x3138] sm:$0xff]  ;;  %5250 = vmatpush.msra.mxu1 %v1721_v22 }
 0x4c3   : > { %v2233_v20 = vld [vmem:[%s8220_s29 + $0x39b8] sm:$0xff]  ;;  %5271 = vmatpush.msra.mxu2 %v1961_v38 }
 0x4c4   : > { %v1433_v24 = vld [vmem:[%s8220_s29 + $0x20b8] sm:$0xff]  ;;  %5290 = vmatpush.msra.mxu3 %v2233_v20 }
 0x4c5   : > { %v1705_v25 = vld [vmem:[%s8220_s29 + $0x2938] sm:$0xff]  ;;  %5232 = vmatpush.msra.mxu0 %v1433_v24 }
 0x4c6   : > { %v1945_v13 = vld [vmem:[%s8220_s29 + $0x30b8] sm:$0xff]  ;;  %5251 = vmatpush.msra.mxu1 %v1705_v25 }
 0x4c7   : > { %v2217_v36 = vld [vmem:[%s8220_s29 + $0x3938] sm:$0xff]  ;;  %5272 = vmatpush.msra.mxu2 %v1945_v13 }
 0x4c8   : > { %v1417_v27 = vld [vmem:[%s8220_s29 + $0x2038] sm:$0xff]  ;;  %5291 = vmatpush.msra.mxu3 %v2217_v36 }
 0x4c9   : > { %v1689_v31 = vld [vmem:[%s8220_s29 + $0x28b8] sm:$0xff]  ;;  %5233 = vmatpush.msra.mxu0 %v1417_v27 }
 0x4ca   : > { %v1929_v33 = vld [vmem:[%s8220_s29 + $0x3038] sm:$0xff]  ;;  %5252 = vmatpush.msra.mxu1 %v1689_v31  ;;  %5234 = vmatmul.f32.vlgmr.msra.gmra.mxu0 %v9762_v58 }
 0x4cb   : > { %v2201_v34 = vld [vmem:[%s8220_s29 + $0x38b8] sm:$0xff]  ;;  %5273 = vmatpush.msra.mxu2 %v1929_v33 }
 0x4cc   : > { %v2681_v39 = vld [vmem:[%s8220_s29 + $0x47b8] sm:$0xff]  ;;  %5292 = vmatpush.msra.mxu3 %v2201_v34  ;;  %5274 = vmatmul.f32.vlgmr.msra.gmra.mxu2 %v9755_v52 }
 0x4cd   : > { %v3193_v21 = vld [vmem:[%s8220_s29 + $0x57b8] sm:$0xff]  ;;  %5298 = vmatpush.msrb.mxu0 %v2681_v39 }
 0x4ce   : > { %v1673_v40 = vld [vmem:[%s8220_s29 + $0x2838] sm:$0xff]  ;;  %5338 = vmatpush.msrb.mxu2 %v3193_v21 }
 0x4cf   : > { %v2185_v41 = vld [vmem:[%s8220_s29 + $0x3838] sm:$0xff]  ;;  %5253 = vmatpush.msra.mxu1 %v1673_v40  ;;  %v4935_v40 = vpop.f32.mrf.mxu1 }
 0x4d0   : > { %v2665_v26 = vld [vmem:[%s8220_s29 + $0x4738] sm:$0xff]  ;;  %5293 = vmatpush.msra.mxu3 %v2185_v41  ;;  %5254 = vmatmul.f32.vlgmr.msra.gmra.mxu1 %v9775_v62 }
 0x4d1   : > { %v2937_v42 = vld [vmem:[%s8220_s29 + $0x4fb8] sm:$0xff]  ;;  %5299 = vmatpush.msrb.mxu0 %v2665_v26  ;;  %5294 = vmatmul.f32.vlgmr.msra.gmra.mxu3 %v9767_v57 }
 0x4d2   : > { %v3177_v44 = vld [vmem:[%s8220_s29 + $0x5738] sm:$0xff]  ;;  %5318 = vmatpush.msrb.mxu1 %v2937_v42  ;;  %v4915_v42 = vpop.f32.mrf.mxu0 }
 0x4d3   : > { %v3449_v48 = vld [vmem:[%s8220_s29 + $0x5fb8] sm:$0xff]  ;;  %5339 = vmatpush.msrb.mxu2 %v3177_v44  ;;  %v634_v44 = vld [vmem:[%s8220_s29 + $0x7c0] sm:$0xff] }
 0x4d4   : > { %v2649_v16 = vld [vmem:[%s8220_s29 + $0x46b8] sm:$0xff]  ;;  %5358 = vmatpush.msrb.mxu3 %v3449_v48  ;;  %v1146_v48 = vld [vmem:[%s8220_s29 + $0x17c0] sm:$0xff] }
 0x4d5   : > { %v2921_v30 = vld [vmem:[%s8220_s29 + $0x4f38] sm:$0xff]  ;;  %5300 = vmatpush.msrb.mxu0 %v2649_v16  ;;  %v4936_v16 = vadd.f32 %v4935_v40, %v4915_v42  ;;  %v1242_v40 = vld [vmem:[%s8220_s29 + $0x1ac0] sm:$0xff] }
 0x4d6   : > { %v3161_v19 = vld [vmem:[%s8220_s29 + $0x56b8] sm:$0xff]  ;;  %5319 = vmatpush.msrb.mxu1 %v2921_v30 }
 0x4d7   : > { %v3433_v50 = vld [vmem:[%s8220_s29 + $0x5f38] sm:$0xff]  ;;  %5340 = vmatpush.msrb.mxu2 %v3161_v19 }
 0x4d8   : > { %v2633_v46 = vld [vmem:[%s8220_s29 + $0x4638] sm:$0xff]  ;;  %5359 = vmatpush.msrb.mxu3 %v3433_v50  ;;  %v4955_v50 = vpop.f32.mrf.mxu2 }
 0x4d9   : > { %v2905_v47 = vld [vmem:[%s8220_s29 + $0x4eb8] sm:$0xff]  ;;  %5301 = vmatpush.msrb.mxu0 %v2633_v46  ;;  %v618_v46 = vld [vmem:[%s8220_s29 + $0x740] sm:$0xff] }
 0x4da   : > { %v3145_v45 = vld [vmem:[%s8220_s29 + $0x5638] sm:$0xff]  ;;  %5320 = vmatpush.msrb.mxu1 %v2905_v47  ;;  %v890_v47 = vld [vmem:[%s8220_s29 + $0xfc0] sm:$0xff] }
 0x4db   : > { %v3417_v43 = vld [vmem:[%s8220_s29 + $0x5eb8] sm:$0xff]  ;;  %5341 = vmatpush.msrb.mxu2 %v3145_v45  ;;  %v1130_v45 = vld [vmem:[%s8220_s29 + $0x1740] sm:$0xff] }
 0x4dc   : > { %v2617_v55 = vld [vmem:[%s8220_s29 + $0x45b8] sm:$0xff]  ;;  %5360 = vmatpush.msrb.mxu3 %v3417_v43  ;;  %v1402_v43 = vld [vmem:[%s8220_s29 + $0x1fc0] sm:$0xff] }
 0x4dd   : > { %v2889_v59 = vld [vmem:[%s8220_s29 + $0x4e38] sm:$0xff]  ;;  %5302 = vmatpush.msrb.mxu0 %v2617_v55  ;;  %v4956_v55 = vadd.f32 %v4955_v50, %v4936_v16  ;;  %v938_v50 = vld [vmem:[%s8220_s29 + $0x1140] sm:$0xff] }
 0x4de   : > { %v3129_v60 = vld [vmem:[%s8220_s29 + $0x55b8] sm:$0xff]  ;;  %5321 = vmatpush.msrb.mxu1 %v2889_v59  ;;  %v4975_v59 = vpop.f32.mrf.mxu3 }
 0x4df   : > { %v3401_v49 = vld [vmem:[%s8220_s29 + $0x5e38] sm:$0xff]  ;;  %5342 = vmatpush.msrb.mxu2 %v3129_v60  ;;  %v1114_v60 = vld [vmem:[%s8220_s29 + $0x16c0] sm:$0xff] }
 0x4e0   : > { %v2601_v52 = vld [vmem:[%s8220_s29 + $0x4538] sm:$0xff]  ;;  %5361 = vmatpush.msrb.mxu3 %v3401_v49  ;;  %v1386_v49 = vld [vmem:[%s8220_s29 + $0x1f40] sm:$0xff] }
 0x4e1   : > { %v2873_v0 = vld [vmem:[%s8220_s29 + $0x4db8] sm:$0xff]  ;;  %5303 = vmatpush.msrb.mxu0 %v2601_v52  ;;  %v586_v52 = vld [vmem:[%s8220_s29 + $0x640] sm:$0xff] }
 0x4e2   : > { %v3113_v1 = vld [vmem:[%s8220_s29 + $0x5538] sm:$0xff]  ;;  %5322 = vmatpush.msrb.mxu1 %v2873_v0  ;;  %v858_v0 = vld [vmem:[%s8220_s29 + $0xec0] sm:$0xff] }
 0x4e3   : > { %v3385_v2 = vld [vmem:[%s8220_s29 + $0x5db8] sm:$0xff]  ;;  %5343 = vmatpush.msrb.mxu2 %v3113_v1  ;;  %v4976_v1 = vadd.f32 %v4975_v59, %v4956_v55  ;;  %v922_v55 = vld [vmem:[%s8220_s29 + $0x10c0] sm:$0xff] }
 0x4e4   : > { %v2585_v58 = vld [vmem:[%s8220_s29 + $0x44b8] sm:$0xff]  ;;  %5362 = vmatpush.msrb.mxu3 %v3385_v2  ;;  %v570_v2 = vld [vmem:[%s8220_s29 + $0x5c0] sm:$0xff] }
 0x4e5   : > { %v2857_v17 = vld [vmem:[%s8220_s29 + $0x4d38] sm:$0xff]  ;;  %5304 = vmatpush.msrb.mxu0 %v2585_v58  ;;  %v842_v58 = vld [vmem:[%s8220_s29 + $0xe40] sm:$0xff] }
 0x4e6   : > { %v3097_v57 = vld [vmem:[%s8220_s29 + $0x54b8] sm:$0xff]  ;;  %5323 = vmatpush.msrb.mxu1 %v2857_v17  ;;  %v4995_v17 = vpop.f32.mrf.mxu0  ;;  %v394_v59 = vld [vmem:[%s8220_s29 + $0x40] sm:$0xff] }
 0x4e7   : > { %v3369_v3 = vld [vmem:[%s8220_s29 + $0x5d38] sm:$0xff]  ;;  %5344 = vmatpush.msrb.mxu2 %v3097_v57  ;;  %v1082_v57 = vld [vmem:[%s8220_s29 + $0x15c0] sm:$0xff] }
 0x4e8   : > { %v2569_v4 = vld [vmem:[%s8220_s29 + $0x4438] sm:$0xff]  ;;  %5363 = vmatpush.msrb.mxu3 %v3369_v3  ;;  %v1354_v3 = vld [vmem:[%s8220_s29 + $0x1e40] sm:$0xff] }
 0x4e9   : > { %v2841_v61 = vld [vmem:[%s8220_s29 + $0x4cb8] sm:$0xff]  ;;  %5305 = vmatpush.msrb.mxu0 %v2569_v4  ;;  %v554_v4 = vld [vmem:[%s8220_s29 + $0x540] sm:$0xff] }
 0x4ea   : > { %v3081_v5 = vld [vmem:[%s8220_s29 + $0x5438] sm:$0xff]  ;;  %5324 = vmatpush.msrb.mxu1 %v2841_v61  ;;  %v826_v61 = vld [vmem:[%s8220_s29 + $0xdc0] sm:$0xff] }
 0x4eb   : > { %v3353_v62 = vld [vmem:[%s8220_s29 + $0x5cb8] sm:$0xff]  ;;  %5345 = vmatpush.msrb.mxu2 %v3081_v5  ;;  %v4996_v5 = vadd.f32 %v4995_v17, %v4976_v1  ;;  %v2170_v1 = vld [vmem:[%s8220_s29 + $0x37c0] sm:$0xff]  ;;  %v364_v17 = vld [vmem:[%s8235_s7 + $0x30] sm:$0xff] }
 0x4ec   : > { %v2553_v6 = vld [vmem:[%s8220_s29 + $0x43b8] sm:$0xff]  ;;  %5364 = vmatpush.msrb.mxu3 %v3353_v62  ;;  %v1066_v62 = vld [vmem:[%s8220_s29 + $0x1540] sm:$0xff] }
 0x4ed   : > { %v2825_v7 = vld [vmem:[%s8220_s29 + $0x4c38] sm:$0xff]  ;;  %5306 = vmatpush.msrb.mxu0 %v2553_v6  ;;  %v1338_v6 = vld [vmem:[%s8220_s29 + $0x1dc0] sm:$0xff] }
 0x4ee   : > { %v3065_v12 = vld [vmem:[%s8220_s29 + $0x53b8] sm:$0xff]  ;;  %5325 = vmatpush.msrb.mxu1 %v2825_v7  ;;  %v5015_v7 = vpop.f32.mrf.mxu1 }
 0x4ef   : > { %v3337_v23 = vld [vmem:[%s8220_s29 + $0x5c38] sm:$0xff]  ;;  %5346 = vmatpush.msrb.mxu2 %v3065_v12  ;;  %v538_v12 = vld [vmem:[%s8220_s29 + $0x4c0] sm:$0xff] }
 0x4f0   : > { %v2537_v56 = vld [vmem:[%s8220_s29 + $0x4338] sm:$0xff]  ;;  %5365 = vmatpush.msrb.mxu3 %v3337_v23  ;;  %v810_v23 = vld [vmem:[%s8220_s29 + $0xd40] sm:$0xff] }
 0x4f1   : > { %v2809_v8 = vld [vmem:[%s8220_s29 + $0x4bb8] sm:$0xff]  ;;  %5307 = vmatpush.msrb.mxu0 %v2537_v56  ;;  %v1050_v56 = vld [vmem:[%s8220_s29 + $0x14c0] sm:$0xff] }
 0x4f2   : > { %v3049_v28 = vld [vmem:[%s8220_s29 + $0x5338] sm:$0xff]  ;;  %5326 = vmatpush.msrb.mxu1 %v2809_v8  ;;  %v1322_v8 = vld [vmem:[%s8220_s29 + $0x1d40] sm:$0xff] }
 0x4f3   : > { %v3321_v29 = vld [vmem:[%s8220_s29 + $0x5bb8] sm:$0xff]  ;;  %5347 = vmatpush.msrb.mxu2 %v3049_v28  ;;  %v522_v28 = vld [vmem:[%s8220_s29 + $0x440] sm:$0xff] }
 0x4f4   : > { %v2521_v32 = vld [vmem:[%s8220_s29 + $0x42b8] sm:$0xff]  ;;  %5366 = vmatpush.msrb.mxu3 %v3321_v29  ;;  %v794_v29 = vld [vmem:[%s8220_s29 + $0xcc0] sm:$0xff] }
 0x4f5   : > { %v2793_v18 = vld [vmem:[%s8220_s29 + $0x4b38] sm:$0xff]  ;;  %5308 = vmatpush.msrb.mxu0 %v2521_v32  ;;  %v5016_v32 = vadd.f32 %v5015_v7, %v4996_v5  ;;  %v2154_v5 = vld [vmem:[%s8220_s29 + $0x3740] sm:$0xff] }
 0x4f6   : > { %v3033_v35 = vld [vmem:[%s8220_s29 + $0x52b8] sm:$0xff]  ;;  %5327 = vmatpush.msrb.mxu1 %v2793_v18  ;;  %v1034_v18 = vld [vmem:[%s8220_s29 + $0x1440] sm:$0xff]  ;;  %v5075_v42 = vpop.f32.mrf.mxu0 }
 0x4f7   : > { %v3305_v10 = vld [vmem:[%s8220_s29 + $0x5b38] sm:$0xff]  ;;  %5348 = vmatpush.msrb.mxu2 %v3033_v35  ;;  %v1306_v35 = vld [vmem:[%s8220_s29 + $0x1cc0] sm:$0xff] }
 0x4f8   : > { %v2505_v11 = vld [vmem:[%s8220_s29 + $0x4238] sm:$0xff]  ;;  %5367 = vmatpush.msrb.mxu3 %v3305_v10  ;;  %v5035_v10 = vpop.f32.mrf.mxu2  ;;  %v1898_v7 = vld [vmem:[%s8220_s29 + $0x2f40] sm:$0xff] }
 0x4f9   : > { %v2777_v14 = vld [vmem:[%s8220_s29 + $0x4ab8] sm:$0xff]  ;;  %5309 = vmatpush.msrb.mxu0 %v2505_v11  ;;  %v506_v11 = vld [vmem:[%s8220_s29 + $0x3c0] sm:$0xff] }
 0x4fa   : > { %v3017_v15 = vld [vmem:[%s8220_s29 + $0x5238] sm:$0xff]  ;;  %5328 = vmatpush.msrb.mxu1 %v2777_v14  ;;  %v778_v14 = vld [vmem:[%s8220_s29 + $0xc40] sm:$0xff] }
 0x4fb   : > { %v3289_v37 = vld [vmem:[%s8220_s29 + $0x5ab8] sm:$0xff]  ;;  %5349 = vmatpush.msrb.mxu2 %v3017_v15  ;;  %v1018_v15 = vld [vmem:[%s8220_s29 + $0x13c0] sm:$0xff] }
 0x4fc   : > { %v2489_v9 = vld [vmem:[%s8220_s29 + $0x41b8] sm:$0xff]  ;;  %5368 = vmatpush.msrb.mxu3 %v3289_v37  ;;  %v1290_v37 = vld [vmem:[%s8220_s29 + $0x1c40] sm:$0xff] }
 0x4fd   : > { %v2761_v22 = vld [vmem:[%s8220_s29 + $0x4a38] sm:$0xff]  ;;  %5310 = vmatpush.msrb.mxu0 %v2489_v9  ;;  %v490_v9 = vld [vmem:[%s8220_s29 + $0x340] sm:$0xff] }
 0x4fe   : > { %v3001_v38 = vld [vmem:[%s8220_s29 + $0x51b8] sm:$0xff]  ;;  %5329 = vmatpush.msrb.mxu1 %v2761_v22  ;;  %v762_v22 = vld [vmem:[%s8220_s29 + $0xbc0] sm:$0xff] }
 0x4ff   : > { %v3273_v20 = vld [vmem:[%s8220_s29 + $0x5a38] sm:$0xff]  ;;  %5350 = vmatpush.msrb.mxu2 %v3001_v38  ;;  %v5036_v38 = vadd.f32 %v5035_v10, %v5016_v32  ;;  %v2394_v32 = vld [vmem:[%s8220_s29 + $0x3ec0] sm:$0xff] }
 0x500   : > { %v2473_v24 = vld [vmem:[%s8220_s29 + $0x4138] sm:$0xff]  ;;  %5369 = vmatpush.msrb.mxu3 %v3273_v20  ;;  %v1002_v20 = vld [vmem:[%s8220_s29 + $0x1340] sm:$0xff] }
 0x501   : > { %v2745_v25 = vld [vmem:[%s8220_s29 + $0x49b8] sm:$0xff]  ;;  %5311 = vmatpush.msrb.mxu0 %v2473_v24  ;;  %v1274_v24 = vld [vmem:[%s8220_s29 + $0x1bc0] sm:$0xff] }
 0x502   : > { %v2985_v13 = vld [vmem:[%s8220_s29 + $0x5138] sm:$0xff]  ;;  %5330 = vmatpush.msrb.mxu1 %v2745_v25  ;;  %v5055_v25 = vpop.f32.mrf.mxu3  ;;  %v2106_v10 = vld [vmem:[%s8220_s29 + $0x35c0] sm:$0xff] }
 0x503   : > { %v3257_v36 = vld [vmem:[%s8220_s29 + $0x59b8] sm:$0xff]  ;;  %5351 = vmatpush.msrb.mxu2 %v2985_v13  ;;  %v474_v13 = vld [vmem:[%s8220_s29 + $0x2c0] sm:$0xff] }
 0x504   : > { %v2457_v27 = vld [vmem:[%s8220_s29 + $0x40b8] sm:$0xff]  ;;  %5370 = vmatpush.msrb.mxu3 %v3257_v36  ;;  %v746_v36 = vld [vmem:[%s8220_s29 + $0xb40] sm:$0xff] }
 0x505   : > { %v2729_v31 = vld [vmem:[%s8220_s29 + $0x4938] sm:$0xff]  ;;  %5312 = vmatpush.msrb.mxu0 %v2457_v27  ;;  %v986_v27 = vld [vmem:[%s8220_s29 + $0x12c0] sm:$0xff] }
 0x506   : > { %v2969_v33 = vld [vmem:[%s8220_s29 + $0x50b8] sm:$0xff]  ;;  %5331 = vmatpush.msrb.mxu1 %v2729_v31  ;;  %v1258_v31 = vld [vmem:[%s8220_s29 + $0x1b40] sm:$0xff] }
 0x507   : > { %v3241_v34 = vld [vmem:[%s8220_s29 + $0x5938] sm:$0xff]  ;;  %5352 = vmatpush.msrb.mxu2 %v2969_v33  ;;  %v458_v33 = vld [vmem:[%s8220_s29 + $0x240] sm:$0xff] }
 0x508   : > { %v2441_v39 = vld [vmem:[%s8220_s29 + $0x4038] sm:$0xff]  ;;  %5371 = vmatpush.msrb.mxu3 %v3241_v34  ;;  %v730_v34 = vld [vmem:[%s8220_s29 + $0xac0] sm:$0xff] }
 0x509   : > { %v2713_v21 = vld [vmem:[%s8220_s29 + $0x48b8] sm:$0xff]  ;;  %5313 = vmatpush.msrb.mxu0 %v2441_v39  ;;  %v5056_v39 = vadd.f32 %v5055_v25, %v5036_v38  ;;  %v1834_v38 = vld [vmem:[%s8220_s29 + $0x2d40] sm:$0xff] }
 0x50a   : > { %v2953_v41 = vld [vmem:[%s8220_s29 + $0x5038] sm:$0xff]  ;;  %5332 = vmatpush.msrb.mxu1 %v2713_v21  ;;  %5314 = vmatmul.f32.vlgmr.msrb.gmra.mxu0 %v9823_v53  ;;  %v602_v53 = vld [vmem:[%s8220_s29 + $0x6c0] sm:$0xff] }
 0x50b   : > { %v3225_v26 = vld [vmem:[%s8220_s29 + $0x58b8] sm:$0xff]  ;;  %5353 = vmatpush.msrb.mxu2 %v2953_v41  ;;  %5378 = vmatpush.msra.mxu0 %v634_v44  ;;  %v970_v21 = vld [vmem:[%s8220_s29 + $0x1240] sm:$0xff]  ;;  %v5076_v16 = vadd.f32 %v5075_v42, %v5056_v39 }
 0x50c   : > { %5372 = vmatpush.msrb.mxu3 %v3225_v26  ;;  %v2697_v30 = vld [vmem:[%s8220_s29 + $0x4838] sm:$0xff]  ;;  %5354 = vmatmul.f32.vlgmr.msrb.gmra.mxu2 %v9827_v54  ;;  %v874_v54 = vld [vmem:[%s8220_s29 + $0xf40] sm:$0xff] }
 0x50d   : > { %v3209_v19 = vld [vmem:[%s8220_s29 + $0x5838] sm:$0xff]  ;;  %5418 = vmatpush.msra.mxu2 %v1146_v48  ;;  %5333 = vmatpush.msrb.mxu1 %v2697_v30  ;;  %v442_v41 = vld [vmem:[%s8220_s29 + $0x1c0] sm:$0xff] }
 0x50e   : > { %5373 = vmatpush.msrb.mxu3 %v3209_v19  ;;  %5334 = vmatmul.f32.vlgmr.msrb.gmra.mxu1 %v9835_v51  ;;  %v1098_v51 = vld [vmem:[%s8220_s29 + $0x1640] sm:$0xff] }
 0x50f   : > { %5374 = vmatmul.f32.vlgmr.msrb.gmra.mxu3 %v9839_v63  ;;  %5379 = vmatpush.msra.mxu0 %v618_v46  ;;  %v1370_v63 = vld [vmem:[%s8220_s29 + $0x1ec0] sm:$0xff] }
 0x510   : > { %5398 = vmatpush.msra.mxu1 %v890_v47  ;;  %5419 = vmatpush.msra.mxu2 %v1130_v45  ;;  %v714_v26 = vld [vmem:[%s8220_s29 + $0xa40] sm:$0xff]  ;;  %v5095_v47 = vpop.f32.mrf.mxu1 }
 0x511   : > { %5438 = vmatpush.msra.mxu3 %v1402_v43  ;;  %5380 = vmatpush.msra.mxu0 %v602_v53  ;;  %v954_v44 = vld [vmem:[%s8220_s29 + $0x11c0] sm:$0xff] }
 0x512   : > { %5399 = vmatpush.msra.mxu1 %v874_v54  ;;  %5420 = vmatpush.msra.mxu2 %v1114_v60  ;;  %v1226_v48 = vld [vmem:[%s8220_s29 + $0x1a40] sm:$0xff]  ;;  %v5096_v54 = vadd.f32 %v5095_v47, %v5076_v16 }
 0x513   : > { %5439 = vmatpush.msra.mxu3 %v1386_v49  ;;  %5381 = vmatpush.msra.mxu0 %v586_v52  ;;  %v426_v30 = vld [vmem:[%s8220_s29 + $0x140] sm:$0xff]  ;;  %v5115_v49 = vpop.f32.mrf.mxu2 }
 0x514   : > { %5400 = vmatpush.msra.mxu1 %v858_v0  ;;  %5421 = vmatpush.msra.mxu2 %v1098_v51  ;;  %v698_v19 = vld [vmem:[%s8220_s29 + $0x9c0] sm:$0xff]  ;;  %v5116_v51 = vadd.f32 %v5115_v49, %v5096_v54 }
 0x515   : > { %5440 = vmatpush.msra.mxu3 %v1370_v63  ;;  %5382 = vmatpush.msra.mxu0 %v570_v2  ;;  %v1210_v46 = vld [vmem:[%s8220_s29 + $0x19c0] sm:$0xff] }
 0x516   : > { %5401 = vmatpush.msra.mxu1 %v842_v58  ;;  %5422 = vmatpush.msra.mxu2 %v1082_v57  ;;  %v410_v45 = vld [vmem:[%s8220_s29 + $0xc0] sm:$0xff]  ;;  %v5135_v57 = vpop.f32.mrf.mxu3 }
 0x517   : > { %5441 = vmatpush.msra.mxu3 %v1354_v3  ;;  %5383 = vmatpush.msra.mxu0 %v554_v4  ;;  %v682_v43 = vld [vmem:[%s8220_s29 + $0x940] sm:$0xff] }
 0x518   : > { %5402 = vmatpush.msra.mxu1 %v826_v61  ;;  %5423 = vmatpush.msra.mxu2 %v1066_v62  ;;  %v1194_v53 = vld [vmem:[%s8220_s29 + $0x1940] sm:$0xff]  ;;  %v5136_v61 = vadd.f32 %v5135_v57, %v5116_v51 }
 0x519   : > { %5442 = vmatpush.msra.mxu3 %v1338_v6  ;;  %5384 = vmatpush.msra.mxu0 %v538_v12  ;;  %v666_v60 = vld [vmem:[%s8220_s29 + $0x8c0] sm:$0xff] }
 0x51a   : > { %5403 = vmatpush.msra.mxu1 %v810_v23  ;;  %5424 = vmatpush.msra.mxu2 %v1050_v56  ;;  %v906_v52 = vld [vmem:[%s8220_s29 + $0x1040] sm:$0xff]  ;;  %v7304_v12 = vadd.f32 %v5136_v61, %v364_v17  ;;  %v10171_v17 = vld [vmem:[%s8212_s17 + $0x10] sm:$0xff] }
 0x51b   : > { %5443 = vmatpush.msra.mxu3 %v1322_v8  ;;  %5385 = vmatpush.msra.mxu0 %v522_v28  ;;  %v1178_v0 = vld [vmem:[%s8220_s29 + $0x18c0] sm:$0xff] }
 0x51c   : > { %5404 = vmatpush.msra.mxu1 %v794_v29  ;;  %5425 = vmatpush.msra.mxu2 %v1034_v18  ;;  %v1658_v63 = vld [vmem:[%s8220_s29 + $0x27c0] sm:$0xff]  ;;  %7320 = vst [vmem:[%s8235_s7 + $0x30] sm:$0xff] %v7304_v12 }
 0x51d   : > { %5444 = vmatpush.msra.mxu3 %v1306_v35  ;;  %5386 = vmatpush.msra.mxu0 %v506_v11  ;;  %v650_v2 = vld [vmem:[%s8220_s29 + $0x840] sm:$0xff] }
 0x51e   : > { %5405 = vmatpush.msra.mxu1 %v778_v14  ;;  %5426 = vmatpush.msra.mxu2 %v1018_v15  ;;  %v1162_v58 = vld [vmem:[%s8220_s29 + $0x1840] sm:$0xff] }
 0x51f   : > { %5445 = vmatpush.msra.mxu3 %v1290_v37  ;;  %5387 = vmatpush.msra.mxu0 %v490_v9  ;;  %v1642_v3 = vld [vmem:[%s8220_s29 + $0x2740] sm:$0xff] }
 0x520   : > { %5406 = vmatpush.msra.mxu1 %v762_v22  ;;  %5427 = vmatpush.msra.mxu2 %v1002_v20  ;;  %v1914_v4 = vld [vmem:[%s8220_s29 + $0x2fc0] sm:$0xff] }
 0x521   : > { %5446 = vmatpush.msra.mxu3 %v1274_v24  ;;  %5388 = vmatpush.msra.mxu0 %v474_v13  ;;  %v2426_v62 = vld [vmem:[%s8220_s29 + $0x3fc0] sm:$0xff] }
 0x522   : > { %5407 = vmatpush.msra.mxu1 %v746_v36  ;;  %5428 = vmatpush.msra.mxu2 %v986_v27  ;;  %v1626_v6 = vld [vmem:[%s8220_s29 + $0x26c0] sm:$0xff] }
 0x523   : > { %5447 = vmatpush.msra.mxu3 %v1258_v31  ;;  %5389 = vmatpush.msra.mxu0 %v458_v33  ;;  %v2138_v23 = vld [vmem:[%s8220_s29 + $0x36c0] sm:$0xff] }
 0x524   : > { %5408 = vmatpush.msra.mxu1 %v730_v34  ;;  %5429 = vmatpush.msra.mxu2 %v970_v21  ;;  %v2410_v56 = vld [vmem:[%s8220_s29 + $0x3f40] sm:$0xff] }
 0x525   : > { %5448 = vmatpush.msra.mxu3 %v1242_v40  ;;  %5390 = vmatpush.msra.mxu0 %v442_v41  ;;  %v1610_v8 = vld [vmem:[%s8220_s29 + $0x2640] sm:$0xff] }
 0x526   : > { %5409 = vmatpush.msra.mxu1 %v714_v26  ;;  %5430 = vmatpush.msra.mxu2 %v954_v44  ;;  %v1882_v28 = vld [vmem:[%s8220_s29 + $0x2ec0] sm:$0xff] }
 0x527   : > { %5449 = vmatpush.msra.mxu3 %v1226_v48  ;;  %5391 = vmatpush.msra.mxu0 %v426_v30  ;;  %v2122_v29 = vld [vmem:[%s8220_s29 + $0x3640] sm:$0xff] }
 0x528   : > { %5410 = vmatpush.msra.mxu1 %v698_v19  ;;  %5431 = vmatpush.msra.mxu2 %v938_v50  ;;  %v1594_v18 = vld [vmem:[%s8220_s29 + $0x25c0] sm:$0xff] }
 0x529   : > { %5450 = vmatpush.msra.mxu3 %v1210_v46  ;;  %5392 = vmatpush.msra.mxu0 %v410_v45  ;;  %v1866_v35 = vld [vmem:[%s8220_s29 + $0x2e40] sm:$0xff] }
 0x52a   : > { %5411 = vmatpush.msra.mxu1 %v682_v43  ;;  %5432 = vmatpush.msra.mxu2 %v922_v55  ;;  %v2378_v11 = vld [vmem:[%s8220_s29 + $0x3e40] sm:$0xff] }
 0x52b   : > { %5451 = vmatpush.msra.mxu3 %v1194_v53  ;;  %5393 = vmatpush.msra.mxu0 %v394_v59  ;;  %v1578_v14 = vld [vmem:[%s8220_s29 + $0x2540] sm:$0xff] }
 0x52c   : > { %5412 = vmatpush.msra.mxu1 %v666_v60  ;;  %5433 = vmatpush.msra.mxu2 %v906_v52  ;;  %v1850_v15 = vld [vmem:[%s8220_s29 + $0x2dc0] sm:$0xff] }
 0x52d   : > { %5452 = vmatpush.msra.mxu3 %v1178_v0  ;;  %5458 = vmatpush.msrb.mxu0 %v1658_v63  ;;  %v2090_v37 = vld [vmem:[%s8220_s29 + $0x3540] sm:$0xff] }
 0x52e   : > { %5498 = vmatpush.msrb.mxu2 %v2170_v1  ;;  %5413 = vmatpush.msra.mxu1 %v650_v2  ;;  %v2362_v9 = vld [vmem:[%s8220_s29 + $0x3dc0] sm:$0xff] }
 0x52f   : > { %5453 = vmatpush.msra.mxu3 %v1162_v58  ;;  %5459 = vmatpush.msrb.mxu0 %v1642_v3  ;;  %v1562_v22 = vld [vmem:[%s8220_s29 + $0x24c0] sm:$0xff] }
 0x530   : > { %5478 = vmatpush.msrb.mxu1 %v1914_v4  ;;  %5499 = vmatpush.msrb.mxu2 %v2154_v5  ;;  %v2074_v20 = vld [vmem:[%s8220_s29 + $0x34c0] sm:$0xff] }
 0x531   : > { %5518 = vmatpush.msrb.mxu3 %v2426_v62  ;;  %5460 = vmatpush.msrb.mxu0 %v1626_v6  ;;  %v2346_v24 = vld [vmem:[%s8220_s29 + $0x3d40] sm:$0xff]  ;;  %v10183_v62 = vld [vmem:[%s8212_s17 + $0x18] sm:$0xff] }
 0x532   : > { %5479 = vmatpush.msrb.mxu1 %v1898_v7  ;;  %5500 = vmatpush.msrb.mxu2 %v2138_v23  ;;  %v1546_v25 = vld [vmem:[%s8220_s29 + $0x2440] sm:$0xff] }
 0x533   : > { %5519 = vmatpush.msrb.mxu3 %v2410_v56  ;;  %5461 = vmatpush.msrb.mxu0 %v1610_v8  ;;  %v1818_v13 = vld [vmem:[%s8220_s29 + $0x2cc0] sm:$0xff]  ;;  %v10191_v56 = vld [vmem:[%s8212_s17 + $0x8] sm:$0xff] }
 0x534   : > { %5480 = vmatpush.msrb.mxu1 %v1882_v28  ;;  %5501 = vmatpush.msrb.mxu2 %v2122_v29  ;;  %v2058_v36 = vld [vmem:[%s8220_s29 + $0x3440] sm:$0xff] }
 0x535   : > { %5520 = vmatpush.msrb.mxu3 %v2394_v32  ;;  %5462 = vmatpush.msrb.mxu0 %v1594_v18  ;;  %v2330_v27 = vld [vmem:[%s8220_s29 + $0x3cc0] sm:$0xff] }
 0x536   : > { %5481 = vmatpush.msrb.mxu1 %v1866_v35  ;;  %5502 = vmatpush.msrb.mxu2 %v2106_v10  ;;  %v1530_v31 = vld [vmem:[%s8220_s29 + $0x23c0] sm:$0xff] }
 0x537   : > { %5521 = vmatpush.msrb.mxu3 %v2378_v11  ;;  %5463 = vmatpush.msrb.mxu0 %v1578_v14  ;;  %v1802_v33 = vld [vmem:[%s8220_s29 + $0x2c40] sm:$0xff]  ;;  %v10203_v14 = vld [vmem:[%s8212_s17 + $0x30] sm:$0xff] }
 0x538   : > { %5482 = vmatpush.msrb.mxu1 %v1850_v15  ;;  %5503 = vmatpush.msrb.mxu2 %v2090_v37  ;;  %v2042_v34 = vld [vmem:[%s8220_s29 + $0x33c0] sm:$0xff] }
 0x539   : > { %5522 = vmatpush.msrb.mxu3 %v2362_v9  ;;  %5464 = vmatpush.msrb.mxu0 %v1562_v22  ;;  %v2314_v39 = vld [vmem:[%s8220_s29 + $0x3c40] sm:$0xff] }
 0x53a   : > { %5483 = vmatpush.msrb.mxu1 %v1834_v38  ;;  %5504 = vmatpush.msrb.mxu2 %v2074_v20  ;;  %v1514_v21 = vld [vmem:[%s8220_s29 + $0x2340] sm:$0xff]  ;;  %v10215_v20 = vld [vmem:[%s8212_s17 + $0x38] sm:$0xff] }
 0x53b   : > { %5523 = vmatpush.msrb.mxu3 %v2346_v24  ;;  %5465 = vmatpush.msrb.mxu0 %v1546_v25  ;;  %v1786_v40 = vld [vmem:[%s8220_s29 + $0x2bc0] sm:$0xff] }
 0x53c   : > { %5484 = vmatpush.msrb.mxu1 %v1818_v13  ;;  %5505 = vmatpush.msrb.mxu2 %v2058_v36  ;;  %v2026_v41 = vld [vmem:[%s8220_s29 + $0x3340] sm:$0xff] }
 0x53d   : > { %5524 = vmatpush.msrb.mxu3 %v2330_v27  ;;  %5466 = vmatpush.msrb.mxu0 %v1530_v31  ;;  %v2298_v26 = vld [vmem:[%s8220_s29 + $0x3bc0] sm:$0xff]  ;;  %v10223_v27 = vld [vmem:[%s8212_s17 + $0x28] sm:$0xff] }
 0x53e   : > { %5485 = vmatpush.msrb.mxu1 %v1802_v33  ;;  %5506 = vmatpush.msrb.mxu2 %v2042_v34  ;;  %v1498_v42 = vld [vmem:[%s8220_s29 + $0x22c0] sm:$0xff] }
 0x53f   : > { %5525 = vmatpush.msrb.mxu3 %v2314_v39  ;;  %v1770_v44 = vld [vmem:[%s8220_s29 + $0x2b40] sm:$0xff]  ;;  %5467 = vmatpush.msrb.mxu0 %v1514_v21 }
 0x540   : > { %5486 = vmatpush.msrb.mxu1 %v1786_v40  ;;  %v2010_v48 = vld [vmem:[%s8220_s29 + $0x32c0] sm:$0xff]  ;;  %5507 = vmatpush.msrb.mxu2 %v2026_v41 }
 0x541   : > { %v2282_v16 = vld [vmem:[%s8220_s29 + $0x3b40] sm:$0xff]  ;;  %5526 = vmatpush.msrb.mxu3 %v2298_v26  ;;  %5468 = vmatpush.msrb.mxu0 %v1498_v42 }
 0x542   : > { %v1482_v30 = vld [vmem:[%s8220_s29 + $0x2240] sm:$0xff]  ;;  %5487 = vmatpush.msrb.mxu1 %v1770_v44  ;;  %5508 = vmatpush.msrb.mxu2 %v2010_v48 }
 0x543   : > { %v1754_v19 = vld [vmem:[%s8220_s29 + $0x2ac0] sm:$0xff]  ;;  %5527 = vmatpush.msrb.mxu3 %v2282_v16  ;;  %5469 = vmatpush.msrb.mxu0 %v1482_v30 }
 0x544   : > { %v1994_v50 = vld [vmem:[%s8220_s29 + $0x3240] sm:$0xff]  ;;  %5488 = vmatpush.msrb.mxu1 %v1754_v19  ;;  %5434 = vmatmul.f32.vlgmr.msra.gmra.mxu2 %v10171_v17 }
 0x545   : > { %v2266_v46 = vld [vmem:[%s8220_s29 + $0x3ac0] sm:$0xff]  ;;  %5509 = vmatpush.msrb.mxu2 %v1994_v50  ;;  %5454 = vmatmul.f32.vlgmr.msra.gmra.mxu3 %v10183_v62 }
 0x546   : > { %v1466_v47 = vld [vmem:[%s8220_s29 + $0x21c0] sm:$0xff]  ;;  %5528 = vmatpush.msrb.mxu3 %v2266_v46  ;;  %5414 = vmatmul.f32.vlgmr.msra.gmra.mxu1 %v10191_v56 }
 0x547   : > { %v1738_v45 = vld [vmem:[%s8220_s29 + $0x2a40] sm:$0xff]  ;;  %5470 = vmatpush.msrb.mxu0 %v1466_v47 }
 0x548   : > { %v1978_v43 = vld [vmem:[%s8220_s29 + $0x31c0] sm:$0xff]  ;;  %5489 = vmatpush.msrb.mxu1 %v1738_v45 }
 0x549   : > { %v2250_v55 = vld [vmem:[%s8220_s29 + $0x3a40] sm:$0xff]  ;;  %5510 = vmatpush.msrb.mxu2 %v1978_v43 }
 0x54a   : > { %v1450_v53 = vld [vmem:[%s8220_s29 + $0x2140] sm:$0xff]  ;;  %5529 = vmatpush.msrb.mxu3 %v2250_v55 }
 0x54b   : > { %v1722_v54 = vld [vmem:[%s8220_s29 + $0x29c0] sm:$0xff]  ;;  %5471 = vmatpush.msrb.mxu0 %v1450_v53 }
 0x54c   : > { %v1962_v59 = vld [vmem:[%s8220_s29 + $0x3140] sm:$0xff]  ;;  %5490 = vmatpush.msrb.mxu1 %v1722_v54 }
 0x54d   : > { %v2234_v60 = vld [vmem:[%s8220_s29 + $0x39c0] sm:$0xff]  ;;  %5511 = vmatpush.msrb.mxu2 %v1962_v59 }
 0x54e   : > { %v1434_v49 = vld [vmem:[%s8220_s29 + $0x20c0] sm:$0xff]  ;;  %5530 = vmatpush.msrb.mxu3 %v2234_v60 }
 0x54f   : > { %v1706_v52 = vld [vmem:[%s8220_s29 + $0x2940] sm:$0xff]  ;;  %5472 = vmatpush.msrb.mxu0 %v1434_v49 }
 0x550   : > { %v1946_v0 = vld [vmem:[%s8220_s29 + $0x30c0] sm:$0xff]  ;;  %5491 = vmatpush.msrb.mxu1 %v1706_v52 }
 0x551   : > { %v2218_v51 = vld [vmem:[%s8220_s29 + $0x3940] sm:$0xff]  ;;  %5512 = vmatpush.msrb.mxu2 %v1946_v0 }
 0x552   : > { %v1418_v63 = vld [vmem:[%s8220_s29 + $0x2040] sm:$0xff]  ;;  %5531 = vmatpush.msrb.mxu3 %v2218_v51 }
 0x553   : > { %v1690_v1 = vld [vmem:[%s8220_s29 + $0x28c0] sm:$0xff]  ;;  %5473 = vmatpush.msrb.mxu0 %v1418_v63 }
 0x554   : > { %v1930_v2 = vld [vmem:[%s8220_s29 + $0x3040] sm:$0xff]  ;;  %5492 = vmatpush.msrb.mxu1 %v1690_v1 }
 0x555   : > { %v2202_v58 = vld [vmem:[%s8220_s29 + $0x38c0] sm:$0xff]  ;;  %5513 = vmatpush.msrb.mxu2 %v1930_v2 }
 0x556   : > { %v2682_v57 = vld [vmem:[%s8220_s29 + $0x47c0] sm:$0xff]  ;;  %5532 = vmatpush.msrb.mxu3 %v2202_v58  ;;  %5514 = vmatmul.f32.vlgmr.msrb.gmra.mxu2 %v10203_v14 }
 0x557   : > { %v3194_v3 = vld [vmem:[%s8220_s29 + $0x57c0] sm:$0xff] }
 0x558   : > { %v1674_v4 = vld [vmem:[%s8220_s29 + $0x2840] sm:$0xff]  ;;  %5578 = vmatpush.msra.mxu2 %v3194_v3 }
 0x559   : > { %v10178_v61 = vld [vmem:[%s8212_s17] sm:$0xff]  ;;  %5493 = vmatpush.msrb.mxu1 %v1674_v4 }
 0x55a   : > { %5394 = vmatmul.f32.vlgmr.msra.gmra.mxu0 %v10178_v61  ;;  %v2186_v5 = vld [vmem:[%s8220_s29 + $0x3840] sm:$0xff]  ;;  %5494 = vmatmul.f32.vlgmr.msrb.gmra.mxu1 %v10223_v27 }
 0x55b   : > { %5538 = vmatpush.msra.mxu0 %v2682_v57  ;;  %v2666_v6 = vld [vmem:[%s8220_s29 + $0x4740] sm:$0xff]  ;;  %5533 = vmatpush.msrb.mxu3 %v2186_v5 }
 0x55c   : > { %v2938_v7 = vld [vmem:[%s8220_s29 + $0x4fc0] sm:$0xff]  ;;  %5534 = vmatmul.f32.vlgmr.msrb.gmra.mxu3 %v10215_v20 }
 0x55d   : > { %v3178_v12 = vld [vmem:[%s8220_s29 + $0x5740] sm:$0xff]  ;;  %5539 = vmatpush.msra.mxu0 %v2666_v6  ;;  %5558 = vmatpush.msra.mxu1 %v2938_v7 }
 0x55e   : > { %v3450_v23 = vld [vmem:[%s8220_s29 + $0x5fc0] sm:$0xff]  ;;  %5579 = vmatpush.msra.mxu2 %v3178_v12  ;;  %v5175_v12 = vpop.f32.mrf.mxu1 }
 0x55f   : > { %v2650_v8 = vld [vmem:[%s8220_s29 + $0x46c0] sm:$0xff]  ;;  %5598 = vmatpush.msra.mxu3 %v3450_v23 }
 0x560   : > { %v2922_v28 = vld [vmem:[%s8220_s29 + $0x4f40] sm:$0xff]  ;;  %5540 = vmatpush.msra.mxu0 %v2650_v8 }
 0x561   : > { %v3162_v29 = vld [vmem:[%s8220_s29 + $0x56c0] sm:$0xff]  ;;  %5559 = vmatpush.msra.mxu1 %v2922_v28  ;;  %v5155_v28 = vpop.f32.mrf.mxu0 }
 0x562   : > { %v3434_v32 = vld [vmem:[%s8220_s29 + $0x5f40] sm:$0xff]  ;;  %5580 = vmatpush.msra.mxu2 %v3162_v29  ;;  %v635_v29 = vld [vmem:[%s8220_s29 + $0x7c8] sm:$0xff] }
 0x563   : > { %v2634_v18 = vld [vmem:[%s8220_s29 + $0x4640] sm:$0xff]  ;;  %5599 = vmatpush.msra.mxu3 %v3434_v32  ;;  %v1147_v32 = vld [vmem:[%s8220_s29 + $0x17c8] sm:$0xff] }
 0x564   : > { %v2906_v35 = vld [vmem:[%s8220_s29 + $0x4ec0] sm:$0xff]  ;;  %5541 = vmatpush.msra.mxu0 %v2634_v18  ;;  %v5176_v18 = vadd.f32 %v5175_v12, %v5155_v28 }
 0x565   : > { %v3146_v10 = vld [vmem:[%s8220_s29 + $0x5640] sm:$0xff]  ;;  %5560 = vmatpush.msra.mxu1 %v2906_v35 }
 0x566   : > { %v3418_v11 = vld [vmem:[%s8220_s29 + $0x5ec0] sm:$0xff]  ;;  %5581 = vmatpush.msra.mxu2 %v3146_v10 }
 0x567   : > { %v2618_v15 = vld [vmem:[%s8220_s29 + $0x45c0] sm:$0xff]  ;;  %5600 = vmatpush.msra.mxu3 %v3418_v11  ;;  %v5195_v11 = vpop.f32.mrf.mxu2 }
 0x568   : > { %v2890_v37 = vld [vmem:[%s8220_s29 + $0x4e40] sm:$0xff]  ;;  %5542 = vmatpush.msra.mxu0 %v2618_v15 }
 0x569   : > { %v3130_v9 = vld [vmem:[%s8220_s29 + $0x55c0] sm:$0xff]  ;;  %5561 = vmatpush.msra.mxu1 %v2890_v37  ;;  %v10275_v37 = vld [vmem:[%s8212_s17 + $0x50] sm:$0xff] }
 0x56a   : > { %v10210_v22 = vld [vmem:[%s8212_s17 + $0x20] sm:$0xff]  ;;  %5582 = vmatpush.msra.mxu2 %v3130_v9  ;;  %v619_v9 = vld [vmem:[%s8220_s29 + $0x748] sm:$0xff] }
 0x56b   : > { %5474 = vmatmul.f32.vlgmr.msrb.gmra.mxu0 %v10210_v22  ;;  %v3402_v38 = vld [vmem:[%s8220_s29 + $0x5e40] sm:$0xff] }
 0x56c   : > { %v2602_v24 = vld [vmem:[%s8220_s29 + $0x4540] sm:$0xff]  ;;  %5601 = vmatpush.msra.mxu3 %v3402_v38  ;;  %v891_v38 = vld [vmem:[%s8220_s29 + $0xfc8] sm:$0xff] }
 0x56d   : > { %v2874_v25 = vld [vmem:[%s8220_s29 + $0x4dc0] sm:$0xff]  ;;  %5543 = vmatpush.msra.mxu0 %v2602_v24  ;;  %v1131_v24 = vld [vmem:[%s8220_s29 + $0x1748] sm:$0xff] }
 0x56e   : > { %v3114_v13 = vld [vmem:[%s8220_s29 + $0x5540] sm:$0xff]  ;;  %5562 = vmatpush.msra.mxu1 %v2874_v25  ;;  %v1403_v25 = vld [vmem:[%s8220_s29 + $0x1fc8] sm:$0xff] }
 0x56f   : > { %v3386_v36 = vld [vmem:[%s8220_s29 + $0x5dc0] sm:$0xff]  ;;  %5583 = vmatpush.msra.mxu2 %v3114_v13  ;;  %v5196_v13 = vadd.f32 %v5195_v11, %v5176_v18  ;;  %v987_v18 = vld [vmem:[%s8220_s29 + $0x12c8] sm:$0xff] }
 0x570   : > { %v2586_v31 = vld [vmem:[%s8220_s29 + $0x44c0] sm:$0xff]  ;;  %5602 = vmatpush.msra.mxu3 %v3386_v36  ;;  %v10283_v36 = vld [vmem:[%s8212_s17 + $0x48] sm:$0xff] }
 0x571   : > { %v2858_v33 = vld [vmem:[%s8220_s29 + $0x4d40] sm:$0xff]  ;;  %5544 = vmatpush.msra.mxu0 %v2586_v31  ;;  %v10287_v31 = vld [vmem:[%s8212_s17 + $0x58] sm:$0xff]  ;;  %v731_v11 = vld [vmem:[%s8220_s29 + $0xac8] sm:$0xff] }
 0x572   : > { %v3098_v34 = vld [vmem:[%s8220_s29 + $0x54c0] sm:$0xff]  ;;  %5563 = vmatpush.msra.mxu1 %v2858_v33  ;;  %v603_v33 = vld [vmem:[%s8220_s29 + $0x6c8] sm:$0xff] }
 0x573   : > { %v3370_v39 = vld [vmem:[%s8220_s29 + $0x5d40] sm:$0xff]  ;;  %5584 = vmatpush.msra.mxu2 %v3098_v34  ;;  %v875_v34 = vld [vmem:[%s8220_s29 + $0xf48] sm:$0xff] }
 0x574   : > { %v2570_v21 = vld [vmem:[%s8220_s29 + $0x4440] sm:$0xff]  ;;  %5603 = vmatpush.msra.mxu3 %v3370_v39  ;;  %v5215_v39 = vpop.f32.mrf.mxu3 }
 0x575   : > { %v2842_v40 = vld [vmem:[%s8220_s29 + $0x4cc0] sm:$0xff]  ;;  %5545 = vmatpush.msra.mxu0 %v2570_v21  ;;  %v1115_v21 = vld [vmem:[%s8220_s29 + $0x16c8] sm:$0xff] }
 0x576   : > { %v3082_v41 = vld [vmem:[%s8220_s29 + $0x5440] sm:$0xff]  ;;  %5564 = vmatpush.msra.mxu1 %v2842_v40  ;;  %v1387_v40 = vld [vmem:[%s8220_s29 + $0x1f48] sm:$0xff] }
 0x577   : > { %v3354_v26 = vld [vmem:[%s8220_s29 + $0x5cc0] sm:$0xff]  ;;  %5585 = vmatpush.msra.mxu2 %v3082_v41  ;;  %v587_v41 = vld [vmem:[%s8220_s29 + $0x648] sm:$0xff] }
 0x578   : > { %v2554_v42 = vld [vmem:[%s8220_s29 + $0x43c0] sm:$0xff]  ;;  %5604 = vmatpush.msra.mxu3 %v3354_v26  ;;  %v859_v26 = vld [vmem:[%s8220_s29 + $0xec8] sm:$0xff] }
 0x579   : > { %v2826_v44 = vld [vmem:[%s8220_s29 + $0x4c40] sm:$0xff]  ;;  %5546 = vmatpush.msra.mxu0 %v2554_v42  ;;  %v1099_v42 = vld [vmem:[%s8220_s29 + $0x1648] sm:$0xff] }
 0x57a   : > { %v3066_v48 = vld [vmem:[%s8220_s29 + $0x53c0] sm:$0xff]  ;;  %5565 = vmatpush.msra.mxu1 %v2826_v44  ;;  %v1371_v44 = vld [vmem:[%s8220_s29 + $0x1ec8] sm:$0xff] }
 0x57b   : > { %v3338_v16 = vld [vmem:[%s8220_s29 + $0x5c40] sm:$0xff]  ;;  %5586 = vmatpush.msra.mxu2 %v3066_v48  ;;  %v5216_v48 = vadd.f32 %v5215_v39, %v5196_v13  ;;  %v715_v13 = vld [vmem:[%s8220_s29 + $0xa48] sm:$0xff] }
 0x57c   : > { %v2538_v30 = vld [vmem:[%s8220_s29 + $0x4340] sm:$0xff]  ;;  %5605 = vmatpush.msra.mxu3 %v3338_v16  ;;  %v571_v16 = vld [vmem:[%s8220_s29 + $0x5c8] sm:$0xff]  ;;  %v5295_v28 = vpop.f32.mrf.mxu3 }
 0x57d   : > { %v2810_v19 = vld [vmem:[%s8220_s29 + $0x4bc0] sm:$0xff]  ;;  %5547 = vmatpush.msra.mxu0 %v2538_v30  ;;  %v843_v30 = vld [vmem:[%s8220_s29 + $0xe48] sm:$0xff] }
 0x57e   : > { %v3050_v50 = vld [vmem:[%s8220_s29 + $0x5340] sm:$0xff]  ;;  %5566 = vmatpush.msra.mxu1 %v2810_v19  ;;  %v5235_v19 = vpop.f32.mrf.mxu0  ;;  %v1227_v39 = vld [vmem:[%s8220_s29 + $0x1a48] sm:$0xff] }
 0x57f   : > { %v3322_v46 = vld [vmem:[%s8220_s29 + $0x5bc0] sm:$0xff]  ;;  %5587 = vmatpush.msra.mxu2 %v3050_v50  ;;  %v1083_v50 = vld [vmem:[%s8220_s29 + $0x15c8] sm:$0xff] }
 0x580   : > { %v2522_v47 = vld [vmem:[%s8220_s29 + $0x42c0] sm:$0xff]  ;;  %5606 = vmatpush.msra.mxu3 %v3322_v46  ;;  %v1355_v46 = vld [vmem:[%s8220_s29 + $0x1e48] sm:$0xff] }
 0x581   : > { %v2794_v45 = vld [vmem:[%s8220_s29 + $0x4b40] sm:$0xff]  ;;  %5548 = vmatpush.msra.mxu0 %v2522_v47  ;;  %v555_v47 = vld [vmem:[%s8220_s29 + $0x548] sm:$0xff] }
 0x582   : > { %v3034_v43 = vld [vmem:[%s8220_s29 + $0x52c0] sm:$0xff]  ;;  %5567 = vmatpush.msra.mxu1 %v2794_v45  ;;  %v827_v45 = vld [vmem:[%s8220_s29 + $0xdc8] sm:$0xff] }
 0x583   : > { %v3306_v55 = vld [vmem:[%s8220_s29 + $0x5b40] sm:$0xff]  ;;  %5588 = vmatpush.msra.mxu2 %v3034_v43  ;;  %v5236_v43 = vadd.f32 %v5235_v19, %v5216_v48  ;;  %v411_v48 = vld [vmem:[%s8220_s29 + $0xc8] sm:$0xff] }
 0x584   : > { %v2506_v53 = vld [vmem:[%s8220_s29 + $0x4240] sm:$0xff]  ;;  %5607 = vmatpush.msra.mxu3 %v3306_v55  ;;  %v1067_v55 = vld [vmem:[%s8220_s29 + $0x1548] sm:$0xff] }
 0x585   : > { %v2778_v54 = vld [vmem:[%s8220_s29 + $0x4ac0] sm:$0xff]  ;;  %5549 = vmatpush.msra.mxu0 %v2506_v53  ;;  %v1339_v53 = vld [vmem:[%s8220_s29 + $0x1dc8] sm:$0xff] }
 0x586   : > { %v3018_v59 = vld [vmem:[%s8220_s29 + $0x5240] sm:$0xff]  ;;  %5568 = vmatpush.msra.mxu1 %v2778_v54  ;;  %v5255_v54 = vpop.f32.mrf.mxu1  ;;  %v1195_v19 = vld [vmem:[%s8220_s29 + $0x1948] sm:$0xff] }
 0x587   : > { %v3290_v60 = vld [vmem:[%s8220_s29 + $0x5ac0] sm:$0xff]  ;;  %5589 = vmatpush.msra.mxu2 %v3018_v59  ;;  %v539_v59 = vld [vmem:[%s8220_s29 + $0x4c8] sm:$0xff] }
 0x588   : > { %v2490_v49 = vld [vmem:[%s8220_s29 + $0x41c0] sm:$0xff]  ;;  %5608 = vmatpush.msra.mxu3 %v3290_v60  ;;  %v811_v60 = vld [vmem:[%s8220_s29 + $0xd48] sm:$0xff] }
 0x589   : > { %v2762_v52 = vld [vmem:[%s8220_s29 + $0x4a40] sm:$0xff]  ;;  %5550 = vmatpush.msra.mxu0 %v2490_v49  ;;  %v1051_v49 = vld [vmem:[%s8220_s29 + $0x14c8] sm:$0xff] }
 0x58a   : > { %v3002_v0 = vld [vmem:[%s8220_s29 + $0x51c0] sm:$0xff]  ;;  %5569 = vmatpush.msra.mxu1 %v2762_v52  ;;  %v1323_v52 = vld [vmem:[%s8220_s29 + $0x1d48] sm:$0xff] }
 0x58b   : > { %v3274_v51 = vld [vmem:[%s8220_s29 + $0x5a40] sm:$0xff]  ;;  %5590 = vmatpush.msra.mxu2 %v3002_v0  ;;  %v523_v0 = vld [vmem:[%s8220_s29 + $0x448] sm:$0xff] }
 0x58c   : > { %v2474_v63 = vld [vmem:[%s8220_s29 + $0x4140] sm:$0xff]  ;;  %5609 = vmatpush.msra.mxu3 %v3274_v51  ;;  %v795_v51 = vld [vmem:[%s8220_s29 + $0xcc8] sm:$0xff] }
 0x58d   : > { %v2746_v1 = vld [vmem:[%s8220_s29 + $0x49c0] sm:$0xff]  ;;  %5551 = vmatpush.msra.mxu0 %v2474_v63  ;;  %v5256_v63 = vadd.f32 %v5255_v54, %v5236_v43  ;;  %v907_v43 = vld [vmem:[%s8220_s29 + $0x1048] sm:$0xff] }
 0x58e   : > { %v2986_v2 = vld [vmem:[%s8220_s29 + $0x5140] sm:$0xff]  ;;  %5570 = vmatpush.msra.mxu1 %v2746_v1  ;;  %v1035_v1 = vld [vmem:[%s8220_s29 + $0x1448] sm:$0xff] }
 0x58f   : > { %v3258_v58 = vld [vmem:[%s8220_s29 + $0x59c0] sm:$0xff]  ;;  %5591 = vmatpush.msra.mxu2 %v2986_v2  ;;  %v1307_v2 = vld [vmem:[%s8220_s29 + $0x1cc8] sm:$0xff] }
 0x590   : > { %v2458_v57 = vld [vmem:[%s8220_s29 + $0x40c0] sm:$0xff]  ;;  %5610 = vmatpush.msra.mxu3 %v3258_v58  ;;  %v5275_v58 = vpop.f32.mrf.mxu2  ;;  %v1659_v54 = vld [vmem:[%s8220_s29 + $0x27c8] sm:$0xff] }
 0x591   : > { %v2730_v3 = vld [vmem:[%s8220_s29 + $0x4940] sm:$0xff]  ;;  %5552 = vmatpush.msra.mxu0 %v2458_v57  ;;  %v507_v57 = vld [vmem:[%s8220_s29 + $0x3c8] sm:$0xff]  ;;  %v5276_v12 = vadd.f32 %v5275_v58, %v5256_v63 }
 0x592   : > { %v2970_v4 = vld [vmem:[%s8220_s29 + $0x50c0] sm:$0xff]  ;;  %5571 = vmatpush.msra.mxu1 %v2730_v3  ;;  %v779_v3 = vld [vmem:[%s8220_s29 + $0xc48] sm:$0xff] }
 0x593   : > { %v3242_v5 = vld [vmem:[%s8220_s29 + $0x5940] sm:$0xff]  ;;  %5592 = vmatpush.msra.mxu2 %v2970_v4  ;;  %v1019_v4 = vld [vmem:[%s8220_s29 + $0x13c8] sm:$0xff] }
 0x594   : > { %v2442_v6 = vld [vmem:[%s8220_s29 + $0x4040] sm:$0xff]  ;;  %5611 = vmatpush.msra.mxu3 %v3242_v5  ;;  %v1291_v5 = vld [vmem:[%s8220_s29 + $0x1c48] sm:$0xff] }
 0x595   : > { %v2714_v7 = vld [vmem:[%s8220_s29 + $0x48c0] sm:$0xff]  ;;  %5553 = vmatpush.msra.mxu0 %v2442_v6  ;;  %v491_v6 = vld [vmem:[%s8220_s29 + $0x348] sm:$0xff] }
 0x596   : > { %v2954_v23 = vld [vmem:[%s8220_s29 + $0x5040] sm:$0xff]  ;;  %5572 = vmatpush.msra.mxu1 %v2714_v7  ;;  %v763_v7 = vld [vmem:[%s8220_s29 + $0xbc8] sm:$0xff] }
 0x597   : > { %v3226_v8 = vld [vmem:[%s8220_s29 + $0x58c0] sm:$0xff]  ;;  %5593 = vmatpush.msra.mxu2 %v2954_v23  ;;  %5618 = vmatpush.msrb.mxu0 %v635_v29  ;;  %v1003_v23 = vld [vmem:[%s8220_s29 + $0x1348] sm:$0xff] }
 0x598   : > { %5612 = vmatpush.msra.mxu3 %v3226_v8  ;;  %v2698_v35 = vld [vmem:[%s8220_s29 + $0x4840] sm:$0xff]  ;;  %5594 = vmatmul.f32.vlgmr.msra.gmra.mxu2 %v10275_v37  ;;  %v1275_v8 = vld [vmem:[%s8220_s29 + $0x1bc8] sm:$0xff] }
 0x599   : > { %v3210_v10 = vld [vmem:[%s8220_s29 + $0x5840] sm:$0xff]  ;;  %5658 = vmatpush.msrb.mxu2 %v1147_v32  ;;  %5573 = vmatpush.msra.mxu1 %v2698_v35  ;;  %v475_v29 = vld [vmem:[%s8220_s29 + $0x2c8] sm:$0xff] }
 0x59a   : > { %v10271_v15 = vld [vmem:[%s8212_s17 + $0x40] sm:$0xff]  ;;  %5613 = vmatpush.msra.mxu3 %v3210_v10  ;;  %5574 = vmatmul.f32.vlgmr.msra.gmra.mxu1 %v10283_v36  ;;  %v747_v32 = vld [vmem:[%s8220_s29 + $0xb48] sm:$0xff] }
 0x59b   : > { %5554 = vmatmul.f32.vlgmr.msra.gmra.mxu0 %v10271_v15  ;;  %5614 = vmatmul.f32.vlgmr.msra.gmra.mxu3 %v10287_v31  ;;  %v1259_v35 = vld [vmem:[%s8220_s29 + $0x1b48] sm:$0xff] }
 0x59c   : > { %5619 = vmatpush.msrb.mxu0 %v619_v9  ;;  %5638 = vmatpush.msrb.mxu1 %v891_v38  ;;  %v459_v10 = vld [vmem:[%s8220_s29 + $0x248] sm:$0xff]  ;;  %v5296_v9 = vadd.f32 %v5295_v28, %v5276_v12 }
 0x59d   : > { %5659 = vmatpush.msrb.mxu2 %v1131_v24  ;;  %5678 = vmatpush.msrb.mxu3 %v1403_v25  ;;  %v971_v38 = vld [vmem:[%s8220_s29 + $0x1248] sm:$0xff] }
 0x59e   : > { %5620 = vmatpush.msrb.mxu0 %v603_v33  ;;  %5639 = vmatpush.msrb.mxu1 %v875_v34  ;;  %v1243_v24 = vld [vmem:[%s8220_s29 + $0x1ac8] sm:$0xff]  ;;  %v5315_v33 = vpop.f32.mrf.mxu0 }
 0x59f   : > { %5660 = vmatpush.msrb.mxu2 %v1115_v21  ;;  %5679 = vmatpush.msrb.mxu3 %v1387_v40  ;;  %v443_v25 = vld [vmem:[%s8220_s29 + $0x1c8] sm:$0xff]  ;;  %v5316_v21 = vadd.f32 %v5315_v33, %v5296_v9 }
 0x5a0   : > { %5621 = vmatpush.msrb.mxu0 %v587_v41  ;;  %5640 = vmatpush.msrb.mxu1 %v859_v26  ;;  %v955_v34 = vld [vmem:[%s8220_s29 + $0x11c8] sm:$0xff] }
 0x5a1   : > { %5661 = vmatpush.msrb.mxu2 %v1099_v42  ;;  %5680 = vmatpush.msrb.mxu3 %v1371_v44  ;;  %v427_v40 = vld [vmem:[%s8220_s29 + $0x148] sm:$0xff]  ;;  %v5335_v44 = vpop.f32.mrf.mxu1 }
 0x5a2   : > { %5622 = vmatpush.msrb.mxu0 %v571_v16  ;;  %5641 = vmatpush.msrb.mxu1 %v843_v30  ;;  %v699_v41 = vld [vmem:[%s8220_s29 + $0x9c8] sm:$0xff] }
 0x5a3   : > { %5662 = vmatpush.msrb.mxu2 %v1083_v50  ;;  %5681 = vmatpush.msrb.mxu3 %v1355_v46  ;;  %v939_v26 = vld [vmem:[%s8220_s29 + $0x1148] sm:$0xff]  ;;  %v5336_v50 = vadd.f32 %v5335_v44, %v5316_v21 }
 0x5a4   : > { %5623 = vmatpush.msrb.mxu0 %v555_v47  ;;  %5642 = vmatpush.msrb.mxu1 %v827_v45  ;;  %v1211_v42 = vld [vmem:[%s8220_s29 + $0x19c8] sm:$0xff]  ;;  %v5355_v45 = vpop.f32.mrf.mxu2 }
 0x5a5   : > { %5663 = vmatpush.msrb.mxu2 %v1067_v55  ;;  %5682 = vmatpush.msrb.mxu3 %v1339_v53  ;;  %v683_v16 = vld [vmem:[%s8220_s29 + $0x948] sm:$0xff]  ;;  %v5356_v53 = vadd.f32 %v5355_v45, %v5336_v50 }
 0x5a6   : > { %5624 = vmatpush.msrb.mxu0 %v539_v59  ;;  %5643 = vmatpush.msrb.mxu1 %v811_v60  ;;  %v923_v30 = vld [vmem:[%s8220_s29 + $0x10c8] sm:$0xff] }
 0x5a7   : > { %5664 = vmatpush.msrb.mxu2 %v1051_v49  ;;  %5683 = vmatpush.msrb.mxu3 %v1323_v52  ;;  %v395_v46 = vld [vmem:[%s8220_s29 + $0x48] sm:$0xff]  ;;  %v365_v52 = vld [vmem:[%s8235_s7 + $0x38] sm:$0xff] }
 0x5a8   : > { %5625 = vmatpush.msrb.mxu0 %v523_v0  ;;  %5644 = vmatpush.msrb.mxu1 %v795_v51  ;;  %v667_v47 = vld [vmem:[%s8220_s29 + $0x8c8] sm:$0xff]  ;;  %v5375_v0 = vpop.f32.mrf.mxu3 }
 0x5a9   : > { %5665 = vmatpush.msrb.mxu2 %v1035_v1  ;;  %5684 = vmatpush.msrb.mxu3 %v1307_v2  ;;  %v1179_v55 = vld [vmem:[%s8220_s29 + $0x18c8] sm:$0xff]  ;;  %v5376_v1 = vadd.f32 %v5375_v0, %v5356_v53 }
 0x5aa   : > { %5626 = vmatpush.msrb.mxu0 %v507_v57  ;;  %5645 = vmatpush.msrb.mxu1 %v779_v3  ;;  %v2171_v59 = vld [vmem:[%s8220_s29 + $0x37c8] sm:$0xff] }
 0x5ab   : > { %5666 = vmatpush.msrb.mxu2 %v1019_v4  ;;  %5685 = vmatpush.msrb.mxu3 %v1291_v5  ;;  %v651_v60 = vld [vmem:[%s8220_s29 + $0x848] sm:$0xff]  ;;  %v7305_v4 = vadd.f32 %v5376_v1, %v365_v52 }
 0x5ac   : > { %5627 = vmatpush.msrb.mxu0 %v491_v6  ;;  %5646 = vmatpush.msrb.mxu1 %v763_v7  ;;  %v1163_v49 = vld [vmem:[%s8220_s29 + $0x1848] sm:$0xff] }
 0x5ad   : > { %5667 = vmatpush.msrb.mxu2 %v1003_v23  ;;  %5686 = vmatpush.msrb.mxu3 %v1275_v8  ;;  %v1643_v51 = vld [vmem:[%s8220_s29 + $0x2748] sm:$0xff]  ;;  %7321 = vst [vmem:[%s8235_s7 + $0x38] sm:$0xff] %v7305_v4 }
 0x5ae   : > { %5628 = vmatpush.msrb.mxu0 %v475_v29  ;;  %5647 = vmatpush.msrb.mxu1 %v747_v32  ;;  %v1915_v63 = vld [vmem:[%s8220_s29 + $0x2fc8] sm:$0xff] }
 0x5af   : > { %5668 = vmatpush.msrb.mxu2 %v987_v18  ;;  %5687 = vmatpush.msrb.mxu3 %v1259_v35  ;;  %v2155_v2 = vld [vmem:[%s8220_s29 + $0x3748] sm:$0xff] }
 0x5b0   : > { %5629 = vmatpush.msrb.mxu0 %v459_v10  ;;  %5648 = vmatpush.msrb.mxu1 %v731_v11  ;;  %v2427_v58 = vld [vmem:[%s8220_s29 + $0x3fc8] sm:$0xff] }
 0x5b1   : > { %5669 = vmatpush.msrb.mxu2 %v971_v38  ;;  %5688 = vmatpush.msrb.mxu3 %v1243_v24  ;;  %v1627_v57 = vld [vmem:[%s8220_s29 + $0x26c8] sm:$0xff] }
 0x5b2   : > { %5630 = vmatpush.msrb.mxu0 %v443_v25  ;;  %5649 = vmatpush.msrb.mxu1 %v715_v13  ;;  %v1899_v3 = vld [vmem:[%s8220_s29 + $0x2f48] sm:$0xff] }
 0x5b3   : > { %5670 = vmatpush.msrb.mxu2 %v955_v34  ;;  %5689 = vmatpush.msrb.mxu3 %v1227_v39  ;;  %v2139_v5 = vld [vmem:[%s8220_s29 + $0x36c8] sm:$0xff] }
 0x5b4   : > { %5631 = vmatpush.msrb.mxu0 %v427_v40  ;;  %5650 = vmatpush.msrb.mxu1 %v699_v41  ;;  %v2411_v6 = vld [vmem:[%s8220_s29 + $0x3f48] sm:$0xff] }
 0x5b5   : > { %5671 = vmatpush.msrb.mxu2 %v939_v26  ;;  %5690 = vmatpush.msrb.mxu3 %v1211_v42  ;;  %v1611_v7 = vld [vmem:[%s8220_s29 + $0x2648] sm:$0xff] }
 0x5b6   : > { %5632 = vmatpush.msrb.mxu0 %v411_v48  ;;  %5651 = vmatpush.msrb.mxu1 %v683_v16  ;;  %v1883_v12 = vld [vmem:[%s8220_s29 + $0x2ec8] sm:$0xff] }
 0x5b7   : > { %5672 = vmatpush.msrb.mxu2 %v923_v30  ;;  %5691 = vmatpush.msrb.mxu3 %v1195_v19  ;;  %v2123_v23 = vld [vmem:[%s8220_s29 + $0x3648] sm:$0xff] }
 0x5b8   : > { %5633 = vmatpush.msrb.mxu0 %v395_v46  ;;  %5652 = vmatpush.msrb.mxu1 %v667_v47  ;;  %v2395_v8 = vld [vmem:[%s8220_s29 + $0x3ec8] sm:$0xff] }
 0x5b9   : > { %5673 = vmatpush.msrb.mxu2 %v907_v43  ;;  %5692 = vmatpush.msrb.mxu3 %v1179_v55  ;;  %v1595_v28 = vld [vmem:[%s8220_s29 + $0x25c8] sm:$0xff] }
 0x5ba   : > { %5698 = vmatpush.msra.mxu0 %v1659_v54  ;;  %5653 = vmatpush.msrb.mxu1 %v651_v60  ;;  %v1867_v29 = vld [vmem:[%s8220_s29 + $0x2e48] sm:$0xff] }
 0x5bb   : > { %5738 = vmatpush.msra.mxu2 %v2171_v59  ;;  %5693 = vmatpush.msrb.mxu3 %v1163_v49  ;;  %v2107_v32 = vld [vmem:[%s8220_s29 + $0x35c8] sm:$0xff] }
 0x5bc   : > { %5699 = vmatpush.msra.mxu0 %v1643_v51  ;;  %5718 = vmatpush.msra.mxu1 %v1915_v63  ;;  %v2379_v18 = vld [vmem:[%s8220_s29 + $0x3e48] sm:$0xff] }
 0x5bd   : > { %5739 = vmatpush.msra.mxu2 %v2155_v2  ;;  %5758 = vmatpush.msra.mxu3 %v2427_v58  ;;  %v1579_v35 = vld [vmem:[%s8220_s29 + $0x2548] sm:$0xff] }
 0x5be   : > { %5700 = vmatpush.msra.mxu0 %v1627_v57  ;;  %5719 = vmatpush.msra.mxu1 %v1899_v3  ;;  %v1851_v10 = vld [vmem:[%s8220_s29 + $0x2dc8] sm:$0xff] }
 0x5bf   : > { %5740 = vmatpush.msra.mxu2 %v2139_v5  ;;  %5759 = vmatpush.msra.mxu3 %v2411_v6  ;;  %v2091_v11 = vld [vmem:[%s8220_s29 + $0x3548] sm:$0xff] }
 0x5c0   : > { %5701 = vmatpush.msra.mxu0 %v1611_v7  ;;  %5720 = vmatpush.msra.mxu1 %v1883_v12  ;;  %v2363_v9 = vld [vmem:[%s8220_s29 + $0x3dc8] sm:$0xff] }
 0x5c1   : > { %5741 = vmatpush.msra.mxu2 %v2123_v23  ;;  %5760 = vmatpush.msra.mxu3 %v2395_v8  ;;  %v1563_v38 = vld [vmem:[%s8220_s29 + $0x24c8] sm:$0xff] }
 0x5c2   : > { %5702 = vmatpush.msra.mxu0 %v1595_v28  ;;  %5721 = vmatpush.msra.mxu1 %v1867_v29  ;;  %v1835_v24 = vld [vmem:[%s8220_s29 + $0x2d48] sm:$0xff] }
 0x5c3   : > { %5742 = vmatpush.msra.mxu2 %v2107_v32  ;;  %5761 = vmatpush.msra.mxu3 %v2379_v18  ;;  %v2075_v25 = vld [vmem:[%s8220_s29 + $0x34c8] sm:$0xff] }
 0x5c4   : > { %5703 = vmatpush.msra.mxu0 %v1579_v35  ;;  %5722 = vmatpush.msra.mxu1 %v1851_v10  ;;  %v2347_v13 = vld [vmem:[%s8220_s29 + $0x3d48] sm:$0xff] }
 0x5c5   : > { %5743 = vmatpush.msra.mxu2 %v2091_v11  ;;  %5762 = vmatpush.msra.mxu3 %v2363_v9  ;;  %v1547_v33 = vld [vmem:[%s8220_s29 + $0x2448] sm:$0xff] }
 0x5c6   : > { %v1819_v34 = vld [vmem:[%s8220_s29 + $0x2cc8] sm:$0xff]  ;;  %5704 = vmatpush.msra.mxu0 %v1563_v38  ;;  %5723 = vmatpush.msra.mxu1 %v1835_v24 }
 0x5c7   : > { %v2059_v39 = vld [vmem:[%s8220_s29 + $0x3448] sm:$0xff]  ;;  %5744 = vmatpush.msra.mxu2 %v2075_v25  ;;  %5763 = vmatpush.msra.mxu3 %v2347_v13 }
 0x5c8   : > { %v2331_v21 = vld [vmem:[%s8220_s29 + $0x3cc8] sm:$0xff]  ;;  %5705 = vmatpush.msra.mxu0 %v1547_v33  ;;  %5724 = vmatpush.msra.mxu1 %v1819_v34 }
 0x5c9   : > { %v1531_v40 = vld [vmem:[%s8220_s29 + $0x23c8] sm:$0xff]  ;;  %5745 = vmatpush.msra.mxu2 %v2059_v39  ;;  %5764 = vmatpush.msra.mxu3 %v2331_v21 }
 0x5ca   : > { %v1803_v41 = vld [vmem:[%s8220_s29 + $0x2c48] sm:$0xff]  ;;  %5706 = vmatpush.msra.mxu0 %v1531_v40  ;;  %5674 = vmatmul.f32.vlgmr.msrb.gmra.mxu2 %v10171_v17 }
 0x5cb   : > { %v2043_v26 = vld [vmem:[%s8220_s29 + $0x33c8] sm:$0xff]  ;;  %5725 = vmatpush.msra.mxu1 %v1803_v41  ;;  %5634 = vmatmul.f32.vlgmr.msrb.gmra.mxu0 %v10178_v61 }
 0x5cc   : > { %v2315_v42 = vld [vmem:[%s8220_s29 + $0x3c48] sm:$0xff]  ;;  %5746 = vmatpush.msra.mxu2 %v2043_v26  ;;  %5694 = vmatmul.f32.vlgmr.msrb.gmra.mxu3 %v10183_v62 }
 0x5cd   : > { %v1515_v44 = vld [vmem:[%s8220_s29 + $0x2348] sm:$0xff]  ;;  %5765 = vmatpush.msra.mxu3 %v2315_v42  ;;  %5654 = vmatmul.f32.vlgmr.msrb.gmra.mxu1 %v10191_v56 }
 0x5ce   : > { %v1787_v48 = vld [vmem:[%s8220_s29 + $0x2bc8] sm:$0xff]  ;;  %5707 = vmatpush.msra.mxu0 %v1515_v44 }
 0x5cf   : > { %v2027_v16 = vld [vmem:[%s8220_s29 + $0x3348] sm:$0xff]  ;;  %5726 = vmatpush.msra.mxu1 %v1787_v48 }
 0x5d0   : > { %v2299_v30 = vld [vmem:[%s8220_s29 + $0x3bc8] sm:$0xff]  ;;  %5747 = vmatpush.msra.mxu2 %v2027_v16 }
 0x5d1   : > { %v1499_v19 = vld [vmem:[%s8220_s29 + $0x22c8] sm:$0xff]  ;;  %5766 = vmatpush.msra.mxu3 %v2299_v30 }
 0x5d2   : > { %v1771_v50 = vld [vmem:[%s8220_s29 + $0x2b48] sm:$0xff]  ;;  %5708 = vmatpush.msra.mxu0 %v1499_v19 }
 0x5d3   : > { %v2011_v46 = vld [vmem:[%s8220_s29 + $0x32c8] sm:$0xff]  ;;  %5727 = vmatpush.msra.mxu1 %v1771_v50 }
 0x5d4   : > { %v2283_v47 = vld [vmem:[%s8220_s29 + $0x3b48] sm:$0xff]  ;;  %5748 = vmatpush.msra.mxu2 %v2011_v46 }
 0x5d5   : > { %v1483_v45 = vld [vmem:[%s8220_s29 + $0x2248] sm:$0xff]  ;;  %5767 = vmatpush.msra.mxu3 %v2283_v47 }
 0x5d6   : > { %v1755_v43 = vld [vmem:[%s8220_s29 + $0x2ac8] sm:$0xff]  ;;  %5709 = vmatpush.msra.mxu0 %v1483_v45 }
 0x5d7   : > { %v1995_v55 = vld [vmem:[%s8220_s29 + $0x3248] sm:$0xff]  ;;  %5728 = vmatpush.msra.mxu1 %v1755_v43 }
 0x5d8   : > { %v2267_v53 = vld [vmem:[%s8220_s29 + $0x3ac8] sm:$0xff]  ;;  %5749 = vmatpush.msra.mxu2 %v1995_v55 }
 0x5d9   : > { %v1467_v54 = vld [vmem:[%s8220_s29 + $0x21c8] sm:$0xff]  ;;  %5768 = vmatpush.msra.mxu3 %v2267_v53 }
 0x5da   : > { %v1739_v59 = vld [vmem:[%s8220_s29 + $0x2a48] sm:$0xff]  ;;  %5710 = vmatpush.msra.mxu0 %v1467_v54 }
 0x5db   : > { %v1979_v60 = vld [vmem:[%s8220_s29 + $0x31c8] sm:$0xff]  ;;  %5729 = vmatpush.msra.mxu1 %v1739_v59 }
 0x5dc   : > { %v2251_v49 = vld [vmem:[%s8220_s29 + $0x3a48] sm:$0xff]  ;;  %5750 = vmatpush.msra.mxu2 %v1979_v60 }
 0x5dd   : > { %v1451_v52 = vld [vmem:[%s8220_s29 + $0x2148] sm:$0xff]  ;;  %5769 = vmatpush.msra.mxu3 %v2251_v49 }
 0x5de   : > { %v1723_v0 = vld [vmem:[%s8220_s29 + $0x29c8] sm:$0xff]  ;;  %5711 = vmatpush.msra.mxu0 %v1451_v52 }
 0x5df   : > { %v1963_v51 = vld [vmem:[%s8220_s29 + $0x3148] sm:$0xff]  ;;  %5730 = vmatpush.msra.mxu1 %v1723_v0 }
 0x5e0   : > { %v2235_v63 = vld [vmem:[%s8220_s29 + $0x39c8] sm:$0xff]  ;;  %5751 = vmatpush.msra.mxu2 %v1963_v51 }
 0x5e1   : > { %v1435_v1 = vld [vmem:[%s8220_s29 + $0x20c8] sm:$0xff]  ;;  %5770 = vmatpush.msra.mxu3 %v2235_v63 }
 0x5e2   : > { %v1707_v2 = vld [vmem:[%s8220_s29 + $0x2948] sm:$0xff]  ;;  %5712 = vmatpush.msra.mxu0 %v1435_v1 }
 0x5e3   : > { %v1947_v58 = vld [vmem:[%s8220_s29 + $0x30c8] sm:$0xff]  ;;  %5731 = vmatpush.msra.mxu1 %v1707_v2 }
 0x5e4   : > { %v2219_v57 = vld [vmem:[%s8220_s29 + $0x3948] sm:$0xff]  ;;  %5752 = vmatpush.msra.mxu2 %v1947_v58 }
 0x5e5   : > { %v1419_v3 = vld [vmem:[%s8220_s29 + $0x2048] sm:$0xff]  ;;  %5771 = vmatpush.msra.mxu3 %v2219_v57 }
 0x5e6   : > { %v1691_v4 = vld [vmem:[%s8220_s29 + $0x28c8] sm:$0xff]  ;;  %5713 = vmatpush.msra.mxu0 %v1419_v3 }
 0x5e7   : > { %v1931_v5 = vld [vmem:[%s8220_s29 + $0x3048] sm:$0xff]  ;;  %5732 = vmatpush.msra.mxu1 %v1691_v4  ;;  %5714 = vmatmul.f32.vlgmr.msra.gmra.mxu0 %v10210_v22 }
 0x5e8   : > { %v2203_v6 = vld [vmem:[%s8220_s29 + $0x38c8] sm:$0xff]  ;;  %5753 = vmatpush.msra.mxu2 %v1931_v5 }
 0x5e9   : > { %v2683_v7 = vld [vmem:[%s8220_s29 + $0x47c8] sm:$0xff]  ;;  %5772 = vmatpush.msra.mxu3 %v2203_v6  ;;  %5754 = vmatmul.f32.vlgmr.msra.gmra.mxu2 %v10203_v14 }
 0x5ea   : > { %v3195_v12 = vld [vmem:[%s8220_s29 + $0x57c8] sm:$0xff]  ;;  %5778 = vmatpush.msrb.mxu0 %v2683_v7 }
 0x5eb   : > { %v1675_v23 = vld [vmem:[%s8220_s29 + $0x2848] sm:$0xff]  ;;  %5818 = vmatpush.msrb.mxu2 %v3195_v12 }
 0x5ec   : > { %v2187_v8 = vld [vmem:[%s8220_s29 + $0x3848] sm:$0xff]  ;;  %5733 = vmatpush.msra.mxu1 %v1675_v23  ;;  %v5415_v23 = vpop.f32.mrf.mxu1 }
 0x5ed   : > { %v2667_v17 = vld [vmem:[%s8220_s29 + $0x4748] sm:$0xff]  ;;  %5773 = vmatpush.msra.mxu3 %v2187_v8  ;;  %5734 = vmatmul.f32.vlgmr.msra.gmra.mxu1 %v10223_v27 }
 0x5ee   : > { %v2939_v28 = vld [vmem:[%s8220_s29 + $0x4fc8] sm:$0xff]  ;;  %5779 = vmatpush.msrb.mxu0 %v2667_v17  ;;  %5774 = vmatmul.f32.vlgmr.msra.gmra.mxu3 %v10215_v20 }
 0x5ef   : > { %v3179_v29 = vld [vmem:[%s8220_s29 + $0x5748] sm:$0xff]  ;;  %5798 = vmatpush.msrb.mxu1 %v2939_v28  ;;  %v5395_v28 = vpop.f32.mrf.mxu0 }
 0x5f0   : > { %v3451_v32 = vld [vmem:[%s8220_s29 + $0x5fc8] sm:$0xff]  ;;  %5819 = vmatpush.msrb.mxu2 %v3179_v29  ;;  %v636_v29 = vld [vmem:[%s8220_s29 + $0x7d0] sm:$0xff] }
 0x5f1   : > { %v2651_v61 = vld [vmem:[%s8220_s29 + $0x46c8] sm:$0xff]  ;;  %5838 = vmatpush.msrb.mxu3 %v3451_v32  ;;  %v1148_v32 = vld [vmem:[%s8220_s29 + $0x17d0] sm:$0xff] }
 0x5f2   : > { %v2923_v18 = vld [vmem:[%s8220_s29 + $0x4f48] sm:$0xff]  ;;  %5780 = vmatpush.msrb.mxu0 %v2651_v61  ;;  %v5416_v61 = vadd.f32 %v5415_v23, %v5395_v28  ;;  %v1244_v23 = vld [vmem:[%s8220_s29 + $0x1ad0] sm:$0xff] }
 0x5f3   : > { %v3163_v62 = vld [vmem:[%s8220_s29 + $0x56c8] sm:$0xff]  ;;  %5799 = vmatpush.msrb.mxu1 %v2923_v18 }
 0x5f4   : > { %v3435_v35 = vld [vmem:[%s8220_s29 + $0x5f48] sm:$0xff]  ;;  %5820 = vmatpush.msrb.mxu2 %v3163_v62 }
 0x5f5   : > { %v2635_v10 = vld [vmem:[%s8220_s29 + $0x4648] sm:$0xff]  ;;  %5839 = vmatpush.msrb.mxu3 %v3435_v35  ;;  %v5435_v35 = vpop.f32.mrf.mxu2 }
 0x5f6   : > { %v2907_v11 = vld [vmem:[%s8220_s29 + $0x4ec8] sm:$0xff]  ;;  %5781 = vmatpush.msrb.mxu0 %v2635_v10  ;;  %v620_v10 = vld [vmem:[%s8220_s29 + $0x750] sm:$0xff] }
 0x5f7   : > { %v3147_v9 = vld [vmem:[%s8220_s29 + $0x5648] sm:$0xff]  ;;  %5800 = vmatpush.msrb.mxu1 %v2907_v11  ;;  %v892_v11 = vld [vmem:[%s8220_s29 + $0xfd0] sm:$0xff] }
 0x5f8   : > { %v3419_v56 = vld [vmem:[%s8220_s29 + $0x5ec8] sm:$0xff]  ;;  %5821 = vmatpush.msrb.mxu2 %v3147_v9  ;;  %v1132_v9 = vld [vmem:[%s8220_s29 + $0x1750] sm:$0xff] }
 0x5f9   : > { %v2619_v38 = vld [vmem:[%s8220_s29 + $0x45c8] sm:$0xff]  ;;  %5840 = vmatpush.msrb.mxu3 %v3419_v56  ;;  %v1404_v56 = vld [vmem:[%s8220_s29 + $0x1fd0] sm:$0xff] }
 0x5fa   : > { %v2891_v24 = vld [vmem:[%s8220_s29 + $0x4e48] sm:$0xff]  ;;  %5782 = vmatpush.msrb.mxu0 %v2619_v38  ;;  %v5436_v38 = vadd.f32 %v5435_v35, %v5416_v61  ;;  %v940_v35 = vld [vmem:[%s8220_s29 + $0x1150] sm:$0xff] }
 0x5fb   : > { %v3131_v25 = vld [vmem:[%s8220_s29 + $0x55c8] sm:$0xff]  ;;  %5801 = vmatpush.msrb.mxu1 %v2891_v24  ;;  %v5455_v24 = vpop.f32.mrf.mxu3 }
 0x5fc   : > { %v3403_v13 = vld [vmem:[%s8220_s29 + $0x5e48] sm:$0xff]  ;;  %5822 = vmatpush.msrb.mxu2 %v3131_v25  ;;  %v1116_v25 = vld [vmem:[%s8220_s29 + $0x16d0] sm:$0xff] }
 0x5fd   : > { %v2603_v14 = vld [vmem:[%s8220_s29 + $0x4548] sm:$0xff]  ;;  %5841 = vmatpush.msrb.mxu3 %v3403_v13  ;;  %v1388_v13 = vld [vmem:[%s8220_s29 + $0x1f50] sm:$0xff] }
 0x5fe   : > { %v2875_v33 = vld [vmem:[%s8220_s29 + $0x4dc8] sm:$0xff]  ;;  %5783 = vmatpush.msrb.mxu0 %v2603_v14  ;;  %v588_v14 = vld [vmem:[%s8220_s29 + $0x650] sm:$0xff] }
 0x5ff   : > { %v3115_v34 = vld [vmem:[%s8220_s29 + $0x5548] sm:$0xff]  ;;  %5802 = vmatpush.msrb.mxu1 %v2875_v33  ;;  %v860_v33 = vld [vmem:[%s8220_s29 + $0xed0] sm:$0xff] }
 0x600   : > { %v3387_v39 = vld [vmem:[%s8220_s29 + $0x5dc8] sm:$0xff]  ;;  %5823 = vmatpush.msrb.mxu2 %v3115_v34  ;;  %v5456_v34 = vadd.f32 %v5455_v24, %v5436_v38  ;;  %v924_v38 = vld [vmem:[%s8220_s29 + $0x10d0] sm:$0xff] }
 0x601   : > { %v2587_v22 = vld [vmem:[%s8220_s29 + $0x44c8] sm:$0xff]  ;;  %5842 = vmatpush.msrb.mxu3 %v3387_v39  ;;  %v572_v39 = vld [vmem:[%s8220_s29 + $0x5d0] sm:$0xff] }
 0x602   : > { %v2859_v21 = vld [vmem:[%s8220_s29 + $0x4d48] sm:$0xff]  ;;  %5784 = vmatpush.msrb.mxu0 %v2587_v22  ;;  %v844_v22 = vld [vmem:[%s8220_s29 + $0xe50] sm:$0xff] }
 0x603   : > { %v3099_v20 = vld [vmem:[%s8220_s29 + $0x54c8] sm:$0xff]  ;;  %5803 = vmatpush.msrb.mxu1 %v2859_v21  ;;  %v5475_v21 = vpop.f32.mrf.mxu0  ;;  %v396_v24 = vld [vmem:[%s8220_s29 + $0x50] sm:$0xff] }
 0x604   : > { %v3371_v40 = vld [vmem:[%s8220_s29 + $0x5d48] sm:$0xff]  ;;  %5824 = vmatpush.msrb.mxu2 %v3099_v20  ;;  %v1084_v20 = vld [vmem:[%s8220_s29 + $0x15d0] sm:$0xff] }
 0x605   : > { %v2571_v41 = vld [vmem:[%s8220_s29 + $0x4448] sm:$0xff]  ;;  %5843 = vmatpush.msrb.mxu3 %v3371_v40  ;;  %v1356_v40 = vld [vmem:[%s8220_s29 + $0x1e50] sm:$0xff] }
 0x606   : > { %v2843_v26 = vld [vmem:[%s8220_s29 + $0x4cc8] sm:$0xff]  ;;  %5785 = vmatpush.msrb.mxu0 %v2571_v41  ;;  %v556_v41 = vld [vmem:[%s8220_s29 + $0x550] sm:$0xff] }
 0x607   : > { %v3083_v42 = vld [vmem:[%s8220_s29 + $0x5448] sm:$0xff]  ;;  %5804 = vmatpush.msrb.mxu1 %v2843_v26  ;;  %v828_v26 = vld [vmem:[%s8220_s29 + $0xdd0] sm:$0xff] }
 0x608   : > { %v3355_v27 = vld [vmem:[%s8220_s29 + $0x5cc8] sm:$0xff]  ;;  %5825 = vmatpush.msrb.mxu2 %v3083_v42  ;;  %v5476_v42 = vadd.f32 %v5475_v21, %v5456_v34  ;;  %v2172_v34 = vld [vmem:[%s8220_s29 + $0x37d0] sm:$0xff]  ;;  %v366_v21 = vld [vmem:[%s8235_s7 + $0x40] sm:$0xff] }
 0x609   : > { %v2555_v44 = vld [vmem:[%s8220_s29 + $0x43c8] sm:$0xff]  ;;  %5844 = vmatpush.msrb.mxu3 %v3355_v27  ;;  %v1068_v27 = vld [vmem:[%s8220_s29 + $0x1550] sm:$0xff] }
 0x60a   : > { %v2827_v48 = vld [vmem:[%s8220_s29 + $0x4c48] sm:$0xff]  ;;  %5786 = vmatpush.msrb.mxu0 %v2555_v44  ;;  %v1340_v44 = vld [vmem:[%s8220_s29 + $0x1dd0] sm:$0xff] }
 0x60b   : > { %v3067_v16 = vld [vmem:[%s8220_s29 + $0x53c8] sm:$0xff]  ;;  %5805 = vmatpush.msrb.mxu1 %v2827_v48  ;;  %v5495_v48 = vpop.f32.mrf.mxu1 }
 0x60c   : > { %v3339_v30 = vld [vmem:[%s8220_s29 + $0x5c48] sm:$0xff]  ;;  %5826 = vmatpush.msrb.mxu2 %v3067_v16  ;;  %v540_v16 = vld [vmem:[%s8220_s29 + $0x4d0] sm:$0xff] }
 0x60d   : > { %v2539_v19 = vld [vmem:[%s8220_s29 + $0x4348] sm:$0xff]  ;;  %5845 = vmatpush.msrb.mxu3 %v3339_v30  ;;  %v812_v30 = vld [vmem:[%s8220_s29 + $0xd50] sm:$0xff] }
 0x60e   : > { %v2811_v50 = vld [vmem:[%s8220_s29 + $0x4bc8] sm:$0xff]  ;;  %5787 = vmatpush.msrb.mxu0 %v2539_v19  ;;  %v1052_v19 = vld [vmem:[%s8220_s29 + $0x14d0] sm:$0xff] }
 0x60f   : > { %v3051_v46 = vld [vmem:[%s8220_s29 + $0x5348] sm:$0xff]  ;;  %5806 = vmatpush.msrb.mxu1 %v2811_v50  ;;  %v1324_v50 = vld [vmem:[%s8220_s29 + $0x1d50] sm:$0xff] }
 0x610   : > { %v3323_v47 = vld [vmem:[%s8220_s29 + $0x5bc8] sm:$0xff]  ;;  %5827 = vmatpush.msrb.mxu2 %v3051_v46  ;;  %v524_v46 = vld [vmem:[%s8220_s29 + $0x450] sm:$0xff] }
 0x611   : > { %v2523_v45 = vld [vmem:[%s8220_s29 + $0x42c8] sm:$0xff]  ;;  %5846 = vmatpush.msrb.mxu3 %v3323_v47  ;;  %v796_v47 = vld [vmem:[%s8220_s29 + $0xcd0] sm:$0xff] }
 0x612   : > { %v2795_v43 = vld [vmem:[%s8220_s29 + $0x4b48] sm:$0xff]  ;;  %5788 = vmatpush.msrb.mxu0 %v2523_v45  ;;  %v5496_v45 = vadd.f32 %v5495_v48, %v5476_v42  ;;  %v2156_v42 = vld [vmem:[%s8220_s29 + $0x3750] sm:$0xff] }
 0x613   : > { %v3035_v55 = vld [vmem:[%s8220_s29 + $0x52c8] sm:$0xff]  ;;  %5807 = vmatpush.msrb.mxu1 %v2795_v43  ;;  %v1036_v43 = vld [vmem:[%s8220_s29 + $0x1450] sm:$0xff] }
 0x614   : > { %v3307_v53 = vld [vmem:[%s8220_s29 + $0x5b48] sm:$0xff]  ;;  %5828 = vmatpush.msrb.mxu2 %v3035_v55  ;;  %v1308_v55 = vld [vmem:[%s8220_s29 + $0x1cd0] sm:$0xff] }
 0x615   : > { %v2507_v54 = vld [vmem:[%s8220_s29 + $0x4248] sm:$0xff]  ;;  %5847 = vmatpush.msrb.mxu3 %v3307_v53  ;;  %v5515_v53 = vpop.f32.mrf.mxu2  ;;  %v1900_v48 = vld [vmem:[%s8220_s29 + $0x2f50] sm:$0xff] }
 0x616   : > { %v2779_v59 = vld [vmem:[%s8220_s29 + $0x4ac8] sm:$0xff]  ;;  %5789 = vmatpush.msrb.mxu0 %v2507_v54  ;;  %v508_v54 = vld [vmem:[%s8220_s29 + $0x3d0] sm:$0xff] }
 0x617   : > { %v3019_v60 = vld [vmem:[%s8220_s29 + $0x5248] sm:$0xff]  ;;  %5808 = vmatpush.msrb.mxu1 %v2779_v59  ;;  %v780_v59 = vld [vmem:[%s8220_s29 + $0xc50] sm:$0xff] }
 0x618   : > { %v3291_v49 = vld [vmem:[%s8220_s29 + $0x5ac8] sm:$0xff]  ;;  %5829 = vmatpush.msrb.mxu2 %v3019_v60  ;;  %v1020_v60 = vld [vmem:[%s8220_s29 + $0x13d0] sm:$0xff]  ;;  %v5555_v28 = vpop.f32.mrf.mxu0 }
 0x619   : > { %v2491_v52 = vld [vmem:[%s8220_s29 + $0x41c8] sm:$0xff]  ;;  %5848 = vmatpush.msrb.mxu3 %v3291_v49  ;;  %v1292_v49 = vld [vmem:[%s8220_s29 + $0x1c50] sm:$0xff] }
 0x61a   : > { %v2763_v0 = vld [vmem:[%s8220_s29 + $0x4a48] sm:$0xff]  ;;  %5790 = vmatpush.msrb.mxu0 %v2491_v52  ;;  %v492_v52 = vld [vmem:[%s8220_s29 + $0x350] sm:$0xff] }
 0x61b   : > { %v3003_v51 = vld [vmem:[%s8220_s29 + $0x51c8] sm:$0xff]  ;;  %5809 = vmatpush.msrb.mxu1 %v2763_v0  ;;  %v764_v0 = vld [vmem:[%s8220_s29 + $0xbd0] sm:$0xff] }
 0x61c   : > { %v3275_v63 = vld [vmem:[%s8220_s29 + $0x5a48] sm:$0xff]  ;;  %5830 = vmatpush.msrb.mxu2 %v3003_v51  ;;  %v5516_v51 = vadd.f32 %v5515_v53, %v5496_v45  ;;  %v2396_v45 = vld [vmem:[%s8220_s29 + $0x3ed0] sm:$0xff] }
 0x61d   : > { %v2475_v1 = vld [vmem:[%s8220_s29 + $0x4148] sm:$0xff]  ;;  %5849 = vmatpush.msrb.mxu3 %v3275_v63  ;;  %v1004_v63 = vld [vmem:[%s8220_s29 + $0x1350] sm:$0xff] }
 0x61e   : > { %v2747_v2 = vld [vmem:[%s8220_s29 + $0x49c8] sm:$0xff]  ;;  %5791 = vmatpush.msrb.mxu0 %v2475_v1  ;;  %v1276_v1 = vld [vmem:[%s8220_s29 + $0x1bd0] sm:$0xff] }
 0x61f   : > { %v2987_v58 = vld [vmem:[%s8220_s29 + $0x5148] sm:$0xff]  ;;  %5810 = vmatpush.msrb.mxu1 %v2747_v2  ;;  %v5535_v2 = vpop.f32.mrf.mxu3  ;;  %v2108_v53 = vld [vmem:[%s8220_s29 + $0x35d0] sm:$0xff] }
 0x620   : > { %v3259_v57 = vld [vmem:[%s8220_s29 + $0x59c8] sm:$0xff]  ;;  %5831 = vmatpush.msrb.mxu2 %v2987_v58  ;;  %v476_v58 = vld [vmem:[%s8220_s29 + $0x2d0] sm:$0xff] }
 0x621   : > { %v2459_v3 = vld [vmem:[%s8220_s29 + $0x40c8] sm:$0xff]  ;;  %5850 = vmatpush.msrb.mxu3 %v3259_v57  ;;  %v748_v57 = vld [vmem:[%s8220_s29 + $0xb50] sm:$0xff] }
 0x622   : > { %v2731_v4 = vld [vmem:[%s8220_s29 + $0x4948] sm:$0xff]  ;;  %5792 = vmatpush.msrb.mxu0 %v2459_v3  ;;  %v988_v3 = vld [vmem:[%s8220_s29 + $0x12d0] sm:$0xff] }
 0x623   : > { %v2971_v5 = vld [vmem:[%s8220_s29 + $0x50c8] sm:$0xff]  ;;  %5811 = vmatpush.msrb.mxu1 %v2731_v4  ;;  %v1260_v4 = vld [vmem:[%s8220_s29 + $0x1b50] sm:$0xff] }
 0x624   : > { %v3243_v6 = vld [vmem:[%s8220_s29 + $0x5948] sm:$0xff]  ;;  %5832 = vmatpush.msrb.mxu2 %v2971_v5  ;;  %v460_v5 = vld [vmem:[%s8220_s29 + $0x250] sm:$0xff] }
 0x625   : > { %v2443_v7 = vld [vmem:[%s8220_s29 + $0x4048] sm:$0xff]  ;;  %5851 = vmatpush.msrb.mxu3 %v3243_v6  ;;  %v732_v6 = vld [vmem:[%s8220_s29 + $0xad0] sm:$0xff] }
 0x626   : > { %v2715_v12 = vld [vmem:[%s8220_s29 + $0x48c8] sm:$0xff]  ;;  %5793 = vmatpush.msrb.mxu0 %v2443_v7  ;;  %v5536_v7 = vadd.f32 %v5535_v2, %v5516_v51  ;;  %v1836_v51 = vld [vmem:[%s8220_s29 + $0x2d50] sm:$0xff] }
 0x627   : > { %v2955_v8 = vld [vmem:[%s8220_s29 + $0x5048] sm:$0xff]  ;;  %5812 = vmatpush.msrb.mxu1 %v2715_v12  ;;  %5794 = vmatmul.f32.vlgmr.msrb.gmra.mxu0 %v10271_v15  ;;  %v604_v15 = vld [vmem:[%s8220_s29 + $0x6d0] sm:$0xff] }
 0x628   : > { %v3227_v17 = vld [vmem:[%s8220_s29 + $0x58c8] sm:$0xff]  ;;  %5833 = vmatpush.msrb.mxu2 %v2955_v8  ;;  %5858 = vmatpush.msra.mxu0 %v636_v29  ;;  %v972_v12 = vld [vmem:[%s8220_s29 + $0x1250] sm:$0xff]  ;;  %v5556_v61 = vadd.f32 %v5555_v28, %v5536_v7 }
 0x629   : > { %5852 = vmatpush.msrb.mxu3 %v3227_v17  ;;  %v2699_v18 = vld [vmem:[%s8220_s29 + $0x4848] sm:$0xff]  ;;  %5834 = vmatmul.f32.vlgmr.msrb.gmra.mxu2 %v10275_v37  ;;  %v876_v37 = vld [vmem:[%s8220_s29 + $0xf50] sm:$0xff] }
 0x62a   : > { %v3211_v62 = vld [vmem:[%s8220_s29 + $0x5848] sm:$0xff]  ;;  %5898 = vmatpush.msra.mxu2 %v1148_v32  ;;  %5813 = vmatpush.msrb.mxu1 %v2699_v18  ;;  %v444_v8 = vld [vmem:[%s8220_s29 + $0x1d0] sm:$0xff] }
 0x62b   : > { %5853 = vmatpush.msrb.mxu3 %v3211_v62  ;;  %5814 = vmatmul.f32.vlgmr.msrb.gmra.mxu1 %v10283_v36  ;;  %v1100_v36 = vld [vmem:[%s8220_s29 + $0x1650] sm:$0xff] }
 0x62c   : > { %5854 = vmatmul.f32.vlgmr.msrb.gmra.mxu3 %v10287_v31  ;;  %5859 = vmatpush.msra.mxu0 %v620_v10  ;;  %v1372_v31 = vld [vmem:[%s8220_s29 + $0x1ed0] sm:$0xff] }
 0x62d   : > { %5878 = vmatpush.msra.mxu1 %v892_v11  ;;  %5899 = vmatpush.msra.mxu2 %v1132_v9  ;;  %v716_v17 = vld [vmem:[%s8220_s29 + $0xa50] sm:$0xff]  ;;  %v5575_v11 = vpop.f32.mrf.mxu1 }
 0x62e   : > { %5918 = vmatpush.msra.mxu3 %v1404_v56  ;;  %5860 = vmatpush.msra.mxu0 %v604_v15  ;;  %v956_v29 = vld [vmem:[%s8220_s29 + $0x11d0] sm:$0xff] }
 0x62f   : > { %5879 = vmatpush.msra.mxu1 %v876_v37  ;;  %5900 = vmatpush.msra.mxu2 %v1116_v25  ;;  %v1228_v32 = vld [vmem:[%s8220_s29 + $0x1a50] sm:$0xff]  ;;  %v5576_v37 = vadd.f32 %v5575_v11, %v5556_v61 }
 0x630   : > { %5919 = vmatpush.msra.mxu3 %v1388_v13  ;;  %5861 = vmatpush.msra.mxu0 %v588_v14  ;;  %v428_v18 = vld [vmem:[%s8220_s29 + $0x150] sm:$0xff]  ;;  %v5595_v13 = vpop.f32.mrf.mxu2 }
 0x631   : > { %5880 = vmatpush.msra.mxu1 %v860_v33  ;;  %5901 = vmatpush.msra.mxu2 %v1100_v36  ;;  %v700_v62 = vld [vmem:[%s8220_s29 + $0x9d0] sm:$0xff]  ;;  %v5596_v36 = vadd.f32 %v5595_v13, %v5576_v37 }
 0x632   : > { %5920 = vmatpush.msra.mxu3 %v1372_v31  ;;  %5862 = vmatpush.msra.mxu0 %v572_v39  ;;  %v1212_v10 = vld [vmem:[%s8220_s29 + $0x19d0] sm:$0xff] }
 0x633   : > { %5881 = vmatpush.msra.mxu1 %v844_v22  ;;  %5902 = vmatpush.msra.mxu2 %v1084_v20  ;;  %v412_v9 = vld [vmem:[%s8220_s29 + $0xd0] sm:$0xff]  ;;  %v5615_v20 = vpop.f32.mrf.mxu3 }
 0x634   : > { %5921 = vmatpush.msra.mxu3 %v1356_v40  ;;  %5863 = vmatpush.msra.mxu0 %v556_v41  ;;  %v684_v56 = vld [vmem:[%s8220_s29 + $0x950] sm:$0xff] }
 0x635   : > { %5882 = vmatpush.msra.mxu1 %v828_v26  ;;  %5903 = vmatpush.msra.mxu2 %v1068_v27  ;;  %v1196_v15 = vld [vmem:[%s8220_s29 + $0x1950] sm:$0xff]  ;;  %v5616_v26 = vadd.f32 %v5615_v20, %v5596_v36 }
 0x636   : > { %5922 = vmatpush.msra.mxu3 %v1340_v44  ;;  %5864 = vmatpush.msra.mxu0 %v540_v16  ;;  %v668_v25 = vld [vmem:[%s8220_s29 + $0x8d0] sm:$0xff] }
 0x637   : > { %5883 = vmatpush.msra.mxu1 %v812_v30  ;;  %5904 = vmatpush.msra.mxu2 %v1052_v19  ;;  %v908_v14 = vld [vmem:[%s8220_s29 + $0x1050] sm:$0xff]  ;;  %v7306_v16 = vadd.f32 %v5616_v26, %v366_v21  ;;  %v10626_v26 = vld [vmem:[%s8212_s17] sm:$0xff] }
 0x638   : > { %5923 = vmatpush.msra.mxu3 %v1324_v50  ;;  %5865 = vmatpush.msra.mxu0 %v524_v46  ;;  %v1180_v33 = vld [vmem:[%s8220_s29 + $0x18d0] sm:$0xff] }
 0x639   : > { %5884 = vmatpush.msra.mxu1 %v796_v47  ;;  %5905 = vmatpush.msra.mxu2 %v1036_v43  ;;  %v1660_v31 = vld [vmem:[%s8220_s29 + $0x27d0] sm:$0xff]  ;;  %7322 = vst [vmem:[%s8235_s7 + $0x40] sm:$0xff] %v7306_v16 }
 0x63a   : > { %5924 = vmatpush.msra.mxu3 %v1308_v55  ;;  %5866 = vmatpush.msra.mxu0 %v508_v54  ;;  %v652_v39 = vld [vmem:[%s8220_s29 + $0x850] sm:$0xff] }
 0x63b   : > { %5885 = vmatpush.msra.mxu1 %v780_v59  ;;  %5906 = vmatpush.msra.mxu2 %v1020_v60  ;;  %v1164_v22 = vld [vmem:[%s8220_s29 + $0x1850] sm:$0xff] }
 0x63c   : > { %5925 = vmatpush.msra.mxu3 %v1292_v49  ;;  %5867 = vmatpush.msra.mxu0 %v492_v52  ;;  %v1644_v40 = vld [vmem:[%s8220_s29 + $0x2750] sm:$0xff] }
 0x63d   : > { %5886 = vmatpush.msra.mxu1 %v764_v0  ;;  %5907 = vmatpush.msra.mxu2 %v1004_v63  ;;  %v1916_v41 = vld [vmem:[%s8220_s29 + $0x2fd0] sm:$0xff] }
 0x63e   : > { %5926 = vmatpush.msra.mxu3 %v1276_v1  ;;  %5868 = vmatpush.msra.mxu0 %v476_v58  ;;  %v2428_v27 = vld [vmem:[%s8220_s29 + $0x3fd0] sm:$0xff] }
 0x63f   : > { %5887 = vmatpush.msra.mxu1 %v748_v57  ;;  %5908 = vmatpush.msra.mxu2 %v988_v3  ;;  %v1628_v44 = vld [vmem:[%s8220_s29 + $0x26d0] sm:$0xff] }
 0x640   : > { %5927 = vmatpush.msra.mxu3 %v1260_v4  ;;  %5869 = vmatpush.msra.mxu0 %v460_v5  ;;  %v2140_v30 = vld [vmem:[%s8220_s29 + $0x36d0] sm:$0xff] }
 0x641   : > { %5888 = vmatpush.msra.mxu1 %v732_v6  ;;  %5909 = vmatpush.msra.mxu2 %v972_v12  ;;  %v2412_v19 = vld [vmem:[%s8220_s29 + $0x3f50] sm:$0xff] }
 0x642   : > { %5928 = vmatpush.msra.mxu3 %v1244_v23  ;;  %5870 = vmatpush.msra.mxu0 %v444_v8  ;;  %v1612_v50 = vld [vmem:[%s8220_s29 + $0x2650] sm:$0xff] }
 0x643   : > { %5889 = vmatpush.msra.mxu1 %v716_v17  ;;  %5910 = vmatpush.msra.mxu2 %v956_v29  ;;  %v1884_v46 = vld [vmem:[%s8220_s29 + $0x2ed0] sm:$0xff] }
 0x644   : > { %5929 = vmatpush.msra.mxu3 %v1228_v32  ;;  %5871 = vmatpush.msra.mxu0 %v428_v18  ;;  %v2124_v47 = vld [vmem:[%s8220_s29 + $0x3650] sm:$0xff] }
 0x645   : > { %5890 = vmatpush.msra.mxu1 %v700_v62  ;;  %5911 = vmatpush.msra.mxu2 %v940_v35  ;;  %v1596_v43 = vld [vmem:[%s8220_s29 + $0x25d0] sm:$0xff] }
 0x646   : > { %5930 = vmatpush.msra.mxu3 %v1212_v10  ;;  %5872 = vmatpush.msra.mxu0 %v412_v9  ;;  %v1868_v55 = vld [vmem:[%s8220_s29 + $0x2e50] sm:$0xff] }
 0x647   : > { %5891 = vmatpush.msra.mxu1 %v684_v56  ;;  %5912 = vmatpush.msra.mxu2 %v924_v38  ;;  %v2380_v54 = vld [vmem:[%s8220_s29 + $0x3e50] sm:$0xff] }
 0x648   : > { %5931 = vmatpush.msra.mxu3 %v1196_v15  ;;  %5873 = vmatpush.msra.mxu0 %v396_v24  ;;  %v1580_v59 = vld [vmem:[%s8220_s29 + $0x2550] sm:$0xff] }
 0x649   : > { %5892 = vmatpush.msra.mxu1 %v668_v25  ;;  %5913 = vmatpush.msra.mxu2 %v908_v14  ;;  %v1852_v60 = vld [vmem:[%s8220_s29 + $0x2dd0] sm:$0xff] }
 0x64a   : > { %5932 = vmatpush.msra.mxu3 %v1180_v33  ;;  %5938 = vmatpush.msrb.mxu0 %v1660_v31  ;;  %v2092_v49 = vld [vmem:[%s8220_s29 + $0x3550] sm:$0xff] }
 0x64b   : > { %5978 = vmatpush.msrb.mxu2 %v2172_v34  ;;  %5893 = vmatpush.msra.mxu1 %v652_v39  ;;  %v2364_v52 = vld [vmem:[%s8220_s29 + $0x3dd0] sm:$0xff] }
 0x64c   : > { %5933 = vmatpush.msra.mxu3 %v1164_v22  ;;  %5939 = vmatpush.msrb.mxu0 %v1644_v40  ;;  %v1564_v0 = vld [vmem:[%s8220_s29 + $0x24d0] sm:$0xff] }
 0x64d   : > { %5958 = vmatpush.msrb.mxu1 %v1916_v41  ;;  %5979 = vmatpush.msrb.mxu2 %v2156_v42  ;;  %v2076_v63 = vld [vmem:[%s8220_s29 + $0x34d0] sm:$0xff] }
 0x64e   : > { %5998 = vmatpush.msrb.mxu3 %v2428_v27  ;;  %5940 = vmatpush.msrb.mxu0 %v1628_v44  ;;  %v2348_v1 = vld [vmem:[%s8220_s29 + $0x3d50] sm:$0xff]  ;;  %v10631_v27 = vld [vmem:[%s8212_s17 + $0x18] sm:$0xff] }
 0x64f   : > { %5959 = vmatpush.msrb.mxu1 %v1900_v48  ;;  %5980 = vmatpush.msrb.mxu2 %v2140_v30  ;;  %v1548_v2 = vld [vmem:[%s8220_s29 + $0x2450] sm:$0xff] }
 0x650   : > { %5999 = vmatpush.msrb.mxu3 %v2412_v19  ;;  %5941 = vmatpush.msrb.mxu0 %v1612_v50  ;;  %v1820_v58 = vld [vmem:[%s8220_s29 + $0x2cd0] sm:$0xff]  ;;  %v10639_v19 = vld [vmem:[%s8212_s17 + $0x8] sm:$0xff] }
 0x651   : > { %5960 = vmatpush.msrb.mxu1 %v1884_v46  ;;  %5981 = vmatpush.msrb.mxu2 %v2124_v47  ;;  %v2060_v57 = vld [vmem:[%s8220_s29 + $0x3450] sm:$0xff] }
 0x652   : > { %6000 = vmatpush.msrb.mxu3 %v2396_v45  ;;  %5942 = vmatpush.msrb.mxu0 %v1596_v43  ;;  %v2332_v3 = vld [vmem:[%s8220_s29 + $0x3cd0] sm:$0xff] }
 0x653   : > { %5961 = vmatpush.msrb.mxu1 %v1868_v55  ;;  %5982 = vmatpush.msrb.mxu2 %v2108_v53  ;;  %v1532_v4 = vld [vmem:[%s8220_s29 + $0x23d0] sm:$0xff] }
 0x654   : > { %6001 = vmatpush.msrb.mxu3 %v2380_v54  ;;  %5943 = vmatpush.msrb.mxu0 %v1580_v59  ;;  %v1804_v5 = vld [vmem:[%s8220_s29 + $0x2c50] sm:$0xff] }
 0x655   : > { %5962 = vmatpush.msrb.mxu1 %v1852_v60  ;;  %5983 = vmatpush.msrb.mxu2 %v2092_v49  ;;  %v2044_v6 = vld [vmem:[%s8220_s29 + $0x33d0] sm:$0xff] }
 0x656   : > { %6002 = vmatpush.msrb.mxu3 %v2364_v52  ;;  %5944 = vmatpush.msrb.mxu0 %v1564_v0  ;;  %v2316_v7 = vld [vmem:[%s8220_s29 + $0x3c50] sm:$0xff]  ;;  %v10658_v0 = vld [vmem:[%s8212_s17 + $0x20] sm:$0xff] }
 0x657   : > { %5963 = vmatpush.msrb.mxu1 %v1836_v51  ;;  %5984 = vmatpush.msrb.mxu2 %v2076_v63  ;;  %v1516_v12 = vld [vmem:[%s8220_s29 + $0x2350] sm:$0xff]  ;;  %v10663_v63 = vld [vmem:[%s8212_s17 + $0x38] sm:$0xff] }
 0x658   : > { %6003 = vmatpush.msrb.mxu3 %v2348_v1  ;;  %5945 = vmatpush.msrb.mxu0 %v1548_v2  ;;  %v1788_v23 = vld [vmem:[%s8220_s29 + $0x2bd0] sm:$0xff] }
 0x659   : > { %5964 = vmatpush.msrb.mxu1 %v1820_v58  ;;  %5985 = vmatpush.msrb.mxu2 %v2060_v57  ;;  %v2028_v8 = vld [vmem:[%s8220_s29 + $0x3350] sm:$0xff] }
 0x65a   : > { %6004 = vmatpush.msrb.mxu3 %v2332_v3  ;;  %5946 = vmatpush.msrb.mxu0 %v1532_v4  ;;  %v2300_v17 = vld [vmem:[%s8220_s29 + $0x3bd0] sm:$0xff]  ;;  %v10671_v3 = vld [vmem:[%s8212_s17 + $0x28] sm:$0xff] }
 0x65b   : > { %5965 = vmatpush.msrb.mxu1 %v1804_v5  ;;  %5986 = vmatpush.msrb.mxu2 %v2044_v6  ;;  %v1500_v28 = vld [vmem:[%s8220_s29 + $0x22d0] sm:$0xff] }
 0x65c   : > { %6005 = vmatpush.msrb.mxu3 %v2316_v7  ;;  %v1772_v29 = vld [vmem:[%s8220_s29 + $0x2b50] sm:$0xff]  ;;  %5947 = vmatpush.msrb.mxu0 %v1516_v12 }
 0x65d   : > { %5966 = vmatpush.msrb.mxu1 %v1788_v23  ;;  %v2012_v32 = vld [vmem:[%s8220_s29 + $0x32d0] sm:$0xff]  ;;  %5987 = vmatpush.msrb.mxu2 %v2028_v8 }
 0x65e   : > { %v2284_v61 = vld [vmem:[%s8220_s29 + $0x3b50] sm:$0xff]  ;;  %6006 = vmatpush.msrb.mxu3 %v2300_v17  ;;  %5948 = vmatpush.msrb.mxu0 %v1500_v28 }
 0x65f   : > { %v1484_v18 = vld [vmem:[%s8220_s29 + $0x2250] sm:$0xff]  ;;  %5967 = vmatpush.msrb.mxu1 %v1772_v29  ;;  %5988 = vmatpush.msrb.mxu2 %v2012_v32 }
 0x660   : > { %v1756_v62 = vld [vmem:[%s8220_s29 + $0x2ad0] sm:$0xff]  ;;  %6007 = vmatpush.msrb.mxu3 %v2284_v61  ;;  %5949 = vmatpush.msrb.mxu0 %v1484_v18 }
 0x661   : > { %v1996_v35 = vld [vmem:[%s8220_s29 + $0x3250] sm:$0xff]  ;;  %5968 = vmatpush.msrb.mxu1 %v1756_v62  ;;  %5874 = vmatmul.f32.vlgmr.msra.gmra.mxu0 %v10626_v26 }
 0x662   : > { %v2268_v10 = vld [vmem:[%s8220_s29 + $0x3ad0] sm:$0xff]  ;;  %5989 = vmatpush.msrb.mxu2 %v1996_v35  ;;  %5934 = vmatmul.f32.vlgmr.msra.gmra.mxu3 %v10631_v27 }
 0x663   : > { %v1468_v11 = vld [vmem:[%s8220_s29 + $0x21d0] sm:$0xff]  ;;  %6008 = vmatpush.msrb.mxu3 %v2268_v10  ;;  %5894 = vmatmul.f32.vlgmr.msra.gmra.mxu1 %v10639_v19 }
 0x664   : > { %v1740_v9 = vld [vmem:[%s8220_s29 + $0x2a50] sm:$0xff]  ;;  %5950 = vmatpush.msrb.mxu0 %v1468_v11 }
 0x665   : > { %v1980_v56 = vld [vmem:[%s8220_s29 + $0x31d0] sm:$0xff]  ;;  %5969 = vmatpush.msrb.mxu1 %v1740_v9 }
 0x666   : > { %v2252_v38 = vld [vmem:[%s8220_s29 + $0x3a50] sm:$0xff]  ;;  %5990 = vmatpush.msrb.mxu2 %v1980_v56 }
 0x667   : > { %v1452_v15 = vld [vmem:[%s8220_s29 + $0x2150] sm:$0xff]  ;;  %6009 = vmatpush.msrb.mxu3 %v2252_v38 }
 0x668   : > { %v1724_v37 = vld [vmem:[%s8220_s29 + $0x29d0] sm:$0xff]  ;;  %5951 = vmatpush.msrb.mxu0 %v1452_v15 }
 0x669   : > { %v1964_v24 = vld [vmem:[%s8220_s29 + $0x3150] sm:$0xff]  ;;  %5970 = vmatpush.msrb.mxu1 %v1724_v37 }
 0x66a   : > { %v2236_v25 = vld [vmem:[%s8220_s29 + $0x39d0] sm:$0xff]  ;;  %5991 = vmatpush.msrb.mxu2 %v1964_v24 }
 0x66b   : > { %v1436_v13 = vld [vmem:[%s8220_s29 + $0x20d0] sm:$0xff]  ;;  %6010 = vmatpush.msrb.mxu3 %v2236_v25 }
 0x66c   : > { %v1708_v14 = vld [vmem:[%s8220_s29 + $0x2950] sm:$0xff]  ;;  %5952 = vmatpush.msrb.mxu0 %v1436_v13 }
 0x66d   : > { %v1948_v33 = vld [vmem:[%s8220_s29 + $0x30d0] sm:$0xff]  ;;  %5971 = vmatpush.msrb.mxu1 %v1708_v14 }
 0x66e   : > { %v2220_v36 = vld [vmem:[%s8220_s29 + $0x3950] sm:$0xff]  ;;  %5992 = vmatpush.msrb.mxu2 %v1948_v33 }
 0x66f   : > { %v1420_v31 = vld [vmem:[%s8220_s29 + $0x2050] sm:$0xff]  ;;  %6011 = vmatpush.msrb.mxu3 %v2220_v36 }
 0x670   : > { %v1692_v34 = vld [vmem:[%s8220_s29 + $0x28d0] sm:$0xff]  ;;  %5953 = vmatpush.msrb.mxu0 %v1420_v31 }
 0x671   : > { %v1932_v39 = vld [vmem:[%s8220_s29 + $0x3050] sm:$0xff]  ;;  %5972 = vmatpush.msrb.mxu1 %v1692_v34  ;;  %5954 = vmatmul.f32.vlgmr.msrb.gmra.mxu0 %v10658_v0 }
 0x672   : > { %v2204_v22 = vld [vmem:[%s8220_s29 + $0x38d0] sm:$0xff]  ;;  %5993 = vmatpush.msrb.mxu2 %v1932_v39 }
 0x673   : > { %v10619_v21 = vld [vmem:[%s8212_s17 + $0x10] sm:$0xff]  ;;  %6012 = vmatpush.msrb.mxu3 %v2204_v22 }
 0x674   : > { %5914 = vmatmul.f32.vlgmr.msra.gmra.mxu2 %v10619_v21  ;;  %v2684_v20 = vld [vmem:[%s8220_s29 + $0x47d0] sm:$0xff] }
 0x675   : > { %v3196_v40 = vld [vmem:[%s8220_s29 + $0x57d0] sm:$0xff]  ;;  %6018 = vmatpush.msra.mxu0 %v2684_v20 }
 0x676   : > { %v1676_v41 = vld [vmem:[%s8220_s29 + $0x2850] sm:$0xff]  ;;  %6058 = vmatpush.msra.mxu2 %v3196_v40 }
 0x677   : > { %v2188_v42 = vld [vmem:[%s8220_s29 + $0x3850] sm:$0xff]  ;;  %5973 = vmatpush.msrb.mxu1 %v1676_v41 }
 0x678   : > { %v2668_v44 = vld [vmem:[%s8220_s29 + $0x4750] sm:$0xff]  ;;  %6013 = vmatpush.msrb.mxu3 %v2188_v42  ;;  %5974 = vmatmul.f32.vlgmr.msrb.gmra.mxu1 %v10671_v3 }
 0x679   : > { %v2940_v48 = vld [vmem:[%s8220_s29 + $0x4fd0] sm:$0xff]  ;;  %6019 = vmatpush.msra.mxu0 %v2668_v44  ;;  %6014 = vmatmul.f32.vlgmr.msrb.gmra.mxu3 %v10663_v63 }
 0x67a   : > { %v3180_v16 = vld [vmem:[%s8220_s29 + $0x5750] sm:$0xff]  ;;  %6038 = vmatpush.msra.mxu1 %v2940_v48 }
 0x67b   : > { %v3452_v30 = vld [vmem:[%s8220_s29 + $0x5fd0] sm:$0xff]  ;;  %6059 = vmatpush.msra.mxu2 %v3180_v16  ;;  %v5655_v16 = vpop.f32.mrf.mxu1 }
 0x67c   : > { %v2652_v50 = vld [vmem:[%s8220_s29 + $0x46d0] sm:$0xff]  ;;  %6078 = vmatpush.msra.mxu3 %v3452_v30 }
 0x67d   : > { %v2924_v46 = vld [vmem:[%s8220_s29 + $0x4f50] sm:$0xff]  ;;  %6020 = vmatpush.msra.mxu0 %v2652_v50 }
 0x67e   : > { %v3164_v47 = vld [vmem:[%s8220_s29 + $0x56d0] sm:$0xff]  ;;  %6039 = vmatpush.msra.mxu1 %v2924_v46  ;;  %v5635_v46 = vpop.f32.mrf.mxu0 }
 0x67f   : > { %v3436_v45 = vld [vmem:[%s8220_s29 + $0x5f50] sm:$0xff]  ;;  %6060 = vmatpush.msra.mxu2 %v3164_v47  ;;  %v637_v47 = vld [vmem:[%s8220_s29 + $0x7d8] sm:$0xff] }
 0x680   : > { %v2636_v43 = vld [vmem:[%s8220_s29 + $0x4650] sm:$0xff]  ;;  %6079 = vmatpush.msra.mxu3 %v3436_v45  ;;  %v1149_v45 = vld [vmem:[%s8220_s29 + $0x17d8] sm:$0xff] }
 0x681   : > { %v2908_v55 = vld [vmem:[%s8220_s29 + $0x4ed0] sm:$0xff]  ;;  %6021 = vmatpush.msra.mxu0 %v2636_v43  ;;  %v5656_v43 = vadd.f32 %v5655_v16, %v5635_v46 }
 0x682   : > { %v3148_v53 = vld [vmem:[%s8220_s29 + $0x5650] sm:$0xff]  ;;  %6040 = vmatpush.msra.mxu1 %v2908_v55 }
 0x683   : > { %v3420_v54 = vld [vmem:[%s8220_s29 + $0x5ed0] sm:$0xff]  ;;  %6061 = vmatpush.msra.mxu2 %v3148_v53 }
 0x684   : > { %v10651_v59 = vld [vmem:[%s8212_s17 + $0x30] sm:$0xff]  ;;  %6080 = vmatpush.msra.mxu3 %v3420_v54  ;;  %v5675_v54 = vpop.f32.mrf.mxu2 }
 0x685   : > { %5994 = vmatmul.f32.vlgmr.msrb.gmra.mxu2 %v10651_v59  ;;  %v2620_v60 = vld [vmem:[%s8220_s29 + $0x45d0] sm:$0xff] }
 0x686   : > { %v2892_v49 = vld [vmem:[%s8220_s29 + $0x4e50] sm:$0xff]  ;;  %6022 = vmatpush.msra.mxu0 %v2620_v60  ;;  %v10719_v60 = vld [vmem:[%s8212_s17 + $0x40] sm:$0xff] }
 0x687   : > { %v3132_v52 = vld [vmem:[%s8220_s29 + $0x55d0] sm:$0xff]  ;;  %6041 = vmatpush.msra.mxu1 %v2892_v49 }
 0x688   : > { %v3404_v51 = vld [vmem:[%s8220_s29 + $0x5e50] sm:$0xff]  ;;  %6062 = vmatpush.msra.mxu2 %v3132_v52  ;;  %v621_v52 = vld [vmem:[%s8220_s29 + $0x758] sm:$0xff] }
 0x689   : > { %v2604_v1 = vld [vmem:[%s8220_s29 + $0x4550] sm:$0xff]  ;;  %6081 = vmatpush.msra.mxu3 %v3404_v51  ;;  %v893_v51 = vld [vmem:[%s8220_s29 + $0xfd8] sm:$0xff] }
 0x68a   : > { %v2876_v2 = vld [vmem:[%s8220_s29 + $0x4dd0] sm:$0xff]  ;;  %6023 = vmatpush.msra.mxu0 %v2604_v1  ;;  %v1133_v1 = vld [vmem:[%s8220_s29 + $0x1758] sm:$0xff] }
 0x68b   : > { %v3116_v58 = vld [vmem:[%s8220_s29 + $0x5550] sm:$0xff]  ;;  %6042 = vmatpush.msra.mxu1 %v2876_v2  ;;  %v1405_v2 = vld [vmem:[%s8220_s29 + $0x1fd8] sm:$0xff] }
 0x68c   : > { %v3388_v57 = vld [vmem:[%s8220_s29 + $0x5dd0] sm:$0xff]  ;;  %6063 = vmatpush.msra.mxu2 %v3116_v58  ;;  %v5676_v58 = vadd.f32 %v5675_v54, %v5656_v43  ;;  %v989_v43 = vld [vmem:[%s8220_s29 + $0x12d8] sm:$0xff] }
 0x68d   : > { %v2588_v4 = vld [vmem:[%s8220_s29 + $0x44d0] sm:$0xff]  ;;  %6082 = vmatpush.msra.mxu3 %v3388_v57  ;;  %v10731_v57 = vld [vmem:[%s8212_s17 + $0x48] sm:$0xff]  ;;  %v733_v54 = vld [vmem:[%s8220_s29 + $0xad8] sm:$0xff] }
 0x68e   : > { %v2860_v5 = vld [vmem:[%s8220_s29 + $0x4d50] sm:$0xff]  ;;  %6024 = vmatpush.msra.mxu0 %v2588_v4  ;;  %v10735_v4 = vld [vmem:[%s8212_s17 + $0x58] sm:$0xff] }
 0x68f   : > { %v3100_v6 = vld [vmem:[%s8220_s29 + $0x54d0] sm:$0xff]  ;;  %6043 = vmatpush.msra.mxu1 %v2860_v5  ;;  %v605_v5 = vld [vmem:[%s8220_s29 + $0x6d8] sm:$0xff] }
 0x690   : > { %v3372_v7 = vld [vmem:[%s8220_s29 + $0x5d50] sm:$0xff]  ;;  %6064 = vmatpush.msra.mxu2 %v3100_v6  ;;  %v877_v6 = vld [vmem:[%s8220_s29 + $0xf58] sm:$0xff] }
 0x691   : > { %v2572_v12 = vld [vmem:[%s8220_s29 + $0x4450] sm:$0xff]  ;;  %6083 = vmatpush.msra.mxu3 %v3372_v7  ;;  %v5695_v7 = vpop.f32.mrf.mxu3 }
 0x692   : > { %v2844_v23 = vld [vmem:[%s8220_s29 + $0x4cd0] sm:$0xff]  ;;  %6025 = vmatpush.msra.mxu0 %v2572_v12  ;;  %v1117_v12 = vld [vmem:[%s8220_s29 + $0x16d8] sm:$0xff] }
 0x693   : > { %v3084_v8 = vld [vmem:[%s8220_s29 + $0x5450] sm:$0xff]  ;;  %6044 = vmatpush.msra.mxu1 %v2844_v23  ;;  %v1389_v23 = vld [vmem:[%s8220_s29 + $0x1f58] sm:$0xff] }
 0x694   : > { %v3356_v17 = vld [vmem:[%s8220_s29 + $0x5cd0] sm:$0xff]  ;;  %6065 = vmatpush.msra.mxu2 %v3084_v8  ;;  %v589_v8 = vld [vmem:[%s8220_s29 + $0x658] sm:$0xff] }
 0x695   : > { %v2556_v28 = vld [vmem:[%s8220_s29 + $0x43d0] sm:$0xff]  ;;  %6084 = vmatpush.msra.mxu3 %v3356_v17  ;;  %v861_v17 = vld [vmem:[%s8220_s29 + $0xed8] sm:$0xff] }
 0x696   : > { %v2828_v29 = vld [vmem:[%s8220_s29 + $0x4c50] sm:$0xff]  ;;  %6026 = vmatpush.msra.mxu0 %v2556_v28  ;;  %v1101_v28 = vld [vmem:[%s8220_s29 + $0x1658] sm:$0xff] }
 0x697   : > { %v3068_v32 = vld [vmem:[%s8220_s29 + $0x53d0] sm:$0xff]  ;;  %6045 = vmatpush.msra.mxu1 %v2828_v29  ;;  %v1373_v29 = vld [vmem:[%s8220_s29 + $0x1ed8] sm:$0xff] }
 0x698   : > { %v3340_v61 = vld [vmem:[%s8220_s29 + $0x5c50] sm:$0xff]  ;;  %6066 = vmatpush.msra.mxu2 %v3068_v32  ;;  %v5696_v32 = vadd.f32 %v5695_v7, %v5676_v58  ;;  %v717_v58 = vld [vmem:[%s8220_s29 + $0xa58] sm:$0xff] }
 0x699   : > { %v2540_v18 = vld [vmem:[%s8220_s29 + $0x4350] sm:$0xff]  ;;  %6085 = vmatpush.msra.mxu3 %v3340_v61  ;;  %v573_v61 = vld [vmem:[%s8220_s29 + $0x5d8] sm:$0xff]  ;;  %v5775_v46 = vpop.f32.mrf.mxu3 }
 0x69a   : > { %v2812_v62 = vld [vmem:[%s8220_s29 + $0x4bd0] sm:$0xff]  ;;  %6027 = vmatpush.msra.mxu0 %v2540_v18  ;;  %v845_v18 = vld [vmem:[%s8220_s29 + $0xe58] sm:$0xff] }
 0x69b   : > { %v3052_v35 = vld [vmem:[%s8220_s29 + $0x5350] sm:$0xff]  ;;  %6046 = vmatpush.msra.mxu1 %v2812_v62  ;;  %v5715_v62 = vpop.f32.mrf.mxu0  ;;  %v1229_v7 = vld [vmem:[%s8220_s29 + $0x1a58] sm:$0xff] }
 0x69c   : > { %v3324_v10 = vld [vmem:[%s8220_s29 + $0x5bd0] sm:$0xff]  ;;  %6067 = vmatpush.msra.mxu2 %v3052_v35  ;;  %v1085_v35 = vld [vmem:[%s8220_s29 + $0x15d8] sm:$0xff] }
 0x69d   : > { %v2524_v11 = vld [vmem:[%s8220_s29 + $0x42d0] sm:$0xff]  ;;  %6086 = vmatpush.msra.mxu3 %v3324_v10  ;;  %v1357_v10 = vld [vmem:[%s8220_s29 + $0x1e58] sm:$0xff] }
 0x69e   : > { %v2796_v9 = vld [vmem:[%s8220_s29 + $0x4b50] sm:$0xff]  ;;  %6028 = vmatpush.msra.mxu0 %v2524_v11  ;;  %v557_v11 = vld [vmem:[%s8220_s29 + $0x558] sm:$0xff] }
 0x69f   : > { %v3036_v56 = vld [vmem:[%s8220_s29 + $0x52d0] sm:$0xff]  ;;  %6047 = vmatpush.msra.mxu1 %v2796_v9  ;;  %v829_v9 = vld [vmem:[%s8220_s29 + $0xdd8] sm:$0xff] }
 0x6a0   : > { %v3308_v38 = vld [vmem:[%s8220_s29 + $0x5b50] sm:$0xff]  ;;  %6068 = vmatpush.msra.mxu2 %v3036_v56  ;;  %v5716_v56 = vadd.f32 %v5715_v62, %v5696_v32  ;;  %v413_v32 = vld [vmem:[%s8220_s29 + $0xd8] sm:$0xff] }
 0x6a1   : > { %v2508_v15 = vld [vmem:[%s8220_s29 + $0x4250] sm:$0xff]  ;;  %6087 = vmatpush.msra.mxu3 %v3308_v38  ;;  %v1069_v38 = vld [vmem:[%s8220_s29 + $0x1558] sm:$0xff] }
 0x6a2   : > { %v2780_v37 = vld [vmem:[%s8220_s29 + $0x4ad0] sm:$0xff]  ;;  %6029 = vmatpush.msra.mxu0 %v2508_v15  ;;  %v1341_v15 = vld [vmem:[%s8220_s29 + $0x1dd8] sm:$0xff] }
 0x6a3   : > { %v3020_v24 = vld [vmem:[%s8220_s29 + $0x5250] sm:$0xff]  ;;  %6048 = vmatpush.msra.mxu1 %v2780_v37  ;;  %v5735_v37 = vpop.f32.mrf.mxu1  ;;  %v1197_v62 = vld [vmem:[%s8220_s29 + $0x1958] sm:$0xff] }
 0x6a4   : > { %v3292_v25 = vld [vmem:[%s8220_s29 + $0x5ad0] sm:$0xff]  ;;  %6069 = vmatpush.msra.mxu2 %v3020_v24  ;;  %v541_v24 = vld [vmem:[%s8220_s29 + $0x4d8] sm:$0xff] }
 0x6a5   : > { %v2492_v13 = vld [vmem:[%s8220_s29 + $0x41d0] sm:$0xff]  ;;  %6088 = vmatpush.msra.mxu3 %v3292_v25  ;;  %v813_v25 = vld [vmem:[%s8220_s29 + $0xd58] sm:$0xff] }
 0x6a6   : > { %v2764_v14 = vld [vmem:[%s8220_s29 + $0x4a50] sm:$0xff]  ;;  %6030 = vmatpush.msra.mxu0 %v2492_v13  ;;  %v1053_v13 = vld [vmem:[%s8220_s29 + $0x14d8] sm:$0xff] }
 0x6a7   : > { %v3004_v33 = vld [vmem:[%s8220_s29 + $0x51d0] sm:$0xff]  ;;  %6049 = vmatpush.msra.mxu1 %v2764_v14  ;;  %v1325_v14 = vld [vmem:[%s8220_s29 + $0x1d58] sm:$0xff] }
 0x6a8   : > { %v3276_v36 = vld [vmem:[%s8220_s29 + $0x5a50] sm:$0xff]  ;;  %6070 = vmatpush.msra.mxu2 %v3004_v33  ;;  %v525_v33 = vld [vmem:[%s8220_s29 + $0x458] sm:$0xff] }
 0x6a9   : > { %v2476_v31 = vld [vmem:[%s8220_s29 + $0x4150] sm:$0xff]  ;;  %6089 = vmatpush.msra.mxu3 %v3276_v36  ;;  %v797_v36 = vld [vmem:[%s8220_s29 + $0xcd8] sm:$0xff] }
 0x6aa   : > { %v2748_v34 = vld [vmem:[%s8220_s29 + $0x49d0] sm:$0xff]  ;;  %6031 = vmatpush.msra.mxu0 %v2476_v31  ;;  %v5736_v31 = vadd.f32 %v5735_v37, %v5716_v56  ;;  %v909_v56 = vld [vmem:[%s8220_s29 + $0x1058] sm:$0xff] }
 0x6ab   : > { %v2988_v39 = vld [vmem:[%s8220_s29 + $0x5150] sm:$0xff]  ;;  %6050 = vmatpush.msra.mxu1 %v2748_v34  ;;  %v1037_v34 = vld [vmem:[%s8220_s29 + $0x1458] sm:$0xff] }
 0x6ac   : > { %v3260_v22 = vld [vmem:[%s8220_s29 + $0x59d0] sm:$0xff]  ;;  %6071 = vmatpush.msra.mxu2 %v2988_v39  ;;  %v1309_v39 = vld [vmem:[%s8220_s29 + $0x1cd8] sm:$0xff] }
 0x6ad   : > { %v2460_v20 = vld [vmem:[%s8220_s29 + $0x40d0] sm:$0xff]  ;;  %6090 = vmatpush.msra.mxu3 %v3260_v22  ;;  %v5755_v22 = vpop.f32.mrf.mxu2  ;;  %v1661_v37 = vld [vmem:[%s8220_s29 + $0x27d8] sm:$0xff] }
 0x6ae   : > { %v2732_v40 = vld [vmem:[%s8220_s29 + $0x4950] sm:$0xff]  ;;  %6032 = vmatpush.msra.mxu0 %v2460_v20  ;;  %v509_v20 = vld [vmem:[%s8220_s29 + $0x3d8] sm:$0xff]  ;;  %v5756_v16 = vadd.f32 %v5755_v22, %v5736_v31 }
 0x6af   : > { %v2972_v41 = vld [vmem:[%s8220_s29 + $0x50d0] sm:$0xff]  ;;  %6051 = vmatpush.msra.mxu1 %v2732_v40  ;;  %v781_v40 = vld [vmem:[%s8220_s29 + $0xc58] sm:$0xff] }
 0x6b0   : > { %v3244_v42 = vld [vmem:[%s8220_s29 + $0x5950] sm:$0xff]  ;;  %6072 = vmatpush.msra.mxu2 %v2972_v41  ;;  %v1021_v41 = vld [vmem:[%s8220_s29 + $0x13d8] sm:$0xff] }
 0x6b1   : > { %v2444_v44 = vld [vmem:[%s8220_s29 + $0x4050] sm:$0xff]  ;;  %6091 = vmatpush.msra.mxu3 %v3244_v42  ;;  %v1293_v42 = vld [vmem:[%s8220_s29 + $0x1c58] sm:$0xff] }
 0x6b2   : > { %v2716_v48 = vld [vmem:[%s8220_s29 + $0x48d0] sm:$0xff]  ;;  %6033 = vmatpush.msra.mxu0 %v2444_v44  ;;  %v493_v44 = vld [vmem:[%s8220_s29 + $0x358] sm:$0xff] }
 0x6b3   : > { %v2956_v30 = vld [vmem:[%s8220_s29 + $0x5050] sm:$0xff]  ;;  %6052 = vmatpush.msra.mxu1 %v2716_v48  ;;  %6034 = vmatmul.f32.vlgmr.msra.gmra.mxu0 %v10719_v60  ;;  %v765_v48 = vld [vmem:[%s8220_s29 + $0xbd8] sm:$0xff] }
 0x6b4   : > { %v3228_v50 = vld [vmem:[%s8220_s29 + $0x58d0] sm:$0xff]  ;;  %6073 = vmatpush.msra.mxu2 %v2956_v30  ;;  %6098 = vmatpush.msrb.mxu0 %v637_v47  ;;  %v1005_v30 = vld [vmem:[%s8220_s29 + $0x1358] sm:$0xff] }
 0x6b5   : > { %6092 = vmatpush.msra.mxu3 %v3228_v50  ;;  %v2700_v55 = vld [vmem:[%s8220_s29 + $0x4850] sm:$0xff]  ;;  %v1277_v50 = vld [vmem:[%s8220_s29 + $0x1bd8] sm:$0xff] }
 0x6b6   : > { %v3212_v53 = vld [vmem:[%s8220_s29 + $0x5850] sm:$0xff]  ;;  %6138 = vmatpush.msrb.mxu2 %v1149_v45  ;;  %6053 = vmatpush.msra.mxu1 %v2700_v55  ;;  %v477_v47 = vld [vmem:[%s8220_s29 + $0x2d8] sm:$0xff] }
 0x6b7   : > { %v10723_v49 = vld [vmem:[%s8212_s17 + $0x50] sm:$0xff]  ;;  %6093 = vmatpush.msra.mxu3 %v3212_v53  ;;  %6054 = vmatmul.f32.vlgmr.msra.gmra.mxu1 %v10731_v57  ;;  %v749_v45 = vld [vmem:[%s8220_s29 + $0xb58] sm:$0xff] }
 0x6b8   : > { %6074 = vmatmul.f32.vlgmr.msra.gmra.mxu2 %v10723_v49  ;;  %6094 = vmatmul.f32.vlgmr.msra.gmra.mxu3 %v10735_v4  ;;  %v1261_v55 = vld [vmem:[%s8220_s29 + $0x1b58] sm:$0xff] }
 0x6b9   : > { %6099 = vmatpush.msrb.mxu0 %v621_v52  ;;  %6118 = vmatpush.msrb.mxu1 %v893_v51  ;;  %v461_v53 = vld [vmem:[%s8220_s29 + $0x258] sm:$0xff]  ;;  %v5776_v52 = vadd.f32 %v5775_v46, %v5756_v16 }
 0x6ba   : > { %6139 = vmatpush.msrb.mxu2 %v1133_v1  ;;  %6158 = vmatpush.msrb.mxu3 %v1405_v2  ;;  %v973_v51 = vld [vmem:[%s8220_s29 + $0x1258] sm:$0xff] }
 0x6bb   : > { %6100 = vmatpush.msrb.mxu0 %v605_v5  ;;  %6119 = vmatpush.msrb.mxu1 %v877_v6  ;;  %v1245_v1 = vld [vmem:[%s8220_s29 + $0x1ad8] sm:$0xff]  ;;  %v5795_v5 = vpop.f32.mrf.mxu0 }
 0x6bc   : > { %6140 = vmatpush.msrb.mxu2 %v1117_v12  ;;  %6159 = vmatpush.msrb.mxu3 %v1389_v23  ;;  %v445_v2 = vld [vmem:[%s8220_s29 + $0x1d8] sm:$0xff]  ;;  %v5796_v12 = vadd.f32 %v5795_v5, %v5776_v52 }
 0x6bd   : > { %6101 = vmatpush.msrb.mxu0 %v589_v8  ;;  %6120 = vmatpush.msrb.mxu1 %v861_v17  ;;  %v957_v6 = vld [vmem:[%s8220_s29 + $0x11d8] sm:$0xff] }
 0x6be   : > { %6141 = vmatpush.msrb.mxu2 %v1101_v28  ;;  %6160 = vmatpush.msrb.mxu3 %v1373_v29  ;;  %v429_v23 = vld [vmem:[%s8220_s29 + $0x158] sm:$0xff]  ;;  %v5815_v29 = vpop.f32.mrf.mxu1 }
 0x6bf   : > { %6102 = vmatpush.msrb.mxu0 %v573_v61  ;;  %6121 = vmatpush.msrb.mxu1 %v845_v18  ;;  %v701_v8 = vld [vmem:[%s8220_s29 + $0x9d8] sm:$0xff] }
 0x6c0   : > { %6142 = vmatpush.msrb.mxu2 %v1085_v35  ;;  %6161 = vmatpush.msrb.mxu3 %v1357_v10  ;;  %v941_v17 = vld [vmem:[%s8220_s29 + $0x1158] sm:$0xff]  ;;  %v5816_v35 = vadd.f32 %v5815_v29, %v5796_v12 }
 0x6c1   : > { %6103 = vmatpush.msrb.mxu0 %v557_v11  ;;  %6122 = vmatpush.msrb.mxu1 %v829_v9  ;;  %v1213_v28 = vld [vmem:[%s8220_s29 + $0x19d8] sm:$0xff]  ;;  %v5835_v9 = vpop.f32.mrf.mxu2 }
 0x6c2   : > { %6143 = vmatpush.msrb.mxu2 %v1069_v38  ;;  %6162 = vmatpush.msrb.mxu3 %v1341_v15  ;;  %v685_v61 = vld [vmem:[%s8220_s29 + $0x958] sm:$0xff]  ;;  %v5836_v15 = vadd.f32 %v5835_v9, %v5816_v35 }
 0x6c3   : > { %6104 = vmatpush.msrb.mxu0 %v541_v24  ;;  %6123 = vmatpush.msrb.mxu1 %v813_v25  ;;  %v925_v18 = vld [vmem:[%s8220_s29 + $0x10d8] sm:$0xff] }
 0x6c4   : > { %6144 = vmatpush.msrb.mxu2 %v1053_v13  ;;  %6163 = vmatpush.msrb.mxu3 %v1325_v14  ;;  %v397_v10 = vld [vmem:[%s8220_s29 + $0x58] sm:$0xff]  ;;  %v367_v14 = vld [vmem:[%s8235_s7 + $0x48] sm:$0xff] }
 0x6c5   : > { %6105 = vmatpush.msrb.mxu0 %v525_v33  ;;  %6124 = vmatpush.msrb.mxu1 %v797_v36  ;;  %v669_v11 = vld [vmem:[%s8220_s29 + $0x8d8] sm:$0xff]  ;;  %v5855_v33 = vpop.f32.mrf.mxu3 }
 0x6c6   : > { %6145 = vmatpush.msrb.mxu2 %v1037_v34  ;;  %6164 = vmatpush.msrb.mxu3 %v1309_v39  ;;  %v1181_v38 = vld [vmem:[%s8220_s29 + $0x18d8] sm:$0xff]  ;;  %v5856_v34 = vadd.f32 %v5855_v33, %v5836_v15 }
 0x6c7   : > { %6106 = vmatpush.msrb.mxu0 %v509_v20  ;;  %6125 = vmatpush.msrb.mxu1 %v781_v40  ;;  %v2173_v24 = vld [vmem:[%s8220_s29 + $0x37d8] sm:$0xff] }
 0x6c8   : > { %6146 = vmatpush.msrb.mxu2 %v1021_v41  ;;  %6165 = vmatpush.msrb.mxu3 %v1293_v42  ;;  %v653_v25 = vld [vmem:[%s8220_s29 + $0x858] sm:$0xff]  ;;  %v7307_v41 = vadd.f32 %v5856_v34, %v367_v14 }
 0x6c9   : > { %6107 = vmatpush.msrb.mxu0 %v493_v44  ;;  %6126 = vmatpush.msrb.mxu1 %v765_v48  ;;  %v1165_v13 = vld [vmem:[%s8220_s29 + $0x1858] sm:$0xff] }
 0x6ca   : > { %6147 = vmatpush.msrb.mxu2 %v1005_v30  ;;  %6166 = vmatpush.msrb.mxu3 %v1277_v50  ;;  %v1645_v36 = vld [vmem:[%s8220_s29 + $0x2758] sm:$0xff]  ;;  %7323 = vst [vmem:[%s8235_s7 + $0x48] sm:$0xff] %v7307_v41 }
 0x6cb   : > { %6108 = vmatpush.msrb.mxu0 %v477_v47  ;;  %6127 = vmatpush.msrb.mxu1 %v749_v45  ;;  %v1917_v31 = vld [vmem:[%s8220_s29 + $0x2fd8] sm:$0xff] }
 0x6cc   : > { %6148 = vmatpush.msrb.mxu2 %v989_v43  ;;  %6167 = vmatpush.msrb.mxu3 %v1261_v55  ;;  %v2157_v39 = vld [vmem:[%s8220_s29 + $0x3758] sm:$0xff] }
 0x6cd   : > { %6109 = vmatpush.msrb.mxu0 %v461_v53  ;;  %6128 = vmatpush.msrb.mxu1 %v733_v54  ;;  %v2429_v22 = vld [vmem:[%s8220_s29 + $0x3fd8] sm:$0xff] }
 0x6ce   : > { %6149 = vmatpush.msrb.mxu2 %v973_v51  ;;  %6168 = vmatpush.msrb.mxu3 %v1245_v1  ;;  %v1629_v20 = vld [vmem:[%s8220_s29 + $0x26d8] sm:$0xff] }
 0x6cf   : > { %6110 = vmatpush.msrb.mxu0 %v445_v2  ;;  %6129 = vmatpush.msrb.mxu1 %v717_v58  ;;  %v1901_v40 = vld [vmem:[%s8220_s29 + $0x2f58] sm:$0xff] }
 0x6d0   : > { %6150 = vmatpush.msrb.mxu2 %v957_v6  ;;  %6169 = vmatpush.msrb.mxu3 %v1229_v7  ;;  %v2141_v42 = vld [vmem:[%s8220_s29 + $0x36d8] sm:$0xff] }
 0x6d1   : > { %6111 = vmatpush.msrb.mxu0 %v429_v23  ;;  %6130 = vmatpush.msrb.mxu1 %v701_v8  ;;  %v2413_v44 = vld [vmem:[%s8220_s29 + $0x3f58] sm:$0xff] }
 0x6d2   : > { %6151 = vmatpush.msrb.mxu2 %v941_v17  ;;  %6170 = vmatpush.msrb.mxu3 %v1213_v28  ;;  %v1613_v48 = vld [vmem:[%s8220_s29 + $0x2658] sm:$0xff] }
 0x6d3   : > { %6112 = vmatpush.msrb.mxu0 %v413_v32  ;;  %6131 = vmatpush.msrb.mxu1 %v685_v61  ;;  %v1885_v16 = vld [vmem:[%s8220_s29 + $0x2ed8] sm:$0xff] }
 0x6d4   : > { %6152 = vmatpush.msrb.mxu2 %v925_v18  ;;  %6171 = vmatpush.msrb.mxu3 %v1197_v62  ;;  %v2125_v30 = vld [vmem:[%s8220_s29 + $0x3658] sm:$0xff] }
 0x6d5   : > { %6113 = vmatpush.msrb.mxu0 %v397_v10  ;;  %6132 = vmatpush.msrb.mxu1 %v669_v11  ;;  %v2397_v50 = vld [vmem:[%s8220_s29 + $0x3ed8] sm:$0xff] }
 0x6d6   : > { %6153 = vmatpush.msrb.mxu2 %v909_v56  ;;  %6172 = vmatpush.msrb.mxu3 %v1181_v38  ;;  %v1597_v46 = vld [vmem:[%s8220_s29 + $0x25d8] sm:$0xff] }
 0x6d7   : > { %6178 = vmatpush.msra.mxu0 %v1661_v37  ;;  %6133 = vmatpush.msrb.mxu1 %v653_v25  ;;  %v1869_v47 = vld [vmem:[%s8220_s29 + $0x2e58] sm:$0xff] }
 0x6d8   : > { %6218 = vmatpush.msra.mxu2 %v2173_v24  ;;  %6173 = vmatpush.msrb.mxu3 %v1165_v13  ;;  %v2109_v45 = vld [vmem:[%s8220_s29 + $0x35d8] sm:$0xff] }
 0x6d9   : > { %6179 = vmatpush.msra.mxu0 %v1645_v36  ;;  %6198 = vmatpush.msra.mxu1 %v1917_v31  ;;  %v2381_v43 = vld [vmem:[%s8220_s29 + $0x3e58] sm:$0xff] }
 0x6da   : > { %6219 = vmatpush.msra.mxu2 %v2157_v39  ;;  %6238 = vmatpush.msra.mxu3 %v2429_v22  ;;  %v1581_v55 = vld [vmem:[%s8220_s29 + $0x2558] sm:$0xff] }
 0x6db   : > { %6180 = vmatpush.msra.mxu0 %v1629_v20  ;;  %6199 = vmatpush.msra.mxu1 %v1901_v40  ;;  %v1853_v53 = vld [vmem:[%s8220_s29 + $0x2dd8] sm:$0xff] }
 0x6dc   : > { %6220 = vmatpush.msra.mxu2 %v2141_v42  ;;  %6239 = vmatpush.msra.mxu3 %v2413_v44  ;;  %v2093_v54 = vld [vmem:[%s8220_s29 + $0x3558] sm:$0xff] }
 0x6dd   : > { %6181 = vmatpush.msra.mxu0 %v1613_v48  ;;  %6200 = vmatpush.msra.mxu1 %v1885_v16  ;;  %v2365_v52 = vld [vmem:[%s8220_s29 + $0x3dd8] sm:$0xff] }
 0x6de   : > { %6221 = vmatpush.msra.mxu2 %v2125_v30  ;;  %6240 = vmatpush.msra.mxu3 %v2397_v50  ;;  %v1565_v51 = vld [vmem:[%s8220_s29 + $0x24d8] sm:$0xff] }
 0x6df   : > { %6182 = vmatpush.msra.mxu0 %v1597_v46  ;;  %6201 = vmatpush.msra.mxu1 %v1869_v47  ;;  %v1837_v1 = vld [vmem:[%s8220_s29 + $0x2d58] sm:$0xff] }
 0x6e0   : > { %6222 = vmatpush.msra.mxu2 %v2109_v45  ;;  %6241 = vmatpush.msra.mxu3 %v2381_v43  ;;  %v2077_v2 = vld [vmem:[%s8220_s29 + $0x34d8] sm:$0xff] }
 0x6e1   : > { %6183 = vmatpush.msra.mxu0 %v1581_v55  ;;  %6202 = vmatpush.msra.mxu1 %v1853_v53  ;;  %v2349_v58 = vld [vmem:[%s8220_s29 + $0x3d58] sm:$0xff] }
 0x6e2   : > { %6223 = vmatpush.msra.mxu2 %v2093_v54  ;;  %6242 = vmatpush.msra.mxu3 %v2365_v52  ;;  %v1549_v5 = vld [vmem:[%s8220_s29 + $0x2458] sm:$0xff] }
 0x6e3   : > { %v1821_v6 = vld [vmem:[%s8220_s29 + $0x2cd8] sm:$0xff]  ;;  %6184 = vmatpush.msra.mxu0 %v1565_v51  ;;  %6203 = vmatpush.msra.mxu1 %v1837_v1 }
 0x6e4   : > { %v2061_v7 = vld [vmem:[%s8220_s29 + $0x3458] sm:$0xff]  ;;  %6224 = vmatpush.msra.mxu2 %v2077_v2  ;;  %6243 = vmatpush.msra.mxu3 %v2349_v58 }
 0x6e5   : > { %v2333_v12 = vld [vmem:[%s8220_s29 + $0x3cd8] sm:$0xff]  ;;  %6185 = vmatpush.msra.mxu0 %v1549_v5  ;;  %6204 = vmatpush.msra.mxu1 %v1821_v6 }
 0x6e6   : > { %v1533_v23 = vld [vmem:[%s8220_s29 + $0x23d8] sm:$0xff]  ;;  %6225 = vmatpush.msra.mxu2 %v2061_v7  ;;  %6244 = vmatpush.msra.mxu3 %v2333_v12 }
 0x6e7   : > { %v1805_v8 = vld [vmem:[%s8220_s29 + $0x2c58] sm:$0xff]  ;;  %6186 = vmatpush.msra.mxu0 %v1533_v23  ;;  %6154 = vmatmul.f32.vlgmr.msrb.gmra.mxu2 %v10619_v21 }
 0x6e8   : > { %v2045_v17 = vld [vmem:[%s8220_s29 + $0x33d8] sm:$0xff]  ;;  %6205 = vmatpush.msra.mxu1 %v1805_v8  ;;  %6114 = vmatmul.f32.vlgmr.msrb.gmra.mxu0 %v10626_v26 }
 0x6e9   : > { %v2317_v28 = vld [vmem:[%s8220_s29 + $0x3c58] sm:$0xff]  ;;  %6226 = vmatpush.msra.mxu2 %v2045_v17  ;;  %6174 = vmatmul.f32.vlgmr.msrb.gmra.mxu3 %v10631_v27 }
 0x6ea   : > { %v1517_v29 = vld [vmem:[%s8220_s29 + $0x2358] sm:$0xff]  ;;  %6245 = vmatpush.msra.mxu3 %v2317_v28  ;;  %6134 = vmatmul.f32.vlgmr.msrb.gmra.mxu1 %v10639_v19 }
 0x6eb   : > { %v1789_v32 = vld [vmem:[%s8220_s29 + $0x2bd8] sm:$0xff]  ;;  %6187 = vmatpush.msra.mxu0 %v1517_v29 }
 0x6ec   : > { %v2029_v61 = vld [vmem:[%s8220_s29 + $0x3358] sm:$0xff]  ;;  %6206 = vmatpush.msra.mxu1 %v1789_v32 }
 0x6ed   : > { %v2301_v18 = vld [vmem:[%s8220_s29 + $0x3bd8] sm:$0xff]  ;;  %6227 = vmatpush.msra.mxu2 %v2029_v61 }
 0x6ee   : > { %v1501_v62 = vld [vmem:[%s8220_s29 + $0x22d8] sm:$0xff]  ;;  %6246 = vmatpush.msra.mxu3 %v2301_v18 }
 0x6ef   : > { %v1773_v35 = vld [vmem:[%s8220_s29 + $0x2b58] sm:$0xff]  ;;  %6188 = vmatpush.msra.mxu0 %v1501_v62 }
 0x6f0   : > { %v2013_v10 = vld [vmem:[%s8220_s29 + $0x32d8] sm:$0xff]  ;;  %6207 = vmatpush.msra.mxu1 %v1773_v35 }
 0x6f1   : > { %v2285_v11 = vld [vmem:[%s8220_s29 + $0x3b58] sm:$0xff]  ;;  %6228 = vmatpush.msra.mxu2 %v2013_v10 }
 0x6f2   : > { %v1485_v9 = vld [vmem:[%s8220_s29 + $0x2258] sm:$0xff]  ;;  %6247 = vmatpush.msra.mxu3 %v2285_v11 }
 0x6f3   : > { %v1757_v56 = vld [vmem:[%s8220_s29 + $0x2ad8] sm:$0xff]  ;;  %6189 = vmatpush.msra.mxu0 %v1485_v9 }
 0x6f4   : > { %v1997_v38 = vld [vmem:[%s8220_s29 + $0x3258] sm:$0xff]  ;;  %6208 = vmatpush.msra.mxu1 %v1757_v56 }
 0x6f5   : > { %v2269_v15 = vld [vmem:[%s8220_s29 + $0x3ad8] sm:$0xff]  ;;  %6229 = vmatpush.msra.mxu2 %v1997_v38 }
 0x6f6   : > { %v1469_v37 = vld [vmem:[%s8220_s29 + $0x21d8] sm:$0xff]  ;;  %6248 = vmatpush.msra.mxu3 %v2269_v15 }
 0x6f7   : > { %v1741_v24 = vld [vmem:[%s8220_s29 + $0x2a58] sm:$0xff]  ;;  %6190 = vmatpush.msra.mxu0 %v1469_v37 }
 0x6f8   : > { %v1981_v25 = vld [vmem:[%s8220_s29 + $0x31d8] sm:$0xff]  ;;  %6209 = vmatpush.msra.mxu1 %v1741_v24 }
 0x6f9   : > { %v2253_v13 = vld [vmem:[%s8220_s29 + $0x3a58] sm:$0xff]  ;;  %6230 = vmatpush.msra.mxu2 %v1981_v25 }
 0x6fa   : > { %v1453_v14 = vld [vmem:[%s8220_s29 + $0x2158] sm:$0xff]  ;;  %6249 = vmatpush.msra.mxu3 %v2253_v13 }
 0x6fb   : > { %v1725_v33 = vld [vmem:[%s8220_s29 + $0x29d8] sm:$0xff]  ;;  %6191 = vmatpush.msra.mxu0 %v1453_v14 }
 0x6fc   : > { %v1965_v36 = vld [vmem:[%s8220_s29 + $0x3158] sm:$0xff]  ;;  %6210 = vmatpush.msra.mxu1 %v1725_v33 }
 0x6fd   : > { %v2237_v31 = vld [vmem:[%s8220_s29 + $0x39d8] sm:$0xff]  ;;  %6231 = vmatpush.msra.mxu2 %v1965_v36 }
 0x6fe   : > { %v1437_v34 = vld [vmem:[%s8220_s29 + $0x20d8] sm:$0xff]  ;;  %6250 = vmatpush.msra.mxu3 %v2237_v31 }
 0x6ff   : > { %v1709_v39 = vld [vmem:[%s8220_s29 + $0x2958] sm:$0xff]  ;;  %6192 = vmatpush.msra.mxu0 %v1437_v34 }
 0x700   : > { %v1949_v22 = vld [vmem:[%s8220_s29 + $0x30d8] sm:$0xff]  ;;  %6211 = vmatpush.msra.mxu1 %v1709_v39 }
 0x701   : > { %v2221_v20 = vld [vmem:[%s8220_s29 + $0x3958] sm:$0xff]  ;;  %6232 = vmatpush.msra.mxu2 %v1949_v22 }
 0x702   : > { %v1421_v40 = vld [vmem:[%s8220_s29 + $0x2058] sm:$0xff]  ;;  %6251 = vmatpush.msra.mxu3 %v2221_v20 }
 0x703   : > { %v1693_v41 = vld [vmem:[%s8220_s29 + $0x28d8] sm:$0xff]  ;;  %6193 = vmatpush.msra.mxu0 %v1421_v40 }
 0x704   : > { %v1933_v42 = vld [vmem:[%s8220_s29 + $0x3058] sm:$0xff]  ;;  %6212 = vmatpush.msra.mxu1 %v1693_v41  ;;  %6194 = vmatmul.f32.vlgmr.msra.gmra.mxu0 %v10658_v0 }
 0x705   : > { %v2205_v44 = vld [vmem:[%s8220_s29 + $0x38d8] sm:$0xff]  ;;  %6233 = vmatpush.msra.mxu2 %v1933_v42 }
 0x706   : > { %v2685_v48 = vld [vmem:[%s8220_s29 + $0x47d8] sm:$0xff]  ;;  %6252 = vmatpush.msra.mxu3 %v2205_v44  ;;  %6234 = vmatmul.f32.vlgmr.msra.gmra.mxu2 %v10651_v59 }
 0x707   : > { %v3197_v16 = vld [vmem:[%s8220_s29 + $0x57d8] sm:$0xff]  ;;  %6258 = vmatpush.msrb.mxu0 %v2685_v48 }
 0x708   : > { %v1677_v30 = vld [vmem:[%s8220_s29 + $0x2858] sm:$0xff]  ;;  %6298 = vmatpush.msrb.mxu2 %v3197_v16 }
 0x709   : > { %v2189_v50 = vld [vmem:[%s8220_s29 + $0x3858] sm:$0xff]  ;;  %6213 = vmatpush.msra.mxu1 %v1677_v30  ;;  %v5895_v30 = vpop.f32.mrf.mxu1 }
 0x70a   : > { %v2669_v21 = vld [vmem:[%s8220_s29 + $0x4758] sm:$0xff]  ;;  %6253 = vmatpush.msra.mxu3 %v2189_v50  ;;  %6214 = vmatmul.f32.vlgmr.msra.gmra.mxu1 %v10671_v3 }
 0x70b   : > { %v2941_v46 = vld [vmem:[%s8220_s29 + $0x4fd8] sm:$0xff]  ;;  %6259 = vmatpush.msrb.mxu0 %v2669_v21  ;;  %6254 = vmatmul.f32.vlgmr.msra.gmra.mxu3 %v10663_v63 }
 0x70c   : > { %v3181_v47 = vld [vmem:[%s8220_s29 + $0x5758] sm:$0xff]  ;;  %6278 = vmatpush.msrb.mxu1 %v2941_v46  ;;  %v5875_v46 = vpop.f32.mrf.mxu0 }
 0x70d   : > { %v3453_v45 = vld [vmem:[%s8220_s29 + $0x5fd8] sm:$0xff]  ;;  %6299 = vmatpush.msrb.mxu2 %v3181_v47  ;;  %v638_v47 = vld [vmem:[%s8220_s29 + $0x7e0] sm:$0xff] }
 0x70e   : > { %v2653_v26 = vld [vmem:[%s8220_s29 + $0x46d8] sm:$0xff]  ;;  %6318 = vmatpush.msrb.mxu3 %v3453_v45  ;;  %v1150_v45 = vld [vmem:[%s8220_s29 + $0x17e0] sm:$0xff] }
 0x70f   : > { %v2925_v43 = vld [vmem:[%s8220_s29 + $0x4f58] sm:$0xff]  ;;  %6260 = vmatpush.msrb.mxu0 %v2653_v26  ;;  %v5896_v26 = vadd.f32 %v5895_v30, %v5875_v46  ;;  %v1246_v30 = vld [vmem:[%s8220_s29 + $0x1ae0] sm:$0xff] }
 0x710   : > { %v3165_v27 = vld [vmem:[%s8220_s29 + $0x56d8] sm:$0xff]  ;;  %6279 = vmatpush.msrb.mxu1 %v2925_v43 }
 0x711   : > { %v3437_v55 = vld [vmem:[%s8220_s29 + $0x5f58] sm:$0xff]  ;;  %6300 = vmatpush.msrb.mxu2 %v3165_v27 }
 0x712   : > { %v2637_v53 = vld [vmem:[%s8220_s29 + $0x4658] sm:$0xff]  ;;  %6319 = vmatpush.msrb.mxu3 %v3437_v55  ;;  %v5915_v55 = vpop.f32.mrf.mxu2 }
 0x713   : > { %v2909_v54 = vld [vmem:[%s8220_s29 + $0x4ed8] sm:$0xff]  ;;  %6261 = vmatpush.msrb.mxu0 %v2637_v53  ;;  %v622_v53 = vld [vmem:[%s8220_s29 + $0x760] sm:$0xff] }
 0x714   : > { %v3149_v52 = vld [vmem:[%s8220_s29 + $0x5658] sm:$0xff]  ;;  %6280 = vmatpush.msrb.mxu1 %v2909_v54  ;;  %v894_v54 = vld [vmem:[%s8220_s29 + $0xfe0] sm:$0xff] }
 0x715   : > { %v3421_v19 = vld [vmem:[%s8220_s29 + $0x5ed8] sm:$0xff]  ;;  %6301 = vmatpush.msrb.mxu2 %v3149_v52  ;;  %v1134_v52 = vld [vmem:[%s8220_s29 + $0x1760] sm:$0xff] }
 0x716   : > { %v2621_v51 = vld [vmem:[%s8220_s29 + $0x45d8] sm:$0xff]  ;;  %6320 = vmatpush.msrb.mxu3 %v3421_v19  ;;  %v1406_v19 = vld [vmem:[%s8220_s29 + $0x1fe0] sm:$0xff] }
 0x717   : > { %v2893_v1 = vld [vmem:[%s8220_s29 + $0x4e58] sm:$0xff]  ;;  %6262 = vmatpush.msrb.mxu0 %v2621_v51  ;;  %v5916_v51 = vadd.f32 %v5915_v55, %v5896_v26  ;;  %v942_v55 = vld [vmem:[%s8220_s29 + $0x1160] sm:$0xff] }
 0x718   : > { %v3133_v2 = vld [vmem:[%s8220_s29 + $0x55d8] sm:$0xff]  ;;  %6281 = vmatpush.msrb.mxu1 %v2893_v1  ;;  %v5935_v1 = vpop.f32.mrf.mxu3 }
 0x719   : > { %v3405_v58 = vld [vmem:[%s8220_s29 + $0x5e58] sm:$0xff]  ;;  %6302 = vmatpush.msrb.mxu2 %v3133_v2  ;;  %v1118_v2 = vld [vmem:[%s8220_s29 + $0x16e0] sm:$0xff] }
 0x71a   : > { %v2605_v59 = vld [vmem:[%s8220_s29 + $0x4558] sm:$0xff]  ;;  %6321 = vmatpush.msrb.mxu3 %v3405_v58  ;;  %v1390_v58 = vld [vmem:[%s8220_s29 + $0x1f60] sm:$0xff] }
 0x71b   : > { %v2877_v5 = vld [vmem:[%s8220_s29 + $0x4dd8] sm:$0xff]  ;;  %6263 = vmatpush.msrb.mxu0 %v2605_v59  ;;  %v590_v59 = vld [vmem:[%s8220_s29 + $0x660] sm:$0xff] }
 0x71c   : > { %v3117_v6 = vld [vmem:[%s8220_s29 + $0x5558] sm:$0xff]  ;;  %6282 = vmatpush.msrb.mxu1 %v2877_v5  ;;  %v862_v5 = vld [vmem:[%s8220_s29 + $0xee0] sm:$0xff] }
 0x71d   : > { %v3389_v7 = vld [vmem:[%s8220_s29 + $0x5dd8] sm:$0xff]  ;;  %6303 = vmatpush.msrb.mxu2 %v3117_v6  ;;  %v5936_v6 = vadd.f32 %v5935_v1, %v5916_v51  ;;  %v926_v51 = vld [vmem:[%s8220_s29 + $0x10e0] sm:$0xff] }
 0x71e   : > { %v2589_v0 = vld [vmem:[%s8220_s29 + $0x44d8] sm:$0xff]  ;;  %6322 = vmatpush.msrb.mxu3 %v3389_v7  ;;  %v574_v7 = vld [vmem:[%s8220_s29 + $0x5e0] sm:$0xff] }
 0x71f   : > { %v2861_v12 = vld [vmem:[%s8220_s29 + $0x4d58] sm:$0xff]  ;;  %6264 = vmatpush.msrb.mxu0 %v2589_v0  ;;  %v846_v0 = vld [vmem:[%s8220_s29 + $0xe60] sm:$0xff] }
 0x720   : > { %v3101_v63 = vld [vmem:[%s8220_s29 + $0x54d8] sm:$0xff]  ;;  %6283 = vmatpush.msrb.mxu1 %v2861_v12  ;;  %v5955_v12 = vpop.f32.mrf.mxu0  ;;  %v398_v1 = vld [vmem:[%s8220_s29 + $0x60] sm:$0xff] }
 0x721   : > { %v3373_v23 = vld [vmem:[%s8220_s29 + $0x5d58] sm:$0xff]  ;;  %6304 = vmatpush.msrb.mxu2 %v3101_v63  ;;  %v1086_v63 = vld [vmem:[%s8220_s29 + $0x15e0] sm:$0xff] }
 0x722   : > { %v2573_v8 = vld [vmem:[%s8220_s29 + $0x4458] sm:$0xff]  ;;  %6323 = vmatpush.msrb.mxu3 %v3373_v23  ;;  %v1358_v23 = vld [vmem:[%s8220_s29 + $0x1e60] sm:$0xff] }
 0x723   : > { %v2845_v17 = vld [vmem:[%s8220_s29 + $0x4cd8] sm:$0xff]  ;;  %6265 = vmatpush.msrb.mxu0 %v2573_v8  ;;  %v558_v8 = vld [vmem:[%s8220_s29 + $0x560] sm:$0xff] }
 0x724   : > { %v3085_v28 = vld [vmem:[%s8220_s29 + $0x5458] sm:$0xff]  ;;  %6284 = vmatpush.msrb.mxu1 %v2845_v17  ;;  %v830_v17 = vld [vmem:[%s8220_s29 + $0xde0] sm:$0xff] }
 0x725   : > { %v3357_v3 = vld [vmem:[%s8220_s29 + $0x5cd8] sm:$0xff]  ;;  %6305 = vmatpush.msrb.mxu2 %v3085_v28  ;;  %v5956_v28 = vadd.f32 %v5955_v12, %v5936_v6  ;;  %v2174_v6 = vld [vmem:[%s8220_s29 + $0x37e0] sm:$0xff]  ;;  %v368_v12 = vld [vmem:[%s8235_s7 + $0x50] sm:$0xff] }
 0x726   : > { %v2557_v29 = vld [vmem:[%s8220_s29 + $0x43d8] sm:$0xff]  ;;  %6324 = vmatpush.msrb.mxu3 %v3357_v3  ;;  %v1070_v3 = vld [vmem:[%s8220_s29 + $0x1560] sm:$0xff] }
 0x727   : > { %v2829_v32 = vld [vmem:[%s8220_s29 + $0x4c58] sm:$0xff]  ;;  %6266 = vmatpush.msrb.mxu0 %v2557_v29  ;;  %v1342_v29 = vld [vmem:[%s8220_s29 + $0x1de0] sm:$0xff] }
 0x728   : > { %v3069_v61 = vld [vmem:[%s8220_s29 + $0x53d8] sm:$0xff]  ;;  %6285 = vmatpush.msrb.mxu1 %v2829_v32  ;;  %v5975_v32 = vpop.f32.mrf.mxu1 }
 0x729   : > { %v3341_v18 = vld [vmem:[%s8220_s29 + $0x5c58] sm:$0xff]  ;;  %6306 = vmatpush.msrb.mxu2 %v3069_v61  ;;  %v542_v61 = vld [vmem:[%s8220_s29 + $0x4e0] sm:$0xff] }
 0x72a   : > { %v2541_v62 = vld [vmem:[%s8220_s29 + $0x4358] sm:$0xff]  ;;  %6325 = vmatpush.msrb.mxu3 %v3341_v18  ;;  %v814_v18 = vld [vmem:[%s8220_s29 + $0xd60] sm:$0xff] }
 0x72b   : > { %v2813_v35 = vld [vmem:[%s8220_s29 + $0x4bd8] sm:$0xff]  ;;  %6267 = vmatpush.msrb.mxu0 %v2541_v62  ;;  %v1054_v62 = vld [vmem:[%s8220_s29 + $0x14e0] sm:$0xff] }
 0x72c   : > { %v3053_v10 = vld [vmem:[%s8220_s29 + $0x5358] sm:$0xff]  ;;  %6286 = vmatpush.msrb.mxu1 %v2813_v35  ;;  %v1326_v35 = vld [vmem:[%s8220_s29 + $0x1d60] sm:$0xff] }
 0x72d   : > { %v3325_v11 = vld [vmem:[%s8220_s29 + $0x5bd8] sm:$0xff]  ;;  %6307 = vmatpush.msrb.mxu2 %v3053_v10  ;;  %v526_v10 = vld [vmem:[%s8220_s29 + $0x460] sm:$0xff] }
 0x72e   : > { %v2525_v9 = vld [vmem:[%s8220_s29 + $0x42d8] sm:$0xff]  ;;  %6326 = vmatpush.msrb.mxu3 %v3325_v11  ;;  %v798_v11 = vld [vmem:[%s8220_s29 + $0xce0] sm:$0xff] }
 0x72f   : > { %v2797_v56 = vld [vmem:[%s8220_s29 + $0x4b58] sm:$0xff]  ;;  %6268 = vmatpush.msrb.mxu0 %v2525_v9  ;;  %v5976_v9 = vadd.f32 %v5975_v32, %v5956_v28  ;;  %v2158_v28 = vld [vmem:[%s8220_s29 + $0x3760] sm:$0xff] }
 0x730   : > { %v3037_v38 = vld [vmem:[%s8220_s29 + $0x52d8] sm:$0xff]  ;;  %6287 = vmatpush.msrb.mxu1 %v2797_v56  ;;  %v1038_v56 = vld [vmem:[%s8220_s29 + $0x1460] sm:$0xff]  ;;  %v6035_v46 = vpop.f32.mrf.mxu0 }
 0x731   : > { %v3309_v15 = vld [vmem:[%s8220_s29 + $0x5b58] sm:$0xff]  ;;  %6308 = vmatpush.msrb.mxu2 %v3037_v38  ;;  %v1310_v38 = vld [vmem:[%s8220_s29 + $0x1ce0] sm:$0xff] }
 0x732   : > { %v2509_v37 = vld [vmem:[%s8220_s29 + $0x4258] sm:$0xff]  ;;  %6327 = vmatpush.msrb.mxu3 %v3309_v15  ;;  %v5995_v15 = vpop.f32.mrf.mxu2  ;;  %v1902_v32 = vld [vmem:[%s8220_s29 + $0x2f60] sm:$0xff] }
 0x733   : > { %v2781_v24 = vld [vmem:[%s8220_s29 + $0x4ad8] sm:$0xff]  ;;  %6269 = vmatpush.msrb.mxu0 %v2509_v37  ;;  %v510_v37 = vld [vmem:[%s8220_s29 + $0x3e0] sm:$0xff] }
 0x734   : > { %v3021_v25 = vld [vmem:[%s8220_s29 + $0x5258] sm:$0xff]  ;;  %6288 = vmatpush.msrb.mxu1 %v2781_v24  ;;  %v782_v24 = vld [vmem:[%s8220_s29 + $0xc60] sm:$0xff] }
 0x735   : > { %v3293_v13 = vld [vmem:[%s8220_s29 + $0x5ad8] sm:$0xff]  ;;  %6309 = vmatpush.msrb.mxu2 %v3021_v25  ;;  %v1022_v25 = vld [vmem:[%s8220_s29 + $0x13e0] sm:$0xff] }
 0x736   : > { %v2493_v14 = vld [vmem:[%s8220_s29 + $0x41d8] sm:$0xff]  ;;  %6328 = vmatpush.msrb.mxu3 %v3293_v13  ;;  %v1294_v13 = vld [vmem:[%s8220_s29 + $0x1c60] sm:$0xff] }
 0x737   : > { %v2765_v33 = vld [vmem:[%s8220_s29 + $0x4a58] sm:$0xff]  ;;  %6270 = vmatpush.msrb.mxu0 %v2493_v14  ;;  %v494_v14 = vld [vmem:[%s8220_s29 + $0x360] sm:$0xff] }
 0x738   : > { %v3005_v36 = vld [vmem:[%s8220_s29 + $0x51d8] sm:$0xff]  ;;  %6289 = vmatpush.msrb.mxu1 %v2765_v33  ;;  %v766_v33 = vld [vmem:[%s8220_s29 + $0xbe0] sm:$0xff] }
 0x739   : > { %v3277_v31 = vld [vmem:[%s8220_s29 + $0x5a58] sm:$0xff]  ;;  %6310 = vmatpush.msrb.mxu2 %v3005_v36  ;;  %v5996_v36 = vadd.f32 %v5995_v15, %v5976_v9  ;;  %v2398_v9 = vld [vmem:[%s8220_s29 + $0x3ee0] sm:$0xff] }
 0x73a   : > { %v2477_v34 = vld [vmem:[%s8220_s29 + $0x4158] sm:$0xff]  ;;  %6329 = vmatpush.msrb.mxu3 %v3277_v31  ;;  %v1006_v31 = vld [vmem:[%s8220_s29 + $0x1360] sm:$0xff] }
 0x73b   : > { %v2749_v39 = vld [vmem:[%s8220_s29 + $0x49d8] sm:$0xff]  ;;  %6271 = vmatpush.msrb.mxu0 %v2477_v34  ;;  %v1278_v34 = vld [vmem:[%s8220_s29 + $0x1be0] sm:$0xff] }
 0x73c   : > { %v2989_v22 = vld [vmem:[%s8220_s29 + $0x5158] sm:$0xff]  ;;  %6290 = vmatpush.msrb.mxu1 %v2749_v39  ;;  %v6015_v39 = vpop.f32.mrf.mxu3  ;;  %v2110_v15 = vld [vmem:[%s8220_s29 + $0x35e0] sm:$0xff] }
 0x73d   : > { %v3261_v20 = vld [vmem:[%s8220_s29 + $0x59d8] sm:$0xff]  ;;  %6311 = vmatpush.msrb.mxu2 %v2989_v22  ;;  %v478_v22 = vld [vmem:[%s8220_s29 + $0x2e0] sm:$0xff] }
 0x73e   : > { %v2461_v40 = vld [vmem:[%s8220_s29 + $0x40d8] sm:$0xff]  ;;  %6330 = vmatpush.msrb.mxu3 %v3261_v20  ;;  %v750_v20 = vld [vmem:[%s8220_s29 + $0xb60] sm:$0xff] }
 0x73f   : > { %v2733_v41 = vld [vmem:[%s8220_s29 + $0x4958] sm:$0xff]  ;;  %6272 = vmatpush.msrb.mxu0 %v2461_v40  ;;  %v990_v40 = vld [vmem:[%s8220_s29 + $0x12e0] sm:$0xff] }
 0x740   : > { %v2973_v42 = vld [vmem:[%s8220_s29 + $0x50d8] sm:$0xff]  ;;  %6291 = vmatpush.msrb.mxu1 %v2733_v41  ;;  %v1262_v41 = vld [vmem:[%s8220_s29 + $0x1b60] sm:$0xff] }
 0x741   : > { %v3245_v44 = vld [vmem:[%s8220_s29 + $0x5958] sm:$0xff]  ;;  %6312 = vmatpush.msrb.mxu2 %v2973_v42  ;;  %v462_v42 = vld [vmem:[%s8220_s29 + $0x260] sm:$0xff] }
 0x742   : > { %v2445_v48 = vld [vmem:[%s8220_s29 + $0x4058] sm:$0xff]  ;;  %6331 = vmatpush.msrb.mxu3 %v3245_v44  ;;  %v734_v44 = vld [vmem:[%s8220_s29 + $0xae0] sm:$0xff] }
 0x743   : > { %v2717_v16 = vld [vmem:[%s8220_s29 + $0x48d8] sm:$0xff]  ;;  %6273 = vmatpush.msrb.mxu0 %v2445_v48  ;;  %v6016_v48 = vadd.f32 %v6015_v39, %v5996_v36  ;;  %v1838_v36 = vld [vmem:[%s8220_s29 + $0x2d60] sm:$0xff] }
 0x744   : > { %v2957_v50 = vld [vmem:[%s8220_s29 + $0x5058] sm:$0xff]  ;;  %6292 = vmatpush.msrb.mxu1 %v2717_v16  ;;  %6274 = vmatmul.f32.vlgmr.msrb.gmra.mxu0 %v10719_v60  ;;  %v606_v60 = vld [vmem:[%s8220_s29 + $0x6e0] sm:$0xff] }
 0x745   : > { %v3229_v21 = vld [vmem:[%s8220_s29 + $0x58d8] sm:$0xff]  ;;  %6313 = vmatpush.msrb.mxu2 %v2957_v50  ;;  %6338 = vmatpush.msra.mxu0 %v638_v47  ;;  %v974_v16 = vld [vmem:[%s8220_s29 + $0x1260] sm:$0xff]  ;;  %v6036_v26 = vadd.f32 %v6035_v46, %v6016_v48 }
 0x746   : > { %6332 = vmatpush.msrb.mxu3 %v3229_v21  ;;  %v2701_v43 = vld [vmem:[%s8220_s29 + $0x4858] sm:$0xff]  ;;  %6314 = vmatmul.f32.vlgmr.msrb.gmra.mxu2 %v10723_v49  ;;  %v878_v49 = vld [vmem:[%s8220_s29 + $0xf60] sm:$0xff] }
 0x747   : > { %v3213_v27 = vld [vmem:[%s8220_s29 + $0x5858] sm:$0xff]  ;;  %6378 = vmatpush.msra.mxu2 %v1150_v45  ;;  %6293 = vmatpush.msrb.mxu1 %v2701_v43  ;;  %v446_v50 = vld [vmem:[%s8220_s29 + $0x1e0] sm:$0xff] }
 0x748   : > { %6333 = vmatpush.msrb.mxu3 %v3213_v27  ;;  %6294 = vmatmul.f32.vlgmr.msrb.gmra.mxu1 %v10731_v57  ;;  %v1102_v57 = vld [vmem:[%s8220_s29 + $0x1660] sm:$0xff] }
 0x749   : > { %6334 = vmatmul.f32.vlgmr.msrb.gmra.mxu3 %v10735_v4  ;;  %6339 = vmatpush.msra.mxu0 %v622_v53  ;;  %v1374_v4 = vld [vmem:[%s8220_s29 + $0x1ee0] sm:$0xff] }
 0x74a   : > { %6358 = vmatpush.msra.mxu1 %v894_v54  ;;  %6379 = vmatpush.msra.mxu2 %v1134_v52  ;;  %v718_v21 = vld [vmem:[%s8220_s29 + $0xa60] sm:$0xff]  ;;  %v6055_v54 = vpop.f32.mrf.mxu1 }
 0x74b   : > { %6398 = vmatpush.msra.mxu3 %v1406_v19  ;;  %6340 = vmatpush.msra.mxu0 %v606_v60  ;;  %v958_v47 = vld [vmem:[%s8220_s29 + $0x11e0] sm:$0xff] }
 0x74c   : > { %6359 = vmatpush.msra.mxu1 %v878_v49  ;;  %6380 = vmatpush.msra.mxu2 %v1118_v2  ;;  %v1230_v45 = vld [vmem:[%s8220_s29 + $0x1a60] sm:$0xff]  ;;  %v6056_v49 = vadd.f32 %v6055_v54, %v6036_v26 }
 0x74d   : > { %6399 = vmatpush.msra.mxu3 %v1390_v58  ;;  %6341 = vmatpush.msra.mxu0 %v590_v59  ;;  %v430_v43 = vld [vmem:[%s8220_s29 + $0x160] sm:$0xff]  ;;  %v6075_v58 = vpop.f32.mrf.mxu2 }
 0x74e   : > { %6360 = vmatpush.msra.mxu1 %v862_v5  ;;  %6381 = vmatpush.msra.mxu2 %v1102_v57  ;;  %v702_v27 = vld [vmem:[%s8220_s29 + $0x9e0] sm:$0xff]  ;;  %v6076_v57 = vadd.f32 %v6075_v58, %v6056_v49 }
 0x74f   : > { %6400 = vmatpush.msra.mxu3 %v1374_v4  ;;  %6342 = vmatpush.msra.mxu0 %v574_v7  ;;  %v1214_v53 = vld [vmem:[%s8220_s29 + $0x19e0] sm:$0xff] }
 0x750   : > { %6361 = vmatpush.msra.mxu1 %v846_v0  ;;  %6382 = vmatpush.msra.mxu2 %v1086_v63  ;;  %v414_v52 = vld [vmem:[%s8220_s29 + $0xe0] sm:$0xff]  ;;  %v6095_v63 = vpop.f32.mrf.mxu3 }
 0x751   : > { %6401 = vmatpush.msra.mxu3 %v1358_v23  ;;  %6343 = vmatpush.msra.mxu0 %v558_v8  ;;  %v686_v19 = vld [vmem:[%s8220_s29 + $0x960] sm:$0xff] }
 0x752   : > { %6362 = vmatpush.msra.mxu1 %v830_v17  ;;  %6383 = vmatpush.msra.mxu2 %v1070_v3  ;;  %v1198_v60 = vld [vmem:[%s8220_s29 + $0x1960] sm:$0xff]  ;;  %v6096_v17 = vadd.f32 %v6095_v63, %v6076_v57 }
 0x753   : > { %6402 = vmatpush.msra.mxu3 %v1342_v29  ;;  %6344 = vmatpush.msra.mxu0 %v542_v61  ;;  %v670_v2 = vld [vmem:[%s8220_s29 + $0x8e0] sm:$0xff] }
 0x754   : > { %6363 = vmatpush.msra.mxu1 %v814_v18  ;;  %6384 = vmatpush.msra.mxu2 %v1054_v62  ;;  %v910_v59 = vld [vmem:[%s8220_s29 + $0x1060] sm:$0xff]  ;;  %v7308_v61 = vadd.f32 %v6096_v17, %v368_v12  ;;  %v11067_v12 = vld [vmem:[%s8212_s17 + $0x10] sm:$0xff] }
 0x755   : > { %6403 = vmatpush.msra.mxu3 %v1326_v35  ;;  %6345 = vmatpush.msra.mxu0 %v526_v10  ;;  %v1182_v5 = vld [vmem:[%s8220_s29 + $0x18e0] sm:$0xff] }
 0x756   : > { %6364 = vmatpush.msra.mxu1 %v798_v11  ;;  %6385 = vmatpush.msra.mxu2 %v1038_v56  ;;  %v1662_v4 = vld [vmem:[%s8220_s29 + $0x27e0] sm:$0xff]  ;;  %7324 = vst [vmem:[%s8235_s7 + $0x50] sm:$0xff] %v7308_v61 }
 0x757   : > { %6404 = vmatpush.msra.mxu3 %v1310_v38  ;;  %6346 = vmatpush.msra.mxu0 %v510_v37  ;;  %v654_v7 = vld [vmem:[%s8220_s29 + $0x860] sm:$0xff] }
 0x758   : > { %6365 = vmatpush.msra.mxu1 %v782_v24  ;;  %6386 = vmatpush.msra.mxu2 %v1022_v25  ;;  %v1166_v0 = vld [vmem:[%s8220_s29 + $0x1860] sm:$0xff] }
 0x759   : > { %6405 = vmatpush.msra.mxu3 %v1294_v13  ;;  %6347 = vmatpush.msra.mxu0 %v494_v14  ;;  %v1646_v23 = vld [vmem:[%s8220_s29 + $0x2760] sm:$0xff] }
 0x75a   : > { %6366 = vmatpush.msra.mxu1 %v766_v33  ;;  %6387 = vmatpush.msra.mxu2 %v1006_v31  ;;  %v1918_v8 = vld [vmem:[%s8220_s29 + $0x2fe0] sm:$0xff] }
 0x75b   : > { %6406 = vmatpush.msra.mxu3 %v1278_v34  ;;  %6348 = vmatpush.msra.mxu0 %v478_v22  ;;  %v2430_v3 = vld [vmem:[%s8220_s29 + $0x3fe0] sm:$0xff] }
 0x75c   : > { %6367 = vmatpush.msra.mxu1 %v750_v20  ;;  %6388 = vmatpush.msra.mxu2 %v990_v40  ;;  %v1630_v29 = vld [vmem:[%s8220_s29 + $0x26e0] sm:$0xff] }
 0x75d   : > { %6407 = vmatpush.msra.mxu3 %v1262_v41  ;;  %6349 = vmatpush.msra.mxu0 %v462_v42  ;;  %v2142_v18 = vld [vmem:[%s8220_s29 + $0x36e0] sm:$0xff] }
 0x75e   : > { %6368 = vmatpush.msra.mxu1 %v734_v44  ;;  %6389 = vmatpush.msra.mxu2 %v974_v16  ;;  %v2414_v62 = vld [vmem:[%s8220_s29 + $0x3f60] sm:$0xff] }
 0x75f   : > { %6408 = vmatpush.msra.mxu3 %v1246_v30  ;;  %6350 = vmatpush.msra.mxu0 %v446_v50  ;;  %v1614_v35 = vld [vmem:[%s8220_s29 + $0x2660] sm:$0xff] }
 0x760   : > { %6369 = vmatpush.msra.mxu1 %v718_v21  ;;  %6390 = vmatpush.msra.mxu2 %v958_v47  ;;  %v1886_v10 = vld [vmem:[%s8220_s29 + $0x2ee0] sm:$0xff] }
 0x761   : > { %6409 = vmatpush.msra.mxu3 %v1230_v45  ;;  %6351 = vmatpush.msra.mxu0 %v430_v43  ;;  %v2126_v11 = vld [vmem:[%s8220_s29 + $0x3660] sm:$0xff] }
 0x762   : > { %6370 = vmatpush.msra.mxu1 %v702_v27  ;;  %6391 = vmatpush.msra.mxu2 %v942_v55  ;;  %v1598_v56 = vld [vmem:[%s8220_s29 + $0x25e0] sm:$0xff] }
 0x763   : > { %6410 = vmatpush.msra.mxu3 %v1214_v53  ;;  %6352 = vmatpush.msra.mxu0 %v414_v52  ;;  %v1870_v38 = vld [vmem:[%s8220_s29 + $0x2e60] sm:$0xff] }
 0x764   : > { %6371 = vmatpush.msra.mxu1 %v686_v19  ;;  %6392 = vmatpush.msra.mxu2 %v926_v51  ;;  %v2382_v37 = vld [vmem:[%s8220_s29 + $0x3e60] sm:$0xff] }
 0x765   : > { %6411 = vmatpush.msra.mxu3 %v1198_v60  ;;  %6353 = vmatpush.msra.mxu0 %v398_v1  ;;  %v1582_v24 = vld [vmem:[%s8220_s29 + $0x2560] sm:$0xff] }
 0x766   : > { %6372 = vmatpush.msra.mxu1 %v670_v2  ;;  %6393 = vmatpush.msra.mxu2 %v910_v59  ;;  %v1854_v25 = vld [vmem:[%s8220_s29 + $0x2de0] sm:$0xff] }
 0x767   : > { %6412 = vmatpush.msra.mxu3 %v1182_v5  ;;  %6418 = vmatpush.msrb.mxu0 %v1662_v4  ;;  %v2094_v13 = vld [vmem:[%s8220_s29 + $0x3560] sm:$0xff] }
 0x768   : > { %6458 = vmatpush.msrb.mxu2 %v2174_v6  ;;  %6373 = vmatpush.msra.mxu1 %v654_v7  ;;  %v2366_v14 = vld [vmem:[%s8220_s29 + $0x3de0] sm:$0xff] }
 0x769   : > { %6413 = vmatpush.msra.mxu3 %v1166_v0  ;;  %6419 = vmatpush.msrb.mxu0 %v1646_v23  ;;  %v1566_v33 = vld [vmem:[%s8220_s29 + $0x24e0] sm:$0xff] }
 0x76a   : > { %6438 = vmatpush.msrb.mxu1 %v1918_v8  ;;  %6459 = vmatpush.msrb.mxu2 %v2158_v28  ;;  %v2078_v31 = vld [vmem:[%s8220_s29 + $0x34e0] sm:$0xff] }
 0x76b   : > { %6478 = vmatpush.msrb.mxu3 %v2430_v3  ;;  %6420 = vmatpush.msrb.mxu0 %v1630_v29  ;;  %v2350_v34 = vld [vmem:[%s8220_s29 + $0x3d60] sm:$0xff]  ;;  %v11079_v3 = vld [vmem:[%s8212_s17 + $0x18] sm:$0xff] }
 0x76c   : > { %6439 = vmatpush.msrb.mxu1 %v1902_v32  ;;  %6460 = vmatpush.msrb.mxu2 %v2142_v18  ;;  %v1550_v39 = vld [vmem:[%s8220_s29 + $0x2460] sm:$0xff] }
 0x76d   : > { %6479 = vmatpush.msrb.mxu3 %v2414_v62  ;;  %6421 = vmatpush.msrb.mxu0 %v1614_v35  ;;  %v1822_v22 = vld [vmem:[%s8220_s29 + $0x2ce0] sm:$0xff]  ;;  %v11087_v62 = vld [vmem:[%s8212_s17 + $0x8] sm:$0xff] }
 0x76e   : > { %6440 = vmatpush.msrb.mxu1 %v1886_v10  ;;  %6461 = vmatpush.msrb.mxu2 %v2126_v11  ;;  %v2062_v20 = vld [vmem:[%s8220_s29 + $0x3460] sm:$0xff] }
 0x76f   : > { %6480 = vmatpush.msrb.mxu3 %v2398_v9  ;;  %6422 = vmatpush.msrb.mxu0 %v1598_v56  ;;  %v2334_v40 = vld [vmem:[%s8220_s29 + $0x3ce0] sm:$0xff] }
 0x770   : > { %6441 = vmatpush.msrb.mxu1 %v1870_v38  ;;  %6462 = vmatpush.msrb.mxu2 %v2110_v15  ;;  %v1534_v41 = vld [vmem:[%s8220_s29 + $0x23e0] sm:$0xff] }
 0x771   : > { %6481 = vmatpush.msrb.mxu3 %v2382_v37  ;;  %6423 = vmatpush.msrb.mxu0 %v1582_v24  ;;  %v1806_v42 = vld [vmem:[%s8220_s29 + $0x2c60] sm:$0xff]  ;;  %v11099_v24 = vld [vmem:[%s8212_s17 + $0x30] sm:$0xff] }
 0x772   : > { %6442 = vmatpush.msrb.mxu1 %v1854_v25  ;;  %6463 = vmatpush.msrb.mxu2 %v2094_v13  ;;  %v2046_v44 = vld [vmem:[%s8220_s29 + $0x33e0] sm:$0xff] }
 0x773   : > { %6482 = vmatpush.msrb.mxu3 %v2366_v14  ;;  %6424 = vmatpush.msrb.mxu0 %v1566_v33  ;;  %v2318_v48 = vld [vmem:[%s8220_s29 + $0x3c60] sm:$0xff] }
 0x774   : > { %6443 = vmatpush.msrb.mxu1 %v1838_v36  ;;  %6464 = vmatpush.msrb.mxu2 %v2078_v31  ;;  %v1518_v16 = vld [vmem:[%s8220_s29 + $0x2360] sm:$0xff]  ;;  %v11111_v31 = vld [vmem:[%s8212_s17 + $0x38] sm:$0xff] }
 0x775   : > { %6483 = vmatpush.msrb.mxu3 %v2350_v34  ;;  %6425 = vmatpush.msrb.mxu0 %v1550_v39  ;;  %v1790_v30 = vld [vmem:[%s8220_s29 + $0x2be0] sm:$0xff] }
 0x776   : > { %6444 = vmatpush.msrb.mxu1 %v1822_v22  ;;  %6465 = vmatpush.msrb.mxu2 %v2062_v20  ;;  %v2030_v50 = vld [vmem:[%s8220_s29 + $0x3360] sm:$0xff] }
 0x777   : > { %6484 = vmatpush.msrb.mxu3 %v2334_v40  ;;  %6426 = vmatpush.msrb.mxu0 %v1534_v41  ;;  %v2302_v21 = vld [vmem:[%s8220_s29 + $0x3be0] sm:$0xff]  ;;  %v11119_v40 = vld [vmem:[%s8212_s17 + $0x28] sm:$0xff] }
 0x778   : > { %6445 = vmatpush.msrb.mxu1 %v1806_v42  ;;  %6466 = vmatpush.msrb.mxu2 %v2046_v44  ;;  %v1502_v46 = vld [vmem:[%s8220_s29 + $0x22e0] sm:$0xff] }
 0x779   : > { %6485 = vmatpush.msrb.mxu3 %v2318_v48  ;;  %v1774_v47 = vld [vmem:[%s8220_s29 + $0x2b60] sm:$0xff]  ;;  %6427 = vmatpush.msrb.mxu0 %v1518_v16 }
 0x77a   : > { %6446 = vmatpush.msrb.mxu1 %v1790_v30  ;;  %v2014_v45 = vld [vmem:[%s8220_s29 + $0x32e0] sm:$0xff]  ;;  %6467 = vmatpush.msrb.mxu2 %v2030_v50 }
 0x77b   : > { %v2286_v26 = vld [vmem:[%s8220_s29 + $0x3b60] sm:$0xff]  ;;  %6486 = vmatpush.msrb.mxu3 %v2302_v21  ;;  %6428 = vmatpush.msrb.mxu0 %v1502_v46 }
 0x77c   : > { %v1486_v43 = vld [vmem:[%s8220_s29 + $0x2260] sm:$0xff]  ;;  %6447 = vmatpush.msrb.mxu1 %v1774_v47  ;;  %6468 = vmatpush.msrb.mxu2 %v2014_v45 }
 0x77d   : > { %v1758_v27 = vld [vmem:[%s8220_s29 + $0x2ae0] sm:$0xff]  ;;  %6487 = vmatpush.msrb.mxu3 %v2286_v26  ;;  %6429 = vmatpush.msrb.mxu0 %v1486_v43 }
 0x77e   : > { %v1998_v55 = vld [vmem:[%s8220_s29 + $0x3260] sm:$0xff]  ;;  %6448 = vmatpush.msrb.mxu1 %v1758_v27  ;;  %6394 = vmatmul.f32.vlgmr.msra.gmra.mxu2 %v11067_v12 }
 0x77f   : > { %v2270_v53 = vld [vmem:[%s8220_s29 + $0x3ae0] sm:$0xff]  ;;  %6469 = vmatpush.msrb.mxu2 %v1998_v55  ;;  %6414 = vmatmul.f32.vlgmr.msra.gmra.mxu3 %v11079_v3 }
 0x780   : > { %v1470_v54 = vld [vmem:[%s8220_s29 + $0x21e0] sm:$0xff]  ;;  %6488 = vmatpush.msrb.mxu3 %v2270_v53  ;;  %6374 = vmatmul.f32.vlgmr.msra.gmra.mxu1 %v11087_v62 }
 0x781   : > { %v1742_v52 = vld [vmem:[%s8220_s29 + $0x2a60] sm:$0xff]  ;;  %6430 = vmatpush.msrb.mxu0 %v1470_v54 }
 0x782   : > { %v1982_v19 = vld [vmem:[%s8220_s29 + $0x31e0] sm:$0xff]  ;;  %6449 = vmatpush.msrb.mxu1 %v1742_v52 }
 0x783   : > { %v2254_v51 = vld [vmem:[%s8220_s29 + $0x3a60] sm:$0xff]  ;;  %6470 = vmatpush.msrb.mxu2 %v1982_v19 }
 0x784   : > { %v1454_v60 = vld [vmem:[%s8220_s29 + $0x2160] sm:$0xff]  ;;  %6489 = vmatpush.msrb.mxu3 %v2254_v51 }
 0x785   : > { %v1726_v49 = vld [vmem:[%s8220_s29 + $0x29e0] sm:$0xff]  ;;  %6431 = vmatpush.msrb.mxu0 %v1454_v60 }
 0x786   : > { %v1966_v1 = vld [vmem:[%s8220_s29 + $0x3160] sm:$0xff]  ;;  %6450 = vmatpush.msrb.mxu1 %v1726_v49 }
 0x787   : > { %v2238_v2 = vld [vmem:[%s8220_s29 + $0x39e0] sm:$0xff]  ;;  %6471 = vmatpush.msrb.mxu2 %v1966_v1 }
 0x788   : > { %v1438_v58 = vld [vmem:[%s8220_s29 + $0x20e0] sm:$0xff]  ;;  %6490 = vmatpush.msrb.mxu3 %v2238_v2 }
 0x789   : > { %v1710_v59 = vld [vmem:[%s8220_s29 + $0x2960] sm:$0xff]  ;;  %6432 = vmatpush.msrb.mxu0 %v1438_v58 }
 0x78a   : > { %v1950_v5 = vld [vmem:[%s8220_s29 + $0x30e0] sm:$0xff]  ;;  %6451 = vmatpush.msrb.mxu1 %v1710_v59 }
 0x78b   : > { %v2222_v57 = vld [vmem:[%s8220_s29 + $0x3960] sm:$0xff]  ;;  %6472 = vmatpush.msrb.mxu2 %v1950_v5 }
 0x78c   : > { %v1422_v4 = vld [vmem:[%s8220_s29 + $0x2060] sm:$0xff]  ;;  %6491 = vmatpush.msrb.mxu3 %v2222_v57 }
 0x78d   : > { %v1694_v6 = vld [vmem:[%s8220_s29 + $0x28e0] sm:$0xff]  ;;  %6433 = vmatpush.msrb.mxu0 %v1422_v4 }
 0x78e   : > { %v1934_v7 = vld [vmem:[%s8220_s29 + $0x3060] sm:$0xff]  ;;  %6452 = vmatpush.msrb.mxu1 %v1694_v6 }
 0x78f   : > { %v2206_v0 = vld [vmem:[%s8220_s29 + $0x38e0] sm:$0xff]  ;;  %6473 = vmatpush.msrb.mxu2 %v1934_v7 }
 0x790   : > { %v2686_v63 = vld [vmem:[%s8220_s29 + $0x47e0] sm:$0xff]  ;;  %6492 = vmatpush.msrb.mxu3 %v2206_v0  ;;  %6474 = vmatmul.f32.vlgmr.msrb.gmra.mxu2 %v11099_v24 }
 0x791   : > { %v3198_v23 = vld [vmem:[%s8220_s29 + $0x57e0] sm:$0xff] }
 0x792   : > { %v1678_v8 = vld [vmem:[%s8220_s29 + $0x2860] sm:$0xff]  ;;  %6538 = vmatpush.msra.mxu2 %v3198_v23 }
 0x793   : > { %v11074_v17 = vld [vmem:[%s8212_s17] sm:$0xff]  ;;  %6453 = vmatpush.msrb.mxu1 %v1678_v8 }
 0x794   : > { %6354 = vmatmul.f32.vlgmr.msra.gmra.mxu0 %v11074_v17  ;;  %v2190_v28 = vld [vmem:[%s8220_s29 + $0x3860] sm:$0xff]  ;;  %6454 = vmatmul.f32.vlgmr.msrb.gmra.mxu1 %v11119_v40 }
 0x795   : > { %6498 = vmatpush.msra.mxu0 %v2686_v63  ;;  %v2670_v29 = vld [vmem:[%s8220_s29 + $0x4760] sm:$0xff]  ;;  %6493 = vmatpush.msrb.mxu3 %v2190_v28 }
 0x796   : > { %v2942_v32 = vld [vmem:[%s8220_s29 + $0x4fe0] sm:$0xff]  ;;  %6494 = vmatmul.f32.vlgmr.msrb.gmra.mxu3 %v11111_v31 }
 0x797   : > { %v3182_v61 = vld [vmem:[%s8220_s29 + $0x5760] sm:$0xff]  ;;  %6499 = vmatpush.msra.mxu0 %v2670_v29  ;;  %6518 = vmatpush.msra.mxu1 %v2942_v32 }
 0x798   : > { %v3454_v18 = vld [vmem:[%s8220_s29 + $0x5fe0] sm:$0xff]  ;;  %6539 = vmatpush.msra.mxu2 %v3182_v61  ;;  %v6135_v61 = vpop.f32.mrf.mxu1 }
 0x799   : > { %v2654_v35 = vld [vmem:[%s8220_s29 + $0x46e0] sm:$0xff]  ;;  %6558 = vmatpush.msra.mxu3 %v3454_v18 }
 0x79a   : > { %v2926_v10 = vld [vmem:[%s8220_s29 + $0x4f60] sm:$0xff]  ;;  %6500 = vmatpush.msra.mxu0 %v2654_v35 }
 0x79b   : > { %v3166_v11 = vld [vmem:[%s8220_s29 + $0x56e0] sm:$0xff]  ;;  %6519 = vmatpush.msra.mxu1 %v2926_v10  ;;  %v6115_v10 = vpop.f32.mrf.mxu0 }
 0x79c   : > { %v3438_v9 = vld [vmem:[%s8220_s29 + $0x5f60] sm:$0xff]  ;;  %6540 = vmatpush.msra.mxu2 %v3166_v11  ;;  %v639_v11 = vld [vmem:[%s8220_s29 + $0x7e8] sm:$0xff] }
 0x79d   : > { %v2638_v56 = vld [vmem:[%s8220_s29 + $0x4660] sm:$0xff]  ;;  %6559 = vmatpush.msra.mxu3 %v3438_v9  ;;  %v1151_v9 = vld [vmem:[%s8220_s29 + $0x17e8] sm:$0xff] }
 0x79e   : > { %v2910_v38 = vld [vmem:[%s8220_s29 + $0x4ee0] sm:$0xff]  ;;  %6501 = vmatpush.msra.mxu0 %v2638_v56  ;;  %v6136_v56 = vadd.f32 %v6135_v61, %v6115_v10 }
 0x79f   : > { %v3150_v15 = vld [vmem:[%s8220_s29 + $0x5660] sm:$0xff]  ;;  %6520 = vmatpush.msra.mxu1 %v2910_v38 }
 0x7a0   : > { %v3422_v37 = vld [vmem:[%s8220_s29 + $0x5ee0] sm:$0xff]  ;;  %6541 = vmatpush.msra.mxu2 %v3150_v15 }
 0x7a1   : > { %v2622_v25 = vld [vmem:[%s8220_s29 + $0x45e0] sm:$0xff]  ;;  %6560 = vmatpush.msra.mxu3 %v3422_v37  ;;  %v6155_v37 = vpop.f32.mrf.mxu2 }
 0x7a2   : > { %v2894_v13 = vld [vmem:[%s8220_s29 + $0x4e60] sm:$0xff]  ;;  %6502 = vmatpush.msra.mxu0 %v2622_v25 }
 0x7a3   : > { %v3134_v14 = vld [vmem:[%s8220_s29 + $0x55e0] sm:$0xff]  ;;  %6521 = vmatpush.msra.mxu1 %v2894_v13  ;;  %v11171_v13 = vld [vmem:[%s8212_s17 + $0x50] sm:$0xff] }
 0x7a4   : > { %v11106_v33 = vld [vmem:[%s8212_s17 + $0x20] sm:$0xff]  ;;  %6542 = vmatpush.msra.mxu2 %v3134_v14  ;;  %v623_v14 = vld [vmem:[%s8220_s29 + $0x768] sm:$0xff] }
 0x7a5   : > { %6434 = vmatmul.f32.vlgmr.msrb.gmra.mxu0 %v11106_v33  ;;  %v3406_v36 = vld [vmem:[%s8220_s29 + $0x5e60] sm:$0xff] }
 0x7a6   : > { %v2606_v34 = vld [vmem:[%s8220_s29 + $0x4560] sm:$0xff]  ;;  %6561 = vmatpush.msra.mxu3 %v3406_v36  ;;  %v895_v36 = vld [vmem:[%s8220_s29 + $0xfe8] sm:$0xff] }
 0x7a7   : > { %v2878_v39 = vld [vmem:[%s8220_s29 + $0x4de0] sm:$0xff]  ;;  %6503 = vmatpush.msra.mxu0 %v2606_v34  ;;  %v1135_v34 = vld [vmem:[%s8220_s29 + $0x1768] sm:$0xff] }
 0x7a8   : > { %v3118_v22 = vld [vmem:[%s8220_s29 + $0x5560] sm:$0xff]  ;;  %6522 = vmatpush.msra.mxu1 %v2878_v39  ;;  %v1407_v39 = vld [vmem:[%s8220_s29 + $0x1fe8] sm:$0xff] }
 0x7a9   : > { %v3390_v20 = vld [vmem:[%s8220_s29 + $0x5de0] sm:$0xff]  ;;  %6543 = vmatpush.msra.mxu2 %v3118_v22  ;;  %v6156_v22 = vadd.f32 %v6155_v37, %v6136_v56  ;;  %v991_v56 = vld [vmem:[%s8220_s29 + $0x12e8] sm:$0xff] }
 0x7aa   : > { %v2590_v41 = vld [vmem:[%s8220_s29 + $0x44e0] sm:$0xff]  ;;  %6562 = vmatpush.msra.mxu3 %v3390_v20  ;;  %v11179_v20 = vld [vmem:[%s8212_s17 + $0x48] sm:$0xff] }
 0x7ab   : > { %v2862_v42 = vld [vmem:[%s8220_s29 + $0x4d60] sm:$0xff]  ;;  %6504 = vmatpush.msra.mxu0 %v2590_v41  ;;  %v11183_v41 = vld [vmem:[%s8212_s17 + $0x58] sm:$0xff]  ;;  %v735_v37 = vld [vmem:[%s8220_s29 + $0xae8] sm:$0xff] }
 0x7ac   : > { %v3102_v44 = vld [vmem:[%s8220_s29 + $0x54e0] sm:$0xff]  ;;  %6523 = vmatpush.msra.mxu1 %v2862_v42  ;;  %v607_v42 = vld [vmem:[%s8220_s29 + $0x6e8] sm:$0xff] }
 0x7ad   : > { %v3374_v48 = vld [vmem:[%s8220_s29 + $0x5d60] sm:$0xff]  ;;  %6544 = vmatpush.msra.mxu2 %v3102_v44  ;;  %v879_v44 = vld [vmem:[%s8220_s29 + $0xf68] sm:$0xff] }
 0x7ae   : > { %v2574_v16 = vld [vmem:[%s8220_s29 + $0x4460] sm:$0xff]  ;;  %6563 = vmatpush.msra.mxu3 %v3374_v48  ;;  %v6175_v48 = vpop.f32.mrf.mxu3 }
 0x7af   : > { %v2846_v30 = vld [vmem:[%s8220_s29 + $0x4ce0] sm:$0xff]  ;;  %6505 = vmatpush.msra.mxu0 %v2574_v16  ;;  %v1119_v16 = vld [vmem:[%s8220_s29 + $0x16e8] sm:$0xff] }
 0x7b0   : > { %v3086_v50 = vld [vmem:[%s8220_s29 + $0x5460] sm:$0xff]  ;;  %6524 = vmatpush.msra.mxu1 %v2846_v30  ;;  %v1391_v30 = vld [vmem:[%s8220_s29 + $0x1f68] sm:$0xff] }
 0x7b1   : > { %v3358_v21 = vld [vmem:[%s8220_s29 + $0x5ce0] sm:$0xff]  ;;  %6545 = vmatpush.msra.mxu2 %v3086_v50  ;;  %v591_v50 = vld [vmem:[%s8220_s29 + $0x668] sm:$0xff] }
 0x7b2   : > { %v2558_v46 = vld [vmem:[%s8220_s29 + $0x43e0] sm:$0xff]  ;;  %6564 = vmatpush.msra.mxu3 %v3358_v21  ;;  %v863_v21 = vld [vmem:[%s8220_s29 + $0xee8] sm:$0xff] }
 0x7b3   : > { %v2830_v47 = vld [vmem:[%s8220_s29 + $0x4c60] sm:$0xff]  ;;  %6506 = vmatpush.msra.mxu0 %v2558_v46  ;;  %v1103_v46 = vld [vmem:[%s8220_s29 + $0x1668] sm:$0xff] }
 0x7b4   : > { %v3070_v45 = vld [vmem:[%s8220_s29 + $0x53e0] sm:$0xff]  ;;  %6525 = vmatpush.msra.mxu1 %v2830_v47  ;;  %v1375_v47 = vld [vmem:[%s8220_s29 + $0x1ee8] sm:$0xff] }
 0x7b5   : > { %v3342_v26 = vld [vmem:[%s8220_s29 + $0x5c60] sm:$0xff]  ;;  %6546 = vmatpush.msra.mxu2 %v3070_v45  ;;  %v6176_v45 = vadd.f32 %v6175_v48, %v6156_v22  ;;  %v719_v22 = vld [vmem:[%s8220_s29 + $0xa68] sm:$0xff] }
 0x7b6   : > { %v2542_v43 = vld [vmem:[%s8220_s29 + $0x4360] sm:$0xff]  ;;  %6565 = vmatpush.msra.mxu3 %v3342_v26  ;;  %v575_v26 = vld [vmem:[%s8220_s29 + $0x5e8] sm:$0xff]  ;;  %v6255_v10 = vpop.f32.mrf.mxu3 }
 0x7b7   : > { %v2814_v27 = vld [vmem:[%s8220_s29 + $0x4be0] sm:$0xff]  ;;  %6507 = vmatpush.msra.mxu0 %v2542_v43  ;;  %v847_v43 = vld [vmem:[%s8220_s29 + $0xe68] sm:$0xff] }
 0x7b8   : > { %v3054_v55 = vld [vmem:[%s8220_s29 + $0x5360] sm:$0xff]  ;;  %6526 = vmatpush.msra.mxu1 %v2814_v27  ;;  %v6195_v27 = vpop.f32.mrf.mxu0  ;;  %v1231_v48 = vld [vmem:[%s8220_s29 + $0x1a68] sm:$0xff] }
 0x7b9   : > { %v3326_v53 = vld [vmem:[%s8220_s29 + $0x5be0] sm:$0xff]  ;;  %6547 = vmatpush.msra.mxu2 %v3054_v55  ;;  %v1087_v55 = vld [vmem:[%s8220_s29 + $0x15e8] sm:$0xff] }
 0x7ba   : > { %v2526_v54 = vld [vmem:[%s8220_s29 + $0x42e0] sm:$0xff]  ;;  %6566 = vmatpush.msra.mxu3 %v3326_v53  ;;  %v1359_v53 = vld [vmem:[%s8220_s29 + $0x1e68] sm:$0xff] }
 0x7bb   : > { %v2798_v52 = vld [vmem:[%s8220_s29 + $0x4b60] sm:$0xff]  ;;  %6508 = vmatpush.msra.mxu0 %v2526_v54  ;;  %v559_v54 = vld [vmem:[%s8220_s29 + $0x568] sm:$0xff] }
 0x7bc   : > { %v3038_v19 = vld [vmem:[%s8220_s29 + $0x52e0] sm:$0xff]  ;;  %6527 = vmatpush.msra.mxu1 %v2798_v52  ;;  %v831_v52 = vld [vmem:[%s8220_s29 + $0xde8] sm:$0xff] }
 0x7bd   : > { %v3310_v51 = vld [vmem:[%s8220_s29 + $0x5b60] sm:$0xff]  ;;  %6548 = vmatpush.msra.mxu2 %v3038_v19  ;;  %v6196_v19 = vadd.f32 %v6195_v27, %v6176_v45  ;;  %v415_v45 = vld [vmem:[%s8220_s29 + $0xe8] sm:$0xff] }
 0x7be   : > { %v2510_v60 = vld [vmem:[%s8220_s29 + $0x4260] sm:$0xff]  ;;  %6567 = vmatpush.msra.mxu3 %v3310_v51  ;;  %v1071_v51 = vld [vmem:[%s8220_s29 + $0x1568] sm:$0xff] }
 0x7bf   : > { %v2782_v49 = vld [vmem:[%s8220_s29 + $0x4ae0] sm:$0xff]  ;;  %6509 = vmatpush.msra.mxu0 %v2510_v60  ;;  %v1343_v60 = vld [vmem:[%s8220_s29 + $0x1de8] sm:$0xff] }
 0x7c0   : > { %v3022_v1 = vld [vmem:[%s8220_s29 + $0x5260] sm:$0xff]  ;;  %6528 = vmatpush.msra.mxu1 %v2782_v49  ;;  %v6215_v49 = vpop.f32.mrf.mxu1  ;;  %v1199_v27 = vld [vmem:[%s8220_s29 + $0x1968] sm:$0xff] }
 0x7c1   : > { %v3294_v2 = vld [vmem:[%s8220_s29 + $0x5ae0] sm:$0xff]  ;;  %6549 = vmatpush.msra.mxu2 %v3022_v1  ;;  %v543_v1 = vld [vmem:[%s8220_s29 + $0x4e8] sm:$0xff] }
 0x7c2   : > { %v2494_v58 = vld [vmem:[%s8220_s29 + $0x41e0] sm:$0xff]  ;;  %6568 = vmatpush.msra.mxu3 %v3294_v2  ;;  %v815_v2 = vld [vmem:[%s8220_s29 + $0xd68] sm:$0xff] }
 0x7c3   : > { %v2766_v59 = vld [vmem:[%s8220_s29 + $0x4a60] sm:$0xff]  ;;  %6510 = vmatpush.msra.mxu0 %v2494_v58  ;;  %v1055_v58 = vld [vmem:[%s8220_s29 + $0x14e8] sm:$0xff] }
 0x7c4   : > { %v3006_v5 = vld [vmem:[%s8220_s29 + $0x51e0] sm:$0xff]  ;;  %6529 = vmatpush.msra.mxu1 %v2766_v59  ;;  %v1327_v59 = vld [vmem:[%s8220_s29 + $0x1d68] sm:$0xff] }
 0x7c5   : > { %v3278_v57 = vld [vmem:[%s8220_s29 + $0x5a60] sm:$0xff]  ;;  %6550 = vmatpush.msra.mxu2 %v3006_v5  ;;  %v527_v5 = vld [vmem:[%s8220_s29 + $0x468] sm:$0xff] }
 0x7c6   : > { %v2478_v4 = vld [vmem:[%s8220_s29 + $0x4160] sm:$0xff]  ;;  %6569 = vmatpush.msra.mxu3 %v3278_v57  ;;  %v799_v57 = vld [vmem:[%s8220_s29 + $0xce8] sm:$0xff] }
 0x7c7   : > { %v2750_v6 = vld [vmem:[%s8220_s29 + $0x49e0] sm:$0xff]  ;;  %6511 = vmatpush.msra.mxu0 %v2478_v4  ;;  %v6216_v4 = vadd.f32 %v6215_v49, %v6196_v19  ;;  %v911_v19 = vld [vmem:[%s8220_s29 + $0x1068] sm:$0xff] }
 0x7c8   : > { %v2990_v7 = vld [vmem:[%s8220_s29 + $0x5160] sm:$0xff]  ;;  %6530 = vmatpush.msra.mxu1 %v2750_v6  ;;  %v1039_v6 = vld [vmem:[%s8220_s29 + $0x1468] sm:$0xff] }
 0x7c9   : > { %v3262_v0 = vld [vmem:[%s8220_s29 + $0x59e0] sm:$0xff]  ;;  %6551 = vmatpush.msra.mxu2 %v2990_v7  ;;  %v1311_v7 = vld [vmem:[%s8220_s29 + $0x1ce8] sm:$0xff] }
 0x7ca   : > { %v2462_v63 = vld [vmem:[%s8220_s29 + $0x40e0] sm:$0xff]  ;;  %6570 = vmatpush.msra.mxu3 %v3262_v0  ;;  %v6235_v0 = vpop.f32.mrf.mxu2  ;;  %v1663_v49 = vld [vmem:[%s8220_s29 + $0x27e8] sm:$0xff] }
 0x7cb   : > { %v2734_v23 = vld [vmem:[%s8220_s29 + $0x4960] sm:$0xff]  ;;  %6512 = vmatpush.msra.mxu0 %v2462_v63  ;;  %v511_v63 = vld [vmem:[%s8220_s29 + $0x3e8] sm:$0xff]  ;;  %v6236_v61 = vadd.f32 %v6235_v0, %v6216_v4 }
 0x7cc   : > { %v2974_v8 = vld [vmem:[%s8220_s29 + $0x50e0] sm:$0xff]  ;;  %6531 = vmatpush.msra.mxu1 %v2734_v23  ;;  %v783_v23 = vld [vmem:[%s8220_s29 + $0xc68] sm:$0xff] }
 0x7cd   : > { %v3246_v28 = vld [vmem:[%s8220_s29 + $0x5960] sm:$0xff]  ;;  %6552 = vmatpush.msra.mxu2 %v2974_v8  ;;  %v1023_v8 = vld [vmem:[%s8220_s29 + $0x13e8] sm:$0xff] }
 0x7ce   : > { %v2446_v29 = vld [vmem:[%s8220_s29 + $0x4060] sm:$0xff]  ;;  %6571 = vmatpush.msra.mxu3 %v3246_v28  ;;  %v1295_v28 = vld [vmem:[%s8220_s29 + $0x1c68] sm:$0xff] }
 0x7cf   : > { %v2718_v32 = vld [vmem:[%s8220_s29 + $0x48e0] sm:$0xff]  ;;  %6513 = vmatpush.msra.mxu0 %v2446_v29  ;;  %v495_v29 = vld [vmem:[%s8220_s29 + $0x368] sm:$0xff] }
 0x7d0   : > { %v2958_v18 = vld [vmem:[%s8220_s29 + $0x5060] sm:$0xff]  ;;  %6532 = vmatpush.msra.mxu1 %v2718_v32  ;;  %v767_v32 = vld [vmem:[%s8220_s29 + $0xbe8] sm:$0xff] }
 0x7d1   : > { %v3230_v35 = vld [vmem:[%s8220_s29 + $0x58e0] sm:$0xff]  ;;  %6553 = vmatpush.msra.mxu2 %v2958_v18  ;;  %6578 = vmatpush.msrb.mxu0 %v639_v11  ;;  %v1007_v18 = vld [vmem:[%s8220_s29 + $0x1368] sm:$0xff] }
 0x7d2   : > { %6572 = vmatpush.msra.mxu3 %v3230_v35  ;;  %v2702_v38 = vld [vmem:[%s8220_s29 + $0x4860] sm:$0xff]  ;;  %6554 = vmatmul.f32.vlgmr.msra.gmra.mxu2 %v11171_v13  ;;  %v1279_v35 = vld [vmem:[%s8220_s29 + $0x1be8] sm:$0xff] }
 0x7d3   : > { %v3214_v15 = vld [vmem:[%s8220_s29 + $0x5860] sm:$0xff]  ;;  %6618 = vmatpush.msrb.mxu2 %v1151_v9  ;;  %6533 = vmatpush.msra.mxu1 %v2702_v38  ;;  %v479_v11 = vld [vmem:[%s8220_s29 + $0x2e8] sm:$0xff] }
 0x7d4   : > { %v11167_v25 = vld [vmem:[%s8212_s17 + $0x40] sm:$0xff]  ;;  %6573 = vmatpush.msra.mxu3 %v3214_v15  ;;  %6534 = vmatmul.f32.vlgmr.msra.gmra.mxu1 %v11179_v20  ;;  %v751_v9 = vld [vmem:[%s8220_s29 + $0xb68] sm:$0xff] }
 0x7d5   : > { %6514 = vmatmul.f32.vlgmr.msra.gmra.mxu0 %v11167_v25  ;;  %6574 = vmatmul.f32.vlgmr.msra.gmra.mxu3 %v11183_v41  ;;  %v1263_v38 = vld [vmem:[%s8220_s29 + $0x1b68] sm:$0xff] }
 0x7d6   : > { %6579 = vmatpush.msrb.mxu0 %v623_v14  ;;  %6598 = vmatpush.msrb.mxu1 %v895_v36  ;;  %v463_v15 = vld [vmem:[%s8220_s29 + $0x268] sm:$0xff]  ;;  %v6256_v14 = vadd.f32 %v6255_v10, %v6236_v61 }
 0x7d7   : > { %6619 = vmatpush.msrb.mxu2 %v1135_v34  ;;  %6638 = vmatpush.msrb.mxu3 %v1407_v39  ;;  %v975_v36 = vld [vmem:[%s8220_s29 + $0x1268] sm:$0xff] }
 0x7d8   : > { %6580 = vmatpush.msrb.mxu0 %v607_v42  ;;  %6599 = vmatpush.msrb.mxu1 %v879_v44  ;;  %v1247_v34 = vld [vmem:[%s8220_s29 + $0x1ae8] sm:$0xff]  ;;  %v6275_v42 = vpop.f32.mrf.mxu0 }
 0x7d9   : > { %6620 = vmatpush.msrb.mxu2 %v1119_v16  ;;  %6639 = vmatpush.msrb.mxu3 %v1391_v30  ;;  %v447_v39 = vld [vmem:[%s8220_s29 + $0x1e8] sm:$0xff]  ;;  %v6276_v16 = vadd.f32 %v6275_v42, %v6256_v14 }
 0x7da   : > { %6581 = vmatpush.msrb.mxu0 %v591_v50  ;;  %6600 = vmatpush.msrb.mxu1 %v863_v21  ;;  %v959_v44 = vld [vmem:[%s8220_s29 + $0x11e8] sm:$0xff] }
 0x7db   : > { %6621 = vmatpush.msrb.mxu2 %v1103_v46  ;;  %6640 = vmatpush.msrb.mxu3 %v1375_v47  ;;  %v431_v30 = vld [vmem:[%s8220_s29 + $0x168] sm:$0xff]  ;;  %v6295_v47 = vpop.f32.mrf.mxu1 }
 0x7dc   : > { %6582 = vmatpush.msrb.mxu0 %v575_v26  ;;  %6601 = vmatpush.msrb.mxu1 %v847_v43  ;;  %v703_v50 = vld [vmem:[%s8220_s29 + $0x9e8] sm:$0xff] }
 0x7dd   : > { %6622 = vmatpush.msrb.mxu2 %v1087_v55  ;;  %6641 = vmatpush.msrb.mxu3 %v1359_v53  ;;  %v943_v21 = vld [vmem:[%s8220_s29 + $0x1168] sm:$0xff]  ;;  %v6296_v55 = vadd.f32 %v6295_v47, %v6276_v16 }
 0x7de   : > { %6583 = vmatpush.msrb.mxu0 %v559_v54  ;;  %6602 = vmatpush.msrb.mxu1 %v831_v52  ;;  %v1215_v46 = vld [vmem:[%s8220_s29 + $0x19e8] sm:$0xff]  ;;  %v6315_v52 = vpop.f32.mrf.mxu2 }
 0x7df   : > { %6623 = vmatpush.msrb.mxu2 %v1071_v51  ;;  %6642 = vmatpush.msrb.mxu3 %v1343_v60  ;;  %v687_v26 = vld [vmem:[%s8220_s29 + $0x968] sm:$0xff]  ;;  %v6316_v60 = vadd.f32 %v6315_v52, %v6296_v55 }
 0x7e0   : > { %6584 = vmatpush.msrb.mxu0 %v543_v1  ;;  %6603 = vmatpush.msrb.mxu1 %v815_v2  ;;  %v927_v43 = vld [vmem:[%s8220_s29 + $0x10e8] sm:$0xff] }
 0x7e1   : > { %6624 = vmatpush.msrb.mxu2 %v1055_v58  ;;  %6643 = vmatpush.msrb.mxu3 %v1327_v59  ;;  %v399_v53 = vld [vmem:[%s8220_s29 + $0x68] sm:$0xff]  ;;  %v369_v59 = vld [vmem:[%s8235_s7 + $0x58] sm:$0xff] }
 0x7e2   : > { %6585 = vmatpush.msrb.mxu0 %v527_v5  ;;  %6604 = vmatpush.msrb.mxu1 %v799_v57  ;;  %v671_v54 = vld [vmem:[%s8220_s29 + $0x8e8] sm:$0xff]  ;;  %v6335_v5 = vpop.f32.mrf.mxu3 }
 0x7e3   : > { %6625 = vmatpush.msrb.mxu2 %v1039_v6  ;;  %6644 = vmatpush.msrb.mxu3 %v1311_v7  ;;  %v1183_v51 = vld [vmem:[%s8220_s29 + $0x18e8] sm:$0xff]  ;;  %v6336_v6 = vadd.f32 %v6335_v5, %v6316_v60 }
 0x7e4   : > { %6586 = vmatpush.msrb.mxu0 %v511_v63  ;;  %6605 = vmatpush.msrb.mxu1 %v783_v23  ;;  %v2175_v1 = vld [vmem:[%s8220_s29 + $0x37e8] sm:$0xff] }
 0x7e5   : > { %6626 = vmatpush.msrb.mxu2 %v1023_v8  ;;  %6645 = vmatpush.msrb.mxu3 %v1295_v28  ;;  %v655_v2 = vld [vmem:[%s8220_s29 + $0x868] sm:$0xff]  ;;  %v7309_v8 = vadd.f32 %v6336_v6, %v369_v59 }
 0x7e6   : > { %6587 = vmatpush.msrb.mxu0 %v495_v29  ;;  %6606 = vmatpush.msrb.mxu1 %v767_v32  ;;  %v1167_v58 = vld [vmem:[%s8220_s29 + $0x1868] sm:$0xff] }
 0x7e7   : > { %6627 = vmatpush.msrb.mxu2 %v1007_v18  ;;  %6646 = vmatpush.msrb.mxu3 %v1279_v35  ;;  %v1647_v57 = vld [vmem:[%s8220_s29 + $0x2768] sm:$0xff]  ;;  %7325 = vst [vmem:[%s8235_s7 + $0x58] sm:$0xff] %v7309_v8 }
 0x7e8   : > { %6588 = vmatpush.msrb.mxu0 %v479_v11  ;;  %6607 = vmatpush.msrb.mxu1 %v751_v9  ;;  %v1919_v4 = vld [vmem:[%s8220_s29 + $0x2fe8] sm:$0xff] }
 0x7e9   : > { %6628 = vmatpush.msrb.mxu2 %v991_v56  ;;  %6647 = vmatpush.msrb.mxu3 %v1263_v38  ;;  %v2159_v7 = vld [vmem:[%s8220_s29 + $0x3768] sm:$0xff] }
 0x7ea   : > { %6589 = vmatpush.msrb.mxu0 %v463_v15  ;;  %6608 = vmatpush.msrb.mxu1 %v735_v37  ;;  %v2431_v0 = vld [vmem:[%s8220_s29 + $0x3fe8] sm:$0xff] }
 0x7eb   : > { %6629 = vmatpush.msrb.mxu2 %v975_v36  ;;  %6648 = vmatpush.msrb.mxu3 %v1247_v34  ;;  %v1631_v63 = vld [vmem:[%s8220_s29 + $0x26e8] sm:$0xff] }
 0x7ec   : > { %6590 = vmatpush.msrb.mxu0 %v447_v39  ;;  %6609 = vmatpush.msrb.mxu1 %v719_v22  ;;  %v1903_v23 = vld [vmem:[%s8220_s29 + $0x2f68] sm:$0xff] }
 0x7ed   : > { %6630 = vmatpush.msrb.mxu2 %v959_v44  ;;  %6649 = vmatpush.msrb.mxu3 %v1231_v48  ;;  %v2143_v28 = vld [vmem:[%s8220_s29 + $0x36e8] sm:$0xff] }
 0x7ee   : > { %6591 = vmatpush.msrb.mxu0 %v431_v30  ;;  %6610 = vmatpush.msrb.mxu1 %v703_v50  ;;  %v2415_v29 = vld [vmem:[%s8220_s29 + $0x3f68] sm:$0xff] }
 0x7ef   : > { %6631 = vmatpush.msrb.mxu2 %v943_v21  ;;  %6650 = vmatpush.msrb.mxu3 %v1215_v46  ;;  %v1615_v32 = vld [vmem:[%s8220_s29 + $0x2668] sm:$0xff] }
 0x7f0   : > { %6592 = vmatpush.msrb.mxu0 %v415_v45  ;;  %6611 = vmatpush.msrb.mxu1 %v687_v26  ;;  %v1887_v61 = vld [vmem:[%s8220_s29 + $0x2ee8] sm:$0xff] }
 0x7f1   : > { %6632 = vmatpush.msrb.mxu2 %v927_v43  ;;  %6651 = vmatpush.msrb.mxu3 %v1199_v27  ;;  %v2127_v18 = vld [vmem:[%s8220_s29 + $0x3668] sm:$0xff] }
 0x7f2   : > { %6593 = vmatpush.msrb.mxu0 %v399_v53  ;;  %6612 = vmatpush.msrb.mxu1 %v671_v54  ;;  %v2399_v35 = vld [vmem:[%s8220_s29 + $0x3ee8] sm:$0xff] }
 0x7f3   : > { %6633 = vmatpush.msrb.mxu2 %v911_v19  ;;  %6652 = vmatpush.msrb.mxu3 %v1183_v51  ;;  %v1599_v10 = vld [vmem:[%s8220_s29 + $0x25e8] sm:$0xff] }
 0x7f4   : > { %6658 = vmatpush.msra.mxu0 %v1663_v49  ;;  %6613 = vmatpush.msrb.mxu1 %v655_v2  ;;  %v1871_v11 = vld [vmem:[%s8220_s29 + $0x2e68] sm:$0xff] }
 0x7f5   : > { %6698 = vmatpush.msra.mxu2 %v2175_v1  ;;  %6653 = vmatpush.msrb.mxu3 %v1167_v58  ;;  %v2111_v9 = vld [vmem:[%s8220_s29 + $0x35e8] sm:$0xff] }
 0x7f6   : > { %6659 = vmatpush.msra.mxu0 %v1647_v57  ;;  %6678 = vmatpush.msra.mxu1 %v1919_v4  ;;  %v2383_v56 = vld [vmem:[%s8220_s29 + $0x3e68] sm:$0xff] }
 0x7f7   : > { %6699 = vmatpush.msra.mxu2 %v2159_v7  ;;  %6718 = vmatpush.msra.mxu3 %v2431_v0  ;;  %v1583_v38 = vld [vmem:[%s8220_s29 + $0x2568] sm:$0xff] }
 0x7f8   : > { %6660 = vmatpush.msra.mxu0 %v1631_v63  ;;  %6679 = vmatpush.msra.mxu1 %v1903_v23  ;;  %v1855_v15 = vld [vmem:[%s8220_s29 + $0x2de8] sm:$0xff] }
 0x7f9   : > { %6700 = vmatpush.msra.mxu2 %v2143_v28  ;;  %6719 = vmatpush.msra.mxu3 %v2415_v29  ;;  %v2095_v37 = vld [vmem:[%s8220_s29 + $0x3568] sm:$0xff] }
 0x7fa   : > { %6661 = vmatpush.msra.mxu0 %v1615_v32  ;;  %6680 = vmatpush.msra.mxu1 %v1887_v61  ;;  %v2367_v14 = vld [vmem:[%s8220_s29 + $0x3de8] sm:$0xff] }
 0x7fb   : > { %6701 = vmatpush.msra.mxu2 %v2127_v18  ;;  %6720 = vmatpush.msra.mxu3 %v2399_v35  ;;  %v1567_v36 = vld [vmem:[%s8220_s29 + $0x24e8] sm:$0xff] }
 0x7fc   : > { %6662 = vmatpush.msra.mxu0 %v1599_v10  ;;  %6681 = vmatpush.msra.mxu1 %v1871_v11  ;;  %v1839_v34 = vld [vmem:[%s8220_s29 + $0x2d68] sm:$0xff] }
 0x7fd   : > { %6702 = vmatpush.msra.mxu2 %v2111_v9  ;;  %6721 = vmatpush.msra.mxu3 %v2383_v56  ;;  %v2079_v39 = vld [vmem:[%s8220_s29 + $0x34e8] sm:$0xff] }
 0x7fe   : > { %6663 = vmatpush.msra.mxu0 %v1583_v38  ;;  %6682 = vmatpush.msra.mxu1 %v1855_v15  ;;  %v2351_v22 = vld [vmem:[%s8220_s29 + $0x3d68] sm:$0xff] }
 0x7ff   : > { %6703 = vmatpush.msra.mxu2 %v2095_v37  ;;  %6722 = vmatpush.msra.mxu3 %v2367_v14  ;;  %v1551_v42 = vld [vmem:[%s8220_s29 + $0x2468] sm:$0xff] }
 0x800   : > { %v1823_v44 = vld [vmem:[%s8220_s29 + $0x2ce8] sm:$0xff]  ;;  %6664 = vmatpush.msra.mxu0 %v1567_v36  ;;  %6683 = vmatpush.msra.mxu1 %v1839_v34 }
 0x801   : > { %v2063_v48 = vld [vmem:[%s8220_s29 + $0x3468] sm:$0xff]  ;;  %6704 = vmatpush.msra.mxu2 %v2079_v39  ;;  %6723 = vmatpush.msra.mxu3 %v2351_v22 }
 0x802   : > { %v2335_v16 = vld [vmem:[%s8220_s29 + $0x3ce8] sm:$0xff]  ;;  %6665 = vmatpush.msra.mxu0 %v1551_v42  ;;  %6684 = vmatpush.msra.mxu1 %v1823_v44 }
 0x803   : > { %v1535_v30 = vld [vmem:[%s8220_s29 + $0x23e8] sm:$0xff]  ;;  %6705 = vmatpush.msra.mxu2 %v2063_v48  ;;  %6724 = vmatpush.msra.mxu3 %v2335_v16 }
 0x804   : > { %v1807_v50 = vld [vmem:[%s8220_s29 + $0x2c68] sm:$0xff]  ;;  %6666 = vmatpush.msra.mxu0 %v1535_v30  ;;  %6634 = vmatmul.f32.vlgmr.msrb.gmra.mxu2 %v11067_v12 }
 0x805   : > { %v2047_v21 = vld [vmem:[%s8220_s29 + $0x33e8] sm:$0xff]  ;;  %6685 = vmatpush.msra.mxu1 %v1807_v50  ;;  %6594 = vmatmul.f32.vlgmr.msrb.gmra.mxu0 %v11074_v17 }
 0x806   : > { %v2319_v46 = vld [vmem:[%s8220_s29 + $0x3c68] sm:$0xff]  ;;  %6706 = vmatpush.msra.mxu2 %v2047_v21  ;;  %6654 = vmatmul.f32.vlgmr.msrb.gmra.mxu3 %v11079_v3 }
 0x807   : > { %v1519_v47 = vld [vmem:[%s8220_s29 + $0x2368] sm:$0xff]  ;;  %6725 = vmatpush.msra.mxu3 %v2319_v46  ;;  %6614 = vmatmul.f32.vlgmr.msrb.gmra.mxu1 %v11087_v62 }
 0x808   : > { %v1791_v45 = vld [vmem:[%s8220_s29 + $0x2be8] sm:$0xff]  ;;  %6667 = vmatpush.msra.mxu0 %v1519_v47 }
 0x809   : > { %v2031_v26 = vld [vmem:[%s8220_s29 + $0x3368] sm:$0xff]  ;;  %6686 = vmatpush.msra.mxu1 %v1791_v45 }
 0x80a   : > { %v2303_v43 = vld [vmem:[%s8220_s29 + $0x3be8] sm:$0xff]  ;;  %6707 = vmatpush.msra.mxu2 %v2031_v26 }
 0x80b   : > { %v1503_v27 = vld [vmem:[%s8220_s29 + $0x22e8] sm:$0xff]  ;;  %6726 = vmatpush.msra.mxu3 %v2303_v43 }
 0x80c   : > { %v1775_v55 = vld [vmem:[%s8220_s29 + $0x2b68] sm:$0xff]  ;;  %6668 = vmatpush.msra.mxu0 %v1503_v27 }
 0x80d   : > { %v2015_v53 = vld [vmem:[%s8220_s29 + $0x32e8] sm:$0xff]  ;;  %6687 = vmatpush.msra.mxu1 %v1775_v55 }
 0x80e   : > { %v2287_v54 = vld [vmem:[%s8220_s29 + $0x3b68] sm:$0xff]  ;;  %6708 = vmatpush.msra.mxu2 %v2015_v53 }
 0x80f   : > { %v1487_v52 = vld [vmem:[%s8220_s29 + $0x2268] sm:$0xff]  ;;  %6727 = vmatpush.msra.mxu3 %v2287_v54 }
 0x810   : > { %v1759_v19 = vld [vmem:[%s8220_s29 + $0x2ae8] sm:$0xff]  ;;  %6669 = vmatpush.msra.mxu0 %v1487_v52 }
 0x811   : > { %v1999_v51 = vld [vmem:[%s8220_s29 + $0x3268] sm:$0xff]  ;;  %6688 = vmatpush.msra.mxu1 %v1759_v19 }
 0x812   : > { %v2271_v60 = vld [vmem:[%s8220_s29 + $0x3ae8] sm:$0xff]  ;;  %6709 = vmatpush.msra.mxu2 %v1999_v51 }
 0x813   : > { %v1471_v49 = vld [vmem:[%s8220_s29 + $0x21e8] sm:$0xff]  ;;  %6728 = vmatpush.msra.mxu3 %v2271_v60 }
 0x814   : > { %v1743_v1 = vld [vmem:[%s8220_s29 + $0x2a68] sm:$0xff]  ;;  %6670 = vmatpush.msra.mxu0 %v1471_v49 }
 0x815   : > { %v1983_v2 = vld [vmem:[%s8220_s29 + $0x31e8] sm:$0xff]  ;;  %6689 = vmatpush.msra.mxu1 %v1743_v1 }
 0x816   : > { %v2255_v58 = vld [vmem:[%s8220_s29 + $0x3a68] sm:$0xff]  ;;  %6710 = vmatpush.msra.mxu2 %v1983_v2 }
 0x817   : > { %v1455_v59 = vld [vmem:[%s8220_s29 + $0x2168] sm:$0xff]  ;;  %6729 = vmatpush.msra.mxu3 %v2255_v58 }
 0x818   : > { %v1727_v5 = vld [vmem:[%s8220_s29 + $0x29e8] sm:$0xff]  ;;  %6671 = vmatpush.msra.mxu0 %v1455_v59 }
 0x819   : > { %v1967_v57 = vld [vmem:[%s8220_s29 + $0x3168] sm:$0xff]  ;;  %6690 = vmatpush.msra.mxu1 %v1727_v5 }
 0x81a   : > { %v2239_v4 = vld [vmem:[%s8220_s29 + $0x39e8] sm:$0xff]  ;;  %6711 = vmatpush.msra.mxu2 %v1967_v57 }
 0x81b   : > { %v1439_v6 = vld [vmem:[%s8220_s29 + $0x20e8] sm:$0xff]  ;;  %6730 = vmatpush.msra.mxu3 %v2239_v4 }
 0x81c   : > { %v1711_v7 = vld [vmem:[%s8220_s29 + $0x2968] sm:$0xff]  ;;  %6672 = vmatpush.msra.mxu0 %v1439_v6 }
 0x81d   : > { %v1951_v0 = vld [vmem:[%s8220_s29 + $0x30e8] sm:$0xff]  ;;  %6691 = vmatpush.msra.mxu1 %v1711_v7 }
 0x81e   : > { %v2223_v63 = vld [vmem:[%s8220_s29 + $0x3968] sm:$0xff]  ;;  %6712 = vmatpush.msra.mxu2 %v1951_v0 }
 0x81f   : > { %v1423_v23 = vld [vmem:[%s8220_s29 + $0x2068] sm:$0xff]  ;;  %6731 = vmatpush.msra.mxu3 %v2223_v63 }
 0x820   : > { %v1695_v8 = vld [vmem:[%s8220_s29 + $0x28e8] sm:$0xff]  ;;  %6673 = vmatpush.msra.mxu0 %v1423_v23 }
 0x821   : > { %v1935_v28 = vld [vmem:[%s8220_s29 + $0x3068] sm:$0xff]  ;;  %6692 = vmatpush.msra.mxu1 %v1695_v8  ;;  %6674 = vmatmul.f32.vlgmr.msra.gmra.mxu0 %v11106_v33 }
 0x822   : > { %v2207_v29 = vld [vmem:[%s8220_s29 + $0x38e8] sm:$0xff]  ;;  %6713 = vmatpush.msra.mxu2 %v1935_v28 }
 0x823   : > { %v2687_v32 = vld [vmem:[%s8220_s29 + $0x47e8] sm:$0xff]  ;;  %6732 = vmatpush.msra.mxu3 %v2207_v29  ;;  %6714 = vmatmul.f32.vlgmr.msra.gmra.mxu2 %v11099_v24 }
 0x824   : > { %v3199_v61 = vld [vmem:[%s8220_s29 + $0x57e8] sm:$0xff]  ;;  %6738 = vmatpush.msrb.mxu0 %v2687_v32 }
 0x825   : > { %v1679_v18 = vld [vmem:[%s8220_s29 + $0x2868] sm:$0xff]  ;;  %6778 = vmatpush.msrb.mxu2 %v3199_v61 }
 0x826   : > { %v2191_v35 = vld [vmem:[%s8220_s29 + $0x3868] sm:$0xff]  ;;  %6693 = vmatpush.msra.mxu1 %v1679_v18  ;;  %v6375_v18 = vpop.f32.mrf.mxu1 }
 0x827   : > { %v2671_v12 = vld [vmem:[%s8220_s29 + $0x4768] sm:$0xff]  ;;  %6733 = vmatpush.msra.mxu3 %v2191_v35  ;;  %6694 = vmatmul.f32.vlgmr.msra.gmra.mxu1 %v11119_v40 }
 0x828   : > { %v2943_v10 = vld [vmem:[%s8220_s29 + $0x4fe8] sm:$0xff]  ;;  %6739 = vmatpush.msrb.mxu0 %v2671_v12  ;;  %6734 = vmatmul.f32.vlgmr.msra.gmra.mxu3 %v11111_v31 }
 0x829   : > { %v3183_v11 = vld [vmem:[%s8220_s29 + $0x5768] sm:$0xff]  ;;  %6758 = vmatpush.msrb.mxu1 %v2943_v10  ;;  %v6355_v10 = vpop.f32.mrf.mxu0 }
 0x82a   : > { %v3455_v9 = vld [vmem:[%s8220_s29 + $0x5fe8] sm:$0xff]  ;;  %6779 = vmatpush.msrb.mxu2 %v3183_v11  ;;  %v640_v11 = vld [vmem:[%s8220_s29 + $0x7f0] sm:$0xff] }
 0x82b   : > { %v2655_v17 = vld [vmem:[%s8220_s29 + $0x46e8] sm:$0xff]  ;;  %6798 = vmatpush.msrb.mxu3 %v3455_v9  ;;  %v1152_v9 = vld [vmem:[%s8220_s29 + $0x17f0] sm:$0xff] }
 0x82c   : > { %v2927_v56 = vld [vmem:[%s8220_s29 + $0x4f68] sm:$0xff]  ;;  %6740 = vmatpush.msrb.mxu0 %v2655_v17  ;;  %v6376_v17 = vadd.f32 %v6375_v18, %v6355_v10  ;;  %v1248_v18 = vld [vmem:[%s8220_s29 + $0x1af0] sm:$0xff] }
 0x82d   : > { %v3167_v3 = vld [vmem:[%s8220_s29 + $0x56e8] sm:$0xff]  ;;  %6759 = vmatpush.msrb.mxu1 %v2927_v56 }
 0x82e   : > { %v3439_v38 = vld [vmem:[%s8220_s29 + $0x5f68] sm:$0xff]  ;;  %6780 = vmatpush.msrb.mxu2 %v3167_v3 }
 0x82f   : > { %v2639_v15 = vld [vmem:[%s8220_s29 + $0x4668] sm:$0xff]  ;;  %6799 = vmatpush.msrb.mxu3 %v3439_v38  ;;  %v6395_v38 = vpop.f32.mrf.mxu2 }
 0x830   : > { %v2911_v37 = vld [vmem:[%s8220_s29 + $0x4ee8] sm:$0xff]  ;;  %6741 = vmatpush.msrb.mxu0 %v2639_v15  ;;  %v624_v15 = vld [vmem:[%s8220_s29 + $0x770] sm:$0xff] }
 0x831   : > { %v3151_v14 = vld [vmem:[%s8220_s29 + $0x5668] sm:$0xff]  ;;  %6760 = vmatpush.msrb.mxu1 %v2911_v37  ;;  %v896_v37 = vld [vmem:[%s8220_s29 + $0xff0] sm:$0xff] }
 0x832   : > { %v3423_v62 = vld [vmem:[%s8220_s29 + $0x5ee8] sm:$0xff]  ;;  %6781 = vmatpush.msrb.mxu2 %v3151_v14  ;;  %v1136_v14 = vld [vmem:[%s8220_s29 + $0x1770] sm:$0xff] }
 0x833   : > { %v2623_v36 = vld [vmem:[%s8220_s29 + $0x45e8] sm:$0xff]  ;;  %6800 = vmatpush.msrb.mxu3 %v3423_v62  ;;  %v1408_v62 = vld [vmem:[%s8220_s29 + $0x1ff0] sm:$0xff] }
 0x834   : > { %v2895_v34 = vld [vmem:[%s8220_s29 + $0x4e68] sm:$0xff]  ;;  %6742 = vmatpush.msrb.mxu0 %v2623_v36  ;;  %v6396_v36 = vadd.f32 %v6395_v38, %v6376_v17  ;;  %v944_v38 = vld [vmem:[%s8220_s29 + $0x1170] sm:$0xff] }
 0x835   : > { %v3135_v39 = vld [vmem:[%s8220_s29 + $0x55e8] sm:$0xff]  ;;  %6761 = vmatpush.msrb.mxu1 %v2895_v34  ;;  %v6415_v34 = vpop.f32.mrf.mxu3 }
 0x836   : > { %v3407_v22 = vld [vmem:[%s8220_s29 + $0x5e68] sm:$0xff]  ;;  %6782 = vmatpush.msrb.mxu2 %v3135_v39  ;;  %v1120_v39 = vld [vmem:[%s8220_s29 + $0x16f0] sm:$0xff] }
 0x837   : > { %v2607_v24 = vld [vmem:[%s8220_s29 + $0x4568] sm:$0xff]  ;;  %6801 = vmatpush.msrb.mxu3 %v3407_v22  ;;  %v1392_v22 = vld [vmem:[%s8220_s29 + $0x1f70] sm:$0xff] }
 0x838   : > { %v2879_v42 = vld [vmem:[%s8220_s29 + $0x4de8] sm:$0xff]  ;;  %6743 = vmatpush.msrb.mxu0 %v2607_v24  ;;  %v592_v24 = vld [vmem:[%s8220_s29 + $0x670] sm:$0xff] }
 0x839   : > { %v3119_v44 = vld [vmem:[%s8220_s29 + $0x5568] sm:$0xff]  ;;  %6762 = vmatpush.msrb.mxu1 %v2879_v42  ;;  %v864_v42 = vld [vmem:[%s8220_s29 + $0xef0] sm:$0xff] }
 0x83a   : > { %v3391_v48 = vld [vmem:[%s8220_s29 + $0x5de8] sm:$0xff]  ;;  %6783 = vmatpush.msrb.mxu2 %v3119_v44  ;;  %v6416_v44 = vadd.f32 %v6415_v34, %v6396_v36  ;;  %v928_v36 = vld [vmem:[%s8220_s29 + $0x10f0] sm:$0xff] }
 0x83b   : > { %v2591_v33 = vld [vmem:[%s8220_s29 + $0x44e8] sm:$0xff]  ;;  %6802 = vmatpush.msrb.mxu3 %v3391_v48  ;;  %v576_v48 = vld [vmem:[%s8220_s29 + $0x5f0] sm:$0xff] }
 0x83c   : > { %v2863_v16 = vld [vmem:[%s8220_s29 + $0x4d68] sm:$0xff]  ;;  %6744 = vmatpush.msrb.mxu0 %v2591_v33  ;;  %v848_v33 = vld [vmem:[%s8220_s29 + $0xe70] sm:$0xff] }
 0x83d   : > { %v3103_v31 = vld [vmem:[%s8220_s29 + $0x54e8] sm:$0xff]  ;;  %6763 = vmatpush.msrb.mxu1 %v2863_v16  ;;  %v6435_v16 = vpop.f32.mrf.mxu0  ;;  %v400_v34 = vld [vmem:[%s8220_s29 + $0x70] sm:$0xff] }
 0x83e   : > { %v3375_v30 = vld [vmem:[%s8220_s29 + $0x5d68] sm:$0xff]  ;;  %6784 = vmatpush.msrb.mxu2 %v3103_v31  ;;  %v1088_v31 = vld [vmem:[%s8220_s29 + $0x15f0] sm:$0xff] }
 0x83f   : > { %v2575_v50 = vld [vmem:[%s8220_s29 + $0x4468] sm:$0xff]  ;;  %6803 = vmatpush.msrb.mxu3 %v3375_v30  ;;  %v1360_v30 = vld [vmem:[%s8220_s29 + $0x1e70] sm:$0xff] }
 0x840   : > { %v2847_v21 = vld [vmem:[%s8220_s29 + $0x4ce8] sm:$0xff]  ;;  %6745 = vmatpush.msrb.mxu0 %v2575_v50  ;;  %v560_v50 = vld [vmem:[%s8220_s29 + $0x570] sm:$0xff] }
 0x841   : > { %v3087_v46 = vld [vmem:[%s8220_s29 + $0x5468] sm:$0xff]  ;;  %6764 = vmatpush.msrb.mxu1 %v2847_v21  ;;  %v832_v21 = vld [vmem:[%s8220_s29 + $0xdf0] sm:$0xff] }
 0x842   : > { %v3359_v40 = vld [vmem:[%s8220_s29 + $0x5ce8] sm:$0xff]  ;;  %6785 = vmatpush.msrb.mxu2 %v3087_v46  ;;  %v6436_v46 = vadd.f32 %v6435_v16, %v6416_v44  ;;  %v2176_v44 = vld [vmem:[%s8220_s29 + $0x37f0] sm:$0xff]  ;;  %v370_v16 = vld [vmem:[%s8235_s7 + $0x60] sm:$0xff] }
 0x843   : > { %v2559_v47 = vld [vmem:[%s8220_s29 + $0x43e8] sm:$0xff]  ;;  %6804 = vmatpush.msrb.mxu3 %v3359_v40  ;;  %v1072_v40 = vld [vmem:[%s8220_s29 + $0x1570] sm:$0xff] }
 0x844   : > { %v2831_v45 = vld [vmem:[%s8220_s29 + $0x4c68] sm:$0xff]  ;;  %6746 = vmatpush.msrb.mxu0 %v2559_v47  ;;  %v1344_v47 = vld [vmem:[%s8220_s29 + $0x1df0] sm:$0xff] }
 0x845   : > { %v3071_v26 = vld [vmem:[%s8220_s29 + $0x53e8] sm:$0xff]  ;;  %6765 = vmatpush.msrb.mxu1 %v2831_v45  ;;  %v6455_v45 = vpop.f32.mrf.mxu1 }
 0x846   : > { %v3343_v43 = vld [vmem:[%s8220_s29 + $0x5c68] sm:$0xff]  ;;  %6786 = vmatpush.msrb.mxu2 %v3071_v26  ;;  %v544_v26 = vld [vmem:[%s8220_s29 + $0x4f0] sm:$0xff] }
 0x847   : > { %v2543_v27 = vld [vmem:[%s8220_s29 + $0x4368] sm:$0xff]  ;;  %6805 = vmatpush.msrb.mxu3 %v3343_v43  ;;  %v816_v43 = vld [vmem:[%s8220_s29 + $0xd70] sm:$0xff] }
 0x848   : > { %v2815_v55 = vld [vmem:[%s8220_s29 + $0x4be8] sm:$0xff]  ;;  %6747 = vmatpush.msrb.mxu0 %v2543_v27  ;;  %v1056_v27 = vld [vmem:[%s8220_s29 + $0x14f0] sm:$0xff] }
 0x849   : > { %v3055_v53 = vld [vmem:[%s8220_s29 + $0x5368] sm:$0xff]  ;;  %6766 = vmatpush.msrb.mxu1 %v2815_v55  ;;  %v1328_v55 = vld [vmem:[%s8220_s29 + $0x1d70] sm:$0xff] }
 0x84a   : > { %v3327_v54 = vld [vmem:[%s8220_s29 + $0x5be8] sm:$0xff]  ;;  %6787 = vmatpush.msrb.mxu2 %v3055_v53  ;;  %v528_v53 = vld [vmem:[%s8220_s29 + $0x470] sm:$0xff] }
 0x84b   : > { %v2527_v52 = vld [vmem:[%s8220_s29 + $0x42e8] sm:$0xff]  ;;  %6806 = vmatpush.msrb.mxu3 %v3327_v54  ;;  %v800_v54 = vld [vmem:[%s8220_s29 + $0xcf0] sm:$0xff] }
 0x84c   : > { %v2799_v19 = vld [vmem:[%s8220_s29 + $0x4b68] sm:$0xff]  ;;  %6748 = vmatpush.msrb.mxu0 %v2527_v52  ;;  %v6456_v52 = vadd.f32 %v6455_v45, %v6436_v46  ;;  %v2160_v46 = vld [vmem:[%s8220_s29 + $0x3770] sm:$0xff] }
 0x84d   : > { %v3039_v51 = vld [vmem:[%s8220_s29 + $0x52e8] sm:$0xff]  ;;  %6767 = vmatpush.msrb.mxu1 %v2799_v19  ;;  %v1040_v19 = vld [vmem:[%s8220_s29 + $0x1470] sm:$0xff] }
 0x84e   : > { %v3311_v60 = vld [vmem:[%s8220_s29 + $0x5b68] sm:$0xff]  ;;  %6788 = vmatpush.msrb.mxu2 %v3039_v51  ;;  %v1312_v51 = vld [vmem:[%s8220_s29 + $0x1cf0] sm:$0xff] }
 0x84f   : > { %v2511_v49 = vld [vmem:[%s8220_s29 + $0x4268] sm:$0xff]  ;;  %6807 = vmatpush.msrb.mxu3 %v3311_v60  ;;  %v6475_v60 = vpop.f32.mrf.mxu2  ;;  %v1904_v45 = vld [vmem:[%s8220_s29 + $0x2f70] sm:$0xff] }
 0x850   : > { %v2783_v1 = vld [vmem:[%s8220_s29 + $0x4ae8] sm:$0xff]  ;;  %6749 = vmatpush.msrb.mxu0 %v2511_v49  ;;  %v512_v49 = vld [vmem:[%s8220_s29 + $0x3f0] sm:$0xff] }
 0x851   : > { %v3023_v2 = vld [vmem:[%s8220_s29 + $0x5268] sm:$0xff]  ;;  %6768 = vmatpush.msrb.mxu1 %v2783_v1  ;;  %v784_v1 = vld [vmem:[%s8220_s29 + $0xc70] sm:$0xff] }
 0x852   : > { %v3295_v58 = vld [vmem:[%s8220_s29 + $0x5ae8] sm:$0xff]  ;;  %6789 = vmatpush.msrb.mxu2 %v3023_v2  ;;  %v1024_v2 = vld [vmem:[%s8220_s29 + $0x13f0] sm:$0xff]  ;;  %v6515_v10 = vpop.f32.mrf.mxu0 }
 0x853   : > { %v2495_v59 = vld [vmem:[%s8220_s29 + $0x41e8] sm:$0xff]  ;;  %6808 = vmatpush.msrb.mxu3 %v3295_v58  ;;  %v1296_v58 = vld [vmem:[%s8220_s29 + $0x1c70] sm:$0xff] }
 0x854   : > { %v2767_v5 = vld [vmem:[%s8220_s29 + $0x4a68] sm:$0xff]  ;;  %6750 = vmatpush.msrb.mxu0 %v2495_v59  ;;  %v496_v59 = vld [vmem:[%s8220_s29 + $0x370] sm:$0xff] }
 0x855   : > { %v3007_v57 = vld [vmem:[%s8220_s29 + $0x51e8] sm:$0xff]  ;;  %6769 = vmatpush.msrb.mxu1 %v2767_v5  ;;  %v768_v5 = vld [vmem:[%s8220_s29 + $0xbf0] sm:$0xff] }
 0x856   : > { %v3279_v4 = vld [vmem:[%s8220_s29 + $0x5a68] sm:$0xff]  ;;  %6790 = vmatpush.msrb.mxu2 %v3007_v57  ;;  %v6476_v57 = vadd.f32 %v6475_v60, %v6456_v52  ;;  %v2400_v52 = vld [vmem:[%s8220_s29 + $0x3ef0] sm:$0xff] }
 0x857   : > { %v2479_v6 = vld [vmem:[%s8220_s29 + $0x4168] sm:$0xff]  ;;  %6809 = vmatpush.msrb.mxu3 %v3279_v4  ;;  %v1008_v4 = vld [vmem:[%s8220_s29 + $0x1370] sm:$0xff] }
 0x858   : > { %v2751_v7 = vld [vmem:[%s8220_s29 + $0x49e8] sm:$0xff]  ;;  %6751 = vmatpush.msrb.mxu0 %v2479_v6  ;;  %v1280_v6 = vld [vmem:[%s8220_s29 + $0x1bf0] sm:$0xff] }
 0x859   : > { %v2991_v0 = vld [vmem:[%s8220_s29 + $0x5168] sm:$0xff]  ;;  %6770 = vmatpush.msrb.mxu1 %v2751_v7  ;;  %v6495_v7 = vpop.f32.mrf.mxu3  ;;  %v2112_v60 = vld [vmem:[%s8220_s29 + $0x35f0] sm:$0xff] }
 0x85a   : > { %v3263_v63 = vld [vmem:[%s8220_s29 + $0x59e8] sm:$0xff]  ;;  %6791 = vmatpush.msrb.mxu2 %v2991_v0  ;;  %v480_v0 = vld [vmem:[%s8220_s29 + $0x2f0] sm:$0xff] }
 0x85b   : > { %v2463_v23 = vld [vmem:[%s8220_s29 + $0x40e8] sm:$0xff]  ;;  %6810 = vmatpush.msrb.mxu3 %v3263_v63  ;;  %v752_v63 = vld [vmem:[%s8220_s29 + $0xb70] sm:$0xff] }
 0x85c   : > { %v2735_v8 = vld [vmem:[%s8220_s29 + $0x4968] sm:$0xff]  ;;  %6752 = vmatpush.msrb.mxu0 %v2463_v23  ;;  %v992_v23 = vld [vmem:[%s8220_s29 + $0x12f0] sm:$0xff] }
 0x85d   : > { %v2975_v28 = vld [vmem:[%s8220_s29 + $0x50e8] sm:$0xff]  ;;  %6771 = vmatpush.msrb.mxu1 %v2735_v8  ;;  %v1264_v8 = vld [vmem:[%s8220_s29 + $0x1b70] sm:$0xff] }
 0x85e   : > { %v3247_v29 = vld [vmem:[%s8220_s29 + $0x5968] sm:$0xff]  ;;  %6792 = vmatpush.msrb.mxu2 %v2975_v28  ;;  %v464_v28 = vld [vmem:[%s8220_s29 + $0x270] sm:$0xff] }
 0x85f   : > { %v2447_v32 = vld [vmem:[%s8220_s29 + $0x4068] sm:$0xff]  ;;  %6811 = vmatpush.msrb.mxu3 %v3247_v29  ;;  %v736_v29 = vld [vmem:[%s8220_s29 + $0xaf0] sm:$0xff] }
 0x860   : > { %v2719_v61 = vld [vmem:[%s8220_s29 + $0x48e8] sm:$0xff]  ;;  %6753 = vmatpush.msrb.mxu0 %v2447_v32  ;;  %v6496_v32 = vadd.f32 %v6495_v7, %v6476_v57  ;;  %v1840_v57 = vld [vmem:[%s8220_s29 + $0x2d70] sm:$0xff] }
 0x861   : > { %v2959_v35 = vld [vmem:[%s8220_s29 + $0x5068] sm:$0xff]  ;;  %6772 = vmatpush.msrb.mxu1 %v2719_v61  ;;  %6754 = vmatmul.f32.vlgmr.msrb.gmra.mxu0 %v11167_v25  ;;  %v608_v25 = vld [vmem:[%s8220_s29 + $0x6f0] sm:$0xff] }
 0x862   : > { %v3231_v12 = vld [vmem:[%s8220_s29 + $0x58e8] sm:$0xff]  ;;  %6793 = vmatpush.msrb.mxu2 %v2959_v35  ;;  %6818 = vmatpush.msra.mxu0 %v640_v11  ;;  %v976_v61 = vld [vmem:[%s8220_s29 + $0x1270] sm:$0xff]  ;;  %v6516_v17 = vadd.f32 %v6515_v10, %v6496_v32 }
 0x863   : > { %6812 = vmatpush.msrb.mxu3 %v3231_v12  ;;  %v2703_v56 = vld [vmem:[%s8220_s29 + $0x4868] sm:$0xff]  ;;  %6794 = vmatmul.f32.vlgmr.msrb.gmra.mxu2 %v11171_v13  ;;  %v880_v13 = vld [vmem:[%s8220_s29 + $0xf70] sm:$0xff] }
 0x864   : > { %v3215_v3 = vld [vmem:[%s8220_s29 + $0x5868] sm:$0xff]  ;;  %6858 = vmatpush.msra.mxu2 %v1152_v9  ;;  %6773 = vmatpush.msrb.mxu1 %v2703_v56  ;;  %v448_v35 = vld [vmem:[%s8220_s29 + $0x1f0] sm:$0xff] }
 0x865   : > { %6813 = vmatpush.msrb.mxu3 %v3215_v3  ;;  %6774 = vmatmul.f32.vlgmr.msrb.gmra.mxu1 %v11179_v20  ;;  %v1104_v20 = vld [vmem:[%s8220_s29 + $0x1670] sm:$0xff] }
 0x866   : > { %6814 = vmatmul.f32.vlgmr.msrb.gmra.mxu3 %v11183_v41  ;;  %6819 = vmatpush.msra.mxu0 %v624_v15  ;;  %v1376_v41 = vld [vmem:[%s8220_s29 + $0x1ef0] sm:$0xff] }
 0x867   : > { %6838 = vmatpush.msra.mxu1 %v896_v37  ;;  %6859 = vmatpush.msra.mxu2 %v1136_v14  ;;  %v720_v12 = vld [vmem:[%s8220_s29 + $0xa70] sm:$0xff]  ;;  %v6535_v37 = vpop.f32.mrf.mxu1 }
 0x868   : > { %6878 = vmatpush.msra.mxu3 %v1408_v62  ;;  %6820 = vmatpush.msra.mxu0 %v608_v25  ;;  %v960_v11 = vld [vmem:[%s8220_s29 + $0x11f0] sm:$0xff] }
 0x869   : > { %6839 = vmatpush.msra.mxu1 %v880_v13  ;;  %6860 = vmatpush.msra.mxu2 %v1120_v39  ;;  %v1232_v9 = vld [vmem:[%s8220_s29 + $0x1a70] sm:$0xff]  ;;  %v6536_v13 = vadd.f32 %v6535_v37, %v6516_v17 }
 0x86a   : > { %6879 = vmatpush.msra.mxu3 %v1392_v22  ;;  %6821 = vmatpush.msra.mxu0 %v592_v24  ;;  %v432_v56 = vld [vmem:[%s8220_s29 + $0x170] sm:$0xff]  ;;  %v6555_v22 = vpop.f32.mrf.mxu2 }
 0x86b   : > { %6840 = vmatpush.msra.mxu1 %v864_v42  ;;  %6861 = vmatpush.msra.mxu2 %v1104_v20  ;;  %v704_v3 = vld [vmem:[%s8220_s29 + $0x9f0] sm:$0xff]  ;;  %v6556_v20 = vadd.f32 %v6555_v22, %v6536_v13 }
 0x86c   : > { %6880 = vmatpush.msra.mxu3 %v1376_v41  ;;  %6822 = vmatpush.msra.mxu0 %v576_v48  ;;  %v1216_v15 = vld [vmem:[%s8220_s29 + $0x19f0] sm:$0xff] }
 0x86d   : > { %6841 = vmatpush.msra.mxu1 %v848_v33  ;;  %6862 = vmatpush.msra.mxu2 %v1088_v31  ;;  %v416_v14 = vld [vmem:[%s8220_s29 + $0xf0] sm:$0xff]  ;;  %v6575_v31 = vpop.f32.mrf.mxu3 }
 0x86e   : > { %6881 = vmatpush.msra.mxu3 %v1360_v30  ;;  %6823 = vmatpush.msra.mxu0 %v560_v50  ;;  %v688_v62 = vld [vmem:[%s8220_s29 + $0x970] sm:$0xff] }
 0x86f   : > { %6842 = vmatpush.msra.mxu1 %v832_v21  ;;  %6863 = vmatpush.msra.mxu2 %v1072_v40  ;;  %v1200_v25 = vld [vmem:[%s8220_s29 + $0x1970] sm:$0xff]  ;;  %v6576_v21 = vadd.f32 %v6575_v31, %v6556_v20 }
 0x870   : > { %6882 = vmatpush.msra.mxu3 %v1344_v47  ;;  %6824 = vmatpush.msra.mxu0 %v544_v26  ;;  %v672_v39 = vld [vmem:[%s8220_s29 + $0x8f0] sm:$0xff] }
 0x871   : > { %6843 = vmatpush.msra.mxu1 %v816_v43  ;;  %6864 = vmatpush.msra.mxu2 %v1056_v27  ;;  %v912_v24 = vld [vmem:[%s8220_s29 + $0x1070] sm:$0xff]  ;;  %v7310_v26 = vadd.f32 %v6576_v21, %v370_v16  ;;  %v11522_v21 = vld [vmem:[%s8212_s17] sm:$0xff] }
 0x872   : > { %6883 = vmatpush.msra.mxu3 %v1328_v55  ;;  %6825 = vmatpush.msra.mxu0 %v528_v53  ;;  %v1184_v42 = vld [vmem:[%s8220_s29 + $0x18f0] sm:$0xff] }
 0x873   : > { %6844 = vmatpush.msra.mxu1 %v800_v54  ;;  %6865 = vmatpush.msra.mxu2 %v1040_v19  ;;  %v1664_v41 = vld [vmem:[%s8220_s29 + $0x27f0] sm:$0xff]  ;;  %7326 = vst [vmem:[%s8235_s7 + $0x60] sm:$0xff] %v7310_v26 }
 0x874   : > { %6884 = vmatpush.msra.mxu3 %v1312_v51  ;;  %6826 = vmatpush.msra.mxu0 %v512_v49  ;;  %v656_v48 = vld [vmem:[%s8220_s29 + $0x870] sm:$0xff] }
 0x875   : > { %6845 = vmatpush.msra.mxu1 %v784_v1  ;;  %6866 = vmatpush.msra.mxu2 %v1024_v2  ;;  %v1168_v33 = vld [vmem:[%s8220_s29 + $0x1870] sm:$0xff] }
 0x876   : > { %6885 = vmatpush.msra.mxu3 %v1296_v58  ;;  %6827 = vmatpush.msra.mxu0 %v496_v59  ;;  %v1648_v30 = vld [vmem:[%s8220_s29 + $0x2770] sm:$0xff] }
 0x877   : > { %6846 = vmatpush.msra.mxu1 %v768_v5  ;;  %6867 = vmatpush.msra.mxu2 %v1008_v4  ;;  %v1920_v50 = vld [vmem:[%s8220_s29 + $0x2ff0] sm:$0xff] }
 0x878   : > { %6886 = vmatpush.msra.mxu3 %v1280_v6  ;;  %6828 = vmatpush.msra.mxu0 %v480_v0  ;;  %v2432_v40 = vld [vmem:[%s8220_s29 + $0x3ff0] sm:$0xff] }
 0x879   : > { %6847 = vmatpush.msra.mxu1 %v752_v63  ;;  %6868 = vmatpush.msra.mxu2 %v992_v23  ;;  %v1632_v47 = vld [vmem:[%s8220_s29 + $0x26f0] sm:$0xff] }
 0x87a   : > { %6887 = vmatpush.msra.mxu3 %v1264_v8  ;;  %6829 = vmatpush.msra.mxu0 %v464_v28  ;;  %v2144_v43 = vld [vmem:[%s8220_s29 + $0x36f0] sm:$0xff] }
 0x87b   : > { %6848 = vmatpush.msra.mxu1 %v736_v29  ;;  %6869 = vmatpush.msra.mxu2 %v976_v61  ;;  %v2416_v27 = vld [vmem:[%s8220_s29 + $0x3f70] sm:$0xff] }
 0x87c   : > { %6888 = vmatpush.msra.mxu3 %v1248_v18  ;;  %6830 = vmatpush.msra.mxu0 %v448_v35  ;;  %v1616_v55 = vld [vmem:[%s8220_s29 + $0x2670] sm:$0xff] }
 0x87d   : > { %6849 = vmatpush.msra.mxu1 %v720_v12  ;;  %6870 = vmatpush.msra.mxu2 %v960_v11  ;;  %v1888_v53 = vld [vmem:[%s8220_s29 + $0x2ef0] sm:$0xff] }
 0x87e   : > { %6889 = vmatpush.msra.mxu3 %v1232_v9  ;;  %6831 = vmatpush.msra.mxu0 %v432_v56  ;;  %v2128_v54 = vld [vmem:[%s8220_s29 + $0x3670] sm:$0xff] }
 0x87f   : > { %6850 = vmatpush.msra.mxu1 %v704_v3  ;;  %6871 = vmatpush.msra.mxu2 %v944_v38  ;;  %v1600_v19 = vld [vmem:[%s8220_s29 + $0x25f0] sm:$0xff] }
 0x880   : > { %6890 = vmatpush.msra.mxu3 %v1216_v15  ;;  %6832 = vmatpush.msra.mxu0 %v416_v14  ;;  %v1872_v51 = vld [vmem:[%s8220_s29 + $0x2e70] sm:$0xff] }
 0x881   : > { %6851 = vmatpush.msra.mxu1 %v688_v62  ;;  %6872 = vmatpush.msra.mxu2 %v928_v36  ;;  %v2384_v49 = vld [vmem:[%s8220_s29 + $0x3e70] sm:$0xff] }
 0x882   : > { %6891 = vmatpush.msra.mxu3 %v1200_v25  ;;  %6833 = vmatpush.msra.mxu0 %v400_v34  ;;  %v1584_v1 = vld [vmem:[%s8220_s29 + $0x2570] sm:$0xff] }
 0x883   : > { %6852 = vmatpush.msra.mxu1 %v672_v39  ;;  %6873 = vmatpush.msra.mxu2 %v912_v24  ;;  %v1856_v2 = vld [vmem:[%s8220_s29 + $0x2df0] sm:$0xff] }
 0x884   : > { %6892 = vmatpush.msra.mxu3 %v1184_v42  ;;  %6898 = vmatpush.msrb.mxu0 %v1664_v41  ;;  %v2096_v58 = vld [vmem:[%s8220_s29 + $0x3570] sm:$0xff] }
 0x885   : > { %6938 = vmatpush.msrb.mxu2 %v2176_v44  ;;  %6853 = vmatpush.msra.mxu1 %v656_v48  ;;  %v2368_v59 = vld [vmem:[%s8220_s29 + $0x3df0] sm:$0xff] }
 0x886   : > { %6893 = vmatpush.msra.mxu3 %v1168_v33  ;;  %6899 = vmatpush.msrb.mxu0 %v1648_v30  ;;  %v1568_v5 = vld [vmem:[%s8220_s29 + $0x24f0] sm:$0xff] }
 0x887   : > { %6918 = vmatpush.msrb.mxu1 %v1920_v50  ;;  %6939 = vmatpush.msrb.mxu2 %v2160_v46  ;;  %v2080_v4 = vld [vmem:[%s8220_s29 + $0x34f0] sm:$0xff] }
 0x888   : > { %6958 = vmatpush.msrb.mxu3 %v2432_v40  ;;  %6900 = vmatpush.msrb.mxu0 %v1632_v47  ;;  %v2352_v6 = vld [vmem:[%s8220_s29 + $0x3d70] sm:$0xff]  ;;  %v11527_v40 = vld [vmem:[%s8212_s17 + $0x18] sm:$0xff] }
 0x889   : > { %6919 = vmatpush.msrb.mxu1 %v1904_v45  ;;  %6940 = vmatpush.msrb.mxu2 %v2144_v43  ;;  %v1552_v7 = vld [vmem:[%s8220_s29 + $0x2470] sm:$0xff] }
 0x88a   : > { %6959 = vmatpush.msrb.mxu3 %v2416_v27  ;;  %6901 = vmatpush.msrb.mxu0 %v1616_v55  ;;  %v1824_v0 = vld [vmem:[%s8220_s29 + $0x2cf0] sm:$0xff]  ;;  %v11535_v27 = vld [vmem:[%s8212_s17 + $0x8] sm:$0xff] }
 0x88b   : > { %6920 = vmatpush.msrb.mxu1 %v1888_v53  ;;  %6941 = vmatpush.msrb.mxu2 %v2128_v54  ;;  %v2064_v63 = vld [vmem:[%s8220_s29 + $0x3470] sm:$0xff] }
 0x88c   : > { %6960 = vmatpush.msrb.mxu3 %v2400_v52  ;;  %6902 = vmatpush.msrb.mxu0 %v1600_v19  ;;  %v2336_v23 = vld [vmem:[%s8220_s29 + $0x3cf0] sm:$0xff] }
 0x88d   : > { %6921 = vmatpush.msrb.mxu1 %v1872_v51  ;;  %6942 = vmatpush.msrb.mxu2 %v2112_v60  ;;  %v1536_v8 = vld [vmem:[%s8220_s29 + $0x23f0] sm:$0xff] }
 0x88e   : > { %6961 = vmatpush.msrb.mxu3 %v2384_v49  ;;  %6903 = vmatpush.msrb.mxu0 %v1584_v1  ;;  %v1808_v28 = vld [vmem:[%s8220_s29 + $0x2c70] sm:$0xff] }
 0x88f   : > { %6922 = vmatpush.msrb.mxu1 %v1856_v2  ;;  %6943 = vmatpush.msrb.mxu2 %v2096_v58  ;;  %v2048_v29 = vld [vmem:[%s8220_s29 + $0x33f0] sm:$0xff] }
 0x890   : > { %6962 = vmatpush.msrb.mxu3 %v2368_v59  ;;  %6904 = vmatpush.msrb.mxu0 %v1568_v5  ;;  %v2320_v32 = vld [vmem:[%s8220_s29 + $0x3c70] sm:$0xff]  ;;  %v11554_v5 = vld [vmem:[%s8212_s17 + $0x20] sm:$0xff] }
 0x891   : > { %6923 = vmatpush.msrb.mxu1 %v1840_v57  ;;  %6944 = vmatpush.msrb.mxu2 %v2080_v4  ;;  %v1520_v61 = vld [vmem:[%s8220_s29 + $0x2370] sm:$0xff]  ;;  %v11559_v4 = vld [vmem:[%s8212_s17 + $0x38] sm:$0xff] }
 0x892   : > { %6963 = vmatpush.msrb.mxu3 %v2352_v6  ;;  %6905 = vmatpush.msrb.mxu0 %v1552_v7  ;;  %v1792_v18 = vld [vmem:[%s8220_s29 + $0x2bf0] sm:$0xff] }
 0x893   : > { %6924 = vmatpush.msrb.mxu1 %v1824_v0  ;;  %6945 = vmatpush.msrb.mxu2 %v2064_v63  ;;  %v2032_v35 = vld [vmem:[%s8220_s29 + $0x3370] sm:$0xff] }
 0x894   : > { %6964 = vmatpush.msrb.mxu3 %v2336_v23  ;;  %6906 = vmatpush.msrb.mxu0 %v1536_v8  ;;  %v2304_v12 = vld [vmem:[%s8220_s29 + $0x3bf0] sm:$0xff]  ;;  %v11567_v23 = vld [vmem:[%s8212_s17 + $0x28] sm:$0xff] }
 0x895   : > { %6925 = vmatpush.msrb.mxu1 %v1808_v28  ;;  %6946 = vmatpush.msrb.mxu2 %v2048_v29  ;;  %v1504_v10 = vld [vmem:[%s8220_s29 + $0x22f0] sm:$0xff] }
 0x896   : > { %6965 = vmatpush.msrb.mxu3 %v2320_v32  ;;  %v1776_v11 = vld [vmem:[%s8220_s29 + $0x2b70] sm:$0xff]  ;;  %6907 = vmatpush.msrb.mxu0 %v1520_v61 }
 0x897   : > { %6926 = vmatpush.msrb.mxu1 %v1792_v18  ;;  %v2016_v9 = vld [vmem:[%s8220_s29 + $0x32f0] sm:$0xff]  ;;  %6947 = vmatpush.msrb.mxu2 %v2032_v35 }
 0x898   : > { %v2288_v17 = vld [vmem:[%s8220_s29 + $0x3b70] sm:$0xff]  ;;  %6966 = vmatpush.msrb.mxu3 %v2304_v12  ;;  %6908 = vmatpush.msrb.mxu0 %v1504_v10 }
 0x899   : > { %v1488_v56 = vld [vmem:[%s8220_s29 + $0x2270] sm:$0xff]  ;;  %6927 = vmatpush.msrb.mxu1 %v1776_v11  ;;  %6948 = vmatpush.msrb.mxu2 %v2016_v9 }
 0x89a   : > { %v1760_v3 = vld [vmem:[%s8220_s29 + $0x2af0] sm:$0xff]  ;;  %6967 = vmatpush.msrb.mxu3 %v2288_v17  ;;  %6909 = vmatpush.msrb.mxu0 %v1488_v56 }
 0x89b   : > { %v2000_v38 = vld [vmem:[%s8220_s29 + $0x3270] sm:$0xff]  ;;  %6928 = vmatpush.msrb.mxu1 %v1760_v3  ;;  %6834 = vmatmul.f32.vlgmr.msra.gmra.mxu0 %v11522_v21 }
 0x89c   : > { %v2272_v15 = vld [vmem:[%s8220_s29 + $0x3af0] sm:$0xff]  ;;  %6949 = vmatpush.msrb.mxu2 %v2000_v38  ;;  %6894 = vmatmul.f32.vlgmr.msra.gmra.mxu3 %v11527_v40 }
 0x89d   : > { %v1472_v37 = vld [vmem:[%s8220_s29 + $0x21f0] sm:$0xff]  ;;  %6968 = vmatpush.msrb.mxu3 %v2272_v15  ;;  %6854 = vmatmul.f32.vlgmr.msra.gmra.mxu1 %v11535_v27 }
 0x89e   : > { %v1744_v14 = vld [vmem:[%s8220_s29 + $0x2a70] sm:$0xff]  ;;  %6910 = vmatpush.msrb.mxu0 %v1472_v37 }
 0x89f   : > { %v1984_v62 = vld [vmem:[%s8220_s29 + $0x31f0] sm:$0xff]  ;;  %6929 = vmatpush.msrb.mxu1 %v1744_v14 }
 0x8a0   : > { %v2256_v36 = vld [vmem:[%s8220_s29 + $0x3a70] sm:$0xff]  ;;  %6950 = vmatpush.msrb.mxu2 %v1984_v62 }
 0x8a1   : > { %v1456_v25 = vld [vmem:[%s8220_s29 + $0x2170] sm:$0xff]  ;;  %6969 = vmatpush.msrb.mxu3 %v2256_v36 }
 0x8a2   : > { %v1728_v13 = vld [vmem:[%s8220_s29 + $0x29f0] sm:$0xff]  ;;  %6911 = vmatpush.msrb.mxu0 %v1456_v25 }
 0x8a3   : > { %v1968_v34 = vld [vmem:[%s8220_s29 + $0x3170] sm:$0xff]  ;;  %6930 = vmatpush.msrb.mxu1 %v1728_v13 }
 0x8a4   : > { %v2240_v39 = vld [vmem:[%s8220_s29 + $0x39f0] sm:$0xff]  ;;  %6951 = vmatpush.msrb.mxu2 %v1968_v34 }
 0x8a5   : > { %v1440_v22 = vld [vmem:[%s8220_s29 + $0x20f0] sm:$0xff]  ;;  %6970 = vmatpush.msrb.mxu3 %v2240_v39 }
 0x8a6   : > { %v1712_v24 = vld [vmem:[%s8220_s29 + $0x2970] sm:$0xff]  ;;  %6912 = vmatpush.msrb.mxu0 %v1440_v22 }
 0x8a7   : > { %v1952_v42 = vld [vmem:[%s8220_s29 + $0x30f0] sm:$0xff]  ;;  %6931 = vmatpush.msrb.mxu1 %v1712_v24 }
 0x8a8   : > { %v2224_v20 = vld [vmem:[%s8220_s29 + $0x3970] sm:$0xff]  ;;  %6952 = vmatpush.msrb.mxu2 %v1952_v42 }
 0x8a9   : > { %v1424_v41 = vld [vmem:[%s8220_s29 + $0x2070] sm:$0xff]  ;;  %6971 = vmatpush.msrb.mxu3 %v2224_v20 }
 0x8aa   : > { %v1696_v44 = vld [vmem:[%s8220_s29 + $0x28f0] sm:$0xff]  ;;  %6913 = vmatpush.msrb.mxu0 %v1424_v41 }
 0x8ab   : > { %v1936_v48 = vld [vmem:[%s8220_s29 + $0x3070] sm:$0xff]  ;;  %6932 = vmatpush.msrb.mxu1 %v1696_v44  ;;  %6914 = vmatmul.f32.vlgmr.msrb.gmra.mxu0 %v11554_v5 }
 0x8ac   : > { %v2208_v33 = vld [vmem:[%s8220_s29 + $0x38f0] sm:$0xff]  ;;  %6953 = vmatpush.msrb.mxu2 %v1936_v48 }
 0x8ad   : > { %v11515_v16 = vld [vmem:[%s8212_s17 + $0x10] sm:$0xff]  ;;  %6972 = vmatpush.msrb.mxu3 %v2208_v33 }
 0x8ae   : > { %6874 = vmatmul.f32.vlgmr.msra.gmra.mxu2 %v11515_v16  ;;  %v2688_v31 = vld [vmem:[%s8220_s29 + $0x47f0] sm:$0xff] }
 0x8af   : > { %v3200_v30 = vld [vmem:[%s8220_s29 + $0x57f0] sm:$0xff]  ;;  %6978 = vmatpush.msra.mxu0 %v2688_v31 }
 0x8b0   : > { %v1680_v50 = vld [vmem:[%s8220_s29 + $0x2870] sm:$0xff]  ;;  %7018 = vmatpush.msra.mxu2 %v3200_v30 }
 0x8b1   : > { %v2192_v46 = vld [vmem:[%s8220_s29 + $0x3870] sm:$0xff]  ;;  %6933 = vmatpush.msrb.mxu1 %v1680_v50 }
 0x8b2   : > { %v2672_v47 = vld [vmem:[%s8220_s29 + $0x4770] sm:$0xff]  ;;  %6973 = vmatpush.msrb.mxu3 %v2192_v46  ;;  %6934 = vmatmul.f32.vlgmr.msrb.gmra.mxu1 %v11567_v23 }
 0x8b3   : > { %v2944_v45 = vld [vmem:[%s8220_s29 + $0x4ff0] sm:$0xff]  ;;  %6979 = vmatpush.msra.mxu0 %v2672_v47  ;;  %6974 = vmatmul.f32.vlgmr.msrb.gmra.mxu3 %v11559_v4 }
 0x8b4   : > { %v3184_v26 = vld [vmem:[%s8220_s29 + $0x5770] sm:$0xff]  ;;  %6998 = vmatpush.msra.mxu1 %v2944_v45 }
 0x8b5   : > { %v3456_v43 = vld [vmem:[%s8220_s29 + $0x5ff0] sm:$0xff]  ;;  %7019 = vmatpush.msra.mxu2 %v3184_v26  ;;  %v6615_v26 = vpop.f32.mrf.mxu1 }
 0x8b6   : > { %v2656_v55 = vld [vmem:[%s8220_s29 + $0x46f0] sm:$0xff]  ;;  %7038 = vmatpush.msra.mxu3 %v3456_v43 }
 0x8b7   : > { %v2928_v53 = vld [vmem:[%s8220_s29 + $0x4f70] sm:$0xff]  ;;  %6980 = vmatpush.msra.mxu0 %v2656_v55 }
 0x8b8   : > { %v3168_v54 = vld [vmem:[%s8220_s29 + $0x56f0] sm:$0xff]  ;;  %6999 = vmatpush.msra.mxu1 %v2928_v53  ;;  %v6595_v53 = vpop.f32.mrf.mxu0 }
 0x8b9   : > { %v3440_v52 = vld [vmem:[%s8220_s29 + $0x5f70] sm:$0xff]  ;;  %7020 = vmatpush.msra.mxu2 %v3168_v54  ;;  %v641_v54 = vld [vmem:[%s8220_s29 + $0x7f8] sm:$0xff] }
 0x8ba   : > { %v2640_v19 = vld [vmem:[%s8220_s29 + $0x4670] sm:$0xff]  ;;  %7039 = vmatpush.msra.mxu3 %v3440_v52  ;;  %v1153_v52 = vld [vmem:[%s8220_s29 + $0x17f8] sm:$0xff] }
 0x8bb   : > { %v2912_v51 = vld [vmem:[%s8220_s29 + $0x4ef0] sm:$0xff]  ;;  %6981 = vmatpush.msra.mxu0 %v2640_v19  ;;  %v6616_v19 = vadd.f32 %v6615_v26, %v6595_v53 }
 0x8bc   : > { %v3152_v60 = vld [vmem:[%s8220_s29 + $0x5670] sm:$0xff]  ;;  %7000 = vmatpush.msra.mxu1 %v2912_v51 }
 0x8bd   : > { %v3424_v49 = vld [vmem:[%s8220_s29 + $0x5ef0] sm:$0xff]  ;;  %7021 = vmatpush.msra.mxu2 %v3152_v60 }
 0x8be   : > { %v11547_v1 = vld [vmem:[%s8212_s17 + $0x30] sm:$0xff]  ;;  %7040 = vmatpush.msra.mxu3 %v3424_v49  ;;  %v6635_v49 = vpop.f32.mrf.mxu2 }
 0x8bf   : > { %6954 = vmatmul.f32.vlgmr.msrb.gmra.mxu2 %v11547_v1  ;;  %v2624_v2 = vld [vmem:[%s8220_s29 + $0x45f0] sm:$0xff] }
 0x8c0   : > { %v2896_v58 = vld [vmem:[%s8220_s29 + $0x4e70] sm:$0xff]  ;;  %6982 = vmatpush.msra.mxu0 %v2624_v2  ;;  %v11615_v2 = vld [vmem:[%s8212_s17 + $0x40] sm:$0xff] }
 0x8c1   : > { %v3136_v59 = vld [vmem:[%s8220_s29 + $0x55f0] sm:$0xff]  ;;  %7001 = vmatpush.msra.mxu1 %v2896_v58 }
 0x8c2   : > { %v3408_v57 = vld [vmem:[%s8220_s29 + $0x5e70] sm:$0xff]  ;;  %7022 = vmatpush.msra.mxu2 %v3136_v59  ;;  %v625_v59 = vld [vmem:[%s8220_s29 + $0x778] sm:$0xff] }
 0x8c3   : > { %v2608_v6 = vld [vmem:[%s8220_s29 + $0x4570] sm:$0xff]  ;;  %7041 = vmatpush.msra.mxu3 %v3408_v57  ;;  %v897_v57 = vld [vmem:[%s8220_s29 + $0xff8] sm:$0xff] }
 0x8c4   : > { %v2880_v7 = vld [vmem:[%s8220_s29 + $0x4df0] sm:$0xff]  ;;  %6983 = vmatpush.msra.mxu0 %v2608_v6  ;;  %v1137_v6 = vld [vmem:[%s8220_s29 + $0x1778] sm:$0xff] }
 0x8c5   : > { %v3120_v0 = vld [vmem:[%s8220_s29 + $0x5570] sm:$0xff]  ;;  %7002 = vmatpush.msra.mxu1 %v2880_v7  ;;  %v1409_v7 = vld [vmem:[%s8220_s29 + $0x1ff8] sm:$0xff] }
 0x8c6   : > { %v3392_v63 = vld [vmem:[%s8220_s29 + $0x5df0] sm:$0xff]  ;;  %7023 = vmatpush.msra.mxu2 %v3120_v0  ;;  %v6636_v0 = vadd.f32 %v6635_v49, %v6616_v19  ;;  %v993_v19 = vld [vmem:[%s8220_s29 + $0x12f8] sm:$0xff] }
 0x8c7   : > { %v2592_v8 = vld [vmem:[%s8220_s29 + $0x44f0] sm:$0xff]  ;;  %7042 = vmatpush.msra.mxu3 %v3392_v63  ;;  %v11627_v63 = vld [vmem:[%s8212_s17 + $0x48] sm:$0xff]  ;;  %v737_v49 = vld [vmem:[%s8220_s29 + $0xaf8] sm:$0xff] }
 0x8c8   : > { %v2864_v28 = vld [vmem:[%s8220_s29 + $0x4d70] sm:$0xff]  ;;  %6984 = vmatpush.msra.mxu0 %v2592_v8  ;;  %v11631_v8 = vld [vmem:[%s8212_s17 + $0x58] sm:$0xff] }
 0x8c9   : > { %v3104_v29 = vld [vmem:[%s8220_s29 + $0x54f0] sm:$0xff]  ;;  %7003 = vmatpush.msra.mxu1 %v2864_v28  ;;  %v609_v28 = vld [vmem:[%s8220_s29 + $0x6f8] sm:$0xff] }
 0x8ca   : > { %v3376_v32 = vld [vmem:[%s8220_s29 + $0x5d70] sm:$0xff]  ;;  %7024 = vmatpush.msra.mxu2 %v3104_v29  ;;  %v881_v29 = vld [vmem:[%s8220_s29 + $0xf78] sm:$0xff] }
 0x8cb   : > { %v2576_v61 = vld [vmem:[%s8220_s29 + $0x4470] sm:$0xff]  ;;  %7043 = vmatpush.msra.mxu3 %v3376_v32  ;;  %v6655_v32 = vpop.f32.mrf.mxu3 }
 0x8cc   : > { %v2848_v18 = vld [vmem:[%s8220_s29 + $0x4cf0] sm:$0xff]  ;;  %6985 = vmatpush.msra.mxu0 %v2576_v61  ;;  %v1121_v61 = vld [vmem:[%s8220_s29 + $0x16f8] sm:$0xff] }
 0x8cd   : > { %v3088_v35 = vld [vmem:[%s8220_s29 + $0x5470] sm:$0xff]  ;;  %7004 = vmatpush.msra.mxu1 %v2848_v18  ;;  %v1393_v18 = vld [vmem:[%s8220_s29 + $0x1f78] sm:$0xff] }
 0x8ce   : > { %v3360_v12 = vld [vmem:[%s8220_s29 + $0x5cf0] sm:$0xff]  ;;  %7025 = vmatpush.msra.mxu2 %v3088_v35  ;;  %v593_v35 = vld [vmem:[%s8220_s29 + $0x678] sm:$0xff] }
 0x8cf   : > { %v2560_v10 = vld [vmem:[%s8220_s29 + $0x43f0] sm:$0xff]  ;;  %7044 = vmatpush.msra.mxu3 %v3360_v12  ;;  %v865_v12 = vld [vmem:[%s8220_s29 + $0xef8] sm:$0xff] }
 0x8d0   : > { %v2832_v11 = vld [vmem:[%s8220_s29 + $0x4c70] sm:$0xff]  ;;  %6986 = vmatpush.msra.mxu0 %v2560_v10  ;;  %v1105_v10 = vld [vmem:[%s8220_s29 + $0x1678] sm:$0xff] }
 0x8d1   : > { %v3072_v9 = vld [vmem:[%s8220_s29 + $0x53f0] sm:$0xff]  ;;  %7005 = vmatpush.msra.mxu1 %v2832_v11  ;;  %v1377_v11 = vld [vmem:[%s8220_s29 + $0x1ef8] sm:$0xff] }
 0x8d2   : > { %v3344_v17 = vld [vmem:[%s8220_s29 + $0x5c70] sm:$0xff]  ;;  %7026 = vmatpush.msra.mxu2 %v3072_v9  ;;  %v6656_v9 = vadd.f32 %v6655_v32, %v6636_v0  ;;  %v721_v0 = vld [vmem:[%s8220_s29 + $0xa78] sm:$0xff] }
 0x8d3   : > { %v2544_v56 = vld [vmem:[%s8220_s29 + $0x4370] sm:$0xff]  ;;  %7045 = vmatpush.msra.mxu3 %v3344_v17  ;;  %v577_v17 = vld [vmem:[%s8220_s29 + $0x5f8] sm:$0xff]  ;;  %v6735_v53 = vpop.f32.mrf.mxu3 }
 0x8d4   : > { %v2816_v3 = vld [vmem:[%s8220_s29 + $0x4bf0] sm:$0xff]  ;;  %6987 = vmatpush.msra.mxu0 %v2544_v56  ;;  %v849_v56 = vld [vmem:[%s8220_s29 + $0xe78] sm:$0xff] }
 0x8d5   : > { %v3056_v38 = vld [vmem:[%s8220_s29 + $0x5370] sm:$0xff]  ;;  %7006 = vmatpush.msra.mxu1 %v2816_v3  ;;  %v6675_v3 = vpop.f32.mrf.mxu0  ;;  %v1233_v32 = vld [vmem:[%s8220_s29 + $0x1a78] sm:$0xff] }
 0x8d6   : > { %v3328_v15 = vld [vmem:[%s8220_s29 + $0x5bf0] sm:$0xff]  ;;  %7027 = vmatpush.msra.mxu2 %v3056_v38  ;;  %v1089_v38 = vld [vmem:[%s8220_s29 + $0x15f8] sm:$0xff] }
 0x8d7   : > { %v2528_v37 = vld [vmem:[%s8220_s29 + $0x42f0] sm:$0xff]  ;;  %7046 = vmatpush.msra.mxu3 %v3328_v15  ;;  %v1361_v15 = vld [vmem:[%s8220_s29 + $0x1e78] sm:$0xff] }
 0x8d8   : > { %v2800_v14 = vld [vmem:[%s8220_s29 + $0x4b70] sm:$0xff]  ;;  %6988 = vmatpush.msra.mxu0 %v2528_v37  ;;  %v561_v37 = vld [vmem:[%s8220_s29 + $0x578] sm:$0xff] }
 0x8d9   : > { %v3040_v62 = vld [vmem:[%s8220_s29 + $0x52f0] sm:$0xff]  ;;  %7007 = vmatpush.msra.mxu1 %v2800_v14  ;;  %v833_v14 = vld [vmem:[%s8220_s29 + $0xdf8] sm:$0xff] }
 0x8da   : > { %v3312_v36 = vld [vmem:[%s8220_s29 + $0x5b70] sm:$0xff]  ;;  %7028 = vmatpush.msra.mxu2 %v3040_v62  ;;  %v6676_v62 = vadd.f32 %v6675_v3, %v6656_v9  ;;  %v417_v9 = vld [vmem:[%s8220_s29 + $0xf8] sm:$0xff] }
 0x8db   : > { %v2512_v25 = vld [vmem:[%s8220_s29 + $0x4270] sm:$0xff]  ;;  %7047 = vmatpush.msra.mxu3 %v3312_v36  ;;  %v1073_v36 = vld [vmem:[%s8220_s29 + $0x1578] sm:$0xff] }
 0x8dc   : > { %v2784_v13 = vld [vmem:[%s8220_s29 + $0x4af0] sm:$0xff]  ;;  %6989 = vmatpush.msra.mxu0 %v2512_v25  ;;  %v1345_v25 = vld [vmem:[%s8220_s29 + $0x1df8] sm:$0xff] }
 0x8dd   : > { %v3024_v34 = vld [vmem:[%s8220_s29 + $0x5270] sm:$0xff]  ;;  %7008 = vmatpush.msra.mxu1 %v2784_v13  ;;  %v6695_v13 = vpop.f32.mrf.mxu1  ;;  %v1201_v3 = vld [vmem:[%s8220_s29 + $0x1978] sm:$0xff] }
 0x8de   : > { %v3296_v39 = vld [vmem:[%s8220_s29 + $0x5af0] sm:$0xff]  ;;  %7029 = vmatpush.msra.mxu2 %v3024_v34  ;;  %v545_v34 = vld [vmem:[%s8220_s29 + $0x4f8] sm:$0xff] }
 0x8df   : > { %v2496_v22 = vld [vmem:[%s8220_s29 + $0x41f0] sm:$0xff]  ;;  %7048 = vmatpush.msra.mxu3 %v3296_v39  ;;  %v817_v39 = vld [vmem:[%s8220_s29 + $0xd78] sm:$0xff] }
 0x8e0   : > { %v2768_v24 = vld [vmem:[%s8220_s29 + $0x4a70] sm:$0xff]  ;;  %6990 = vmatpush.msra.mxu0 %v2496_v22  ;;  %v1057_v22 = vld [vmem:[%s8220_s29 + $0x14f8] sm:$0xff] }
 0x8e1   : > { %v3008_v42 = vld [vmem:[%s8220_s29 + $0x51f0] sm:$0xff]  ;;  %7009 = vmatpush.msra.mxu1 %v2768_v24  ;;  %v1329_v24 = vld [vmem:[%s8220_s29 + $0x1d78] sm:$0xff] }
 0x8e2   : > { %v3280_v20 = vld [vmem:[%s8220_s29 + $0x5a70] sm:$0xff]  ;;  %7030 = vmatpush.msra.mxu2 %v3008_v42  ;;  %v529_v42 = vld [vmem:[%s8220_s29 + $0x478] sm:$0xff] }
 0x8e3   : > { %v2480_v41 = vld [vmem:[%s8220_s29 + $0x4170] sm:$0xff]  ;;  %7049 = vmatpush.msra.mxu3 %v3280_v20  ;;  %v801_v20 = vld [vmem:[%s8220_s29 + $0xcf8] sm:$0xff] }
 0x8e4   : > { %v2752_v44 = vld [vmem:[%s8220_s29 + $0x49f0] sm:$0xff]  ;;  %6991 = vmatpush.msra.mxu0 %v2480_v41  ;;  %v6696_v41 = vadd.f32 %v6695_v13, %v6676_v62  ;;  %v913_v62 = vld [vmem:[%s8220_s29 + $0x1078] sm:$0xff] }
 0x8e5   : > { %v2992_v48 = vld [vmem:[%s8220_s29 + $0x5170] sm:$0xff]  ;;  %7010 = vmatpush.msra.mxu1 %v2752_v44  ;;  %v1041_v44 = vld [vmem:[%s8220_s29 + $0x1478] sm:$0xff] }
 0x8e6   : > { %v3264_v33 = vld [vmem:[%s8220_s29 + $0x59f0] sm:$0xff]  ;;  %7031 = vmatpush.msra.mxu2 %v2992_v48  ;;  %v1313_v48 = vld [vmem:[%s8220_s29 + $0x1cf8] sm:$0xff] }
 0x8e7   : > { %v2464_v31 = vld [vmem:[%s8220_s29 + $0x40f0] sm:$0xff]  ;;  %7050 = vmatpush.msra.mxu3 %v3264_v33  ;;  %v6715_v33 = vpop.f32.mrf.mxu2  ;;  %v1665_v13 = vld [vmem:[%s8220_s29 + $0x27f8] sm:$0xff] }
 0x8e8   : > { %v2736_v30 = vld [vmem:[%s8220_s29 + $0x4970] sm:$0xff]  ;;  %6992 = vmatpush.msra.mxu0 %v2464_v31  ;;  %v513_v31 = vld [vmem:[%s8220_s29 + $0x3f8] sm:$0xff]  ;;  %v6716_v26 = vadd.f32 %v6715_v33, %v6696_v41 }
 0x8e9   : > { %v2976_v50 = vld [vmem:[%s8220_s29 + $0x50f0] sm:$0xff]  ;;  %7011 = vmatpush.msra.mxu1 %v2736_v30  ;;  %v785_v30 = vld [vmem:[%s8220_s29 + $0xc78] sm:$0xff] }
 0x8ea   : > { %v3248_v46 = vld [vmem:[%s8220_s29 + $0x5970] sm:$0xff]  ;;  %7032 = vmatpush.msra.mxu2 %v2976_v50  ;;  %v1025_v50 = vld [vmem:[%s8220_s29 + $0x13f8] sm:$0xff] }
 0x8eb   : > { %v2448_v47 = vld [vmem:[%s8220_s29 + $0x4070] sm:$0xff]  ;;  %7051 = vmatpush.msra.mxu3 %v3248_v46  ;;  %v1297_v46 = vld [vmem:[%s8220_s29 + $0x1c78] sm:$0xff] }
 0x8ec   : > { %v2720_v45 = vld [vmem:[%s8220_s29 + $0x48f0] sm:$0xff]  ;;  %6993 = vmatpush.msra.mxu0 %v2448_v47  ;;  %v497_v47 = vld [vmem:[%s8220_s29 + $0x378] sm:$0xff] }
 0x8ed   : > { %v2960_v43 = vld [vmem:[%s8220_s29 + $0x5070] sm:$0xff]  ;;  %7012 = vmatpush.msra.mxu1 %v2720_v45  ;;  %6994 = vmatmul.f32.vlgmr.msra.gmra.mxu0 %v11615_v2  ;;  %v769_v45 = vld [vmem:[%s8220_s29 + $0xbf8] sm:$0xff] }
 0x8ee   : > { %v3232_v55 = vld [vmem:[%s8220_s29 + $0x58f0] sm:$0xff]  ;;  %7033 = vmatpush.msra.mxu2 %v2960_v43  ;;  %7058 = vmatpush.msrb.mxu0 %v641_v54  ;;  %v1009_v43 = vld [vmem:[%s8220_s29 + $0x1378] sm:$0xff] }
 0x8ef   : > { %7052 = vmatpush.msra.mxu3 %v3232_v55  ;;  %v2704_v51 = vld [vmem:[%s8220_s29 + $0x4870] sm:$0xff]  ;;  %v1281_v55 = vld [vmem:[%s8220_s29 + $0x1bf8] sm:$0xff] }
 0x8f0   : > { %v3216_v60 = vld [vmem:[%s8220_s29 + $0x5870] sm:$0xff]  ;;  %7098 = vmatpush.msrb.mxu2 %v1153_v52  ;;  %7013 = vmatpush.msra.mxu1 %v2704_v51  ;;  %v481_v54 = vld [vmem:[%s8220_s29 + $0x2f8] sm:$0xff] }
 0x8f1   : > { %v11619_v58 = vld [vmem:[%s8212_s17 + $0x50] sm:$0xff]  ;;  %7053 = vmatpush.msra.mxu3 %v3216_v60  ;;  %7014 = vmatmul.f32.vlgmr.msra.gmra.mxu1 %v11627_v63  ;;  %v753_v52 = vld [vmem:[%s8220_s29 + $0xb78] sm:$0xff]  ;;  %s7506_s17 = sshll.u32 %s7966_s22, 7 }
 0x8f2   : > { %7034 = vmatmul.f32.vlgmr.msra.gmra.mxu2 %v11619_v58  ;;  %7054 = vmatmul.f32.vlgmr.msra.gmra.mxu3 %v11631_v8  ;;  %v1265_v51 = vld [vmem:[%s8220_s29 + $0x1b78] sm:$0xff]  ;;  %s7344_s15 = scalar_lea.hbm %s11943_s3, %s7506_s17 }
 0x8f3   : > { %7059 = vmatpush.msrb.mxu0 %v625_v59  ;;  %7078 = vmatpush.msrb.mxu1 %v897_v57  ;;  %v465_v60 = vld [vmem:[%s8220_s29 + $0x278] sm:$0xff]  ;;  %v6736_v59 = vadd.f32 %v6735_v53, %v6716_v26  ;;  %s7348_s8 = sshll.u32 %s7344_s15, 4  ;;  %s7349_s8 = int_to_ptr.hbm [resolvable:$true] %s7348_s8 }
 0x8f4   : > { %7099 = vmatpush.msrb.mxu2 %v1137_v6  ;;  %7118 = vmatpush.msrb.mxu3 %v1409_v7  ;;  %v977_v57 = vld [vmem:[%s8220_s29 + $0x1278] sm:$0xff]  ;;  %s7838_s1 = sshra.s32 %s7349_s8, 4  ;;  %s7839_s1 = int_to_ptr.hbm [resolvable:$true] %s7838_s1 }
 0x8f5   : > { %7060 = vmatpush.msrb.mxu0 %v609_v28  ;;  %7079 = vmatpush.msrb.mxu1 %v881_v29  ;;  %v1249_v6 = vld [vmem:[%s8220_s29 + $0x1af8] sm:$0xff]  ;;  %v6755_v28 = vpop.f32.mrf.mxu0  ;;  %s7840_s22 = scalar_lea.hbm %s7839_s1, 128  ;;  %p7845_p6 = scmp.lt.s32.totalorder %s7839_s1, %s11943_s3 }
 0x8f6   : > { %7100 = vmatpush.msrb.mxu2 %v1121_v61  ;;  %7119 = vmatpush.msrb.mxu3 %v1393_v18  ;;  %v449_v7 = vld [vmem:[%s8220_s29 + $0x1f8] sm:$0xff]  ;;  %v6756_v61 = vadd.f32 %v6755_v28, %v6736_v59  ;;  %p7841_p8 = scmp.ne.s32.totalorder %s7839_s1, %s7840_s22  ;;  %p7846_p10 = scmp.lt.s32.totalorder %s7844_s30, %s7840_s22 }
 0x8f7   : > { %7061 = vmatpush.msrb.mxu0 %v593_v35  ;;  %7080 = vmatpush.msrb.mxu1 %v865_v12  ;;  %v961_v29 = vld [vmem:[%s8220_s29 + $0x11f8] sm:$0xff] }
 0x8f8   : > { %7101 = vmatpush.msrb.mxu2 %v1105_v10  ;;  %7120 = vmatpush.msrb.mxu3 %v1377_v11  ;;  %v433_v18 = vld [vmem:[%s8220_s29 + $0x178] sm:$0xff]  ;;  %v6775_v11 = vpop.f32.mrf.mxu1  ;;  %p7842_p3 = pnand %p7841_p8, %p8191_p9  ;;  %p7847_p11 = por %p7846_p10, %p7845_p6 }
 0x8f9   : > { %7062 = vmatpush.msrb.mxu0 %v577_v17  ;;  %7081 = vmatpush.msrb.mxu1 %v849_v56  ;;  %v705_v35 = vld [vmem:[%s8220_s29 + $0x9f8] sm:$0xff] }
 0x8fa   : > { %7102 = vmatpush.msrb.mxu2 %v1089_v38  ;;  %7121 = vmatpush.msrb.mxu3 %v1361_v15  ;;  %v945_v12 = vld [vmem:[%s8220_s29 + $0x1178] sm:$0xff]  ;;  %v6776_v38 = vadd.f32 %v6775_v11, %v6756_v61  ;;  %p7843_p5 = pneg %p7842_p3 }
 0x8fb   : > { %7063 = vmatpush.msrb.mxu0 %v561_v37  ;;  %7082 = vmatpush.msrb.mxu1 %v833_v14  ;;  %v1217_v10 = vld [vmem:[%s8220_s29 + $0x19f8] sm:$0xff]  ;;  %v6795_v14 = vpop.f32.mrf.mxu2 }
 0x8fc   : > { %7103 = vmatpush.msrb.mxu2 %v1073_v36  ;;  %7122 = vmatpush.msrb.mxu3 %v1345_v25  ;;  %v689_v17 = vld [vmem:[%s8220_s29 + $0x978] sm:$0xff]  ;;  %v6796_v25 = vadd.f32 %v6795_v14, %v6776_v38  ;;  %p7848_p12 = pnand %p7847_p11, %p7843_p5 }
 0x8fd   : > { %7064 = vmatpush.msrb.mxu0 %v545_v34  ;;  %7083 = vmatpush.msrb.mxu1 %v817_v39  ;;  %v929_v56 = vld [vmem:[%s8220_s29 + $0x10f8] sm:$0xff] }
 0x8fe   : > { %7104 = vmatpush.msrb.mxu2 %v1057_v22  ;;  %7123 = vmatpush.msrb.mxu3 %v1329_v24  ;;  %v401_v15 = vld [vmem:[%s8220_s29 + $0x78] sm:$0xff]  ;;  %v371_v24 = vld [vmem:[%s8235_s7 + $0x68] sm:$0xff] }
 0x8ff   : > { %7065 = vmatpush.msrb.mxu0 %v529_v42  ;;  %7084 = vmatpush.msrb.mxu1 %v801_v20  ;;  %v673_v37 = vld [vmem:[%s8220_s29 + $0x8f8] sm:$0xff]  ;;  %v6815_v42 = vpop.f32.mrf.mxu3 }
 0x900   : > { %7105 = vmatpush.msrb.mxu2 %v1041_v44  ;;  %7124 = vmatpush.msrb.mxu3 %v1313_v48  ;;  %v1185_v36 = vld [vmem:[%s8220_s29 + $0x18f8] sm:$0xff]  ;;  %v6816_v44 = vadd.f32 %v6815_v42, %v6796_v25 }
 0x901   : > { %7066 = vmatpush.msrb.mxu0 %v513_v31  ;;  %7085 = vmatpush.msrb.mxu1 %v785_v30  ;;  %v2177_v34 = vld [vmem:[%s8220_s29 + $0x37f8] sm:$0xff] }
 0x902   : > { %7106 = vmatpush.msrb.mxu2 %v1025_v50  ;;  %7125 = vmatpush.msrb.mxu3 %v1297_v46  ;;  %v657_v39 = vld [vmem:[%s8220_s29 + $0x878] sm:$0xff]  ;;  %v7311_v50 = vadd.f32 %v6816_v44, %v371_v24 }
 0x903   : > { %7067 = vmatpush.msrb.mxu0 %v497_v47  ;;  %7086 = vmatpush.msrb.mxu1 %v769_v45  ;;  %v1169_v22 = vld [vmem:[%s8220_s29 + $0x1878] sm:$0xff] }
 0x904   : > { %7107 = vmatpush.msrb.mxu2 %v1009_v43  ;;  %7126 = vmatpush.msrb.mxu3 %v1281_v55  ;;  %v1649_v20 = vld [vmem:[%s8220_s29 + $0x2778] sm:$0xff]  ;;  %7327 = vst [vmem:[%s8235_s7 + $0x68] sm:$0xff] %v7311_v50 }
 0x905   : > { %7068 = vmatpush.msrb.mxu0 %v481_v54  ;;  %7087 = vmatpush.msrb.mxu1 %v753_v52  ;;  %v1921_v41 = vld [vmem:[%s8220_s29 + $0x2ff8] sm:$0xff] }
 0x906   : > { %7108 = vmatpush.msrb.mxu2 %v993_v19  ;;  %7127 = vmatpush.msrb.mxu3 %v1265_v51  ;;  %v2161_v48 = vld [vmem:[%s8220_s29 + $0x3778] sm:$0xff] }
 0x907   : > { %7069 = vmatpush.msrb.mxu0 %v465_v60  ;;  %7088 = vmatpush.msrb.mxu1 %v737_v49  ;;  %v2433_v33 = vld [vmem:[%s8220_s29 + $0x3ff8] sm:$0xff] }
 0x908   : > { %7109 = vmatpush.msrb.mxu2 %v977_v57  ;;  %7128 = vmatpush.msrb.mxu3 %v1249_v6  ;;  %v1633_v31 = vld [vmem:[%s8220_s29 + $0x26f8] sm:$0xff] }
 0x909   : > { %7070 = vmatpush.msrb.mxu0 %v449_v7  ;;  %7089 = vmatpush.msrb.mxu1 %v721_v0  ;;  %v1905_v30 = vld [vmem:[%s8220_s29 + $0x2f78] sm:$0xff] }
 0x90a   : > { %7110 = vmatpush.msrb.mxu2 %v961_v29  ;;  %7129 = vmatpush.msrb.mxu3 %v1233_v32  ;;  %v2145_v46 = vld [vmem:[%s8220_s29 + $0x36f8] sm:$0xff] }
 0x90b   : > { %7071 = vmatpush.msrb.mxu0 %v433_v18  ;;  %7090 = vmatpush.msrb.mxu1 %v705_v35  ;;  %v2417_v47 = vld [vmem:[%s8220_s29 + $0x3f78] sm:$0xff] }
 0x90c   : > { %7111 = vmatpush.msrb.mxu2 %v945_v12  ;;  %7130 = vmatpush.msrb.mxu3 %v1217_v10  ;;  %v1617_v45 = vld [vmem:[%s8220_s29 + $0x2678] sm:$0xff] }
 0x90d   : > { %7072 = vmatpush.msrb.mxu0 %v417_v9  ;;  %7091 = vmatpush.msrb.mxu1 %v689_v17  ;;  %v1889_v26 = vld [vmem:[%s8220_s29 + $0x2ef8] sm:$0xff] }
 0x90e   : > { %7112 = vmatpush.msrb.mxu2 %v929_v56  ;;  %7131 = vmatpush.msrb.mxu3 %v1201_v3  ;;  %v2129_v43 = vld [vmem:[%s8220_s29 + $0x3678] sm:$0xff] }
 0x90f   : > { %7073 = vmatpush.msrb.mxu0 %v401_v15  ;;  %7092 = vmatpush.msrb.mxu1 %v673_v37  ;;  %v2401_v55 = vld [vmem:[%s8220_s29 + $0x3ef8] sm:$0xff] }
 0x910   : > { %7113 = vmatpush.msrb.mxu2 %v913_v62  ;;  %7132 = vmatpush.msrb.mxu3 %v1185_v36  ;;  %v1601_v53 = vld [vmem:[%s8220_s29 + $0x25f8] sm:$0xff] }
 0x911   : > { %7138 = vmatpush.msra.mxu0 %v1665_v13  ;;  %7093 = vmatpush.msrb.mxu1 %v657_v39  ;;  %v1873_v54 = vld [vmem:[%s8220_s29 + $0x2e78] sm:$0xff] }
 0x912   : > { %7178 = vmatpush.msra.mxu2 %v2177_v34  ;;  %7133 = vmatpush.msrb.mxu3 %v1169_v22  ;;  %v2113_v52 = vld [vmem:[%s8220_s29 + $0x35f8] sm:$0xff] }
 0x913   : > { %7139 = vmatpush.msra.mxu0 %v1649_v20  ;;  %7158 = vmatpush.msra.mxu1 %v1921_v41  ;;  %v2385_v19 = vld [vmem:[%s8220_s29 + $0x3e78] sm:$0xff] }
 0x914   : > { %7179 = vmatpush.msra.mxu2 %v2161_v48  ;;  %7198 = vmatpush.msra.mxu3 %v2433_v33  ;;  %v1585_v51 = vld [vmem:[%s8220_s29 + $0x2578] sm:$0xff] }
 0x915   : > { %7140 = vmatpush.msra.mxu0 %v1633_v31  ;;  %7159 = vmatpush.msra.mxu1 %v1905_v30  ;;  %v1857_v60 = vld [vmem:[%s8220_s29 + $0x2df8] sm:$0xff] }
 0x916   : > { %7180 = vmatpush.msra.mxu2 %v2145_v46  ;;  %7199 = vmatpush.msra.mxu3 %v2417_v47  ;;  %v2097_v49 = vld [vmem:[%s8220_s29 + $0x3578] sm:$0xff] }
 0x917   : > { %7141 = vmatpush.msra.mxu0 %v1617_v45  ;;  %7160 = vmatpush.msra.mxu1 %v1889_v26  ;;  %v2369_v59 = vld [vmem:[%s8220_s29 + $0x3df8] sm:$0xff] }
 0x918   : > { %7181 = vmatpush.msra.mxu2 %v2129_v43  ;;  %7200 = vmatpush.msra.mxu3 %v2401_v55  ;;  %v1569_v57 = vld [vmem:[%s8220_s29 + $0x24f8] sm:$0xff] }
 0x919   : > { %7142 = vmatpush.msra.mxu0 %v1601_v53  ;;  %7161 = vmatpush.msra.mxu1 %v1873_v54  ;;  %v1841_v6 = vld [vmem:[%s8220_s29 + $0x2d78] sm:$0xff] }
 0x91a   : > { %7182 = vmatpush.msra.mxu2 %v2113_v52  ;;  %7201 = vmatpush.msra.mxu3 %v2385_v19  ;;  %v2081_v7 = vld [vmem:[%s8220_s29 + $0x34f8] sm:$0xff] }
 0x91b   : > { %7143 = vmatpush.msra.mxu0 %v1585_v51  ;;  %7162 = vmatpush.msra.mxu1 %v1857_v60  ;;  %v2353_v0 = vld [vmem:[%s8220_s29 + $0x3d78] sm:$0xff] }
 0x91c   : > { %7183 = vmatpush.msra.mxu2 %v2097_v49  ;;  %7202 = vmatpush.msra.mxu3 %v2369_v59  ;;  %v1553_v28 = vld [vmem:[%s8220_s29 + $0x2478] sm:$0xff] }
 0x91d   : > { %v1825_v29 = vld [vmem:[%s8220_s29 + $0x2cf8] sm:$0xff]  ;;  %7144 = vmatpush.msra.mxu0 %v1569_v57  ;;  %7163 = vmatpush.msra.mxu1 %v1841_v6 }
 0x91e   : > { %v2065_v32 = vld [vmem:[%s8220_s29 + $0x3478] sm:$0xff]  ;;  %7184 = vmatpush.msra.mxu2 %v2081_v7  ;;  %7203 = vmatpush.msra.mxu3 %v2353_v0 }
 0x91f   : > { %v2337_v61 = vld [vmem:[%s8220_s29 + $0x3cf8] sm:$0xff]  ;;  %7145 = vmatpush.msra.mxu0 %v1553_v28  ;;  %7164 = vmatpush.msra.mxu1 %v1825_v29 }
 0x920   : > { %v1537_v18 = vld [vmem:[%s8220_s29 + $0x23f8] sm:$0xff]  ;;  %7185 = vmatpush.msra.mxu2 %v2065_v32  ;;  %7204 = vmatpush.msra.mxu3 %v2337_v61 }
 0x921   : > { %v1809_v35 = vld [vmem:[%s8220_s29 + $0x2c78] sm:$0xff]  ;;  %7146 = vmatpush.msra.mxu0 %v1537_v18  ;;  %7114 = vmatmul.f32.vlgmr.msrb.gmra.mxu2 %v11515_v16 }
 0x922   : > { %v2049_v12 = vld [vmem:[%s8220_s29 + $0x33f8] sm:$0xff]  ;;  %7165 = vmatpush.msra.mxu1 %v1809_v35  ;;  %7074 = vmatmul.f32.vlgmr.msrb.gmra.mxu0 %v11522_v21 }
 0x923   : > { %v2321_v10 = vld [vmem:[%s8220_s29 + $0x3c78] sm:$0xff]  ;;  %7186 = vmatpush.msra.mxu2 %v2049_v12  ;;  %7134 = vmatmul.f32.vlgmr.msrb.gmra.mxu3 %v11527_v40 }
 0x924   : > { %v1521_v11 = vld [vmem:[%s8220_s29 + $0x2378] sm:$0xff]  ;;  %7205 = vmatpush.msra.mxu3 %v2321_v10  ;;  %7094 = vmatmul.f32.vlgmr.msrb.gmra.mxu1 %v11535_v27 }
 0x925   : > { %v1793_v9 = vld [vmem:[%s8220_s29 + $0x2bf8] sm:$0xff]  ;;  %7147 = vmatpush.msra.mxu0 %v1521_v11 }
 0x926   : > { %v2033_v17 = vld [vmem:[%s8220_s29 + $0x3378] sm:$0xff]  ;;  %7166 = vmatpush.msra.mxu1 %v1793_v9 }
 0x927   : > { %v2305_v56 = vld [vmem:[%s8220_s29 + $0x3bf8] sm:$0xff]  ;;  %7187 = vmatpush.msra.mxu2 %v2033_v17 }
 0x928   : > { %v1505_v3 = vld [vmem:[%s8220_s29 + $0x22f8] sm:$0xff]  ;;  %7206 = vmatpush.msra.mxu3 %v2305_v56 }
 0x929   : > { %v1777_v38 = vld [vmem:[%s8220_s29 + $0x2b78] sm:$0xff]  ;;  %7148 = vmatpush.msra.mxu0 %v1505_v3 }
 0x92a   : > { %v2017_v15 = vld [vmem:[%s8220_s29 + $0x32f8] sm:$0xff]  ;;  %7167 = vmatpush.msra.mxu1 %v1777_v38 }
 0x92b   : > { %v2289_v37 = vld [vmem:[%s8220_s29 + $0x3b78] sm:$0xff]  ;;  %7188 = vmatpush.msra.mxu2 %v2017_v15 }
 0x92c   : > { %v1489_v14 = vld [vmem:[%s8220_s29 + $0x2278] sm:$0xff]  ;;  %7207 = vmatpush.msra.mxu3 %v2289_v37 }
 0x92d   : > { %v1761_v62 = vld [vmem:[%s8220_s29 + $0x2af8] sm:$0xff]  ;;  %7149 = vmatpush.msra.mxu0 %v1489_v14 }
 0x92e   : > { %v2001_v36 = vld [vmem:[%s8220_s29 + $0x3278] sm:$0xff]  ;;  %7168 = vmatpush.msra.mxu1 %v1761_v62 }
 0x92f   : > { %v2273_v25 = vld [vmem:[%s8220_s29 + $0x3af8] sm:$0xff]  ;;  %7189 = vmatpush.msra.mxu2 %v2001_v36 }
 0x930   : > { %v1473_v13 = vld [vmem:[%s8220_s29 + $0x21f8] sm:$0xff]  ;;  %7208 = vmatpush.msra.mxu3 %v2273_v25 }
 0x931   : > { %v1745_v34 = vld [vmem:[%s8220_s29 + $0x2a78] sm:$0xff]  ;;  %7150 = vmatpush.msra.mxu0 %v1473_v13 }
 0x932   : > { %v1985_v39 = vld [vmem:[%s8220_s29 + $0x31f8] sm:$0xff]  ;;  %7169 = vmatpush.msra.mxu1 %v1745_v34 }
 0x933   : > { %v2257_v22 = vld [vmem:[%s8220_s29 + $0x3a78] sm:$0xff]  ;;  %7190 = vmatpush.msra.mxu2 %v1985_v39 }
 0x934   : > { %v1457_v24 = vld [vmem:[%s8220_s29 + $0x2178] sm:$0xff]  ;;  %7209 = vmatpush.msra.mxu3 %v2257_v22 }
 0x935   : > { %v1729_v42 = vld [vmem:[%s8220_s29 + $0x29f8] sm:$0xff]  ;;  %7151 = vmatpush.msra.mxu0 %v1457_v24 }
 0x936   : > { %v1969_v20 = vld [vmem:[%s8220_s29 + $0x3178] sm:$0xff]  ;;  %7170 = vmatpush.msra.mxu1 %v1729_v42 }
 0x937   : > { %v2241_v41 = vld [vmem:[%s8220_s29 + $0x39f8] sm:$0xff]  ;;  %7191 = vmatpush.msra.mxu2 %v1969_v20 }
 0x938   : > { %v1441_v44 = vld [vmem:[%s8220_s29 + $0x20f8] sm:$0xff]  ;;  %7210 = vmatpush.msra.mxu3 %v2241_v41 }
 0x939   : > { %v1713_v48 = vld [vmem:[%s8220_s29 + $0x2978] sm:$0xff]  ;;  %7152 = vmatpush.msra.mxu0 %v1441_v44 }
 0x93a   : > { %v1953_v33 = vld [vmem:[%s8220_s29 + $0x30f8] sm:$0xff]  ;;  %7171 = vmatpush.msra.mxu1 %v1713_v48 }
 0x93b   : > { %v2225_v31 = vld [vmem:[%s8220_s29 + $0x3978] sm:$0xff]  ;;  %7192 = vmatpush.msra.mxu2 %v1953_v33 }
 0x93c   : > { %v1425_v30 = vld [vmem:[%s8220_s29 + $0x2078] sm:$0xff]  ;;  %7211 = vmatpush.msra.mxu3 %v2225_v31 }
 0x93d   : > { %v1697_v50 = vld [vmem:[%s8220_s29 + $0x28f8] sm:$0xff]  ;;  %7153 = vmatpush.msra.mxu0 %v1425_v30 }
 0x93e   : > { %v1937_v46 = vld [vmem:[%s8220_s29 + $0x3078] sm:$0xff]  ;;  %7172 = vmatpush.msra.mxu1 %v1697_v50  ;;  %7154 = vmatmul.f32.vlgmr.msra.gmra.mxu0 %v11554_v5 }
 0x93f   : > { %v2209_v47 = vld [vmem:[%s8220_s29 + $0x38f8] sm:$0xff]  ;;  %7193 = vmatpush.msra.mxu2 %v1937_v46 }
 0x940   : > { %v2689_v45 = vld [vmem:[%s8220_s29 + $0x47f8] sm:$0xff]  ;;  %7212 = vmatpush.msra.mxu3 %v2209_v47  ;;  %7194 = vmatmul.f32.vlgmr.msra.gmra.mxu2 %v11547_v1 }
 0x941   : > { %v3201_v26 = vld [vmem:[%s8220_s29 + $0x57f8] sm:$0xff]  ;;  %7218 = vmatpush.msrb.mxu0 %v2689_v45 }
 0x942   : > { %v1681_v43 = vld [vmem:[%s8220_s29 + $0x2878] sm:$0xff]  ;;  %7258 = vmatpush.msrb.mxu2 %v3201_v26 }
 0x943   : > { %v2193_v55 = vld [vmem:[%s8220_s29 + $0x3878] sm:$0xff]  ;;  %7173 = vmatpush.msra.mxu1 %v1681_v43  ;;  %v6855_v43 = vpop.f32.mrf.mxu1 }
 0x944   : > { %v2673_v16 = vld [vmem:[%s8220_s29 + $0x4778] sm:$0xff]  ;;  %7213 = vmatpush.msra.mxu3 %v2193_v55  ;;  %7174 = vmatmul.f32.vlgmr.msra.gmra.mxu1 %v11567_v23 }
 0x945   : > { %v2945_v53 = vld [vmem:[%s8220_s29 + $0x4ff8] sm:$0xff]  ;;  %7219 = vmatpush.msrb.mxu0 %v2673_v16  ;;  %7214 = vmatmul.f32.vlgmr.msra.gmra.mxu3 %v11559_v4 }
 0x946   : > { %v3185_v54 = vld [vmem:[%s8220_s29 + $0x5778] sm:$0xff]  ;;  %7238 = vmatpush.msrb.mxu1 %v2945_v53  ;;  %v6835_v53 = vpop.f32.mrf.mxu0 }
 0x947   : > { %v3457_v52 = vld [vmem:[%s8220_s29 + $0x5ff8] sm:$0xff]  ;;  %7259 = vmatpush.msrb.mxu2 %v3185_v54 }
 0x948   : > { %v2657_v21 = vld [vmem:[%s8220_s29 + $0x46f8] sm:$0xff]  ;;  %7278 = vmatpush.msrb.mxu3 %v3457_v52 }
 0x949   : > { %v2929_v19 = vld [vmem:[%s8220_s29 + $0x4f78] sm:$0xff]  ;;  %7220 = vmatpush.msrb.mxu0 %v2657_v21  ;;  %v6856_v21 = vadd.f32 %v6855_v43, %v6835_v53 }
 0x94a   : > { %v3169_v40 = vld [vmem:[%s8220_s29 + $0x56f8] sm:$0xff]  ;;  %7239 = vmatpush.msrb.mxu1 %v2929_v19  ;;  %v6875_v19 = vpop.f32.mrf.mxu2 }
 0x94b   : > { %v3441_v51 = vld [vmem:[%s8220_s29 + $0x5f78] sm:$0xff]  ;;  %7260 = vmatpush.msrb.mxu2 %v3169_v40  ;;  %v6876_v40 = vadd.f32 %v6875_v19, %v6856_v21 }
 0x94c   : > { %v2641_v60 = vld [vmem:[%s8220_s29 + $0x4678] sm:$0xff]  ;;  %7279 = vmatpush.msrb.mxu3 %v3441_v51  ;;  %v6895_v51 = vpop.f32.mrf.mxu3 }
 0x94d   : > { %v2913_v49 = vld [vmem:[%s8220_s29 + $0x4ef8] sm:$0xff]  ;;  %7221 = vmatpush.msrb.mxu0 %v2641_v60  ;;  %v6896_v60 = vadd.f32 %v6895_v51, %v6876_v40 }
 0x94e   : > { %v3153_v59 = vld [vmem:[%s8220_s29 + $0x5678] sm:$0xff]  ;;  %7240 = vmatpush.msrb.mxu1 %v2913_v49  ;;  %v6915_v49 = vpop.f32.mrf.mxu0 }
 0x94f   : > { %v3425_v27 = vld [vmem:[%s8220_s29 + $0x5ef8] sm:$0xff]  ;;  %7261 = vmatpush.msrb.mxu2 %v3153_v59  ;;  %v6916_v59 = vadd.f32 %v6915_v49, %v6896_v60 }
 0x950   : > { %v2625_v57 = vld [vmem:[%s8220_s29 + $0x45f8] sm:$0xff]  ;;  %7280 = vmatpush.msrb.mxu3 %v3425_v27  ;;  %v6935_v27 = vpop.f32.mrf.mxu1 }
 0x951   : > { %v2897_v6 = vld [vmem:[%s8220_s29 + $0x4e78] sm:$0xff]  ;;  %7222 = vmatpush.msrb.mxu0 %v2625_v57  ;;  %v6936_v57 = vadd.f32 %v6935_v27, %v6916_v59 }
 0x952   : > { %v3137_v7 = vld [vmem:[%s8220_s29 + $0x55f8] sm:$0xff]  ;;  %7241 = vmatpush.msrb.mxu1 %v2897_v6  ;;  %v6955_v6 = vpop.f32.mrf.mxu2 }
 0x953   : > { %v3409_v0 = vld [vmem:[%s8220_s29 + $0x5e78] sm:$0xff]  ;;  %7262 = vmatpush.msrb.mxu2 %v3137_v7  ;;  %v6956_v7 = vadd.f32 %v6955_v6, %v6936_v57 }
 0x954   : > { %v2609_v1 = vld [vmem:[%s8220_s29 + $0x4578] sm:$0xff]  ;;  %7281 = vmatpush.msrb.mxu3 %v3409_v0 }
 0x955   : > { %v2881_v28 = vld [vmem:[%s8220_s29 + $0x4df8] sm:$0xff]  ;;  %7223 = vmatpush.msrb.mxu0 %v2609_v1 }
 0x956   : > { %v3121_v29 = vld [vmem:[%s8220_s29 + $0x5578] sm:$0xff]  ;;  %7242 = vmatpush.msrb.mxu1 %v2881_v28 }
 0x957   : > { %v3393_v32 = vld [vmem:[%s8220_s29 + $0x5df8] sm:$0xff]  ;;  %7263 = vmatpush.msrb.mxu2 %v3121_v29 }
 0x958   : > { %v2593_v5 = vld [vmem:[%s8220_s29 + $0x44f8] sm:$0xff]  ;;  %7282 = vmatpush.msrb.mxu3 %v3393_v32 }
 0x959   : > { %v2865_v61 = vld [vmem:[%s8220_s29 + $0x4d78] sm:$0xff]  ;;  %7224 = vmatpush.msrb.mxu0 %v2593_v5 }
 0x95a   : > { %v3105_v4 = vld [vmem:[%s8220_s29 + $0x54f8] sm:$0xff]  ;;  %7243 = vmatpush.msrb.mxu1 %v2865_v61 }
 0x95b   : > { %v3377_v18 = vld [vmem:[%s8220_s29 + $0x5d78] sm:$0xff]  ;;  %7264 = vmatpush.msrb.mxu2 %v3105_v4 }
 0x95c   : > { %v2577_v35 = vld [vmem:[%s8220_s29 + $0x4478] sm:$0xff]  ;;  %7283 = vmatpush.msrb.mxu3 %v3377_v18 }
 0x95d   : > { %v2849_v12 = vld [vmem:[%s8220_s29 + $0x4cf8] sm:$0xff]  ;;  %7225 = vmatpush.msrb.mxu0 %v2577_v35 }
 0x95e   : > { %v3089_v10 = vld [vmem:[%s8220_s29 + $0x5478] sm:$0xff]  ;;  %7244 = vmatpush.msrb.mxu1 %v2849_v12 }
 0x95f   : > { %v3361_v23 = vld [vmem:[%s8220_s29 + $0x5cf8] sm:$0xff]  ;;  %7265 = vmatpush.msrb.mxu2 %v3089_v10 }
 0x960   : > { %v2561_v11 = vld [vmem:[%s8220_s29 + $0x43f8] sm:$0xff]  ;;  %7284 = vmatpush.msrb.mxu3 %v3361_v23 }
 0x961   : > { %v2833_v9 = vld [vmem:[%s8220_s29 + $0x4c78] sm:$0xff]  ;;  %7226 = vmatpush.msrb.mxu0 %v2561_v11 }
 0x962   : > { %v3073_v17 = vld [vmem:[%s8220_s29 + $0x53f8] sm:$0xff]  ;;  %7245 = vmatpush.msrb.mxu1 %v2833_v9 }
 0x963   : > { %v3345_v56 = vld [vmem:[%s8220_s29 + $0x5c78] sm:$0xff]  ;;  %7266 = vmatpush.msrb.mxu2 %v3073_v17 }
 0x964   : > { %v2545_v3 = vld [vmem:[%s8220_s29 + $0x4378] sm:$0xff]  ;;  %7285 = vmatpush.msrb.mxu3 %v3345_v56 }
 0x965   : > { %v2817_v38 = vld [vmem:[%s8220_s29 + $0x4bf8] sm:$0xff]  ;;  %7227 = vmatpush.msrb.mxu0 %v2545_v3 }
 0x966   : > { %v3057_v15 = vld [vmem:[%s8220_s29 + $0x5378] sm:$0xff]  ;;  %7246 = vmatpush.msrb.mxu1 %v2817_v38 }
 0x967   : > { %v3329_v37 = vld [vmem:[%s8220_s29 + $0x5bf8] sm:$0xff]  ;;  %7267 = vmatpush.msrb.mxu2 %v3057_v15 }
 0x968   : > { %v2529_v14 = vld [vmem:[%s8220_s29 + $0x42f8] sm:$0xff]  ;;  %7286 = vmatpush.msrb.mxu3 %v3329_v37 }
 0x969   : > { %v2801_v62 = vld [vmem:[%s8220_s29 + $0x4b78] sm:$0xff]  ;;  %7228 = vmatpush.msrb.mxu0 %v2529_v14 }
 0x96a   : > { %v3041_v36 = vld [vmem:[%s8220_s29 + $0x52f8] sm:$0xff]  ;;  %7247 = vmatpush.msrb.mxu1 %v2801_v62 }
 0x96b   : > { %v3313_v25 = vld [vmem:[%s8220_s29 + $0x5b78] sm:$0xff]  ;;  %7268 = vmatpush.msrb.mxu2 %v3041_v36 }
 0x96c   : > { %v2513_v13 = vld [vmem:[%s8220_s29 + $0x4278] sm:$0xff]  ;;  %7287 = vmatpush.msrb.mxu3 %v3313_v25 }
 0x96d   : > { %v2785_v34 = vld [vmem:[%s8220_s29 + $0x4af8] sm:$0xff]  ;;  %7229 = vmatpush.msrb.mxu0 %v2513_v13 }
 0x96e   : > { %v3025_v39 = vld [vmem:[%s8220_s29 + $0x5278] sm:$0xff]  ;;  %7248 = vmatpush.msrb.mxu1 %v2785_v34  ;;  %v7015_v28 = vpop.f32.mrf.mxu1 }
 0x96f   : > { %v3297_v22 = vld [vmem:[%s8220_s29 + $0x5af8] sm:$0xff]  ;;  %7269 = vmatpush.msrb.mxu2 %v3025_v39 }
 0x970   : > { %v2497_v24 = vld [vmem:[%s8220_s29 + $0x41f8] sm:$0xff]  ;;  %7288 = vmatpush.msrb.mxu3 %v3297_v22 }
 0x971   : > { %v2769_v42 = vld [vmem:[%s8220_s29 + $0x4a78] sm:$0xff]  ;;  %7230 = vmatpush.msrb.mxu0 %v2497_v24 }
 0x972   : > { %v3009_v20 = vld [vmem:[%s8220_s29 + $0x51f8] sm:$0xff]  ;;  %7249 = vmatpush.msrb.mxu1 %v2769_v42 }
 0x973   : > { %v3281_v41 = vld [vmem:[%s8220_s29 + $0x5a78] sm:$0xff]  ;;  %7270 = vmatpush.msrb.mxu2 %v3009_v20 }
 0x974   : > { %v2481_v44 = vld [vmem:[%s8220_s29 + $0x4178] sm:$0xff]  ;;  %7289 = vmatpush.msrb.mxu3 %v3281_v41 }
 0x975   : > { %v2753_v48 = vld [vmem:[%s8220_s29 + $0x49f8] sm:$0xff]  ;;  %7231 = vmatpush.msrb.mxu0 %v2481_v44 }
 0x976   : > { %v2993_v33 = vld [vmem:[%s8220_s29 + $0x5178] sm:$0xff]  ;;  %7250 = vmatpush.msrb.mxu1 %v2753_v48 }
 0x977   : > { %v3265_v31 = vld [vmem:[%s8220_s29 + $0x59f8] sm:$0xff]  ;;  %7271 = vmatpush.msrb.mxu2 %v2993_v33 }
 0x978   : > { %v2465_v30 = vld [vmem:[%s8220_s29 + $0x40f8] sm:$0xff]  ;;  %7290 = vmatpush.msrb.mxu3 %v3265_v31 }
 0x979   : > { %v2737_v50 = vld [vmem:[%s8220_s29 + $0x4978] sm:$0xff]  ;;  %7232 = vmatpush.msrb.mxu0 %v2465_v30 }
 0x97a   : > { %v2977_v46 = vld [vmem:[%s8220_s29 + $0x50f8] sm:$0xff]  ;;  %7251 = vmatpush.msrb.mxu1 %v2737_v50 }
 0x97b   : > { %v3249_v47 = vld [vmem:[%s8220_s29 + $0x5978] sm:$0xff]  ;;  %7272 = vmatpush.msrb.mxu2 %v2977_v46 }
 0x97c   : > { %v2449_v45 = vld [vmem:[%s8220_s29 + $0x4078] sm:$0xff]  ;;  %7291 = vmatpush.msrb.mxu3 %v3249_v47 }
 0x97d   : > { %v2721_v26 = vld [vmem:[%s8220_s29 + $0x48f8] sm:$0xff]  ;;  %7233 = vmatpush.msrb.mxu0 %v2449_v45 }
 0x97e   : > { %v2961_v55 = vld [vmem:[%s8220_s29 + $0x5078] sm:$0xff]  ;;  %7252 = vmatpush.msrb.mxu1 %v2721_v26  ;;  %7234 = vmatmul.f32.vlgmr.msrb.gmra.mxu0 %v11615_v2  ;;  %v6975_v2 = vpop.f32.mrf.mxu3 }
 0x97f   : > { %v3233_v16 = vld [vmem:[%s8220_s29 + $0x58f8] sm:$0xff]  ;;  %7273 = vmatpush.msrb.mxu2 %v2961_v55  ;;  %v6976_v0 = vadd.f32 %v6975_v2, %v6956_v7 }
 0x980   : > { %v2705_v54 = vld [vmem:[%s8220_s29 + $0x4878] sm:$0xff]  ;;  %7292 = vmatpush.msrb.mxu3 %v3233_v16  ;;  %7274 = vmatmul.f32.vlgmr.msrb.gmra.mxu2 %v11619_v58  ;;  %v6995_v58 = vpop.f32.mrf.mxu0 }
 0x981   : > { %v3217_v52 = vld [vmem:[%s8220_s29 + $0x5878] sm:$0xff]  ;;  %7253 = vmatpush.msrb.mxu1 %v2705_v54  ;;  %v6996_v1 = vadd.f32 %v6995_v58, %v6976_v0 }
 0x982   : > { %7293 = vmatpush.msrb.mxu3 %v3217_v52  ;;  %7254 = vmatmul.f32.vlgmr.msrb.gmra.mxu1 %v11627_v63  ;;  %v7035_v63 = vpop.f32.mrf.mxu2  ;;  %v373_v24 = vld [vmem:[%s8235_s7 + $0x78] sm:$0xff] }
 0x983   : > { %7294 = vmatmul.f32.vlgmr.msrb.gmra.mxu3 %v11631_v8  ;;  %v7016_v29 = vadd.f32 %v7015_v28, %v6996_v1  ;;  %v372_v8 = vld [vmem:[%s8235_s7 + $0x70] sm:$0xff] }
 0x985   : > { %v7036_v32 = vadd.f32 %v7035_v63, %v7016_v29 }
 0x986   : > { %v7055_v5 = vpop.f32.mrf.mxu3 }
 0x987   : > { %v7056_v61 = vadd.f32 %v7055_v5, %v7036_v32 }
 0x989   : > { %v7312_v4 = vadd.f32 %v7056_v61, %v372_v8 }
 0x98b   : > { %7328 = vst [vmem:[%s8235_s7 + $0x70] sm:$0xff] %v7312_v4 }
 0x99f   : > { %v7075_v35 = vpop.f32.mrf.mxu0 }
 0x9a1   : > { %v7095_v18 = vpop.f32.mrf.mxu1 }
 0x9a2   : > { %v7096_v12 = vadd.f32 %v7095_v18, %v7075_v35 }
 0x9a4   : > { %v7115_v10 = vpop.f32.mrf.mxu2 }
 0x9a5   : > { %v7116_v23 = vadd.f32 %v7115_v10, %v7096_v12 }
 0x9a6   : > { %v7135_v11 = vpop.f32.mrf.mxu3 }
 0x9a7   : > { %v7136_v9 = vadd.f32 %v7135_v11, %v7116_v23 }
 0x9bb   : > { %v7155_v17 = vpop.f32.mrf.mxu0 }
 0x9bc   : > { %v7156_v56 = vadd.f32 %v7155_v17, %v7136_v9 }
 0x9c1   : > { %v7175_v3 = vpop.f32.mrf.mxu1 }
 0x9c2   : > { %v7176_v38 = vadd.f32 %v7175_v3, %v7156_v56 }
 0x9c3   : > { %v7195_v15 = vpop.f32.mrf.mxu2 }
 0x9c4   : > { %v7196_v37 = vadd.f32 %v7195_v15, %v7176_v38 }
 0x9c8   : > { %v7215_v14 = vpop.f32.mrf.mxu3 }
 0x9c9   : > { %v7216_v62 = vadd.f32 %v7215_v14, %v7196_v37 }
 0x9fb   : > { %v7235_v36 = vpop.f32.mrf.mxu0 }
 0x9fc   : > { %v7236_v25 = vadd.f32 %v7235_v36, %v7216_v62 }
 0x9ff   : > { %v7255_v13 = vpop.f32.mrf.mxu1 }
 0xa00   : > { %v7256_v34 = vadd.f32 %v7255_v13, %v7236_v25 }
 0xa03   : > { %v7275_v39 = vpop.f32.mrf.mxu2 }
 0xa04   : > { %v7276_v22 = vadd.f32 %v7275_v39, %v7256_v34 }
 0xa06   : > { %v7295_v42 = vpop.f32.mrf.mxu3 }
 0xa07   : > { %v7296_v20 = vadd.f32 %v7295_v42, %v7276_v22 }
 0xa09   : > { %v7313_v41 = vadd.f32 %v7296_v20, %v373_v24 }
 0xa0b   : > { %7329 = vst [vmem:[%s8235_s7 + $0x78] sm:$0xff] %v7313_v41 }
 0xa0c   : > { %7851 = shalt.err (!%p7848_p12)
}
 0xa0d   : > { %7517 = dma.vmem_to_hbm [thread:$0]  (%p8191_p9), %s7347_s6, 2048, %s7349_s8, %s7331_s9  }
 0xa0e PF: > { %p7534_p13 = scmp.ge.s32.totalorder %s7978_s25, 2  ;;  %s7360_s29 = sand.u32 1, %s7926_s12  }
 0xa0f   : > { %s7361_s0 = scalar_lea.sflag [#allocation4], %s7360_s29 }
 0xa10   : > { %p7530_p1 = pnand %p7534_p13, %p8195_p2 }
 0xa12   : > { %p7531_p7 = pneg %p7530_p1 }
 0xa14   : > { %7921 = dma.done.wait (%p7531_p7), %s7361_s0, 2048  }
 0xa15   : > { %7923 = vsyncadd (%p7531_p7), %s7361_s0, 4294965248  ;;  %s22_s25 = sadd.s32 1, %s7978_s25   ;;  %s11945_s28 = sld [smem:[#allocation13_spill]] }
 0xa16   : > { %p11859_p0 = scmp.ge.s32.totalorder %s22_s25, 14   ;;  %s11946_s17 = sld [smem:[#allocation20_spill]] }
 0xa17   : > { %s11947_s5 = sld [smem:[#allocation14_spill]]  ;;  %s11954_s12 = smov %s7930_s13 }
 0xa18   : > { %s11948_s20 = sld [smem:[#allocation19_spill]]  ;;  %s11955_s13 = smov %s7934_s14 }
 0xa19   : > { %s11949_s21 = sld [smem:[#allocation15_spill]]  ;;  %s11956_s14 = smov %s8173_s23 }
 0xa1a   : > { %s11950_s22 = sld [smem:[#allocation16_spill]]  ;;  %s11957_s15 = smov %s7942_s16 }
 0xa1b   : > { %s11951_s26 = sld [smem:[#allocation17_spill]]  ;;  %s11958_s16 = smov %s11945_s28 }
 0xa1c   : > { %s11952_s27 = sld [smem:[#allocation18_spill]]  ;;  %s11959_s18 = smov %s7954_s19 }
 0xa1d   : > { %s11960_s19 = smov %s11947_s5 }
 0xa1e   :  { %21 = sbr.rel (!%p11859_p0) target bundleno = 16 (0x10), region = 105 }
 0xa21   : > { %s11961_s23 = smov %s11951_s26 }
 0xa22   : > { %s11962_s24 = smov %s11952_s27 }
 0xa23   :  { %7367 = vsyncpa [#allocation3], 1 }
 0xa24   :  { %7369 = vsyncpa [#allocation3 + $0x1], 1 }
 0xa25   :  { %7370 = vsyncpa [#allocation6], 1 }
 0xa26   :  { %7372 = vsyncpa [#allocation6 + $0x1], 1 }
 0xa27   :  { %7373 = vsyncpa [#allocation4], 1 }
 0xa28   :  { %7375 = vsyncpa [#allocation4 + $0x1], 1 }

</bundles_post_ra>
